<compile_context>
chip_gen: v5e
topology: v5e:2x2
jax: 0.10.0
libtpu: 0.0.40
codegen_flags: <defaults>
</compile_context>

<pallas_src>
import math
import functools

import numpy as np
import jax
import jax.numpy as jnp
from jax.experimental import pallas as pl
from jax.experimental.pallas import tpu as pltpu

RES = 32
V = RES * RES * RES                 # 32768 voxels, z-major (D, H, W)
VS, VL = V // 128, 128              # dense (sublane, lane) packing of the voxel axis
LEAKY_SLOPE = 0.2
LEAKY_GAIN = math.sqrt(2.0 / (1.0 + LEAKY_SLOPE ** 2))   # calculate_gain('leaky_relu', 0.2)
SEG = 128                           # lane-aligned segment width of the MLP output slab


# --------------------------------------------------------------------------
# Kernel 1: fused small MLP (trunk + all small heads) -- one launch,
#           one lane-dense output slab (each segment 128-lane aligned).
# --------------------------------------------------------------------------
def _mlp_kernel(x_ref,
                t0w, t0b, t1w, t1b,
                s0w, s0b, s1w, s1b,
                r0w, r0b, r1w, r1b,
                p0w, p0b, p1w, p1b,
                w0w, w0b,
                o_ref):
    def lin(x, w_ref, b_ref):
        return jnp.dot(x, w_ref[...], preferred_element_type=jnp.float32) + b_ref[...]

    def leaky(y):
        return jnp.where(y >= 0.0, y, LEAKY_SLOPE * y)

    x = x_ref[...]
    h = leaky(lin(x, t0w, t0b))
    h = leaky(lin(h, t1w, t1b))
    warps = lin(leaky(lin(h, s0w, s0b)), s1w, s1b)
    warpr = lin(leaky(lin(h, r0w, r0b)), r1w, r1b)
    warpt = lin(leaky(lin(h, p0w, p0b)), p1w, p1b) * 0.1
    hw = leaky(lin(h, w0w, w0b))

    # Single output slab -> one writeback DMA.  Every segment starts at a
    # 128-lane-aligned offset so the masked stores need no lane rotation.
    o_ref[...] = jnp.zeros_like(o_ref)
    o_ref[:, 0:warps.shape[1]] = warps
    o_ref[:, SEG:SEG + warpr.shape[1]] = warpr
    o_ref[:, 2 * SEG:2 * SEG + warpt.shape[1]] = warpt
    o_ref[:, 3 * SEG:3 * SEG + hw.shape[1]] = hw


def pallas_mlp(x, p):
    B = x.shape[0]
    n3 = p["warps1_w"].shape[1]
    n4 = p["warpr1_w"].shape[1]
    nw = p["wb0_w"].shape[1]
    assert max(n3, n4, nw) <= SEG, "each head must fit one 128-lane segment"
    args = (x,
            p["trunk0_w"], p["trunk0_b"].reshape(1, -1),
            p["trunk1_w"], p["trunk1_b"].reshape(1, -1),
            p["warps0_w"], p["warps0_b"].reshape(1, -1),
            p["warps1_w"], p["warps1_b"].reshape(1, -1),
            p["warpr0_w"], p["warpr0_b"].reshape(1, -1),
            p["warpr1_w"], p["warpr1_b"].reshape(1, -1),
            p["warpt0_w"], p["warpt0_b"].reshape(1, -1),
            p["warpt1_w"], p["warpt1_b"].reshape(1, -1),
            p["wb0_w"], p["wb0_b"].reshape(1, -1))
    # No grid: every operand is a whole-array VMEM block, kernel runs once.
    slab = pl.pallas_call(
        _mlp_kernel,
        out_shape=jax.ShapeDtypeStruct((B, 4 * SEG), jnp.float32),
    )(*args)
    return (slab[:, 0:n3],                          # warps (flat)
            slab[:, SEG:SEG + n4],                  # warpr (flat)
            slab[:, 2 * SEG:2 * SEG + n3],          # warpt (flat, *0.1 applied)
            slab[:, 3 * SEG:3 * SEG + nw])          # hw (input to wb1)


# --------------------------------------------------------------------------
# Kernel 2: big weight-branch matmul with fused exp (the only heavy matmul).
# 4 even grid steps (16 MiB weight read is the whole cost; HBM-roofline).
# --------------------------------------------------------------------------
def _weight_exp_kernel(x_ref, w_ref, b_ref, o_ref):
    y = jnp.dot(x_ref[...], w_ref[...], preferred_element_type=jnp.float32) + b_ref[...]
    o_ref[...] = jnp.exp(y)


def _pick_tile_n(N, cap=16384):
    # cap=16384 keeps the double-buffered weight tile at ~8 MB (safe on all
    # gens) and the grid at 4 steps -> even split across v7x's 2 TensorCores.
    if N <= cap:
        return N
    for cand in (16384, 8192, 4096, 2048, 1024, 512, 256, 128):
        if cand <= cap and N % cand == 0:
            return cand
    return N


def pallas_weight_exp(x, w, b, tile_cap=16384):
    B, K = x.shape
    N = w.shape[1]
    tn = _pick_tile_n(N, tile_cap)
    return pl.pallas_call(
        _weight_exp_kernel,
        out_shape=jax.ShapeDtypeStruct((B, N), jnp.float32),
        grid_spec=pltpu.PrefetchScalarGridSpec(
            num_scalar_prefetch=0,
            grid=(N // tn,),
            in_specs=[pl.BlockSpec((B, K), lambda j: (0, 0)),   # fetched once
                      pl.BlockSpec((K, tn), lambda j: (0, j)),
                      pl.BlockSpec((1, tn), lambda j: (0, j))],
            out_specs=pl.BlockSpec((B, tn), lambda j: (0, j)),
        ),
        compiler_params=pltpu.CompilerParams(dimension_semantics=("parallel",)),
    )(x, w, b.reshape(1, N))


# --------------------------------------------------------------------------
# Kernel 3: warped sampling coordinates as ONE MXU matmul per V-tile.
#   coords[(b,i,k), v] = sum_j A4[(b,i,k), j] * grid_aug[j, v]
#   with A4[.., 0:3] = s_k * rot[k, :]  and  A4[.., 3] = -(A @ t)_k,
#   grid_aug rows = [x, y, z, 1, 0, 0, 0, 0]  (K padded 4 -> 8).
# --------------------------------------------------------------------------
def _coords_kernel(a_ref, g_ref, o_ref):
    o_ref[...] = jnp.dot(a_ref[...], g_ref[...], preferred_element_type=jnp.float32)


def pallas_coords(A8, grid_aug):
    R3, K8 = A8.shape
    _, Vtot = grid_aug.shape
    steps = 4                              # even -> both v7x TensorCores busy
    tn = Vtot // steps
    return pl.pallas_call(
        _coords_kernel,
        out_shape=jax.ShapeDtypeStruct((R3, Vtot), jnp.float32),
        grid_spec=pltpu.PrefetchScalarGridSpec(
            num_scalar_prefetch=0,
            grid=(steps,),
            in_specs=[pl.BlockSpec((R3, K8), lambda j: (0, 0)),   # A4, resident
                      pl.BlockSpec((K8, tn), lambda j: (0, j))],  # [grid; 1; 0]
            out_specs=pl.BlockSpec((R3, tn), lambda j: (0, j)),
        ),
        compiler_params=pltpu.CompilerParams(dimension_semantics=("parallel",)),
    )(A8, grid_aug)


# --------------------------------------------------------------------------
# Kernel 4: fused coordinate-recompute + normalized weighted mix on dense
# (256, 128) voxel tiles.  A4 scalars come from SMEM; the canonical grid is
# fetched once (constant block index); ww is the trilinearly sampled weight.
#   warp[b,k,v] = sum_i ww[b,i,v] * c[b,i,k,v] / max(sum_i ww[b,i,v], 1e-3)
# --------------------------------------------------------------------------
def _mix_kernel(a_sm, g_ref, ww_ref, o_ref, *, n_sub):
    b = pl.program_id(0)
    gx = g_ref[0, :, :]
    gy = g_ref[1, :, :]
    gz = g_ref[2, :, :]

    den = ww_ref[0, 0, :, :]
    for i in range(1, n_sub):
        den = den + ww_ref[0, i, :, :]
    # den >= 1e-3, so the EUP approx reciprocal is well-conditioned
    # (~1e-4 relative delta vs exact division).
    inv = pl.reciprocal(jnp.maximum(den, 0.001), approx=True)

    for k in range(3):
        acc = None
        for i in range(n_sub):
            base = i * 12 + k * 4
            c = (a_sm[b, base + 0] * gx + a_sm[b, base + 1] * gy
                 + a_sm[b, base + 2] * gz + a_sm[b, base + 3])
            term = ww_ref[0, i, :, :] * c
            acc = term if acc is None else acc + term
        o_ref[0, k, :, :] = acc * inv


def pallas_mix(A4_flat, grid_packed, ww, n_sub):
    B = ww.shape[0]
    S, L = grid_packed.shape[1], grid_packed.shape[2]
    kernel = functools.partial(_mix_kernel, n_sub=n_sub)
    return pl.pallas_call(
        kernel,
        out_shape=jax.ShapeDtypeStruct((B, 3, S, L), jnp.float32),
        grid_spec=pltpu.PrefetchScalarGridSpec(
            num_scalar_prefetch=0,
            grid=(B,),
            in_specs=[pl.BlockSpec(memory_space=pltpu.MemorySpace.SMEM),        # A4 (B, n_sub*12)
                      pl.BlockSpec((3, S, L), lambda b: (0, 0, 0)),             # grid, resident
                      pl.BlockSpec((1, n_sub, S, L), lambda b: (b, 0, 0, 0))],  # sampled weights
            out_specs=pl.BlockSpec((1, 3, S, L), lambda b: (b, 0, 0, 0)),
        ),
        compiler_params=pltpu.CompilerParams(dimension_semantics=("parallel",)),
    )(A4_flat, grid_packed, ww)


# --------------------------------------------------------------------------
# Plain-JAX glue (tiny ops / the data-dependent gather).
# --------------------------------------------------------------------------
def quaternion(rvec):
    # Exact replica of Quaternion.forward (NOT a unit quaternion due to 1e-5).
    theta = jnp.sqrt(1e-05 + jnp.sum(rvec ** 2, axis=1))
    r = rvec / theta[:, None]
    m = jnp.stack((
        1.0 - 2.0 * r[:, 1] ** 2 - 2.0 * r[:, 2] ** 2,
        2.0 * (r[:, 0] * r[:, 1] - r[:, 2] * r[:, 3]),
        2.0 * (r[:, 0] * r[:, 2] + r[:, 1] * r[:, 3]),
        2.0 * (r[:, 0] * r[:, 1] + r[:, 2] * r[:, 3]),
        1.0 - 2.0 * r[:, 0] ** 2 - 2.0 * r[:, 2] ** 2,
        2.0 * (r[:, 1] * r[:, 2] - r[:, 0] * r[:, 3]),
        2.0 * (r[:, 0] * r[:, 2] - r[:, 1] * r[:, 3]),
        2.0 * (r[:, 0] * r[:, 3] + r[:, 1] * r[:, 2]),
        1.0 - 2.0 * r[:, 0] ** 2 - 2.0 * r[:, 1] ** 2), axis=1)
    return m.reshape(-1, 3, 3)


# TODO(synk): F.grid_sample (trilinear, border, align_corners=False) is an
# arbitrary gather from a 32^3 table with no robust Mosaic lowering; kept in XLA.
def grid_sample_3d_border(vflat, coords):
    # vflat: (V,) f32 flattened (D, H, W) z-major; coords: (3, V), channels (x, y, z).
    D = H = W = RES
    x, y, z = coords[0], coords[1], coords[2]
    ix = jnp.clip(((x + 1.0) * W - 1.0) * 0.5, 0.0, W - 1.0)
    iy = jnp.clip(((y + 1.0) * H - 1.0) * 0.5, 0.0, H - 1.0)
    iz = jnp.clip(((z + 1.0) * D - 1.0) * 0.5, 0.0, D - 1.0)
    ix0f, iy0f, iz0f = jnp.floor(ix), jnp.floor(iy), jnp.floor(iz)
    fx, fy, fz = ix - ix0f, iy - iy0f, iz - iz0f
    ix0 = jnp.clip(ix0f.astype(jnp.int32), 0, W - 1)
    iy0 = jnp.clip(iy0f.astype(jnp.int32), 0, H - 1)
    iz0 = jnp.clip(iz0f.astype(jnp.int32), 0, D - 1)
    ix1 = jnp.clip(ix0 + 1, 0, W - 1)
    iy1 = jnp.clip(iy0 + 1, 0, H - 1)
    iz1 = jnp.clip(iz0 + 1, 0, D - 1)

    def gat(zz, yy, xx):
        return jnp.take(vflat, (zz * H + yy) * W + xx)

    return (gat(iz0, iy0, ix0) * (1 - fz) * (1 - fy) * (1 - fx)
            + gat(iz0, iy0, ix1) * (1 - fz) * (1 - fy) * fx
            + gat(iz0, iy1, ix0) * (1 - fz) * fy * (1 - fx)
            + gat(iz0, iy1, ix1) * (1 - fz) * fy * fx
            + gat(iz1, iy0, ix0) * fz * (1 - fy) * (1 - fx)
            + gat(iz1, iy0, ix1) * fz * (1 - fy) * fx
            + gat(iz1, iy1, ix0) * fz * fy * (1 - fx)
            + gat(iz1, iy1, ix1) * fz * fy * fx)


def _base_grid():
    lin = np.linspace(-1.0, 1.0, RES)
    zg, yg, xg = np.meshgrid(lin, lin, lin, indexing="ij")
    # channel order (x, y, z), voxel axis z-major -> matches the PyTorch buffer
    # np.stack((xgrid, ygrid, zgrid), axis=-1).
    return np.stack((xg.ravel(), yg.ravel(), zg.ravel()), axis=0).astype(np.float32)  # (3, V)


def make_grid_aug():
    g = _base_grid()
    aug = np.concatenate([g, np.ones((1, V), np.float32),
                          np.zeros((4, V), np.float32)], axis=0)   # (8, V), K padded to 8
    return jnp.asarray(aug)


def make_grid_packed():
    return jnp.asarray(_base_grid().reshape(3, VS, VL))            # (3, 256, 128)


# --------------------------------------------------------------------------
# Parameter init (deterministic, replicating initseq's xavier_uniform_ rules).
# --------------------------------------------------------------------------
def xavier_uniform(key, n_in, n_out, gain):
    std = gain * math.sqrt(2.0 / (n_in + n_out))
    bound = std * math.sqrt(3.0)
    return jax.random.uniform(key, (n_in, n_out), jnp.float32, -bound, bound)


def init_params(key, d_in, d_hidden, n_sub):
    specs = {
        "trunk0": (d_in, d_hidden, LEAKY_GAIN),
        "trunk1": (d_hidden, d_hidden, LEAKY_GAIN),
        "warps0": (d_hidden, 128, LEAKY_GAIN),
        "warps1": (128, 3 * n_sub, 1.0),
        "warpr0": (d_hidden, 128, LEAKY_GAIN),
        "warpr1": (128, 4 * n_sub, 1.0),
        "warpt0": (d_hidden, 128, LEAKY_GAIN),
        "warpt1": (128, 3 * n_sub, 1.0),
        "wb0": (d_hidden, 64, LEAKY_GAIN),
        "wb1": (64, n_sub * V, 1.0),
    }
    keys = jax.random.split(key, len(specs))
    params = {}
    for k_, (name, (ni, no, g)) in zip(keys, specs.items()):
        params[name + "_w"] = xavier_uniform(k_, ni, no, g)
        params[name + "_b"] = jnp.zeros((no,), jnp.float32)   # initmod zeroes biases
    return params


# --------------------------------------------------------------------------
# Forward pass (mirrors AffineMixWarp.forward).
# --------------------------------------------------------------------------
def affine_mix_warp_forward(params, encoding, grid_aug, grid_packed, n_sub):
    B = encoding.shape[0]

    # 1) all tiny matmuls fused into one Pallas launch
    warps_f, warpr_f, warpt_f, hw = pallas_mlp(encoding, params)
    warps = warps_f.reshape(B, n_sub, 3)
    warpr = warpr_f.reshape(B, n_sub, 4)
    warpt = warpt_f.reshape(B, n_sub, 3)          # * 0.1 already applied in-kernel

    # 2) the only heavy matmul: weight branch with fused exp
    weight = pallas_weight_exp(hw, params["wb1_w"], params["wb1_b"])   # (B, n_sub*V)

    # 3) affine parameters; translation folded into a 4th homogeneous column
    warprot = quaternion(warpr.reshape(-1, 4)).reshape(B, n_sub, 3, 3)
    A = warps[..., :, None] * warprot                                  # A[k,j] = s_k*rot[k,j]
    trans = -jnp.einsum("bikj,bij->bik", A, warpt)                     # -(A @ t)
    A4 = jnp.concatenate([A, trans[..., None]], axis=-1)               # (B, n_sub, 3, 4)
    A8 = jnp.concatenate([A4.reshape(B * n_sub * 3, 4),
                          jnp.zeros((B * n_sub * 3, 4), jnp.float32)], axis=-1)

    # 4) warped sampling coordinates: one MXU matmul per V-tile
    coords = pallas_coords(A8, grid_aug)                               # (B*n_sub*3, V)

    # 5) trilinear border sampling of the weight volumes (plain JAX / XLA)
    ww = jax.vmap(grid_sample_3d_border)(weight.reshape(B * n_sub, V),
                                         coords.reshape(B * n_sub, 3, V))   # (B*n_sub, V)

    # 6) fused coordinate-recompute + normalized weighted mix on dense tiles
    warp = pallas_mix(A4.reshape(B, n_sub * 12), grid_packed,
                      ww.reshape(B, n_sub, VS, VL), n_sub)             # (B, 3, 256, 128)
    return warp.reshape(B, 3, RES, RES, RES)      # == permute(0, 4, 1, 2, 3)


# --------------------------------------------------------------------------
if __name__ == "__main__":
    B, d_in, d_hidden, n_sub = 2, 16, 64, 2

    key = jax.random.PRNGKey(0)
    pkey, xkey = jax.random.split(key)
    params = init_params(pkey, d_in, d_hidden, n_sub)
    encoding = jax.random.normal(xkey, (B, d_in), jnp.float32)
    grid_aug = make_grid_aug()
    grid_packed = make_grid_packed()

    fwd = jax.jit(affine_mix_warp_forward, static_argnums=(4,))
    out = fwd(params, encoding, grid_aug, grid_packed, n_sub)
    out = jax.block_until_ready(out)

    assert out.shape == (B, 3, RES, RES, RES), out.shape
    assert bool(jnp.all(jnp.isfinite(out)))
    print("KERNEL_OK")
</pallas_src>

<mosaic_0001>
module attributes {stable_mosaic.version = 11 : i64} {
  func.func @_mlp_kernel(%arg0: memref<2x16xf32, #tpu.memory_space<vmem>>, %arg1: memref<16x64xf32, #tpu.memory_space<vmem>>, %arg2: memref<1x64xf32, #tpu.memory_space<vmem>>, %arg3: memref<64x64xf32, #tpu.memory_space<vmem>>, %arg4: memref<1x64xf32, #tpu.memory_space<vmem>>, %arg5: memref<64x128xf32, #tpu.memory_space<vmem>>, %arg6: memref<1x128xf32, #tpu.memory_space<vmem>>, %arg7: memref<128x6xf32, #tpu.memory_space<vmem>>, %arg8: memref<1x6xf32, #tpu.memory_space<vmem>>, %arg9: memref<64x128xf32, #tpu.memory_space<vmem>>, %arg10: memref<1x128xf32, #tpu.memory_space<vmem>>, %arg11: memref<128x8xf32, #tpu.memory_space<vmem>>, %arg12: memref<1x8xf32, #tpu.memory_space<vmem>>, %arg13: memref<64x128xf32, #tpu.memory_space<vmem>>, %arg14: memref<1x128xf32, #tpu.memory_space<vmem>>, %arg15: memref<128x6xf32, #tpu.memory_space<vmem>>, %arg16: memref<1x6xf32, #tpu.memory_space<vmem>>, %arg17: memref<64x64xf32, #tpu.memory_space<vmem>>, %arg18: memref<1x64xf32, #tpu.memory_space<vmem>>, %arg19: memref<2x512xf32, #tpu.memory_space<vmem>>) attributes {dimension_semantics = [], scalar_prefetch = 0 : i64, scratch_operands = 0 : i64, tpu.core_type = #tpu.core_type<tc>} {
    %c0 = arith.constant 0 : index
    %c0_0 = arith.constant 0 : index
    %0 = vector.load %arg0[%c0, %c0_0] : memref<2x16xf32, #tpu.memory_space<vmem>>, vector<2x16xf32>
    %c0_1 = arith.constant 0 : index
    %c0_2 = arith.constant 0 : index
    %1 = vector.load %arg1[%c0_1, %c0_2] : memref<16x64xf32, #tpu.memory_space<vmem>>, vector<16x64xf32>
    %cst = arith.constant dense<0.000000e+00> : vector<2x64xf32>
    %2 = tpu.matmul %0, %1, %cst {dimension_numbers = #tpu.dot_dimension_numbers<[1], [0], [0], [1], [0, 0, 1, 1], [], []>} : vector<2x16xf32>, vector<16x64xf32>, vector<2x64xf32> -> vector<2x64xf32>
    %c0_3 = arith.constant 0 : index
    %c0_4 = arith.constant 0 : index
    %3 = vector.load %arg2[%c0_3, %c0_4] : memref<1x64xf32, #tpu.memory_space<vmem>>, vector<1x64xf32>
    %4 = vector.broadcast %3 : vector<1x64xf32> to vector<2x64xf32>
    %5 = arith.addf %2, %4 : vector<2x64xf32>
    %cst_5 = arith.constant 0.000000e+00 : f32
    %6 = vector.broadcast %cst_5 : f32 to vector<2x64xf32>
    %7 = arith.cmpf oge, %5, %6 : vector<2x64xf32>
    %cst_6 = arith.constant 2.000000e-01 : f32
    %8 = vector.broadcast %cst_6 : f32 to vector<2x64xf32>
    %9 = arith.mulf %8, %5 : vector<2x64xf32>
    %10 = arith.select %7, %5, %9 : vector<2x64xi1>, vector<2x64xf32>
    %c0_7 = arith.constant 0 : index
    %c0_8 = arith.constant 0 : index
    %11 = vector.load %arg3[%c0_7, %c0_8] : memref<64x64xf32, #tpu.memory_space<vmem>>, vector<64x64xf32>
    %cst_9 = arith.constant dense<0.000000e+00> : vector<2x64xf32>
    %12 = tpu.matmul %10, %11, %cst_9 {dimension_numbers = #tpu.dot_dimension_numbers<[1], [0], [0], [1], [0, 0, 1, 1], [], []>} : vector<2x64xf32>, vector<64x64xf32>, vector<2x64xf32> -> vector<2x64xf32>
    %c0_10 = arith.constant 0 : index
    %c0_11 = arith.constant 0 : index
    %13 = vector.load %arg4[%c0_10, %c0_11] : memref<1x64xf32, #tpu.memory_space<vmem>>, vector<1x64xf32>
    %14 = vector.broadcast %13 : vector<1x64xf32> to vector<2x64xf32>
    %15 = arith.addf %12, %14 : vector<2x64xf32>
    %cst_12 = arith.constant 0.000000e+00 : f32
    %16 = vector.broadcast %cst_12 : f32 to vector<2x64xf32>
    %17 = arith.cmpf oge, %15, %16 : vector<2x64xf32>
    %cst_13 = arith.constant 2.000000e-01 : f32
    %18 = vector.broadcast %cst_13 : f32 to vector<2x64xf32>
    %19 = arith.mulf %18, %15 : vector<2x64xf32>
    %20 = arith.select %17, %15, %19 : vector<2x64xi1>, vector<2x64xf32>
    %c0_14 = arith.constant 0 : index
    %c0_15 = arith.constant 0 : index
    %21 = vector.load %arg5[%c0_14, %c0_15] : memref<64x128xf32, #tpu.memory_space<vmem>>, vector<64x128xf32>
    %cst_16 = arith.constant dense<0.000000e+00> : vector<2x128xf32>
    %22 = tpu.matmul %20, %21, %cst_16 {dimension_numbers = #tpu.dot_dimension_numbers<[1], [0], [0], [1], [0, 0, 1, 1], [], []>} : vector<2x64xf32>, vector<64x128xf32>, vector<2x128xf32> -> vector<2x128xf32>
    %c0_17 = arith.constant 0 : index
    %c0_18 = arith.constant 0 : index
    %23 = vector.load %arg6[%c0_17, %c0_18] : memref<1x128xf32, #tpu.memory_space<vmem>>, vector<1x128xf32>
    %24 = vector.broadcast %23 : vector<1x128xf32> to vector<2x128xf32>
    %25 = arith.addf %22, %24 : vector<2x128xf32>
    %cst_19 = arith.constant 0.000000e+00 : f32
    %26 = vector.broadcast %cst_19 : f32 to vector<2x128xf32>
    %27 = arith.cmpf oge, %25, %26 : vector<2x128xf32>
    %cst_20 = arith.constant 2.000000e-01 : f32
    %28 = vector.broadcast %cst_20 : f32 to vector<2x128xf32>
    %29 = arith.mulf %28, %25 : vector<2x128xf32>
    %30 = arith.select %27, %25, %29 : vector<2x128xi1>, vector<2x128xf32>
    %c0_21 = arith.constant 0 : index
    %c0_22 = arith.constant 0 : index
    %31 = vector.load %arg7[%c0_21, %c0_22] : memref<128x6xf32, #tpu.memory_space<vmem>>, vector<128x6xf32>
    %cst_23 = arith.constant dense<0.000000e+00> : vector<2x6xf32>
    %32 = tpu.matmul %30, %31, %cst_23 {dimension_numbers = #tpu.dot_dimension_numbers<[1], [0], [0], [1], [0, 0, 1, 1], [], []>} : vector<2x128xf32>, vector<128x6xf32>, vector<2x6xf32> -> vector<2x6xf32>
    %c0_24 = arith.constant 0 : index
    %c0_25 = arith.constant 0 : index
    %33 = vector.load %arg8[%c0_24, %c0_25] : memref<1x6xf32, #tpu.memory_space<vmem>>, vector<1x6xf32>
    %34 = vector.broadcast %33 : vector<1x6xf32> to vector<2x6xf32>
    %35 = arith.addf %32, %34 : vector<2x6xf32>
    %c0_26 = arith.constant 0 : index
    %c0_27 = arith.constant 0 : index
    %36 = vector.load %arg9[%c0_26, %c0_27] : memref<64x128xf32, #tpu.memory_space<vmem>>, vector<64x128xf32>
    %cst_28 = arith.constant dense<0.000000e+00> : vector<2x128xf32>
    %37 = tpu.matmul %20, %36, %cst_28 {dimension_numbers = #tpu.dot_dimension_numbers<[1], [0], [0], [1], [0, 0, 1, 1], [], []>} : vector<2x64xf32>, vector<64x128xf32>, vector<2x128xf32> -> vector<2x128xf32>
    %c0_29 = arith.constant 0 : index
    %c0_30 = arith.constant 0 : index
    %38 = vector.load %arg10[%c0_29, %c0_30] : memref<1x128xf32, #tpu.memory_space<vmem>>, vector<1x128xf32>
    %39 = vector.broadcast %38 : vector<1x128xf32> to vector<2x128xf32>
    %40 = arith.addf %37, %39 : vector<2x128xf32>
    %cst_31 = arith.constant 0.000000e+00 : f32
    %41 = vector.broadcast %cst_31 : f32 to vector<2x128xf32>
    %42 = arith.cmpf oge, %40, %41 : vector<2x128xf32>
    %cst_32 = arith.constant 2.000000e-01 : f32
    %43 = vector.broadcast %cst_32 : f32 to vector<2x128xf32>
    %44 = arith.mulf %43, %40 : vector<2x128xf32>
    %45 = arith.select %42, %40, %44 : vector<2x128xi1>, vector<2x128xf32>
    %c0_33 = arith.constant 0 : index
    %c0_34 = arith.constant 0 : index
    %46 = vector.load %arg11[%c0_33, %c0_34] : memref<128x8xf32, #tpu.memory_space<vmem>>, vector<128x8xf32>
    %cst_35 = arith.constant dense<0.000000e+00> : vector<2x8xf32>
    %47 = tpu.matmul %45, %46, %cst_35 {dimension_numbers = #tpu.dot_dimension_numbers<[1], [0], [0], [1], [0, 0, 1, 1], [], []>} : vector<2x128xf32>, vector<128x8xf32>, vector<2x8xf32> -> vector<2x8xf32>
    %c0_36 = arith.constant 0 : index
    %c0_37 = arith.constant 0 : index
    %48 = vector.load %arg12[%c0_36, %c0_37] : memref<1x8xf32, #tpu.memory_space<vmem>>, vector<1x8xf32>
    %49 = vector.broadcast %48 : vector<1x8xf32> to vector<2x8xf32>
    %50 = arith.addf %47, %49 : vector<2x8xf32>
    %c0_38 = arith.constant 0 : index
    %c0_39 = arith.constant 0 : index
    %51 = vector.load %arg13[%c0_38, %c0_39] : memref<64x128xf32, #tpu.memory_space<vmem>>, vector<64x128xf32>
    %cst_40 = arith.constant dense<0.000000e+00> : vector<2x128xf32>
    %52 = tpu.matmul %20, %51, %cst_40 {dimension_numbers = #tpu.dot_dimension_numbers<[1], [0], [0], [1], [0, 0, 1, 1], [], []>} : vector<2x64xf32>, vector<64x128xf32>, vector<2x128xf32> -> vector<2x128xf32>
    %c0_41 = arith.constant 0 : index
    %c0_42 = arith.constant 0 : index
    %53 = vector.load %arg14[%c0_41, %c0_42] : memref<1x128xf32, #tpu.memory_space<vmem>>, vector<1x128xf32>
    %54 = vector.broadcast %53 : vector<1x128xf32> to vector<2x128xf32>
    %55 = arith.addf %52, %54 : vector<2x128xf32>
    %cst_43 = arith.constant 0.000000e+00 : f32
    %56 = vector.broadcast %cst_43 : f32 to vector<2x128xf32>
    %57 = arith.cmpf oge, %55, %56 : vector<2x128xf32>
    %cst_44 = arith.constant 2.000000e-01 : f32
    %58 = vector.broadcast %cst_44 : f32 to vector<2x128xf32>
    %59 = arith.mulf %58, %55 : vector<2x128xf32>
    %60 = arith.select %57, %55, %59 : vector<2x128xi1>, vector<2x128xf32>
    %c0_45 = arith.constant 0 : index
    %c0_46 = arith.constant 0 : index
    %61 = vector.load %arg15[%c0_45, %c0_46] : memref<128x6xf32, #tpu.memory_space<vmem>>, vector<128x6xf32>
    %cst_47 = arith.constant dense<0.000000e+00> : vector<2x6xf32>
    %62 = tpu.matmul %60, %61, %cst_47 {dimension_numbers = #tpu.dot_dimension_numbers<[1], [0], [0], [1], [0, 0, 1, 1], [], []>} : vector<2x128xf32>, vector<128x6xf32>, vector<2x6xf32> -> vector<2x6xf32>
    %c0_48 = arith.constant 0 : index
    %c0_49 = arith.constant 0 : index
    %63 = vector.load %arg16[%c0_48, %c0_49] : memref<1x6xf32, #tpu.memory_space<vmem>>, vector<1x6xf32>
    %64 = vector.broadcast %63 : vector<1x6xf32> to vector<2x6xf32>
    %65 = arith.addf %62, %64 : vector<2x6xf32>
    %cst_50 = arith.constant 1.000000e-01 : f32
    %66 = vector.broadcast %cst_50 : f32 to vector<2x6xf32>
    %67 = arith.mulf %65, %66 : vector<2x6xf32>
    %c0_51 = arith.constant 0 : index
    %c0_52 = arith.constant 0 : index
    %68 = vector.load %arg17[%c0_51, %c0_52] : memref<64x64xf32, #tpu.memory_space<vmem>>, vector<64x64xf32>
    %cst_53 = arith.constant dense<0.000000e+00> : vector<2x64xf32>
    %69 = tpu.matmul %20, %68, %cst_53 {dimension_numbers = #tpu.dot_dimension_numbers<[1], [0], [0], [1], [0, 0, 1, 1], [], []>} : vector<2x64xf32>, vector<64x64xf32>, vector<2x64xf32> -> vector<2x64xf32>
    %c0_54 = arith.constant 0 : index
    %c0_55 = arith.constant 0 : index
    %70 = vector.load %arg18[%c0_54, %c0_55] : memref<1x64xf32, #tpu.memory_space<vmem>>, vector<1x64xf32>
    %71 = vector.broadcast %70 : vector<1x64xf32> to vector<2x64xf32>
    %72 = arith.addf %69, %71 : vector<2x64xf32>
    %cst_56 = arith.constant 0.000000e+00 : f32
    %73 = vector.broadcast %cst_56 : f32 to vector<2x64xf32>
    %74 = arith.cmpf oge, %72, %73 : vector<2x64xf32>
    %cst_57 = arith.constant 2.000000e-01 : f32
    %75 = vector.broadcast %cst_57 : f32 to vector<2x64xf32>
    %76 = arith.mulf %75, %72 : vector<2x64xf32>
    %77 = arith.select %74, %72, %76 : vector<2x64xi1>, vector<2x64xf32>
    %cst_58 = arith.constant 0.000000e+00 : f32
    %78 = vector.broadcast %cst_58 : f32 to vector<2x512xf32>
    %c0_59 = arith.constant 0 : index
    %c0_60 = arith.constant 0 : index
    %79 = vector.load %arg19[%c0_59, %c0_60] : memref<2x512xf32, #tpu.memory_space<vmem>>, vector<2x512xf32>
    tpu.vector_store %arg19[%c0_59, %c0_60], %78 {strides = array<i32>} : memref<2x512xf32, #tpu.memory_space<vmem>>, vector<2x512xf32>,
    %c0_61 = arith.constant 0 : index
    %c0_62 = arith.constant 0 : index
    %80 = vector.load %arg19[%c0_61, %c0_62] : memref<2x512xf32, #tpu.memory_space<vmem>>, vector<2x6xf32>
    tpu.vector_store %arg19[%c0_61, %c0_62], %35 {strides = array<i32>} : memref<2x512xf32, #tpu.memory_space<vmem>>, vector<2x6xf32>,
    %c0_63 = arith.constant 0 : index
    %c128 = arith.constant 128 : index
    %81 = vector.load %arg19[%c0_63, %c128] : memref<2x512xf32, #tpu.memory_space<vmem>>, vector<2x8xf32>
    tpu.vector_store %arg19[%c0_63, %c128], %50 {strides = array<i32>} : memref<2x512xf32, #tpu.memory_space<vmem>>, vector<2x8xf32>,
    %c0_64 = arith.constant 0 : index
    %c256 = arith.constant 256 : index
    %82 = vector.load %arg19[%c0_64, %c256] : memref<2x512xf32, #tpu.memory_space<vmem>>, vector<2x6xf32>
    tpu.vector_store %arg19[%c0_64, %c256], %67 {strides = array<i32>} : memref<2x512xf32, #tpu.memory_space<vmem>>, vector<2x6xf32>,
    %c0_65 = arith.constant 0 : index
    %c384 = arith.constant 384 : index
    %83 = vector.load %arg19[%c0_65, %c384] : memref<2x512xf32, #tpu.memory_space<vmem>>, vector<2x64xf32>
    tpu.vector_store %arg19[%c0_65, %c384], %77 {strides = array<i32>} : memref<2x512xf32, #tpu.memory_space<vmem>>, vector<2x64xf32>,
    return
  }
}

module attributes {stable_mosaic.version = 11 : i64} {
  func.func @_weight_exp_kernel(%arg0: i32, %arg1: memref<2x64xf32, #tpu.memory_space<vmem>>, %arg2: memref<64x16384xf32, #tpu.memory_space<vmem>>, %arg3: memref<1x16384xf32, #tpu.memory_space<vmem>>, %arg4: memref<2x16384xf32, #tpu.memory_space<vmem>>) attributes {dimension_semantics = [#tpu.dimension_semantics<parallel>], iteration_bounds = array<i64: 4>, scalar_prefetch = 0 : i64, scratch_operands = 0 : i64, tpu.core_type = #tpu.core_type<tc>, window_params = [{pipeline_mode = #tpu.pipeline_mode<synchronous>, transform_indices = @transform_0, window_bounds = array<i64: 2, 64>}, {transform_indices = @transform_1, window_bounds = array<i64: 64, 16384>}, {transform_indices = @transform_2, window_bounds = array<i64: 1, 16384>}, {transform_indices = @transform_3, window_bounds = array<i64: 2, 16384>}]} {
    %c0 = arith.constant 0 : index
    %c0_0 = arith.constant 0 : index
    %0 = vector.load %arg1[%c0, %c0_0] : memref<2x64xf32, #tpu.memory_space<vmem>>, vector<2x64xf32>
    %c0_1 = arith.constant 0 : index
    %c0_2 = arith.constant 0 : index
    %1 = vector.load %arg2[%c0_1, %c0_2] : memref<64x16384xf32, #tpu.memory_space<vmem>>, vector<64x16384xf32>
    %cst = arith.constant dense<0.000000e+00> : vector<2x16384xf32>
    %2 = tpu.matmul %0, %1, %cst {dimension_numbers = #tpu.dot_dimension_numbers<[1], [0], [0], [1], [0, 0, 1, 1], [], []>} : vector<2x64xf32>, vector<64x16384xf32>, vector<2x16384xf32> -> vector<2x16384xf32>
    %c0_3 = arith.constant 0 : index
    %c0_4 = arith.constant 0 : index
    %3 = vector.load %arg3[%c0_3, %c0_4] : memref<1x16384xf32, #tpu.memory_space<vmem>>, vector<1x16384xf32>
    %4 = vector.broadcast %3 : vector<1x16384xf32> to vector<2x16384xf32>
    %5 = arith.addf %2, %4 : vector<2x16384xf32>
    %6 = math.exp %5 : vector<2x16384xf32>
    %c0_5 = arith.constant 0 : index
    %c0_6 = arith.constant 0 : index
    %7 = vector.load %arg4[%c0_5, %c0_6] : memref<2x16384xf32, #tpu.memory_space<vmem>>, vector<2x16384xf32>
    tpu.vector_store %arg4[%c0_5, %c0_6], %6 {strides = array<i32>} : memref<2x16384xf32, #tpu.memory_space<vmem>>, vector<2x16384xf32>,
    return
  }
  func.func @transform_0(%arg0: i32) -> (i32, i32) {
    %c0_i32 = arith.constant 0 : i32
    %c0_i32_0 = arith.constant 0 : i32
    %c0_i32_1 = arith.constant 0 : i32
    return %c0_i32, %c0_i32_0 : i32, i32
  }
  func.func @transform_1(%arg0: i32) -> (i32, i32) {
    %c0_i32 = arith.constant 0 : i32
    %c0_i32_0 = arith.constant 0 : i32
    return %c0_i32, %arg0 : i32, i32
  }
  func.func @transform_2(%arg0: i32) -> (i32, i32) {
    %c0_i32 = arith.constant 0 : i32
    %c0_i32_0 = arith.constant 0 : i32
    return %c0_i32, %arg0 : i32, i32
  }
  func.func @transform_3(%arg0: i32) -> (i32, i32) {
    %c0_i32 = arith.constant 0 : i32
    %c0_i32_0 = arith.constant 0 : i32
    return %c0_i32, %arg0 : i32, i32
  }
}

module attributes {stable_mosaic.version = 11 : i64} {
  func.func @_coords_kernel(%arg0: i32, %arg1: memref<12x8xf32, #tpu.memory_space<vmem>>, %arg2: memref<8x8192xf32, #tpu.memory_space<vmem>>, %arg3: memref<12x8192xf32, #tpu.memory_space<vmem>>) attributes {dimension_semantics = [#tpu.dimension_semantics<parallel>], iteration_bounds = array<i64: 4>, scalar_prefetch = 0 : i64, scratch_operands = 0 : i64, tpu.core_type = #tpu.core_type<tc>, window_params = [{pipeline_mode = #tpu.pipeline_mode<synchronous>, transform_indices = @transform_0, window_bounds = array<i64: 12, 8>}, {transform_indices = @transform_1, window_bounds = array<i64: 8, 8192>}, {transform_indices = @transform_2, window_bounds = array<i64: 12, 8192>}]} {
    %c0 = arith.constant 0 : index
    %c0_0 = arith.constant 0 : index
    %0 = vector.load %arg1[%c0, %c0_0] : memref<12x8xf32, #tpu.memory_space<vmem>>, vector<12x8xf32>
    %c0_1 = arith.constant 0 : index
    %c0_2 = arith.constant 0 : index
    %1 = vector.load %arg2[%c0_1, %c0_2] : memref<8x8192xf32, #tpu.memory_space<vmem>>, vector<8x8192xf32>
    %cst = arith.constant dense<0.000000e+00> : vector<12x8192xf32>
    %2 = tpu.matmul %0, %1, %cst {dimension_numbers = #tpu.dot_dimension_numbers<[1], [0], [0], [1], [0, 0, 1, 1], [], []>} : vector<12x8xf32>, vector<8x8192xf32>, vector<12x8192xf32> -> vector<12x8192xf32>
    %c0_3 = arith.constant 0 : index
    %c0_4 = arith.constant 0 : index
    %3 = vector.load %arg3[%c0_3, %c0_4] : memref<12x8192xf32, #tpu.memory_space<vmem>>, vector<12x8192xf32>
    tpu.vector_store %arg3[%c0_3, %c0_4], %2 {strides = array<i32>} : memref<12x8192xf32, #tpu.memory_space<vmem>>, vector<12x8192xf32>,
    return
  }
  func.func @transform_0(%arg0: i32) -> (i32, i32) {
    %c0_i32 = arith.constant 0 : i32
    %c0_i32_0 = arith.constant 0 : i32
    %c0_i32_1 = arith.constant 0 : i32
    return %c0_i32, %c0_i32_0 : i32, i32
  }
  func.func @transform_1(%arg0: i32) -> (i32, i32) {
    %c0_i32 = arith.constant 0 : i32
    %c0_i32_0 = arith.constant 0 : i32
    return %c0_i32, %arg0 : i32, i32
  }
  func.func @transform_2(%arg0: i32) -> (i32, i32) {
    %c0_i32 = arith.constant 0 : i32
    %c0_i32_0 = arith.constant 0 : i32
    return %c0_i32, %arg0 : i32, i32
  }
}

module attributes {stable_mosaic.version = 11 : i64} {
  func.func @_mix_kernel(%arg0: i32, %arg1: memref<2x24xf32, #tpu.memory_space<smem>>, %arg2: memref<3x256x128xf32, #tpu.memory_space<vmem>>, %arg3: memref<1x2x256x128xf32, #tpu.memory_space<vmem>>, %arg4: memref<1x3x256x128xf32, #tpu.memory_space<vmem>>) attributes {dimension_semantics = [#tpu.dimension_semantics<parallel>], iteration_bounds = array<i64: 2>, scalar_prefetch = 0 : i64, scratch_operands = 0 : i64, tpu.core_type = #tpu.core_type<tc>, window_params = [{transform_indices = @transform_0, window_bounds = array<i64: 2, 24>}, {pipeline_mode = #tpu.pipeline_mode<synchronous>, transform_indices = @transform_1, window_bounds = array<i64: 3, 256, 128>}, {transform_indices = @transform_2, window_bounds = array<i64: 1, 2, 256, 128>}, {transform_indices = @transform_3, window_bounds = array<i64: 1, 3, 256, 128>}]} {
    %c0 = arith.constant 0 : index
    %c0_0 = arith.constant 0 : index
    %c0_1 = arith.constant 0 : index
    %0 = vector.load %arg2[%c0, %c0_0, %c0_1] : memref<3x256x128xf32, #tpu.memory_space<vmem>>, vector<1x256x128xf32>
    %1 = vector.shape_cast %0 : vector<1x256x128xf32> to vector<256x128xf32>
    %c1 = arith.constant 1 : index
    %c0_2 = arith.constant 0 : index
    %c0_3 = arith.constant 0 : index
    %2 = vector.load %arg2[%c1, %c0_2, %c0_3] : memref<3x256x128xf32, #tpu.memory_space<vmem>>, vector<1x256x128xf32>
    %3 = vector.shape_cast %2 : vector<1x256x128xf32> to vector<256x128xf32>
    %c2 = arith.constant 2 : index
    %c0_4 = arith.constant 0 : index
    %c0_5 = arith.constant 0 : index
    %4 = vector.load %arg2[%c2, %c0_4, %c0_5] : memref<3x256x128xf32, #tpu.memory_space<vmem>>, vector<1x256x128xf32>
    %5 = vector.shape_cast %4 : vector<1x256x128xf32> to vector<256x128xf32>
    %c0_6 = arith.constant 0 : index
    %c0_7 = arith.constant 0 : index
    %c0_8 = arith.constant 0 : index
    %c0_9 = arith.constant 0 : index
    %6 = vector.load %arg3[%c0_6, %c0_7, %c0_8, %c0_9] : memref<1x2x256x128xf32, #tpu.memory_space<vmem>>, vector<1x1x256x128xf32>
    %7 = vector.shape_cast %6 : vector<1x1x256x128xf32> to vector<256x128xf32>
    %c0_10 = arith.constant 0 : index
    %c1_11 = arith.constant 1 : index
    %c0_12 = arith.constant 0 : index
    %c0_13 = arith.constant 0 : index
    %8 = vector.load %arg3[%c0_10, %c1_11, %c0_12, %c0_13] : memref<1x2x256x128xf32, #tpu.memory_space<vmem>>, vector<1x1x256x128xf32>
    %9 = vector.shape_cast %8 : vector<1x1x256x128xf32> to vector<256x128xf32>
    %10 = arith.addf %7, %9 : vector<256x128xf32>
    %cst = arith.constant 1.000000e-03 : f32
    %11 = vector.broadcast %cst : f32 to vector<256x128xf32>
    %12 = arith.maximumf %10, %11 : vector<256x128xf32>
    %13 = tpu.reciprocal %12 {approx = true} : vector<256x128xf32> -> vector<256x128xf32>
    %14 = arith.index_cast %arg0 : i32 to index
    %c0_14 = arith.constant 0 : index
    %15 = memref.load %arg1[%14, %c0_14] : memref<2x24xf32, #tpu.memory_space<smem>>
    %16 = vector.broadcast %15 : f32 to vector<256x128xf32>
    %17 = arith.mulf %16, %1 : vector<256x128xf32>
    %18 = arith.index_cast %arg0 : i32 to index
    %c1_15 = arith.constant 1 : index
    %19 = memref.load %arg1[%18, %c1_15] : memref<2x24xf32, #tpu.memory_space<smem>>
    %20 = vector.broadcast %19 : f32 to vector<256x128xf32>
    %21 = arith.mulf %20, %3 : vector<256x128xf32>
    %22 = arith.addf %17, %21 : vector<256x128xf32>
    %23 = arith.index_cast %arg0 : i32 to index
    %c2_16 = arith.constant 2 : index
    %24 = memref.load %arg1[%23, %c2_16] : memref<2x24xf32, #tpu.memory_space<smem>>
    %25 = vector.broadcast %24 : f32 to vector<256x128xf32>
    %26 = arith.mulf %25, %5 : vector<256x128xf32>
    %27 = arith.addf %22, %26 : vector<256x128xf32>
    %28 = arith.index_cast %arg0 : i32 to index
    %c3 = arith.constant 3 : index
    %29 = memref.load %arg1[%28, %c3] : memref<2x24xf32, #tpu.memory_space<smem>>
    %30 = vector.broadcast %29 : f32 to vector<256x128xf32>
    %31 = arith.addf %27, %30 : vector<256x128xf32>
    %c0_17 = arith.constant 0 : index
    %c0_18 = arith.constant 0 : index
    %c0_19 = arith.constant 0 : index
    %c0_20 = arith.constant 0 : index
    %32 = vector.load %arg3[%c0_17, %c0_18, %c0_19, %c0_20] : memref<1x2x256x128xf32, #tpu.memory_space<vmem>>, vector<1x1x256x128xf32>
    %33 = vector.shape_cast %32 : vector<1x1x256x128xf32> to vector<256x128xf32>
    %34 = arith.mulf %33, %31 : vector<256x128xf32>
    %35 = arith.index_cast %arg0 : i32 to index
    %c12 = arith.constant 12 : index
    %36 = memref.load %arg1[%35, %c12] : memref<2x24xf32, #tpu.memory_space<smem>>
    %37 = vector.broadcast %36 : f32 to vector<256x128xf32>
    %38 = arith.mulf %37, %1 : vector<256x128xf32>
    %39 = arith.index_cast %arg0 : i32 to index
    %c13 = arith.constant 13 : index
    %40 = memref.load %arg1[%39, %c13] : memref<2x24xf32, #tpu.memory_space<smem>>
    %41 = vector.broadcast %40 : f32 to vector<256x128xf32>
    %42 = arith.mulf %41, %3 : vector<256x128xf32>
    %43 = arith.addf %38, %42 : vector<256x128xf32>
    %44 = arith.index_cast %arg0 : i32 to index
    %c14 = arith.constant 14 : index
    %45 = memref.load %arg1[%44, %c14] : memref<2x24xf32, #tpu.memory_space<smem>>
    %46 = vector.broadcast %45 : f32 to vector<256x128xf32>
    %47 = arith.mulf %46, %5 : vector<256x128xf32>
    %48 = arith.addf %43, %47 : vector<256x128xf32>
    %49 = arith.index_cast %arg0 : i32 to index
    %c15 = arith.constant 15 : index
    %50 = memref.load %arg1[%49, %c15] : memref<2x24xf32, #tpu.memory_space<smem>>
    %51 = vector.broadcast %50 : f32 to vector<256x128xf32>
    %52 = arith.addf %48, %51 : vector<256x128xf32>
    %c0_21 = arith.constant 0 : index
    %c1_22 = arith.constant 1 : index
    %c0_23 = arith.constant 0 : index
    %c0_24 = arith.constant 0 : index
    %53 = vector.load %arg3[%c0_21, %c1_22, %c0_23, %c0_24] : memref<1x2x256x128xf32, #tpu.memory_space<vmem>>, vector<1x1x256x128xf32>
    %54 = vector.shape_cast %53 : vector<1x1x256x128xf32> to vector<256x128xf32>
    %55 = arith.mulf %54, %52 : vector<256x128xf32>
    %56 = arith.addf %34, %55 : vector<256x128xf32>
    %57 = arith.mulf %56, %13 : vector<256x128xf32>
    %c0_25 = arith.constant 0 : index
    %c0_26 = arith.constant 0 : index
    %c0_27 = arith.constant 0 : index
    %c0_28 = arith.constant 0 : index
    %58 = vector.load %arg4[%c0_25, %c0_26, %c0_27, %c0_28] : memref<1x3x256x128xf32, #tpu.memory_space<vmem>>, vector<1x1x256x128xf32>
    %59 = vector.shape_cast %58 : vector<1x1x256x128xf32> to vector<256x128xf32>
    %60 = vector.shape_cast %57 : vector<256x128xf32> to vector<1x1x256x128xf32>
    tpu.vector_store %arg4[%c0_25, %c0_26, %c0_27, %c0_28], %60 {strides = array<i32>} : memref<1x3x256x128xf32, #tpu.memory_space<vmem>>, vector<1x1x256x128xf32>,
    %61 = arith.index_cast %arg0 : i32 to index
    %c4 = arith.constant 4 : index
    %62 = memref.load %arg1[%61, %c4] : memref<2x24xf32, #tpu.memory_space<smem>>
    %63 = vector.broadcast %62 : f32 to vector<256x128xf32>
    %64 = arith.mulf %63, %1 : vector<256x128xf32>
    %65 = arith.index_cast %arg0 : i32 to index
    %c5 = arith.constant 5 : index
    %66 = memref.load %arg1[%65, %c5] : memref<2x24xf32, #tpu.memory_space<smem>>
    %67 = vector.broadcast %66 : f32 to vector<256x128xf32>
    %68 = arith.mulf %67, %3 : vector<256x128xf32>
    %69 = arith.addf %64, %68 : vector<256x128xf32>
    %70 = arith.index_cast %arg0 : i32 to index
    %c6 = arith.constant 6 : index
    %71 = memref.load %arg1[%70, %c6] : memref<2x24xf32, #tpu.memory_space<smem>>
    %72 = vector.broadcast %71 : f32 to vector<256x128xf32>
    %73 = arith.mulf %72, %5 : vector<256x128xf32>
    %74 = arith.addf %69, %73 : vector<256x128xf32>
    %75 = arith.index_cast %arg0 : i32 to index
    %c7 = arith.constant 7 : index
    %76 = memref.load %arg1[%75, %c7] : memref<2x24xf32, #tpu.memory_space<smem>>
    %77 = vector.broadcast %76 : f32 to vector<256x128xf32>
    %78 = arith.addf %74, %77 : vector<256x128xf32>
    %c0_29 = arith.constant 0 : index
    %c0_30 = arith.constant 0 : index
    %c0_31 = arith.constant 0 : index
    %c0_32 = arith.constant 0 : index
    %79 = vector.load %arg3[%c0_29, %c0_30, %c0_31, %c0_32] : memref<1x2x256x128xf32, #tpu.memory_space<vmem>>, vector<1x1x256x128xf32>
    %80 = vector.shape_cast %79 : vector<1x1x256x128xf32> to vector<256x128xf32>
    %81 = arith.mulf %80, %78 : vector<256x128xf32>
    %82 = arith.index_cast %arg0 : i32 to index
    %c16 = arith.constant 16 : index
    %83 = memref.load %arg1[%82, %c16] : memref<2x24xf32, #tpu.memory_space<smem>>
    %84 = vector.broadcast %83 : f32 to vector<256x128xf32>
    %85 = arith.mulf %84, %1 : vector<256x128xf32>
    %86 = arith.index_cast %arg0 : i32 to index
    %c17 = arith.constant 17 : index
    %87 = memref.load %arg1[%86, %c17] : memref<2x24xf32, #tpu.memory_space<smem>>
    %88 = vector.broadcast %87 : f32 to vector<256x128xf32>
    %89 = arith.mulf %88, %3 : vector<256x128xf32>
    %90 = arith.addf %85, %89 : vector<256x128xf32>
    %91 = arith.index_cast %arg0 : i32 to index
    %c18 = arith.constant 18 : index
    %92 = memref.load %arg1[%91, %c18] : memref<2x24xf32, #tpu.memory_space<smem>>
    %93 = vector.broadcast %92 : f32 to vector<256x128xf32>
    %94 = arith.mulf %93, %5 : vector<256x128xf32>
    %95 = arith.addf %90, %94 : vector<256x128xf32>
    %96 = arith.index_cast %arg0 : i32 to index
    %c19 = arith.constant 19 : index
    %97 = memref.load %arg1[%96, %c19] : memref<2x24xf32, #tpu.memory_space<smem>>
    %98 = vector.broadcast %97 : f32 to vector<256x128xf32>
    %99 = arith.addf %95, %98 : vector<256x128xf32>
    %c0_33 = arith.constant 0 : index
    %c1_34 = arith.constant 1 : index
    %c0_35 = arith.constant 0 : index
    %c0_36 = arith.constant 0 : index
    %100 = vector.load %arg3[%c0_33, %c1_34, %c0_35, %c0_36] : memref<1x2x256x128xf32, #tpu.memory_space<vmem>>, vector<1x1x256x128xf32>
    %101 = vector.shape_cast %100 : vector<1x1x256x128xf32> to vector<256x128xf32>
    %102 = arith.mulf %101, %99 : vector<256x128xf32>
    %103 = arith.addf %81, %102 : vector<256x128xf32>
    %104 = arith.mulf %103, %13 : vector<256x128xf32>
    %c0_37 = arith.constant 0 : index
    %c1_38 = arith.constant 1 : index
    %c0_39 = arith.constant 0 : index
    %c0_40 = arith.constant 0 : index
    %105 = vector.load %arg4[%c0_37, %c1_38, %c0_39, %c0_40] : memref<1x3x256x128xf32, #tpu.memory_space<vmem>>, vector<1x1x256x128xf32>
    %106 = vector.shape_cast %105 : vector<1x1x256x128xf32> to vector<256x128xf32>
    %107 = vector.shape_cast %104 : vector<256x128xf32> to vector<1x1x256x128xf32>
    tpu.vector_store %arg4[%c0_37, %c1_38, %c0_39, %c0_40], %107 {strides = array<i32>} : memref<1x3x256x128xf32, #tpu.memory_space<vmem>>, vector<1x1x256x128xf32>,
    %108 = arith.index_cast %arg0 : i32 to index
    %c8 = arith.constant 8 : index
    %109 = memref.load %arg1[%108, %c8] : memref<2x24xf32, #tpu.memory_space<smem>>
    %110 = vector.broadcast %109 : f32 to vector<256x128xf32>
    %111 = arith.mulf %110, %1 : vector<256x128xf32>
    %112 = arith.index_cast %arg0 : i32 to index
    %c9 = arith.constant 9 : index
    %113 = memref.load %arg1[%112, %c9] : memref<2x24xf32, #tpu.memory_space<smem>>
    %114 = vector.broadcast %113 : f32 to vector<256x128xf32>
    %115 = arith.mulf %114, %3 : vector<256x128xf32>
    %116 = arith.addf %111, %115 : vector<256x128xf32>
    %117 = arith.index_cast %arg0 : i32 to index
    %c10 = arith.constant 10 : index
    %118 = memref.load %arg1[%117, %c10] : memref<2x24xf32, #tpu.memory_space<smem>>
    %119 = vector.broadcast %118 : f32 to vector<256x128xf32>
    %120 = arith.mulf %119, %5 : vector<256x128xf32>
    %121 = arith.addf %116, %120 : vector<256x128xf32>
    %122 = arith.index_cast %arg0 : i32 to index
    %c11 = arith.constant 11 : index
    %123 = memref.load %arg1[%122, %c11] : memref<2x24xf32, #tpu.memory_space<smem>>
    %124 = vector.broadcast %123 : f32 to vector<256x128xf32>
    %125 = arith.addf %121, %124 : vector<256x128xf32>
    %c0_41 = arith.constant 0 : index
    %c0_42 = arith.constant 0 : index
    %c0_43 = arith.constant 0 : index
    %c0_44 = arith.constant 0 : index
    %126 = vector.load %arg3[%c0_41, %c0_42, %c0_43, %c0_44] : memref<1x2x256x128xf32, #tpu.memory_space<vmem>>, vector<1x1x256x128xf32>
    %127 = vector.shape_cast %126 : vector<1x1x256x128xf32> to vector<256x128xf32>
    %128 = arith.mulf %127, %125 : vector<256x128xf32>
    %129 = arith.index_cast %arg0 : i32 to index
    %c20 = arith.constant 20 : index
    %130 = memref.load %arg1[%129, %c20] : memref<2x24xf32, #tpu.memory_space<smem>>
    %131 = vector.broadcast %130 : f32 to vector<256x128xf32>
    %132 = arith.mulf %131, %1 : vector<256x128xf32>
    %133 = arith.index_cast %arg0 : i32 to index
    %c21 = arith.constant 21 : index
    %134 = memref.load %arg1[%133, %c21] : memref<2x24xf32, #tpu.memory_space<smem>>
    %135 = vector.broadcast %134 : f32 to vector<256x128xf32>
    %136 = arith.mulf %135, %3 : vector<256x128xf32>
    %137 = arith.addf %132, %136 : vector<256x128xf32>
    %138 = arith.index_cast %arg0 : i32 to index
    %c22 = arith.constant 22 : index
    %139 = memref.load %arg1[%138, %c22] : memref<2x24xf32, #tpu.memory_space<smem>>
    %140 = vector.broadcast %139 : f32 to vector<256x128xf32>
    %141 = arith.mulf %140, %5 : vector<256x128xf32>
    %142 = arith.addf %137, %141 : vector<256x128xf32>
    %143 = arith.index_cast %arg0 : i32 to index
    %c23 = arith.constant 23 : index
    %144 = memref.load %arg1[%143, %c23] : memref<2x24xf32, #tpu.memory_space<smem>>
    %145 = vector.broadcast %144 : f32 to vector<256x128xf32>
    %146 = arith.addf %142, %145 : vector<256x128xf32>
    %c0_45 = arith.constant 0 : index
    %c1_46 = arith.constant 1 : index
    %c0_47 = arith.constant 0 : index
    %c0_48 = arith.constant 0 : index
    %147 = vector.load %arg3[%c0_45, %c1_46, %c0_47, %c0_48] : memref<1x2x256x128xf32, #tpu.memory_space<vmem>>, vector<1x1x256x128xf32>
    %148 = vector.shape_cast %147 : vector<1x1x256x128xf32> to vector<256x128xf32>
    %149 = arith.mulf %148, %146 : vector<256x128xf32>
    %150 = arith.addf %128, %149 : vector<256x128xf32>
    %151 = arith.mulf %150, %13 : vector<256x128xf32>
    %c0_49 = arith.constant 0 : index
    %c2_50 = arith.constant 2 : index
    %c0_51 = arith.constant 0 : index
    %c0_52 = arith.constant 0 : index
    %152 = vector.load %arg4[%c0_49, %c2_50, %c0_51, %c0_52] : memref<1x3x256x128xf32, #tpu.memory_space<vmem>>, vector<1x1x256x128xf32>
    %153 = vector.shape_cast %152 : vector<1x1x256x128xf32> to vector<256x128xf32>
    %154 = vector.shape_cast %151 : vector<256x128xf32> to vector<1x1x256x128xf32>
    tpu.vector_store %arg4[%c0_49, %c2_50, %c0_51, %c0_52], %154 {strides = array<i32>} : memref<1x3x256x128xf32, #tpu.memory_space<vmem>>, vector<1x1x256x128xf32>,
    return
  }
  func.func @transform_0(%arg0: i32) -> (i32, i32) {
    %c0_i32 = arith.constant 0 : i32
    %c0_i32_0 = arith.constant 0 : i32
    %c0_i32_1 = arith.constant 0 : i32
    return %c0_i32, %c0_i32_0 : i32, i32
  }
  func.func @transform_1(%arg0: i32) -> (i32, i32, i32) {
    %c0_i32 = arith.constant 0 : i32
    %c0_i32_0 = arith.constant 0 : i32
    %c0_i32_1 = arith.constant 0 : i32
    %c0_i32_2 = arith.constant 0 : i32
    return %c0_i32, %c0_i32_0, %c0_i32_1 : i32, i32, i32
  }
  func.func @transform_2(%arg0: i32) -> (i32, i32, i32, i32) {
    %c0_i32 = arith.constant 0 : i32
    %c0_i32_0 = arith.constant 0 : i32
    %c0_i32_1 = arith.constant 0 : i32
    %c0_i32_2 = arith.constant 0 : i32
    return %arg0, %c0_i32, %c0_i32_0, %c0_i32_1 : i32, i32, i32, i32
  }
  func.func @transform_3(%arg0: i32) -> (i32, i32, i32, i32) {
    %c0_i32 = arith.constant 0 : i32
    %c0_i32_0 = arith.constant 0 : i32
    %c0_i32_1 = arith.constant 0 : i32
    %c0_i32_2 = arith.constant 0 : i32
    return %arg0, %c0_i32, %c0_i32_0, %c0_i32_1 : i32, i32, i32, i32
  }
}

</mosaic_0001>

<bundles_post_ra>
// kernel: mul.99
= control target key start
LH: loop header
LB: loop body
LE: loop exit
PB: predicated region body
PF: predicated region fallthrough
CT: control target
= control target key end

     0   :  { %vm7_vm0 = vcmask 23552   ;;  %s49_s0 = inlined_call_operand.vmem [shape: f32[2,6], index: 0, kind: input, shape index: {}]   ;;  %s50_s1 = inlined_call_operand.vmem [shape: f32[2,2,3], index: 1, kind: output, shape index: {}]  }
   0x1   :  { %v4_v0 = vld [vmem:[%s49_s0] sm:$0x3]  ;;  %s29_s0 = smov 125  }
   0x2   :  { %5 = vst [vmem:[#allocation1] sm:$0x3] %v4_v0 }
   0x9   :  { %v9_v1 = vld [vmem:[#allocation1] sm:$0x3]  }
   0xa   :  { %v6_v2 = vld [vmem:[#allocation1] sm:$0x3]   ;;  %10 = vrot.lane.b32.xlu0 %v9_v1, %s29_s0 }
   0xb   :  { %8 = vst.msk [vmem:[#allocation0] ss:$8 sm:$0x3] %vm7_vm0, %v6_v2  }
  0x7c   :  { %v11_v3 = vpop.permute.xlu0 %10  }
  0x7d   :  { %14 = vst.msk [vmem:[#allocation0 + $0x1] ss:$8 sm:$0x3] %vm7_vm0, %v11_v3  }
  0x84   :  { %v17_v4 = vld [vmem:[#allocation0] sm:$0x3]  ;;  %v22_v5 = vld [vmem:[#allocation0 + $0x8] sm:$0x3] }
  0x85   :  { %20 = vst [vmem:[%s50_s1] sm:$0x3] %v17_v4 }
  0x86   :  { %27 = vst [vmem:[%s50_s1 + $0x2] sm:$0x3] %v22_v5 }

// kernel: affine_mix_warp_forward.4
= control target key start
LH: loop header
LB: loop body
LE: loop exit
PB: predicated region body
PF: predicated region fallthrough
CT: control target
= control target key end

     0   :  { %s1434_s0 = inlined_call_operand.hbm [shape: f32[2,16], index: 0, kind: input, shape index: {}]   ;;  %s1435_s1 = inlined_call_operand.hbm [shape: f32[16,64], index: 1, kind: input, shape index: {}]   ;;  %s1436_s2 = inlined_call_operand.hbm [shape: f32[1,64], index: 2, kind: input, shape index: {}]   ;;  %s1437_s3 = inlined_call_operand.hbm [shape: f32[64,64], index: 3, kind: input, shape index: {}]   ;;  %s1438_s4 = inlined_call_operand.hbm [shape: f32[1,64], index: 4, kind: input, shape index: {}]   ;;  %s1439_s5 = inlined_call_operand.hbm [shape: f32[64,128], index: 5, kind: input, shape index: {}]   ;;  %s1440_s6 = inlined_call_operand.hbm [shape: f32[1,128], index: 6, kind: input, shape index: {}]   ;;  %s1441_s7 = inlined_call_operand.vmem [shape: f32[128,6], index: 7, kind: input, shape index: {}]   ;;  %s1442_s8 = inlined_call_operand.hbm [shape: f32[1,6], index: 8, kind: input, shape index: {}]   ;;  %s1443_s9 = inlined_call_operand.hbm [shape: f32[64,128], index: 9, kind: input, shape index: {}]   ;;  %s1444_s10 = inlined_call_operand.hbm [shape: f32[1,128], index: 10, kind: input, shape index: {}]   ;;  %s1445_s11 = inlined_call_operand.vmem [shape: f32[128,8], index: 11, kind: input, shape index: {}]   ;;  %s1446_s12 = inlined_call_operand.hbm [shape: f32[1,8], index: 12, kind: input, shape index: {}]   ;;  %s1447_s13 = inlined_call_operand.hbm [shape: f32[64,128], index: 13, kind: input, shape index: {}]   ;;  %s1448_s14 = inlined_call_operand.hbm [shape: f32[1,128], index: 14, kind: input, shape index: {}]   ;;  %s1449_s15 = inlined_call_operand.vmem [shape: f32[128,6], index: 15, kind: input, shape index: {}]   ;;  %s1450_s16 = inlined_call_operand.hbm [shape: f32[1,6], index: 16, kind: input, shape index: {}]   ;;  %s1451_s17 = inlined_call_operand.hbm [shape: f32[64,64], index: 17, kind: input, shape index: {}]   ;;  %s1452_s18 = inlined_call_operand.hbm [shape: f32[1,64], index: 18, kind: input, shape index: {}]   ;;  %s1453_s19 = inlined_call_operand.vmem [shape: f32[2,512], index: 19, kind: output, shape index: {}]  }
   0x1   :  { %1454 = sst [smem:[#allocation36_spill]] %s1434_s0 }
   0x2   :  { %1455 = sst [smem:[#allocation37_spill]] %s1435_s1 }
   0x3   :  { %1456 = sst [smem:[#allocation38_spill]] %s1436_s2 }
   0x4   :  { %1457 = sst [smem:[#allocation39_spill]] %s1437_s3 }
   0x5   :  { %24 = vsyncpa [#allocation3], 0 }
   0x6   :  { %25 = vsyncpa [#allocation5], 0 }
   0x7   :  { %26 = vsyncpa [#allocation8], 0 }
   0x8   :  { %27 = vsyncpa [#allocation11], 0 }
   0x9   :  { %28 = vsyncpa [#allocation14], 0 }
   0xa   :  { %29 = vsyncpa [#allocation17], 0 }
   0xb   :  { %30 = vsyncpa [#allocation20], 0 }
   0xc   :  { %31 = vsyncpa [#allocation23], 0  ;;  %s1458_s20 = sld [smem:[#allocation37_spill]] }
  0x12   :  { %s48_s21 = sshll.u32 %s1458_s20, 4  ;;  %s49_s21 = int_to_ptr.hbm [resolvable:$true] %s48_s21 }
  0x13   :  { %32 = vsyncpa [#allocation26], 0  ;;  %s1085_s1 = smov [#allocation4]   ;;  %s1459_s24 = sld [smem:[#allocation39_spill]] }
  0x14   :  { %s50_s22 = sshll.u32 %s1085_s1, 4  ;;  %s1086_s3 = smov 128   ;;  %s51_s22 = int_to_ptr.vmem [resolvable:$true] %s50_s22 }
  0x15   :  { %s1087_s26 = smov 8   ;;  %s1088_s27 = smov [#allocation7]  }
  0x16   :  { %56 = dma.hbm_to_vmem [thread:$0]  %s49_s21, 256, %s51_s22, [#allocation5], %s1086_s3, %s1086_s3, %s1087_s26  }
  0x17   :  { %s74_s28 = sshll.u32 %s1088_s27, 4  ;;  %s96_s30 = sshll.u32 %s1439_s5, 4  ;;  %s75_s28 = int_to_ptr.vmem [resolvable:$true] %s74_s28  ;;  %s97_s30 = int_to_ptr.hbm [resolvable:$true] %s96_s30 }
  0x18   :  { %s123_s2 = sshll.u32 %s1442_s8, 4  ;;  %s1089_s23 = smov [#allocation10]   ;;  %s124_s2 = int_to_ptr.hbm [resolvable:$true] %s123_s2 }
  0x19   :  { %s72_s25 = sshll.u32 %s1459_s24, 4  ;;  %s98_s24 = sshll.u32 %s1089_s23, 4  ;;  %s73_s25 = int_to_ptr.hbm [resolvable:$true] %s72_s25  ;;  %s99_s24 = int_to_ptr.vmem [resolvable:$true] %s98_s24 }
  0x1a   :  { %80 = dma.hbm_to_vmem [thread:$0]  %s73_s25, 1024, %s75_s28, [#allocation8], %s1086_s3, %s1086_s3, %s1087_s26  }
  0x1b   :  { %104 = dma.hbm_to_vmem [thread:$0]  %s97_s30, 1024, %s99_s24, [#allocation11], %s1086_s3, %s1086_s3, %s1087_s26  }
  0x1c   :  { %s1090_s21 = smov [#allocation13]   ;;  %s147_s29 = sshll.u32 %s1444_s10, 4  ;;  %s148_s29 = int_to_ptr.hbm [resolvable:$true] %s147_s29 }
  0x1d   :  { %s125_s5 = sshll.u32 %s1090_s21, 4  ;;  %s170_s8 = sshll.u32 %s1447_s13, 4  ;;  %s126_s5 = int_to_ptr.vmem [resolvable:$true] %s125_s5  ;;  %s171_s8 = int_to_ptr.hbm [resolvable:$true] %s170_s8 }
  0x1e   :  { %128 = dma.hbm_to_vmem [thread:$0]  %s124_s2, 16, %s126_s5, [#allocation14]  }
  0x1f   :  { %s1091_s0 = smov [#allocation16]   ;;  %s1092_s1 = smov [#allocation19]  }
  0x20   :  { %s149_s20 = sshll.u32 %s1091_s0, 4  ;;  %s172_s30 = sshll.u32 %s1092_s1, 4  ;;  %s150_s20 = int_to_ptr.vmem [resolvable:$true] %s149_s20  ;;  %s173_s30 = int_to_ptr.vmem [resolvable:$true] %s172_s30 }
  0x21   :  { %152 = dma.hbm_to_vmem [thread:$0]  %s148_s29, 16, %s150_s20, [#allocation17]  }
  0x22   :  { %s197_s21 = sshll.u32 %s1450_s16, 4  ;;  %s1460_s13 = sld [smem:[#allocation36_spill]]  ;;  %s198_s21 = int_to_ptr.hbm [resolvable:$true] %s197_s21 }
  0x23   :  { %178 = dma.hbm_to_vmem [thread:$0]  %s171_s8, 1024, %s173_s30, [#allocation20], %s1086_s3, %s1086_s3, %s1087_s26  }
  0x24   :  { %s1093_s22 = smov [#allocation22]   ;;  %s1094_s29 = smov [#allocation2]  }
  0x25   :  { %s199_s27 = sshll.u32 %s1093_s22, 4  ;;  %s40_s25 = sshll.u32 %s1094_s29, 4  ;;  %s200_s27 = int_to_ptr.vmem [resolvable:$true] %s199_s27  ;;  %s41_s25 = int_to_ptr.vmem [resolvable:$true] %s40_s25 }
  0x26   :  { %202 = dma.hbm_to_vmem [thread:$0]  %s198_s21, 16, %s200_s27, [#allocation23]  }
  0x27   :  { %s1461_s16 = sld [smem:[#allocation38_spill]]  ;;  %s86_s30 = sshll.u32 %s1438_s4, 4  ;;  %s87_s30 = int_to_ptr.hbm [resolvable:$true] %s86_s30 }
  0x28   :  { %s38_s5 = sshll.u32 %s1460_s13, 4  ;;  %s1095_s23 = smov [#allocation6]   ;;  %s39_s5 = int_to_ptr.hbm [resolvable:$true] %s38_s5 }
  0x29   :  { %43 = dma.hbm_to_vmem [thread:$0]  %s39_s5, 32, %s41_s25, [#allocation3]  }
  0x2a   :  { %s64_s24 = sshll.u32 %s1095_s23, 4  ;;  %s1096_s10 = smov [#allocation9]   ;;  %s65_s24 = int_to_ptr.vmem [resolvable:$true] %s64_s24 }
  0x2b   :  { %s88_s21 = sshll.u32 %s1096_s10, 4  ;;  %s110_s22 = sshll.u32 %s1440_s6, 4  ;;  %s89_s21 = int_to_ptr.vmem [resolvable:$true] %s88_s21  ;;  %s111_s22 = int_to_ptr.hbm [resolvable:$true] %s110_s22 }
  0x2c   :  { %91 = dma.hbm_to_vmem [thread:$0]  %s87_s30, 16, %s89_s21, [#allocation8]  }
  0x2d   :  { %s62_s20 = sshll.u32 %s1461_s16, 4  ;;  %s133_s29 = sshll.u32 %s1443_s9, 4  ;;  %s63_s20 = int_to_ptr.hbm [resolvable:$true] %s62_s20  ;;  %s134_s29 = int_to_ptr.hbm [resolvable:$true] %s133_s29 }
  0x2e   :  { %67 = dma.hbm_to_vmem [thread:$0]  %s63_s20, 16, %s65_s24, [#allocation5]  }
  0x2f   :  { %s1097_s25 = smov [#allocation12]   ;;  %s1098_s28 = smov [#allocation15]  }
  0x30   :  { %s112_s4 = sshll.u32 %s1097_s25, 4  ;;  %s135_s0 = sshll.u32 %s1098_s28, 4  ;;  %s113_s4 = int_to_ptr.vmem [resolvable:$true] %s112_s4  ;;  %s136_s0 = int_to_ptr.vmem [resolvable:$true] %s135_s0 }
  0x31   :  { %115 = dma.hbm_to_vmem [thread:$0]  %s111_s22, 16, %s113_s4, [#allocation11]  }
  0x32   :  { %s160_s1 = sshll.u32 %s1446_s12, 4  ;;  %s184_s9 = sshll.u32 %s1448_s14, 4  ;;  %s161_s1 = int_to_ptr.hbm [resolvable:$true] %s160_s1  ;;  %s185_s9 = int_to_ptr.hbm [resolvable:$true] %s184_s9 }
  0x33   :  { %141 = dma.hbm_to_vmem [thread:$0]  %s134_s29, 1024, %s136_s0, [#allocation14], %s1086_s3, %s1086_s3, %s1087_s26  }
  0x34   :  { %s1099_s30 = smov [#allocation18]   ;;  %s1100_s24 = smov [#allocation21]  }
  0x35   :  { %s162_s23 = sshll.u32 %s1099_s30, 4  ;;  %s186_s10 = sshll.u32 %s1100_s24, 4  ;;  %s163_s23 = int_to_ptr.vmem [resolvable:$true] %s162_s23  ;;  %s187_s10 = int_to_ptr.vmem [resolvable:$true] %s186_s10 }
  0x36   :  { %165 = dma.hbm_to_vmem [thread:$0]  %s161_s1, 16, %s163_s23, [#allocation17]  }
  0x37   :  { %s207_s12 = sshll.u32 %s1451_s17, 4  ;;  %s221_s27 = sshll.u32 %s1452_s18, 4  ;;  %s208_s12 = int_to_ptr.hbm [resolvable:$true] %s207_s12  ;;  %s222_s27 = int_to_ptr.hbm [resolvable:$true] %s221_s27 }
  0x38   :  { %189 = dma.hbm_to_vmem [thread:$0]  %s185_s9, 16, %s187_s10, [#allocation20]  }
  0x39   :  { %s1101_s5 = smov [#allocation24]   ;;  %s1102_s29 = smov [#allocation25]  }
  0x3a   :  { %s209_s14 = sshll.u32 %s1101_s5, 4  ;;  %s223_s25 = sshll.u32 %s1102_s29, 4  ;;  %s210_s14 = int_to_ptr.vmem [resolvable:$true] %s209_s14  ;;  %s224_s25 = int_to_ptr.vmem [resolvable:$true] %s223_s25 }
  0x3b   :  { %215 = dma.hbm_to_vmem [thread:$0]  %s208_s12, 1024, %s210_s14, [#allocation23], %s1086_s3, %s1086_s3, %s1087_s26  }
  0x3c   :  { %226 = dma.hbm_to_vmem [thread:$0]  %s222_s27, 16, %s224_s25, [#allocation26]  }
  0x3d   :  { %1067 = dma.done.wait [#allocation3], 32  }
  0x3e   :  { %1068 = vsyncadd [#allocation3], 4294967264 }
  0x3f   :  { %1069 = dma.done.wait [#allocation5], 272  }
  0x40   :  { %1070 = vsyncadd [#allocation5], 4294967024 }
  0x41   :  { %1071 = dma.done.wait [#allocation8], 1040  }
  0x42   :  { %1072 = vsyncadd [#allocation8], 4294966256 }
  0x43   :  { %1073 = dma.done.wait [#allocation11], 1040  }
  0x44   :  { %1074 = vsyncadd [#allocation11], 4294966256 }
  0x45   :  { %1075 = dma.done.wait [#allocation14], 1040  }
  0x46   :  { %1076 = vsyncadd [#allocation14], 4294966256 }
  0x47   :  { %1077 = dma.done.wait [#allocation17], 32  }
  0x48   :  { %1078 = vsyncadd [#allocation17], 4294967264 }
  0x49   :  { %1079 = dma.done.wait [#allocation20], 1040  }
  0x4a   :  { %1080 = vsyncadd [#allocation20], 4294966256 }
  0x4b   :  { %1081 = dma.done.wait [#allocation23], 1040  }
  0x4c   :  { %1082 = vsyncadd [#allocation23], 4294966256 }
  0x4d   :  { %1083 = dma.done.wait [#allocation26], 16  }
  0x4e   :  { %1084 = vsyncadd [#allocation26], 4294967280  ;;  %v293_v0 = vld [vmem:[#allocation4 + $0x8] sm:$0xff]  ;;  %v292_v1 = vld [vmem:[#allocation4] sm:$0xff]  ;;  %vm298_vm0 = vcmask 130048   ;;  %vm337_vm2 = vcmask 523264  }
  0x4f   :  { %316 = vmatpush.msra.mxu3 %v293_v0  ;;  %v291_v2 = vld [vmem:[#allocation2] sm:$0x3]  ;;  %v332_v3 = vld [vmem:[#allocation7 + $0x38] sm:$0xff]  ;;  %v331_v4 = vld [vmem:[#allocation7 + $0x30] sm:$0xff]  ;;  %vm634_vm8 = vcmask 517120   ;;  %vm631_vm9 = vcmask 58368  }
  0x50   :  { %349 = vmatpush.msra.mxu1 %v332_v3  ;;  %v330_v5 = vld [vmem:[#allocation7 + $0x28] sm:$0xff]  ;;  %v329_v6 = vld [vmem:[#allocation7 + $0x20] sm:$0xff]  ;;  %v328_v7 = vld [vmem:[#allocation7 + $0x18] sm:$0xff]  ;;  %vm629_vm10 = vcmask 41984  }
  0x51   :  { %317 = vmatpush.msra.mxu3 %v292_v1  ;;  %v327_v8 = vld [vmem:[#allocation7 + $0x10] sm:$0xff]  ;;  %v326_v9 = vld [vmem:[#allocation7 + $0x8] sm:$0xff]  ;;  %v325_v10 = vld [vmem:[#allocation7] sm:$0xff] }
  0x52   :  { %649 = vmatmul.msk.f32.vlgmr.msra.gmra.mxu3 %vm298_vm0, %v291_v2  ;;  %350 = vmatpush.msra.mxu1 %v331_v4  ;;  %v371_v11 = vld [vmem:[#allocation10 + $0x38] sm:$0xff]  ;;  %v370_v12 = vld [vmem:[#allocation10 + $0x30] sm:$0xff]  ;;  %v369_v13 = vld [vmem:[#allocation10 + $0x28] sm:$0xff] }
  0x53   :  { %387 = vmatpush.msra.mxu2 %v371_v11  ;;  %v449_v14 = vld [vmem:[#allocation15 + $0x38] sm:$0xff]  ;;  %v448_v15 = vld [vmem:[#allocation15 + $0x30] sm:$0xff]  ;;  %v447_v17 = vld [vmem:[#allocation15 + $0x28] sm:$0xff] }
  0x54   :  { %351 = vmatpush.msra.mxu1 %v330_v5  ;;  %462 = vmatpush.msra.mxu0 %v449_v14  ;;  %v368_v16 = vld [vmem:[#allocation10 + $0x20] sm:$0xff]  ;;  %v367_v18 = vld [vmem:[#allocation10 + $0x18] sm:$0xff]  ;;  %v366_v20 = vld [vmem:[#allocation10 + $0x10] sm:$0xff] }
  0x55   :  { %388 = vmatpush.msra.mxu2 %v370_v12  ;;  %v446_v19 = vld [vmem:[#allocation15 + $0x20] sm:$0xff]  ;;  %v445_v21 = vld [vmem:[#allocation15 + $0x18] sm:$0xff]  ;;  %v522_v26 = vld [vmem:[#allocation19 + $0x28] sm:$0xff] }
  0x56   :  { %352 = vmatpush.msra.mxu1 %v329_v6  ;;  %463 = vmatpush.msra.mxu0 %v448_v15  ;;  %v365_v22 = vld [vmem:[#allocation10 + $0x8] sm:$0xff]  ;;  %v364_v23 = vld [vmem:[#allocation10] sm:$0xff]  ;;  %v523_v25 = vld [vmem:[#allocation19 + $0x30] sm:$0xff] }
  0x57   :  { %389 = vmatpush.msra.mxu2 %v369_v13  ;;  %v524_v24 = vld [vmem:[#allocation19 + $0x38] sm:$0xff]  ;;  %v521_v27 = vld [vmem:[#allocation19 + $0x20] sm:$0xff]  ;;  %v674_v28 = vld [vmem:[#allocation6] ss:$0 sm:$0xff] }
  0x58   :  { %353 = vmatpush.msra.mxu1 %v328_v7  ;;  %464 = vmatpush.msra.mxu0 %v447_v17  ;;  %v520_v33 = vld [vmem:[#allocation19 + $0x18] sm:$0xff]  ;;  %v444_v34 = vld [vmem:[#allocation15 + $0x10] sm:$0xff]  ;;  %v443_v36 = vld [vmem:[#allocation15 + $0x8] sm:$0xff] }
  0x59   :  { %390 = vmatpush.msra.mxu2 %v368_v16  ;;  %v519_v35 = vld [vmem:[#allocation19 + $0x10] sm:$0xff]  ;;  %v518_v37 = vld [vmem:[#allocation19 + $0x8] sm:$0xff]  ;;  %v442_v38 = vld [vmem:[#allocation15] sm:$0xff] }
  0x5a   :  { %354 = vmatpush.msra.mxu1 %v327_v8  ;;  %465 = vmatpush.msra.mxu0 %v446_v19  ;;  %v517_v39 = vld [vmem:[#allocation19] sm:$0xff]  ;;  %v491_v41 = vld [vmem:[%s1445_s11 + $0x70] sm:$0xff]  ;;  %v490_v44 = vld [vmem:[%s1445_s11 + $0x68] sm:$0xff] }
  0x5b   :  { %391 = vmatpush.msra.mxu2 %v367_v18  ;;  %v492_v40 = vld [vmem:[%s1445_s11 + $0x78] sm:$0xff]  ;;  %v416_v43 = vld [vmem:[%s1441_s7 + $0x70] sm:$0xff]  ;;  %v415_v45 = vld [vmem:[%s1441_s7 + $0x68] sm:$0xff] }
  0x5c   :  { %355 = vmatpush.msra.mxu1 %v326_v9  ;;  %466 = vmatpush.msra.mxu0 %v445_v21  ;;  %v417_v42 = vld [vmem:[%s1441_s7 + $0x78] sm:$0xff]  ;;  %v489_v46 = vld [vmem:[%s1445_s11 + $0x60] sm:$0xff]  ;;  %v566_v49 = vld [vmem:[%s1449_s15 + $0x70] sm:$0xff] }
  0x5d   :  { %392 = vmatpush.msra.mxu2 %v366_v20  ;;  %422 = vmatpush.msrb.mxu3 %v417_v42  ;;  %v567_v47 = vld [vmem:[%s1449_s15 + $0x78] sm:$0xff]  ;;  %v414_v48 = vld [vmem:[%s1441_s7 + $0x60] sm:$0xff]  ;;  %v565_v51 = vld [vmem:[%s1449_s15 + $0x68] sm:$0xff] }
  0x5e   :  { %356 = vmatpush.msra.mxu1 %v325_v10  ;;  %467 = vmatpush.msra.mxu0 %v444_v34  ;;  %v488_v50 = vld [vmem:[%s1445_s11 + $0x58] sm:$0xff]  ;;  %v675_v52 = vld [vmem:[#allocation9] ss:$0 sm:$0xff]  ;;  %v564_v55 = vld [vmem:[%s1449_s15 + $0x60] sm:$0xff] }
  0x5f   :  { %393 = vmatpush.msra.mxu2 %v365_v22  ;;  %423 = vmatpush.msrb.mxu3 %v416_v43  ;;  %v413_v53 = vld [vmem:[%s1441_s7 + $0x58] sm:$0xff]  ;;  %v487_v54 = vld [vmem:[%s1445_s11 + $0x50] sm:$0xff]  ;;  %v486_v58 = vld [vmem:[%s1445_s11 + $0x48] sm:$0xff] }
  0x60   :  { %468 = vmatpush.msra.mxu0 %v443_v36  ;;  %497 = vmatpush.msrb.mxu1 %v492_v40  ;;  %v412_v56 = vld [vmem:[%s1441_s7 + $0x50] sm:$0xff]  ;;  %v563_v59 = vld [vmem:[%s1449_s15 + $0x58] sm:$0xff]  ;;  %v411_v61 = vld [vmem:[%s1441_s7 + $0x48] sm:$0xff] }
  0x61   :  { %394 = vmatpush.msra.mxu2 %v364_v23  ;;  %424 = vmatpush.msrb.mxu3 %v415_v45  ;;  %v485_v62 = vld [vmem:[%s1445_s11 + $0x40] sm:$0xff]  ;;  %v562_v63 = vld [vmem:[%s1449_s15 + $0x50] sm:$0xff]  ;;  %v484_v2 = vld [vmem:[%s1445_s11 + $0x38] sm:$0xff] }
  0x62   :  { %469 = vmatpush.msra.mxu0 %v442_v38  ;;  %498 = vmatpush.msrb.mxu1 %v491_v41  ;;  %v600_v1 = vld [vmem:[#allocation24 + $0x38] sm:$0xff]  ;;  %v599_v5 = vld [vmem:[#allocation24 + $0x30] sm:$0xff]  ;;  %v598_v8 = vld [vmem:[#allocation24 + $0x28] sm:$0xff] }
  0x63   :  { %537 = vmatpush.msrb.mxu2 %v524_v24  ;;  %425 = vmatpush.msrb.mxu3 %v414_v48  ;;  %v410_v4 = vld [vmem:[%s1441_s7 + $0x40] sm:$0xff]  ;;  %v483_v6 = vld [vmem:[%s1445_s11 + $0x30] sm:$0xff]  ;;  %v409_v7 = vld [vmem:[%s1441_s7 + $0x38] sm:$0xff] }
  0x64   :  { %499 = vmatpush.msrb.mxu1 %v490_v44  ;;  %572 = vmatpush.msrb.mxu0 %v567_v47  ;;  %v482_v9 = vld [vmem:[%s1445_s11 + $0x28] sm:$0xff]  ;;  %v408_v10 = vld [vmem:[%s1441_s7 + $0x30] sm:$0xff]  ;;  %v481_v12 = vld [vmem:[%s1445_s11 + $0x20] sm:$0xff] }
  0x65   :  { %538 = vmatpush.msrb.mxu2 %v523_v25  ;;  %426 = vmatpush.msrb.mxu3 %v413_v53  ;;  %v597_v11 = vld [vmem:[#allocation24 + $0x20] sm:$0xff]  ;;  %v596_v13 = vld [vmem:[#allocation24 + $0x18] sm:$0xff]  ;;  %v595_v15 = vld [vmem:[#allocation24 + $0x10] sm:$0xff] }
  0x66   :  { %500 = vmatpush.msrb.mxu1 %v489_v46  ;;  %573 = vmatpush.msrb.mxu0 %v566_v49  ;;  %v480_v14 = vld [vmem:[%s1445_s11 + $0x18] sm:$0xff]  ;;  %v594_v16 = vld [vmem:[#allocation24 + $0x8] sm:$0xff]  ;;  %v593_v17 = vld [vmem:[#allocation24] sm:$0xff] }
  0x67   :  { %539 = vmatpush.msrb.mxu2 %v522_v26  ;;  %427 = vmatpush.msrb.mxu3 %v412_v56  ;;  %v407_v18 = vld [vmem:[%s1441_s7 + $0x28] sm:$0xff]  ;;  %v479_v19 = vld [vmem:[%s1445_s11 + $0x10] sm:$0xff]  ;;  %v406_v21 = vld [vmem:[%s1441_s7 + $0x20] sm:$0xff] }
  0x68   :  { %501 = vmatpush.msrb.mxu1 %v488_v50  ;;  %574 = vmatpush.msrb.mxu0 %v565_v51  ;;  %v561_v20 = vld [vmem:[%s1449_s15 + $0x48] sm:$0xff]  ;;  %v560_v23 = vld [vmem:[%s1449_s15 + $0x40] sm:$0xff]  ;;  %v405_v24 = vld [vmem:[%s1441_s7 + $0x18] sm:$0xff] }
  0x69   :  { %540 = vmatpush.msrb.mxu2 %v521_v27  ;;  %428 = vmatpush.msrb.mxu3 %v411_v61  ;;  %v478_v22 = vld [vmem:[%s1445_s11 + $0x8] sm:$0xff]  ;;  %v477_v25 = vld [vmem:[%s1445_s11] sm:$0xff]  ;;  %v559_v26 = vld [vmem:[%s1449_s15 + $0x38] sm:$0xff] }
  0x6a   :  { %502 = vmatpush.msrb.mxu1 %v487_v54  ;;  %575 = vmatpush.msrb.mxu0 %v564_v55  ;;  %v404_v27 = vld [vmem:[%s1441_s7 + $0x10] sm:$0xff]  ;;  %v552_v36 = vld [vmem:[%s1449_s15] sm:$0xff]  ;;  %v676_v38 = vld [vmem:[#allocation16] ss:$0 sm:$0xff] }
  0x6b   :  { %541 = vmatpush.msrb.mxu2 %v520_v33  ;;  %429 = vmatpush.msrb.mxu3 %v410_v4  ;;  %v555_v33 = vld [vmem:[%s1449_s15 + $0x18] sm:$0xff]  ;;  %v554_v34 = vld [vmem:[%s1449_s15 + $0x10] sm:$0xff]  ;;  %v679_v53 = vld [vmem:[#allocation25] ss:$0 sm:$0xff] }
  0x6c   :  { %503 = vmatpush.msrb.mxu1 %v486_v58  ;;  %576 = vmatpush.msrb.mxu0 %v563_v59  ;;  %v677_v42 = vld [vmem:[#allocation12] ss:$0 sm:$0xff]  ;;  %v678_v48 = vld [vmem:[#allocation21] ss:$0 sm:$0xff]  ;;  %v680_v58 = vld [vmem:[#allocation18] ss:$0 sm:$0xff] }
  0x6d   :  { %542 = vmatpush.msrb.mxu2 %v519_v35  ;;  %430 = vmatpush.msrb.mxu3 %v409_v7  ;;  %v553_v35 = vld [vmem:[%s1449_s15 + $0x8] sm:$0xff]  ;;  %v681_v61 = vld [vmem:[#allocation13] ss:$0 sm:$0xff] }
  0x6e   :  { %504 = vmatpush.msrb.mxu1 %v485_v62  ;;  %577 = vmatpush.msrb.mxu0 %v562_v63  ;;  %v682_v62 = vld [vmem:[#allocation22] ss:$0 sm:$0xff] }
  0x6f   :  { %543 = vmatpush.msrb.mxu2 %v518_v37  ;;  %431 = vmatpush.msrb.mxu3 %v408_v10  ;;  %v1103_v37 = vmov 0.0  }
  0x70   :  { %505 = vmatpush.msrb.mxu1 %v484_v2  ;;  %578 = vmatpush.msrb.mxu0 %v561_v20  ;;  %628 = vst [vmem:[%s1453_s19] sm:$0xff] %v1103_v37 }
  0x71   :  { %544 = vmatpush.msrb.mxu2 %v517_v39  ;;  %432 = vmatpush.msrb.mxu3 %v407_v18 }
  0x72   :  { %506 = vmatpush.msrb.mxu1 %v483_v6  ;;  %579 = vmatpush.msrb.mxu0 %v560_v23 }
  0x73   :  { %433 = vmatpush.msrb.mxu3 %v406_v21 }
  0x74   :  { %507 = vmatpush.msrb.mxu1 %v482_v9  ;;  %580 = vmatpush.msrb.mxu0 %v559_v26 }
  0x75   :  { %434 = vmatpush.msrb.mxu3 %v405_v24 }
  0x76   :  { %508 = vmatpush.msrb.mxu1 %v481_v12 }
  0x77   :  { %435 = vmatpush.msrb.mxu3 %v404_v27 }
  0x78   :  { %509 = vmatpush.msrb.mxu1 %v480_v14 }
  0x7a   :  { %510 = vmatpush.msrb.mxu1 %v479_v19 }
  0x7c   :  { %511 = vmatpush.msrb.mxu1 %v478_v22 }
  0x7e   :  { %512 = vmatpush.msrb.mxu1 %v477_v25 }
  0xd5   :  { %v319_v29 = vpop.f32.mrf.mxu3 }
  0xd6   :  { %v320_v30 = vadd.f32 %v674_v28, %v319_v29  ;;  %v558_v28 = vld [vmem:[%s1449_s15 + $0x30] sm:$0xff]  ;;  %v403_v29 = vld [vmem:[%s1441_s7 + $0x8] sm:$0xff] }
  0xd7   :  { %581 = vmatpush.msrb.mxu0 %v558_v28  ;;  %436 = vmatpush.msrb.mxu3 %v403_v29 }
  0xd8   :  { %v323_v31 = vmul.f32 0.2, %v320_v30  ;;  %vm322_vm1 = vcmp.ge.f32.partialorder %v320_v30, 0.0 }
  0xda   :  { %v324_v32 = vsel %vm322_vm1, %v320_v30, %v323_v31  ;;  %v557_v30 = vld [vmem:[%s1449_s15 + $0x28] sm:$0xff]  ;;  %v402_v31 = vld [vmem:[%s1441_s7] sm:$0xff] }
  0xdb   :  { %650 = vmatmul.msk.f32.vlgmr.msra.gmra.mxu1 %vm337_vm2, %v324_v32  ;;  %v556_v32 = vld [vmem:[%s1449_s15 + $0x20] sm:$0xff]  ;;  %582 = vmatpush.msrb.mxu0 %v557_v30 }
  0xdc   :  { %437 = vmatpush.msrb.mxu3 %v402_v31 }
  0xdd   :  { %583 = vmatpush.msrb.mxu0 %v556_v32 }
  0xdf   :  { %584 = vmatpush.msrb.mxu0 %v555_v33 }
  0xe1   :  { %585 = vmatpush.msrb.mxu0 %v554_v34 }
  0xe3   :  { %586 = vmatpush.msrb.mxu0 %v553_v35 }
  0xe5   :  { %587 = vmatpush.msrb.mxu0 %v552_v36 }
 0x158   :  { %v358_v57 = vpop.f32.mrf.mxu1 }
 0x159   :  { %v359_v60 = vadd.f32 %v675_v52, %v358_v57 }
 0x15b   :  { %vm361_vm3 = vcmp.ge.f32.partialorder %v359_v60, 0.0  ;;  %v362_v0 = vmul.f32 0.2, %v359_v60 }
 0x15d   :  { %v363_v3 = vsel %vm361_vm3, %v359_v60, %v362_v0 }
 0x15e   :  { %651 = vmatmul.msk.f32.vlgmr.msra.gmra.mxu2 %vm337_vm2, %v363_v3  ;;  %652 = vmatmul.msk.f32.vlgmr.msra.gmra.mxu0 %vm337_vm2, %v363_v3 }
 0x15f   :  { %613 = vmatpush.msra.mxu2 %v600_v1 }
 0x161   :  { %614 = vmatpush.msra.mxu2 %v599_v5 }
 0x163   :  { %615 = vmatpush.msra.mxu2 %v598_v8 }
 0x165   :  { %616 = vmatpush.msra.mxu2 %v597_v11 }
 0x166   :  { %653 = vmatmul.msk.f32.vlgmr.msrb.gmra.mxu2 %vm337_vm2, %v363_v3 }
 0x167   :  { %617 = vmatpush.msra.mxu2 %v596_v13 }
 0x169   :  { %618 = vmatpush.msra.mxu2 %v595_v15 }
 0x16b   :  { %619 = vmatpush.msra.mxu2 %v594_v16 }
 0x16d   :  { %620 = vmatpush.msra.mxu2 %v593_v17 }
 0x16e   :  { %654 = vmatmul.msk.f32.vlgmr.msra.gmra.mxu2 %vm337_vm2, %v363_v3 }
 0x1db   :  { %v471_v39 = vpop.f32.mrf.mxu0 }
 0x1dc   :  { %v472_v40 = vadd.f32 %v676_v38, %v471_v39 }
 0x1de   :  { %v475_v41 = vmul.f32 0.2, %v472_v40  ;;  %vm474_vm4 = vcmp.ge.f32.partialorder %v472_v40, 0.0 }
 0x1e0   :  { %v476_v43 = vsel %vm474_vm4, %v472_v40, %v475_v41 }
 0x1e1   :  { %v396_v44 = vpop.f32.mrf.mxu2  ;;  %513 = vmatmul.f32.vlgmr.msrb.gmra.mxu1 %v476_v43 }
 0x1e2   :  { %v397_v45 = vadd.f32 %v677_v42, %v396_v44 }
 0x1e4   :  { %v400_v46 = vmul.f32 0.2, %v397_v45  ;;  %vm399_vm5 = vcmp.ge.f32.partialorder %v397_v45, 0.0 }
 0x1e6   :  { %v401_v47 = vsel %vm399_vm5, %v397_v45, %v400_v46 }
 0x1e7   :  { %438 = vmatmul.f32.vlgmr.msrb.gmra.mxu3 %v401_v47 }
 0x1e9   :  { %v546_v49 = vpop.f32.mrf.mxu2 }
 0x1ea   :  { %v547_v50 = vadd.f32 %v678_v48, %v546_v49 }
 0x1ec   :  { %v550_v51 = vmul.f32 0.2, %v547_v50  ;;  %vm549_vm6 = vcmp.ge.f32.partialorder %v547_v50, 0.0 }
 0x1ee   :  { %v551_v52 = vsel %vm549_vm6, %v547_v50, %v550_v51 }
 0x1ef   :  { %588 = vmatmul.f32.vlgmr.msrb.gmra.mxu0 %v551_v52 }
 0x1f1   :  { %v622_v54 = vpop.f32.mrf.mxu2 }
 0x1f2   :  { %v623_v55 = vadd.f32 %v679_v53, %v622_v54 }
 0x1f4   :  { %vm625_vm7 = vcmp.ge.f32.partialorder %v623_v55, 0.0  ;;  %v626_v56 = vmul.f32 0.2, %v623_v55 }
 0x1f6   :  { %v627_v57 = vsel %vm625_vm7, %v623_v55, %v626_v56 }
 0x1f7   :  { %635 = vst.msk [vmem:[%s1453_s19 + $0x6] sm:$0x3] %vm634_vm8, %v627_v57 }
 0x25e   :  { %v514_v59 = vpop.f32.mrf.mxu1 }
 0x25f   :  { %v515_v60 = vadd.f32 %v680_v58, %v514_v59 }
 0x261   :  { %632 = vst.msk [vmem:[%s1453_s19 + $0x2] sm:$0x3] %vm631_vm9, %v515_v60 }
 0x26a   :  { %v439_v63 = vpop.f32.mrf.mxu3 }
 0x26b   :  { %v440_v0 = vadd.f32 %v681_v61, %v439_v63 }
 0x26c   :  { %v589_v1 = vpop.f32.mrf.mxu0 }
 0x26d   :  { %630 = vst.msk [vmem:[%s1453_s19] sm:$0x3] %vm629_vm10, %v440_v0  ;;  %v590_v2 = vadd.f32 %v682_v62, %v589_v1 }
 0x26f   :  { %v592_v3 = vmul.f32 0.1, %v590_v2 }
 0x271   :  { %633 = vst.msk [vmem:[%s1453_s19 + $0x4] sm:$0x3] %vm629_vm10, %v592_v3 }
 0x272   :  { %640 = vsyncpa [#allocation3], 1 }
 0x273   :  { %641 = vsyncpa [#allocation5], 1 }
 0x274   :  { %642 = vsyncpa [#allocation8], 1 }
 0x275   :  { %643 = vsyncpa [#allocation11], 1 }
 0x276   :  { %644 = vsyncpa [#allocation14], 1 }
 0x277   :  { %645 = vsyncpa [#allocation17], 1 }
 0x278   :  { %646 = vsyncpa [#allocation20], 1 }
 0x279   :  { %647 = vsyncpa [#allocation23], 1 }
 0x27a   :  { %648 = vsyncpa [#allocation26], 1 }

// kernel: affine_mix_warp_forward.6
= control target key start
LH: loop header
LB: loop body
LE: loop exit
PB: predicated region body
PF: predicated region fallthrough
CT: control target
= control target key end

     0   :  { %7 = vsyncpa [#allocation3], 0  ;;  %s3265_s0 = inlined_call_operand.vmem [shape: f32[12,8], index: 0, kind: input, shape index: {}]   ;;  %s3266_s1 = inlined_call_operand.hbm [shape: f32[8,32768], index: 1, kind: input, shape index: {}]   ;;  %s3267_s2 = inlined_call_operand.vmem [shape: f32[12,32768], index: 2, kind: output, shape index: {}]  }
   0x1   :  { %9 = vsyncpa [#allocation3 + $0x1], 0  ;;  %s2440_s9 = smov 0   ;;  %s2442_s10 = smov 0  }
   0x2   :  { %s2444_s11 = smov 0   ;;  %s2446_s12 = smov 0  }
   0x3 LB: > { %s2459_s13 = sadd.s32 4294967295, %s2423_s12   ;;  %s2462_s14 = sadd.s32 1, %s2423_s12   ;;  %s2423_s12 = sphi %s2446_s12, %s3275_s12   ;;  %s2419_s11 = sphi %s2444_s11, %s3274_s11   ;;  %s2415_s10 = sphi %s2442_s10, %s3273_s10   ;;  %s2411_s9 = sphi %s2440_s9, %s3272_s9  }
   0x4   : > { %s40_s15 = ssub.s32 %s2423_s12, %s2462_s14  ;;  %s43_s16 = sadd.s32 1, %s2419_s11 }
   0x5   : > { %p41_p0 = scmp.eq.s32.totalorder %s40_s15, 0  ;;  %p50_p1 = scmp.ne.s32.totalorder %s2419_s11, %s2415_s10 }
   0x6   : > { %p51_p2 = scmp.eq.s32.totalorder %s2423_s12, 0  ;;  %p56_p3 = scmp.ne.s32.totalorder %s2415_s10, %s2411_s9 }
   0x7   : > { %s2472_s17 = scalar_select %p41_p0, %s2419_s11, %s43_s16  }
   0x8   : > { %p2474_p4 = por %p51_p2, %p50_p1  ;;  %p57_p5 = scmp.eq.s32.totalorder %s2459_s13, 0 }
   0x9   : > { %p80_p6 = scmp.eq.s32.totalorder %s2459_s13, 3  ;;  %p2326_p8 = scmp.lt.s32.totalorder %s2423_s12, 4 }
   0xa   : > { %p2480_p7 = por %p57_p5, %p56_p3  ;;  %s109_s21 = sand.u32 1, %s2419_s11  }
   0xb   : > { %p2485_p9 = por %p80_p6, %p50_p1  ;;  %s2179_s22 = sshll.u32 %s109_s21, 9 }
   0xc   : > { %s2318_s23 = sshll.u32 %s2423_s12, 9  ;;  %s113_s27 = scalar_lea.vmem [#allocation2], %s2179_s22 }
   0xd   : > { %s118_s26 = scalar_lea.hbm %s3266_s1, %s2318_s23  ;;  %s122_s28 = sshll.u32 %s113_s27, 4  ;;  %s123_s28 = int_to_ptr.vmem [resolvable:$true] %s122_s28 }
   0xe   : > { %s120_s29 = sshll.u32 %s118_s26, 4  ;;  %p2496_p10 = pnand %p2326_p8, %p2474_p4  ;;  %s121_s29 = int_to_ptr.hbm [resolvable:$true] %s120_s29 }
   0xf   : > { %p2182_p11 = scmp.ge.s32.totalorder %s2423_s12, 1  ;;  %p127_p12 = scmp.lt.s32.totalorder %s2423_s12, 5 }
  0x10   : > { %s110_s3 = scalar_lea.sflag [#allocation3], %s109_s21  ;;  %s2359_s4 = sshra.s32 %s121_s29, 4  ;;  %s2360_s4 = int_to_ptr.hbm [resolvable:$true] %s2359_s4 }
  0x11   : > { %s2361_s5 = scalar_lea.hbm %s2360_s4, 512  ;;  %p2363_p0 = pneg %p2496_p10 }
  0x12   : > { %p2362_p13 = scmp.ne.s32.totalorder %s2360_s4, %s2361_s5  ;;  %s2366_s8 = scalar_lea.hbm %s3266_s1, 2048 }
  0x13   : > { %p2367_p3 = scmp.lt.s32.totalorder %s2360_s4, %s3266_s1  ;;  %p2368_p4 = scmp.lt.s32.totalorder %s2366_s8, %s2361_s5 }
  0x14   : > { %p2364_p1 = pnand %p2363_p0, %p2362_p13 }
  0x15   : > { %p2369_p5 = por %p2368_p4, %p2367_p3 }
  0x16   : > { %p2365_p2 = pneg %p2364_p1 }
  0x18   : > { %p2370_p6 = pnand %p2369_p5, %p2365_p2 }
  0x1a   : > { %2373 = shalt.err (!%p2370_p6)
}
  0x1b   : > { %2325 = dma.hbm_to_vmem [thread:$0]  (!%p2496_p10), %s121_s29, 8192, %s123_s28, %s110_s3  }
  0x1c   : > { %p128_p8 = pnand %p2182_p11, %p127_p12 }
  0x1d   : > { %s2517_s16 = sand.u32 (!%p128_p8), 1, %s2415_s10  }
  0x1e   : > { %131 = sbr.rel (%p128_p8) target bundleno = 487 (0x1e7), region = 28  ;;  %s2183_s18 = sshll.u32 (!%p128_p8), %s2517_s16, 9 }
  0x1f   : > { %s134_s21 = scalar_lea.sflag (!%p128_p8), [#allocation3], %s2517_s16  ;;  %s2521_s22 = scalar_lea.vmem (!%p128_p8), [#allocation2], %s2183_s18 }
  0x23   : > { %2406 = dma.done.wait (%p2480_p7), %s134_s21, 8192  }
  0x24   : > { %2408 = vsyncadd (%p2480_p7), %s134_s21, 4294959104  ;;  %vm226_vm0 = vcmask 64512   ;;  %v164_v0 = vld [vmem:[%s2521_s22 + $0x10] sm:$0xff]  ;;  %v165_v1 = vld [vmem:[%s2521_s22 + $0x18] sm:$0xff]  ;;  %s2184_s25 = sshll.u32 %s2517_s16, 10  ;;  %s2319_s27 = sshll.u32 (%p2485_p9), %s2459_s13, 9 }
  0x25   : > { %v2532_v2 = vld [vmem:[%s3265_s0] sm:$0xff]  ;;  %294 = vmatpush.msra.mxu2 %v164_v0  ;;  %317 = vmatpush.msra.mxu3 %v165_v1  ;;  %v168_v3 = vld [vmem:[%s2521_s22 + $0x30] sm:$0xff]  ;;  %v169_v4 = vld [vmem:[%s2521_s22 + $0x38] sm:$0xff]  ;;  %s2712_s26 = scalar_lea.vmem [#allocation4], %s2184_s25  ;;  %s2996_s30 = scalar_lea.vmem (%p2485_p9), %s3267_s2, %s2319_s27 }
  0x26   : > { %v162_v5 = vld [vmem:[%s2521_s22] sm:$0xff]  ;;  %2189 = vmatmul.msk.f32.vlgmr.msra.gmra.mxu2 %vm226_vm0, %v2532_v2  ;;  %2191 = vmatmul.msk.f32.vlgmr.msra.gmra.mxu3 %vm226_vm0, %v2532_v2  ;;  %v163_v6 = vld [vmem:[%s2521_s22 + $0x8] sm:$0xff]  ;;  %v172_v9 = vld [vmem:[%s2521_s22 + $0x50] sm:$0xff] }
  0x27   : > { %386 = vmatpush.msrb.mxu2 %v168_v3  ;;  %409 = vmatpush.msrb.mxu3 %v169_v4  ;;  %v166_v7 = vld [vmem:[%s2521_s22 + $0x20] sm:$0xff]  ;;  %v167_v8 = vld [vmem:[%s2521_s22 + $0x28] sm:$0xff]  ;;  %v173_v10 = vld [vmem:[%s2521_s22 + $0x58] sm:$0xff] }
  0x28   : > { %248 = vmatpush.msra.mxu0 %v162_v5  ;;  %271 = vmatpush.msra.mxu1 %v163_v6  ;;  %v170_v11 = vld [vmem:[%s2521_s22 + $0x40] sm:$0xff]  ;;  %v171_v12 = vld [vmem:[%s2521_s22 + $0x48] sm:$0xff]  ;;  %v176_v14 = vld [vmem:[%s2521_s22 + $0x70] sm:$0xff] }
  0x29   : > { %2185 = vmatmul.msk.f32.vlgmr.msra.gmra.mxu0 %vm226_vm0, %v2532_v2  ;;  %2187 = vmatmul.msk.f32.vlgmr.msra.gmra.mxu1 %vm226_vm0, %v2532_v2  ;;  %v2555_v13 = vld [vmem:[%s3265_s0 + $0x8] sm:$0xf]  ;;  %v177_v15 = vld [vmem:[%s2521_s22 + $0x78] sm:$0xff]  ;;  %v174_v16 = vld [vmem:[%s2521_s22 + $0x60] sm:$0xff] }
  0x2a   : > { %340 = vmatpush.msrb.mxu0 %v166_v7  ;;  %363 = vmatpush.msrb.mxu1 %v167_v8  ;;  %v175_v17 = vld [vmem:[%s2521_s22 + $0x68] sm:$0xff]  ;;  %v180_v18 = vld [vmem:[%s2521_s22 + $0x90] sm:$0xff]  ;;  %v181_v19 = vld [vmem:[%s2521_s22 + $0x98] sm:$0xff] }
  0x2b   : > { %478 = vmatpush.msra.mxu2 %v172_v9  ;;  %501 = vmatpush.msra.mxu3 %v173_v10  ;;  %v178_v20 = vld [vmem:[%s2521_s22 + $0x80] sm:$0xff]  ;;  %v179_v21 = vld [vmem:[%s2521_s22 + $0x88] sm:$0xff]  ;;  %v184_v22 = vld [vmem:[%s2521_s22 + $0xb0] sm:$0xff] }
  0x2c   : > { %432 = vmatpush.msra.mxu0 %v170_v11  ;;  %455 = vmatpush.msra.mxu1 %v171_v12  ;;  %v185_v23 = vld [vmem:[%s2521_s22 + $0xb8] sm:$0xff]  ;;  %v182_v24 = vld [vmem:[%s2521_s22 + $0xa0] sm:$0xff]  ;;  %v183_v25 = vld [vmem:[%s2521_s22 + $0xa8] sm:$0xff] }
  0x2d   : > { %v188_v26 = vld [vmem:[%s2521_s22 + $0xd0] sm:$0xff]  ;;  %v189_v27 = vld [vmem:[%s2521_s22 + $0xd8] sm:$0xff]  ;;  %v186_v28 = vld [vmem:[%s2521_s22 + $0xc0] sm:$0xff] }
  0x2e   : > { %2190 = vmatmul.msk.f32.gmra.mxu2 %vm226_vm0, %v2555_v13  ;;  %2192 = vmatmul.msk.f32.gmra.mxu3 %vm226_vm0, %v2555_v13  ;;  %v187_v29 = vld [vmem:[%s2521_s22 + $0xc8] sm:$0xff]  ;;  %v192_v30 = vld [vmem:[%s2521_s22 + $0xf0] sm:$0xff]  ;;  %v193_v31 = vld [vmem:[%s2521_s22 + $0xf8] sm:$0xff] }
  0x2f   : > { %v190_v32 = vld [vmem:[%s2521_s22 + $0xe0] sm:$0xff]  ;;  %v191_v33 = vld [vmem:[%s2521_s22 + $0xe8] sm:$0xff]  ;;  %v196_v34 = vld [vmem:[%s2521_s22 + $0x110] sm:$0xff] }
  0x30   : > { %v197_v35 = vld [vmem:[%s2521_s22 + $0x118] sm:$0xff]  ;;  %v194_v36 = vld [vmem:[%s2521_s22 + $0x100] sm:$0xff]  ;;  %v195_v37 = vld [vmem:[%s2521_s22 + $0x108] sm:$0xff] }
  0x31   : > { %2186 = vmatmul.msk.f32.gmra.mxu0 %vm226_vm0, %v2555_v13  ;;  %2188 = vmatmul.msk.f32.gmra.mxu1 %vm226_vm0, %v2555_v13  ;;  %v200_v38 = vld [vmem:[%s2521_s22 + $0x130] sm:$0xff]  ;;  %v201_v39 = vld [vmem:[%s2521_s22 + $0x138] sm:$0xff]  ;;  %v198_v40 = vld [vmem:[%s2521_s22 + $0x120] sm:$0xff] }
  0x32   : > { %v199_v41 = vld [vmem:[%s2521_s22 + $0x128] sm:$0xff]  ;;  %v204_v42 = vld [vmem:[%s2521_s22 + $0x150] sm:$0xff]  ;;  %v205_v43 = vld [vmem:[%s2521_s22 + $0x158] sm:$0xff] }
  0x33   : > { %v202_v46 = vld [vmem:[%s2521_s22 + $0x140] sm:$0xff]  ;;  %v203_v47 = vld [vmem:[%s2521_s22 + $0x148] sm:$0xff]  ;;  %v208_v54 = vld [vmem:[%s2521_s22 + $0x170] sm:$0xff] }
  0x34   : > { %v209_v55 = vld [vmem:[%s2521_s22 + $0x178] sm:$0xff]  ;;  %v206_v58 = vld [vmem:[%s2521_s22 + $0x160] sm:$0xff]  ;;  %v207_v59 = vld [vmem:[%s2521_s22 + $0x168] sm:$0xff] }
  0x35   : > { %v212_v3 = vld [vmem:[%s2521_s22 + $0x190] sm:$0xff]  ;;  %v213_v4 = vld [vmem:[%s2521_s22 + $0x198] sm:$0xff]  ;;  %v210_v7 = vld [vmem:[%s2521_s22 + $0x180] sm:$0xff] }
  0x36   : > { %2197 = vmatmul.msk.f32.vlgmr.msrb.gmra.mxu2 %vm226_vm0, %v2532_v2  ;;  %2199 = vmatmul.msk.f32.vlgmr.msrb.gmra.mxu3 %vm226_vm0, %v2532_v2  ;;  %v211_v8 = vld [vmem:[%s2521_s22 + $0x188] sm:$0xff] }
  0x37   : > { %570 = vmatpush.msrb.mxu2 %v176_v14  ;;  %593 = vmatpush.msrb.mxu3 %v177_v15 }
  0x39   : > { %2193 = vmatmul.msk.f32.vlgmr.msrb.gmra.mxu0 %vm226_vm0, %v2532_v2  ;;  %2195 = vmatmul.msk.f32.vlgmr.msrb.gmra.mxu1 %vm226_vm0, %v2532_v2 }
  0x3a   : > { %524 = vmatpush.msrb.mxu0 %v174_v16  ;;  %547 = vmatpush.msrb.mxu1 %v175_v17  ;;  %v216_v16 = vld [vmem:[%s2521_s22 + $0x1b0] sm:$0xff]  ;;  %v217_v17 = vld [vmem:[%s2521_s22 + $0x1b8] sm:$0xff] }
  0x3e   : > { %2198 = vmatmul.msk.f32.gmra.mxu2 %vm226_vm0, %v2555_v13  ;;  %2200 = vmatmul.msk.f32.gmra.mxu3 %vm226_vm0, %v2555_v13 }
  0x41   : > { %2194 = vmatmul.msk.f32.gmra.mxu0 %vm226_vm0, %v2555_v13  ;;  %2196 = vmatmul.msk.f32.gmra.mxu1 %vm226_vm0, %v2555_v13 }
  0x46   : > { %2205 = vmatmul.msk.f32.vlgmr.msra.gmra.mxu2 %vm226_vm0, %v2532_v2  ;;  %2207 = vmatmul.msk.f32.vlgmr.msra.gmra.mxu3 %vm226_vm0, %v2532_v2 }
  0x47   : > { %662 = vmatpush.msra.mxu2 %v180_v18  ;;  %685 = vmatpush.msra.mxu3 %v181_v19 }
  0x49   : > { %2201 = vmatmul.msk.f32.vlgmr.msra.gmra.mxu0 %vm226_vm0, %v2532_v2  ;;  %2203 = vmatmul.msk.f32.vlgmr.msra.gmra.mxu1 %vm226_vm0, %v2532_v2 }
  0x4a   : > { %616 = vmatpush.msra.mxu0 %v178_v20  ;;  %639 = vmatpush.msra.mxu1 %v179_v21  ;;  %v214_v20 = vld [vmem:[%s2521_s22 + $0x1a0] sm:$0xff]  ;;  %v215_v21 = vld [vmem:[%s2521_s22 + $0x1a8] sm:$0xff] }
  0x4e   : > { %2206 = vmatmul.msk.f32.gmra.mxu2 %vm226_vm0, %v2555_v13  ;;  %2208 = vmatmul.msk.f32.gmra.mxu3 %vm226_vm0, %v2555_v13 }
  0x51   : > { %2202 = vmatmul.msk.f32.gmra.mxu0 %vm226_vm0, %v2555_v13  ;;  %2204 = vmatmul.msk.f32.gmra.mxu1 %vm226_vm0, %v2555_v13 }
  0x56   : > { %2213 = vmatmul.msk.f32.vlgmr.msrb.gmra.mxu2 %vm226_vm0, %v2532_v2  ;;  %2215 = vmatmul.msk.f32.vlgmr.msrb.gmra.mxu3 %vm226_vm0, %v2532_v2 }
  0x57   : > { %754 = vmatpush.msrb.mxu2 %v184_v22  ;;  %777 = vmatpush.msrb.mxu3 %v185_v23 }
  0x59   : > { %2209 = vmatmul.msk.f32.vlgmr.msrb.gmra.mxu0 %vm226_vm0, %v2532_v2  ;;  %2211 = vmatmul.msk.f32.vlgmr.msrb.gmra.mxu1 %vm226_vm0, %v2532_v2 }
  0x5a   : > { %708 = vmatpush.msrb.mxu0 %v182_v24  ;;  %731 = vmatpush.msrb.mxu1 %v183_v25 }
  0x5e   : > { %2214 = vmatmul.msk.f32.gmra.mxu2 %vm226_vm0, %v2555_v13  ;;  %2216 = vmatmul.msk.f32.gmra.mxu3 %vm226_vm0, %v2555_v13 }
  0x61   : > { %2210 = vmatmul.msk.f32.gmra.mxu0 %vm226_vm0, %v2555_v13  ;;  %2212 = vmatmul.msk.f32.gmra.mxu1 %vm226_vm0, %v2555_v13 }
  0x66   : > { %2221 = vmatmul.msk.f32.vlgmr.msra.gmra.mxu2 %vm226_vm0, %v2532_v2  ;;  %2223 = vmatmul.msk.f32.vlgmr.msra.gmra.mxu3 %vm226_vm0, %v2532_v2 }
  0x67   : > { %846 = vmatpush.msra.mxu2 %v188_v26  ;;  %869 = vmatpush.msra.mxu3 %v189_v27 }
  0x69   : > { %2217 = vmatmul.msk.f32.vlgmr.msra.gmra.mxu0 %vm226_vm0, %v2532_v2  ;;  %2219 = vmatmul.msk.f32.vlgmr.msra.gmra.mxu1 %vm226_vm0, %v2532_v2 }
  0x6a   : > { %800 = vmatpush.msra.mxu0 %v186_v28  ;;  %823 = vmatpush.msra.mxu1 %v187_v29  ;;  %v220_v28 = vld [vmem:[%s2521_s22 + $0x1d0] sm:$0xff]  ;;  %v221_v29 = vld [vmem:[%s2521_s22 + $0x1d8] sm:$0xff] }
  0x6e   : > { %2222 = vmatmul.msk.f32.gmra.mxu2 %vm226_vm0, %v2555_v13  ;;  %2224 = vmatmul.msk.f32.gmra.mxu3 %vm226_vm0, %v2555_v13 }
  0x71   : > { %2218 = vmatmul.msk.f32.gmra.mxu0 %vm226_vm0, %v2555_v13  ;;  %2220 = vmatmul.msk.f32.gmra.mxu1 %vm226_vm0, %v2555_v13 }
  0x76   : > { %2229 = vmatmul.msk.f32.vlgmr.msrb.gmra.mxu2 %vm226_vm0, %v2532_v2  ;;  %2231 = vmatmul.msk.f32.vlgmr.msrb.gmra.mxu3 %vm226_vm0, %v2532_v2 }
  0x77   : > { %938 = vmatpush.msrb.mxu2 %v192_v30  ;;  %961 = vmatpush.msrb.mxu3 %v193_v31 }
  0x79   : > { %2225 = vmatmul.msk.f32.vlgmr.msrb.gmra.mxu0 %vm226_vm0, %v2532_v2  ;;  %2227 = vmatmul.msk.f32.vlgmr.msrb.gmra.mxu1 %vm226_vm0, %v2532_v2 }
  0x7a   : > { %892 = vmatpush.msrb.mxu0 %v190_v32  ;;  %915 = vmatpush.msrb.mxu1 %v191_v33  ;;  %v218_v32 = vld [vmem:[%s2521_s22 + $0x1c0] sm:$0xff]  ;;  %v219_v33 = vld [vmem:[%s2521_s22 + $0x1c8] sm:$0xff] }
  0x7e   : > { %2230 = vmatmul.msk.f32.gmra.mxu2 %vm226_vm0, %v2555_v13  ;;  %2232 = vmatmul.msk.f32.gmra.mxu3 %vm226_vm0, %v2555_v13 }
  0x81   : > { %2226 = vmatmul.msk.f32.gmra.mxu0 %vm226_vm0, %v2555_v13  ;;  %2228 = vmatmul.msk.f32.gmra.mxu1 %vm226_vm0, %v2555_v13 }
  0x86   : > { %2237 = vmatmul.msk.f32.vlgmr.msra.gmra.mxu2 %vm226_vm0, %v2532_v2  ;;  %2239 = vmatmul.msk.f32.vlgmr.msra.gmra.mxu3 %vm226_vm0, %v2532_v2 }
  0x87   : > { %1030 = vmatpush.msra.mxu2 %v196_v34  ;;  %1053 = vmatpush.msra.mxu3 %v197_v35 }
  0x89   : > { %2233 = vmatmul.msk.f32.vlgmr.msra.gmra.mxu0 %vm226_vm0, %v2532_v2  ;;  %2235 = vmatmul.msk.f32.vlgmr.msra.gmra.mxu1 %vm226_vm0, %v2532_v2 }
  0x8a   : > { %984 = vmatpush.msra.mxu0 %v194_v36  ;;  %1007 = vmatpush.msra.mxu1 %v195_v37 }
  0x8e   : > { %2238 = vmatmul.msk.f32.gmra.mxu2 %vm226_vm0, %v2555_v13  ;;  %2240 = vmatmul.msk.f32.gmra.mxu3 %vm226_vm0, %v2555_v13 }
  0x91   : > { %2234 = vmatmul.msk.f32.gmra.mxu0 %vm226_vm0, %v2555_v13  ;;  %2236 = vmatmul.msk.f32.gmra.mxu1 %vm226_vm0, %v2555_v13 }
  0x96   : > { %2245 = vmatmul.msk.f32.vlgmr.msrb.gmra.mxu2 %vm226_vm0, %v2532_v2  ;;  %2247 = vmatmul.msk.f32.vlgmr.msrb.gmra.mxu3 %vm226_vm0, %v2532_v2 }
  0x97   : > { %1122 = vmatpush.msrb.mxu2 %v200_v38  ;;  %1145 = vmatpush.msrb.mxu3 %v201_v39 }
  0x99   : > { %2241 = vmatmul.msk.f32.vlgmr.msrb.gmra.mxu0 %vm226_vm0, %v2532_v2  ;;  %2243 = vmatmul.msk.f32.vlgmr.msrb.gmra.mxu1 %vm226_vm0, %v2532_v2 }
  0x9a   : > { %1076 = vmatpush.msrb.mxu0 %v198_v40  ;;  %1099 = vmatpush.msrb.mxu1 %v199_v41  ;;  %v224_v40 = vld [vmem:[%s2521_s22 + $0x1f0] sm:$0xff]  ;;  %v225_v41 = vld [vmem:[%s2521_s22 + $0x1f8] sm:$0xff] }
  0x9e   : > { %2246 = vmatmul.msk.f32.gmra.mxu2 %vm226_vm0, %v2555_v13  ;;  %2248 = vmatmul.msk.f32.gmra.mxu3 %vm226_vm0, %v2555_v13 }
  0xa1   : > { %2242 = vmatmul.msk.f32.gmra.mxu0 %vm226_vm0, %v2555_v13  ;;  %2244 = vmatmul.msk.f32.gmra.mxu1 %vm226_vm0, %v2555_v13 }
  0xa6   : > { %2253 = vmatmul.msk.f32.vlgmr.msra.gmra.mxu2 %vm226_vm0, %v2532_v2  ;;  %2255 = vmatmul.msk.f32.vlgmr.msra.gmra.mxu3 %vm226_vm0, %v2532_v2  ;;  %v250_v44 = vpop.f32.mrf.mxu0  ;;  %v273_v45 = vpop.f32.mrf.mxu1 }
  0xa7   : > { %1705 = vst [vmem:[%s2712_s26] sm:$0xff] %v250_v44  ;;  %1214 = vmatpush.msra.mxu2 %v204_v42  ;;  %1237 = vmatpush.msra.mxu3 %v205_v43  ;;  %v222_v44 = vld [vmem:[%s2521_s22 + $0x1e0] sm:$0xff] }
  0xa8   : > { %1706 = vst [vmem:[%s2712_s26 + $0x8] sm:$0xff] %v273_v45  ;;  %v223_v45 = vld [vmem:[%s2521_s22 + $0x1e8] sm:$0xff] }
  0xa9   : > { %v296_v48 = vpop.f32.mrf.mxu2  ;;  %v319_v49 = vpop.f32.mrf.mxu3  ;;  %2249 = vmatmul.msk.f32.vlgmr.msra.gmra.mxu0 %vm226_vm0, %v2532_v2  ;;  %2251 = vmatmul.msk.f32.vlgmr.msra.gmra.mxu1 %vm226_vm0, %v2532_v2 }
  0xaa   : > { %1707 = vst [vmem:[%s2712_s26 + $0x10] sm:$0xff] %v296_v48  ;;  %1168 = vmatpush.msra.mxu0 %v202_v46  ;;  %1191 = vmatpush.msra.mxu1 %v203_v47 }
  0xab   : > { %1708 = vst [vmem:[%s2712_s26 + $0x18] sm:$0xff] %v319_v49 }
  0xae   : > { %2254 = vmatmul.msk.f32.gmra.mxu2 %vm226_vm0, %v2555_v13  ;;  %2256 = vmatmul.msk.f32.gmra.mxu3 %vm226_vm0, %v2555_v13  ;;  %v253_v50 = vpop.f32.mrf.mxu0  ;;  %v276_v51 = vpop.f32.mrf.mxu1 }
  0xaf   : > { %1769 = vst [vmem:[%s2712_s26 + $0x200] sm:$0xf] %v253_v50 }
  0xb0   : > { %1770 = vst [vmem:[%s2712_s26 + $0x208] sm:$0xf] %v276_v51 }
  0xb1   : > { %v299_v52 = vpop.f32.mrf.mxu2  ;;  %v322_v53 = vpop.f32.mrf.mxu3  ;;  %2250 = vmatmul.msk.f32.gmra.mxu0 %vm226_vm0, %v2555_v13  ;;  %2252 = vmatmul.msk.f32.gmra.mxu1 %vm226_vm0, %v2555_v13 }
  0xb2   : > { %1771 = vst [vmem:[%s2712_s26 + $0x210] sm:$0xf] %v299_v52 }
  0xb3   : > { %1772 = vst [vmem:[%s2712_s26 + $0x218] sm:$0xf] %v322_v53 }
  0xb6   : > { %2261 = vmatmul.msk.f32.vlgmr.msrb.gmra.mxu2 %vm226_vm0, %v2532_v2  ;;  %2263 = vmatmul.msk.f32.vlgmr.msrb.gmra.mxu3 %vm226_vm0, %v2532_v2  ;;  %v342_v56 = vpop.f32.mrf.mxu0  ;;  %v365_v57 = vpop.f32.mrf.mxu1 }
  0xb7   : > { %1709 = vst [vmem:[%s2712_s26 + $0x20] sm:$0xff] %v342_v56  ;;  %1306 = vmatpush.msrb.mxu2 %v208_v54  ;;  %1329 = vmatpush.msrb.mxu3 %v209_v55 }
  0xb8   : > { %1710 = vst [vmem:[%s2712_s26 + $0x28] sm:$0xff] %v365_v57 }
  0xb9   : > { %v388_v60 = vpop.f32.mrf.mxu2  ;;  %v411_v61 = vpop.f32.mrf.mxu3  ;;  %2257 = vmatmul.msk.f32.vlgmr.msrb.gmra.mxu0 %vm226_vm0, %v2532_v2  ;;  %2259 = vmatmul.msk.f32.vlgmr.msrb.gmra.mxu1 %vm226_vm0, %v2532_v2 }
  0xba   : > { %1711 = vst [vmem:[%s2712_s26 + $0x30] sm:$0xff] %v388_v60  ;;  %1260 = vmatpush.msrb.mxu0 %v206_v58  ;;  %1283 = vmatpush.msrb.mxu1 %v207_v59 }
  0xbb   : > { %1712 = vst [vmem:[%s2712_s26 + $0x38] sm:$0xff] %v411_v61 }
  0xbe   : > { %2262 = vmatmul.msk.f32.gmra.mxu2 %vm226_vm0, %v2555_v13  ;;  %2264 = vmatmul.msk.f32.gmra.mxu3 %vm226_vm0, %v2555_v13  ;;  %v345_v62 = vpop.f32.mrf.mxu0  ;;  %v368_v63 = vpop.f32.mrf.mxu1 }
  0xbf   : > { %1773 = vst [vmem:[%s2712_s26 + $0x220] sm:$0xf] %v345_v62 }
  0xc0   : > { %1774 = vst [vmem:[%s2712_s26 + $0x228] sm:$0xf] %v368_v63 }
  0xc1   : > { %v391_v0 = vpop.f32.mrf.mxu2  ;;  %v414_v1 = vpop.f32.mrf.mxu3  ;;  %2258 = vmatmul.msk.f32.gmra.mxu0 %vm226_vm0, %v2555_v13  ;;  %2260 = vmatmul.msk.f32.gmra.mxu1 %vm226_vm0, %v2555_v13 }
  0xc2   : > { %1775 = vst [vmem:[%s2712_s26 + $0x230] sm:$0xf] %v391_v0 }
  0xc3   : > { %1776 = vst [vmem:[%s2712_s26 + $0x238] sm:$0xf] %v414_v1 }
  0xc6   : > { %2269 = vmatmul.msk.f32.vlgmr.msra.gmra.mxu2 %vm226_vm0, %v2532_v2  ;;  %2271 = vmatmul.msk.f32.vlgmr.msra.gmra.mxu3 %vm226_vm0, %v2532_v2  ;;  %v434_v5 = vpop.f32.mrf.mxu0  ;;  %v457_v6 = vpop.f32.mrf.mxu1 }
  0xc7   : > { %1713 = vst [vmem:[%s2712_s26 + $0x40] sm:$0xff] %v434_v5  ;;  %1398 = vmatpush.msra.mxu2 %v212_v3  ;;  %1421 = vmatpush.msra.mxu3 %v213_v4 }
  0xc8   : > { %1714 = vst [vmem:[%s2712_s26 + $0x48] sm:$0xff] %v457_v6 }
  0xc9   : > { %v480_v9 = vpop.f32.mrf.mxu2  ;;  %v503_v10 = vpop.f32.mrf.mxu3  ;;  %2265 = vmatmul.msk.f32.vlgmr.msra.gmra.mxu0 %vm226_vm0, %v2532_v2  ;;  %2267 = vmatmul.msk.f32.vlgmr.msra.gmra.mxu1 %vm226_vm0, %v2532_v2 }
  0xca   : > { %1715 = vst [vmem:[%s2712_s26 + $0x50] sm:$0xff] %v480_v9  ;;  %1352 = vmatpush.msra.mxu0 %v210_v7  ;;  %1375 = vmatpush.msra.mxu1 %v211_v8 }
  0xcb   : > { %1716 = vst [vmem:[%s2712_s26 + $0x58] sm:$0xff] %v503_v10 }
  0xce   : > { %2270 = vmatmul.msk.f32.gmra.mxu2 %vm226_vm0, %v2555_v13  ;;  %2272 = vmatmul.msk.f32.gmra.mxu3 %vm226_vm0, %v2555_v13  ;;  %v437_v11 = vpop.f32.mrf.mxu0  ;;  %v460_v12 = vpop.f32.mrf.mxu1 }
  0xcf   : > { %1777 = vst [vmem:[%s2712_s26 + $0x240] sm:$0xf] %v437_v11 }
  0xd0   : > { %1778 = vst [vmem:[%s2712_s26 + $0x248] sm:$0xf] %v460_v12 }
  0xd1   : > { %v483_v14 = vpop.f32.mrf.mxu2  ;;  %v506_v15 = vpop.f32.mrf.mxu3  ;;  %2266 = vmatmul.msk.f32.gmra.mxu0 %vm226_vm0, %v2555_v13  ;;  %2268 = vmatmul.msk.f32.gmra.mxu1 %vm226_vm0, %v2555_v13 }
  0xd2   : > { %1779 = vst [vmem:[%s2712_s26 + $0x250] sm:$0xf] %v483_v14 }
  0xd3   : > { %1780 = vst [vmem:[%s2712_s26 + $0x258] sm:$0xf] %v506_v15 }
  0xd6   : > { %2277 = vmatmul.msk.f32.vlgmr.msrb.gmra.mxu2 %vm226_vm0, %v2532_v2  ;;  %2279 = vmatmul.msk.f32.vlgmr.msrb.gmra.mxu3 %vm226_vm0, %v2532_v2  ;;  %v526_v18 = vpop.f32.mrf.mxu0  ;;  %v549_v19 = vpop.f32.mrf.mxu1 }
  0xd7   : > { %1717 = vst [vmem:[%s2712_s26 + $0x60] sm:$0xff] %v526_v18  ;;  %1490 = vmatpush.msrb.mxu2 %v216_v16  ;;  %1513 = vmatpush.msrb.mxu3 %v217_v17 }
  0xd8   : > { %1718 = vst [vmem:[%s2712_s26 + $0x68] sm:$0xff] %v549_v19 }
  0xd9   : > { %v572_v22 = vpop.f32.mrf.mxu2  ;;  %v595_v23 = vpop.f32.mrf.mxu3  ;;  %2273 = vmatmul.msk.f32.vlgmr.msrb.gmra.mxu0 %vm226_vm0, %v2532_v2  ;;  %2275 = vmatmul.msk.f32.vlgmr.msrb.gmra.mxu1 %vm226_vm0, %v2532_v2 }
  0xda   : > { %1719 = vst [vmem:[%s2712_s26 + $0x70] sm:$0xff] %v572_v22  ;;  %1444 = vmatpush.msrb.mxu0 %v214_v20  ;;  %1467 = vmatpush.msrb.mxu1 %v215_v21 }
  0xdb   : > { %1720 = vst [vmem:[%s2712_s26 + $0x78] sm:$0xff] %v595_v23 }
  0xde   : > { %2278 = vmatmul.msk.f32.gmra.mxu2 %vm226_vm0, %v2555_v13  ;;  %2280 = vmatmul.msk.f32.gmra.mxu3 %vm226_vm0, %v2555_v13  ;;  %v529_v24 = vpop.f32.mrf.mxu0  ;;  %v552_v25 = vpop.f32.mrf.mxu1 }
  0xdf   : > { %1781 = vst [vmem:[%s2712_s26 + $0x260] sm:$0xf] %v529_v24 }
  0xe0   : > { %1782 = vst [vmem:[%s2712_s26 + $0x268] sm:$0xf] %v552_v25 }
  0xe1   : > { %v575_v26 = vpop.f32.mrf.mxu2  ;;  %v598_v27 = vpop.f32.mrf.mxu3  ;;  %2274 = vmatmul.msk.f32.gmra.mxu0 %vm226_vm0, %v2555_v13  ;;  %2276 = vmatmul.msk.f32.gmra.mxu1 %vm226_vm0, %v2555_v13 }
  0xe2   : > { %1783 = vst [vmem:[%s2712_s26 + $0x270] sm:$0xf] %v575_v26 }
  0xe3   : > { %1784 = vst [vmem:[%s2712_s26 + $0x278] sm:$0xf] %v598_v27 }
  0xe6   : > { %2285 = vmatmul.msk.f32.vlgmr.msra.gmra.mxu2 %vm226_vm0, %v2532_v2  ;;  %2287 = vmatmul.msk.f32.vlgmr.msra.gmra.mxu3 %vm226_vm0, %v2532_v2  ;;  %v618_v30 = vpop.f32.mrf.mxu0  ;;  %v641_v31 = vpop.f32.mrf.mxu1 }
  0xe7   : > { %1721 = vst [vmem:[%s2712_s26 + $0x80] sm:$0xff] %v618_v30  ;;  %1582 = vmatpush.msra.mxu2 %v220_v28  ;;  %1605 = vmatpush.msra.mxu3 %v221_v29 }
  0xe8   : > { %1722 = vst [vmem:[%s2712_s26 + $0x88] sm:$0xff] %v641_v31 }
  0xe9   : > { %v664_v34 = vpop.f32.mrf.mxu2  ;;  %v687_v35 = vpop.f32.mrf.mxu3  ;;  %2281 = vmatmul.msk.f32.vlgmr.msra.gmra.mxu0 %vm226_vm0, %v2532_v2  ;;  %2283 = vmatmul.msk.f32.vlgmr.msra.gmra.mxu1 %vm226_vm0, %v2532_v2 }
  0xea   : > { %1723 = vst [vmem:[%s2712_s26 + $0x90] sm:$0xff] %v664_v34  ;;  %1536 = vmatpush.msra.mxu0 %v218_v32  ;;  %1559 = vmatpush.msra.mxu1 %v219_v33 }
  0xeb   : > { %1724 = vst [vmem:[%s2712_s26 + $0x98] sm:$0xff] %v687_v35 }
  0xee   : > { %2286 = vmatmul.msk.f32.gmra.mxu2 %vm226_vm0, %v2555_v13  ;;  %2288 = vmatmul.msk.f32.gmra.mxu3 %vm226_vm0, %v2555_v13  ;;  %v621_v36 = vpop.f32.mrf.mxu0  ;;  %v644_v37 = vpop.f32.mrf.mxu1 }
  0xef   : > { %1785 = vst [vmem:[%s2712_s26 + $0x280] sm:$0xf] %v621_v36 }
  0xf0   : > { %1786 = vst [vmem:[%s2712_s26 + $0x288] sm:$0xf] %v644_v37 }
  0xf1   : > { %v667_v38 = vpop.f32.mrf.mxu2  ;;  %v690_v39 = vpop.f32.mrf.mxu3  ;;  %2282 = vmatmul.msk.f32.gmra.mxu0 %vm226_vm0, %v2555_v13  ;;  %2284 = vmatmul.msk.f32.gmra.mxu1 %vm226_vm0, %v2555_v13 }
  0xf2   : > { %1787 = vst [vmem:[%s2712_s26 + $0x290] sm:$0xf] %v667_v38 }
  0xf3   : > { %1788 = vst [vmem:[%s2712_s26 + $0x298] sm:$0xf] %v690_v39 }
  0xf6   : > { %2293 = vmatmul.msk.f32.vlgmr.msrb.gmra.mxu2 %vm226_vm0, %v2532_v2  ;;  %2295 = vmatmul.msk.f32.vlgmr.msrb.gmra.mxu3 %vm226_vm0, %v2532_v2  ;;  %v710_v42 = vpop.f32.mrf.mxu0  ;;  %v733_v43 = vpop.f32.mrf.mxu1 }
  0xf7   : > { %1725 = vst [vmem:[%s2712_s26 + $0xa0] sm:$0xff] %v710_v42  ;;  %1674 = vmatpush.msrb.mxu2 %v224_v40  ;;  %1697 = vmatpush.msrb.mxu3 %v225_v41 }
  0xf8   : > { %1726 = vst [vmem:[%s2712_s26 + $0xa8] sm:$0xff] %v733_v43 }
  0xf9   : > { %v756_v46 = vpop.f32.mrf.mxu2  ;;  %v779_v47 = vpop.f32.mrf.mxu3  ;;  %2289 = vmatmul.msk.f32.vlgmr.msrb.gmra.mxu0 %vm226_vm0, %v2532_v2  ;;  %2291 = vmatmul.msk.f32.vlgmr.msrb.gmra.mxu1 %vm226_vm0, %v2532_v2 }
  0xfa   : > { %1727 = vst [vmem:[%s2712_s26 + $0xb0] sm:$0xff] %v756_v46  ;;  %1628 = vmatpush.msrb.mxu0 %v222_v44  ;;  %1651 = vmatpush.msrb.mxu1 %v223_v45 }
  0xfb   : > { %1728 = vst [vmem:[%s2712_s26 + $0xb8] sm:$0xff] %v779_v47 }
  0xfe   : > { %2294 = vmatmul.msk.f32.gmra.mxu2 %vm226_vm0, %v2555_v13  ;;  %2296 = vmatmul.msk.f32.gmra.mxu3 %vm226_vm0, %v2555_v13  ;;  %v713_v48 = vpop.f32.mrf.mxu0  ;;  %v736_v49 = vpop.f32.mrf.mxu1 }
  0xff   : > { %1789 = vst [vmem:[%s2712_s26 + $0x2a0] sm:$0xf] %v713_v48 }
 0x100   : > { %1790 = vst [vmem:[%s2712_s26 + $0x2a8] sm:$0xf] %v736_v49 }
 0x101   : > { %v759_v50 = vpop.f32.mrf.mxu2  ;;  %v782_v51 = vpop.f32.mrf.mxu3  ;;  %2290 = vmatmul.msk.f32.gmra.mxu0 %vm226_vm0, %v2555_v13  ;;  %2292 = vmatmul.msk.f32.gmra.mxu1 %vm226_vm0, %v2555_v13 }
 0x102   : > { %1791 = vst [vmem:[%s2712_s26 + $0x2b0] sm:$0xf] %v759_v50 }
 0x103   : > { %1792 = vst [vmem:[%s2712_s26 + $0x2b8] sm:$0xf] %v782_v51 }
 0x106   : > { %2301 = vmatmul.msk.f32.vlgmr.msra.gmra.mxu2 %vm226_vm0, %v2532_v2  ;;  %2303 = vmatmul.msk.f32.vlgmr.msra.gmra.mxu3 %vm226_vm0, %v2532_v2  ;;  %v802_v52 = vpop.f32.mrf.mxu0  ;;  %v825_v53 = vpop.f32.mrf.mxu1 }
 0x107   : > { %1729 = vst [vmem:[%s2712_s26 + $0xc0] sm:$0xff] %v802_v52 }
 0x108   : > { %1730 = vst [vmem:[%s2712_s26 + $0xc8] sm:$0xff] %v825_v53 }
 0x109   : > { %v848_v54 = vpop.f32.mrf.mxu2  ;;  %v871_v55 = vpop.f32.mrf.mxu3  ;;  %2297 = vmatmul.msk.f32.vlgmr.msra.gmra.mxu0 %vm226_vm0, %v2532_v2  ;;  %2299 = vmatmul.msk.f32.vlgmr.msra.gmra.mxu1 %vm226_vm0, %v2532_v2 }
 0x10a   : > { %1731 = vst [vmem:[%s2712_s26 + $0xd0] sm:$0xff] %v848_v54 }
 0x10b   : > { %1732 = vst [vmem:[%s2712_s26 + $0xd8] sm:$0xff] %v871_v55 }
 0x10e   : > { %2302 = vmatmul.msk.f32.gmra.mxu2 %vm226_vm0, %v2555_v13  ;;  %2304 = vmatmul.msk.f32.gmra.mxu3 %vm226_vm0, %v2555_v13  ;;  %v805_v56 = vpop.f32.mrf.mxu0  ;;  %v828_v57 = vpop.f32.mrf.mxu1 }
 0x10f   : > { %1793 = vst [vmem:[%s2712_s26 + $0x2c0] sm:$0xf] %v805_v56 }
 0x110   : > { %1794 = vst [vmem:[%s2712_s26 + $0x2c8] sm:$0xf] %v828_v57 }
 0x111   : > { %v851_v58 = vpop.f32.mrf.mxu2  ;;  %v874_v59 = vpop.f32.mrf.mxu3  ;;  %2298 = vmatmul.msk.f32.gmra.mxu0 %vm226_vm0, %v2555_v13  ;;  %2300 = vmatmul.msk.f32.gmra.mxu1 %vm226_vm0, %v2555_v13 }
 0x112   : > { %1795 = vst [vmem:[%s2712_s26 + $0x2d0] sm:$0xf] %v851_v58 }
 0x113   : > { %1796 = vst [vmem:[%s2712_s26 + $0x2d8] sm:$0xf] %v874_v59 }
 0x116   : > { %2309 = vmatmul.msk.f32.vlgmr.msrb.gmra.mxu2 %vm226_vm0, %v2532_v2  ;;  %2311 = vmatmul.msk.f32.vlgmr.msrb.gmra.mxu3 %vm226_vm0, %v2532_v2  ;;  %v894_v60 = vpop.f32.mrf.mxu0  ;;  %v917_v61 = vpop.f32.mrf.mxu1 }
 0x117   : > { %1733 = vst [vmem:[%s2712_s26 + $0xe0] sm:$0xff] %v894_v60 }
 0x118   : > { %1734 = vst [vmem:[%s2712_s26 + $0xe8] sm:$0xff] %v917_v61 }
 0x119   : > { %v940_v62 = vpop.f32.mrf.mxu2  ;;  %v963_v63 = vpop.f32.mrf.mxu3  ;;  %2305 = vmatmul.msk.f32.vlgmr.msrb.gmra.mxu0 %vm226_vm0, %v2532_v2  ;;  %2307 = vmatmul.msk.f32.vlgmr.msrb.gmra.mxu1 %vm226_vm0, %v2532_v2 }
 0x11a   : > { %1735 = vst [vmem:[%s2712_s26 + $0xf0] sm:$0xff] %v940_v62 }
 0x11b   : > { %1736 = vst [vmem:[%s2712_s26 + $0xf8] sm:$0xff] %v963_v63 }
 0x11e   : > { %2310 = vmatmul.msk.f32.gmra.mxu2 %vm226_vm0, %v2555_v13  ;;  %2312 = vmatmul.msk.f32.gmra.mxu3 %vm226_vm0, %v2555_v13  ;;  %v897_v0 = vpop.f32.mrf.mxu0  ;;  %v920_v1 = vpop.f32.mrf.mxu1 }
 0x11f   : > { %1797 = vst [vmem:[%s2712_s26 + $0x2e0] sm:$0xf] %v897_v0 }
 0x120   : > { %1798 = vst [vmem:[%s2712_s26 + $0x2e8] sm:$0xf] %v920_v1 }
 0x121   : > { %v943_v3 = vpop.f32.mrf.mxu2  ;;  %v966_v4 = vpop.f32.mrf.mxu3  ;;  %2306 = vmatmul.msk.f32.gmra.mxu0 %vm226_vm0, %v2555_v13  ;;  %2308 = vmatmul.msk.f32.gmra.mxu1 %vm226_vm0, %v2555_v13 }
 0x122   : > { %1799 = vst [vmem:[%s2712_s26 + $0x2f0] sm:$0xf] %v943_v3 }
 0x123   : > { %1800 = vst [vmem:[%s2712_s26 + $0x2f8] sm:$0xf] %v966_v4 }
 0x126   : > { %v986_v2 = vpop.f32.mrf.mxu0  ;;  %v1009_v5 = vpop.f32.mrf.mxu1 }
 0x127   : > { %1737 = vst [vmem:[%s2712_s26 + $0x100] sm:$0xff] %v986_v2  ;;  %v1855_v2 = vld [vmem:[%s2712_s26] sm:$0xff] (%p2485_p9) }
 0x128   : > { %1738 = vst [vmem:[%s2712_s26 + $0x108] sm:$0xff] %v1009_v5  ;;  %v1857_v5 = vld [vmem:[%s2712_s26 + $0x8] sm:$0xff] (%p2485_p9) }
 0x129   : > { %v1032_v6 = vpop.f32.mrf.mxu2  ;;  %v1055_v7 = vpop.f32.mrf.mxu3  ;;  %1856 = vst [vmem:[%s2996_s30] sm:$0xff] (%p2485_p9), %v1855_v2  ;;  %v1983_v2 = vld [vmem:[%s2712_s26 + $0x200] sm:$0xff] (%p2485_p9) }
 0x12a   : > { %1739 = vst [vmem:[%s2712_s26 + $0x110] sm:$0xff] %v1032_v6  ;;  %v1859_v6 = vld [vmem:[%s2712_s26 + $0x10] sm:$0xff] (%p2485_p9) }
 0x12b   : > { %1740 = vst [vmem:[%s2712_s26 + $0x118] sm:$0xff] %v1055_v7  ;;  %v1861_v7 = vld [vmem:[%s2712_s26 + $0x18] sm:$0xff] (%p2485_p9) }
 0x12c   : > { %1858 = vst [vmem:[%s2996_s30 + $0x8] sm:$0xff] (%p2485_p9), %v1857_v5  ;;  %v1985_v5 = vld [vmem:[%s2712_s26 + $0x208] sm:$0xff] (%p2485_p9) }
 0x12d   : > { %1860 = vst [vmem:[%s2996_s30 + $0x10] sm:$0xff] (%p2485_p9), %v1859_v6  ;;  %v1987_v6 = vld [vmem:[%s2712_s26 + $0x210] sm:$0xff] (%p2485_p9) }
 0x12e   : > { %v989_v8 = vpop.f32.mrf.mxu0  ;;  %v1012_v9 = vpop.f32.mrf.mxu1  ;;  %1862 = vst [vmem:[%s2996_s30 + $0x18] sm:$0xff] (%p2485_p9), %v1861_v7  ;;  %v1989_v7 = vld [vmem:[%s2712_s26 + $0x218] sm:$0xff] (%p2485_p9) }
 0x12f   : > { %1801 = vst [vmem:[%s2712_s26 + $0x300] sm:$0xf] %v989_v8  ;;  %v1863_v8 = vld [vmem:[%s2712_s26 + $0x20] sm:$0xff] (%p2485_p9) }
 0x130   : > { %1802 = vst [vmem:[%s2712_s26 + $0x308] sm:$0xf] %v1012_v9  ;;  %v1865_v9 = vld [vmem:[%s2712_s26 + $0x28] sm:$0xff] (%p2485_p9) }
 0x131   : > { %v1035_v13 = vpop.f32.mrf.mxu2  ;;  %v1058_v10 = vpop.f32.mrf.mxu3  ;;  %1864 = vst [vmem:[%s2996_s30 + $0x20] sm:$0xff] (%p2485_p9), %v1863_v8  ;;  %v1991_v8 = vld [vmem:[%s2712_s26 + $0x220] sm:$0xff] (%p2485_p9) }
 0x132   : > { %1803 = vst [vmem:[%s2712_s26 + $0x310] sm:$0xf] %v1035_v13  ;;  %v1867_v13 = vld [vmem:[%s2712_s26 + $0x30] sm:$0xff] (%p2485_p9) }
 0x133   : > { %1804 = vst [vmem:[%s2712_s26 + $0x318] sm:$0xf] %v1058_v10  ;;  %v1869_v10 = vld [vmem:[%s2712_s26 + $0x38] sm:$0xff] (%p2485_p9) }
 0x134   : > { %1866 = vst [vmem:[%s2996_s30 + $0x28] sm:$0xff] (%p2485_p9), %v1865_v9  ;;  %v1993_v9 = vld [vmem:[%s2712_s26 + $0x228] sm:$0xff] (%p2485_p9) }
 0x135   : > { %1868 = vst [vmem:[%s2996_s30 + $0x30] sm:$0xff] (%p2485_p9), %v1867_v13  ;;  %v1995_v13 = vld [vmem:[%s2712_s26 + $0x230] sm:$0xff] (%p2485_p9) }
 0x136   : > { %v1078_v11 = vpop.f32.mrf.mxu0  ;;  %v1101_v12 = vpop.f32.mrf.mxu1  ;;  %1870 = vst [vmem:[%s2996_s30 + $0x38] sm:$0xff] (%p2485_p9), %v1869_v10  ;;  %v1997_v10 = vld [vmem:[%s2712_s26 + $0x238] sm:$0xff] (%p2485_p9) }
 0x137   : > { %1741 = vst [vmem:[%s2712_s26 + $0x120] sm:$0xff] %v1078_v11  ;;  %v1871_v11 = vld [vmem:[%s2712_s26 + $0x40] sm:$0xff] (%p2485_p9) }
 0x138   : > { %1742 = vst [vmem:[%s2712_s26 + $0x128] sm:$0xff] %v1101_v12  ;;  %v1873_v12 = vld [vmem:[%s2712_s26 + $0x48] sm:$0xff] (%p2485_p9) }
 0x139   : > { %v1124_v14 = vpop.f32.mrf.mxu2  ;;  %v1147_v15 = vpop.f32.mrf.mxu3  ;;  %1872 = vst [vmem:[%s2996_s30 + $0x40] sm:$0xff] (%p2485_p9), %v1871_v11  ;;  %v1999_v11 = vld [vmem:[%s2712_s26 + $0x240] sm:$0xff] (%p2485_p9) }
 0x13a   : > { %1743 = vst [vmem:[%s2712_s26 + $0x130] sm:$0xff] %v1124_v14  ;;  %v1875_v14 = vld [vmem:[%s2712_s26 + $0x50] sm:$0xff] (%p2485_p9) }
 0x13b   : > { %1744 = vst [vmem:[%s2712_s26 + $0x138] sm:$0xff] %v1147_v15  ;;  %v1877_v15 = vld [vmem:[%s2712_s26 + $0x58] sm:$0xff] (%p2485_p9) }
 0x13c   : > { %1874 = vst [vmem:[%s2996_s30 + $0x48] sm:$0xff] (%p2485_p9), %v1873_v12  ;;  %v2001_v12 = vld [vmem:[%s2712_s26 + $0x248] sm:$0xff] (%p2485_p9) }
 0x13d   : > { %1876 = vst [vmem:[%s2996_s30 + $0x50] sm:$0xff] (%p2485_p9), %v1875_v14  ;;  %v2003_v14 = vld [vmem:[%s2712_s26 + $0x250] sm:$0xff] (%p2485_p9) }
 0x13e   : > { %v1081_v16 = vpop.f32.mrf.mxu0  ;;  %v1104_v17 = vpop.f32.mrf.mxu1  ;;  %1878 = vst [vmem:[%s2996_s30 + $0x58] sm:$0xff] (%p2485_p9), %v1877_v15  ;;  %v2005_v15 = vld [vmem:[%s2712_s26 + $0x258] sm:$0xff] (%p2485_p9) }
 0x13f   : > { %1805 = vst [vmem:[%s2712_s26 + $0x320] sm:$0xf] %v1081_v16  ;;  %v1879_v16 = vld [vmem:[%s2712_s26 + $0x60] sm:$0xff] (%p2485_p9) }
 0x140   : > { %1806 = vst [vmem:[%s2712_s26 + $0x328] sm:$0xf] %v1104_v17  ;;  %v1881_v17 = vld [vmem:[%s2712_s26 + $0x68] sm:$0xff] (%p2485_p9) }
 0x141   : > { %v1127_v18 = vpop.f32.mrf.mxu2  ;;  %v1150_v19 = vpop.f32.mrf.mxu3  ;;  %1880 = vst [vmem:[%s2996_s30 + $0x60] sm:$0xff] (%p2485_p9), %v1879_v16  ;;  %v2007_v16 = vld [vmem:[%s2712_s26 + $0x260] sm:$0xff] (%p2485_p9) }
 0x142   : > { %1807 = vst [vmem:[%s2712_s26 + $0x330] sm:$0xf] %v1127_v18  ;;  %v1883_v18 = vld [vmem:[%s2712_s26 + $0x70] sm:$0xff] (%p2485_p9) }
 0x143   : > { %1808 = vst [vmem:[%s2712_s26 + $0x338] sm:$0xf] %v1150_v19  ;;  %v1885_v19 = vld [vmem:[%s2712_s26 + $0x78] sm:$0xff] (%p2485_p9) }
 0x144   : > { %1882 = vst [vmem:[%s2996_s30 + $0x68] sm:$0xff] (%p2485_p9), %v1881_v17  ;;  %v2009_v17 = vld [vmem:[%s2712_s26 + $0x268] sm:$0xff] (%p2485_p9) }
 0x145   : > { %1884 = vst [vmem:[%s2996_s30 + $0x70] sm:$0xff] (%p2485_p9), %v1883_v18  ;;  %v2011_v18 = vld [vmem:[%s2712_s26 + $0x270] sm:$0xff] (%p2485_p9) }
 0x146   : > { %v1170_v20 = vpop.f32.mrf.mxu0  ;;  %v1193_v21 = vpop.f32.mrf.mxu1  ;;  %1886 = vst [vmem:[%s2996_s30 + $0x78] sm:$0xff] (%p2485_p9), %v1885_v19  ;;  %v2013_v19 = vld [vmem:[%s2712_s26 + $0x278] sm:$0xff] (%p2485_p9) }
 0x147   : > { %1745 = vst [vmem:[%s2712_s26 + $0x140] sm:$0xff] %v1170_v20  ;;  %v1887_v20 = vld [vmem:[%s2712_s26 + $0x80] sm:$0xff] (%p2485_p9) }
 0x148   : > { %1746 = vst [vmem:[%s2712_s26 + $0x148] sm:$0xff] %v1193_v21  ;;  %v1889_v21 = vld [vmem:[%s2712_s26 + $0x88] sm:$0xff] (%p2485_p9) }
 0x149   : > { %v1216_v22 = vpop.f32.mrf.mxu2  ;;  %v1239_v23 = vpop.f32.mrf.mxu3  ;;  %1888 = vst [vmem:[%s2996_s30 + $0x80] sm:$0xff] (%p2485_p9), %v1887_v20  ;;  %v2015_v20 = vld [vmem:[%s2712_s26 + $0x280] sm:$0xff] (%p2485_p9) }
 0x14a   : > { %1747 = vst [vmem:[%s2712_s26 + $0x150] sm:$0xff] %v1216_v22  ;;  %v1891_v22 = vld [vmem:[%s2712_s26 + $0x90] sm:$0xff] (%p2485_p9) }
 0x14b   : > { %1748 = vst [vmem:[%s2712_s26 + $0x158] sm:$0xff] %v1239_v23  ;;  %v1893_v23 = vld [vmem:[%s2712_s26 + $0x98] sm:$0xff] (%p2485_p9) }
 0x14c   : > { %1890 = vst [vmem:[%s2996_s30 + $0x88] sm:$0xff] (%p2485_p9), %v1889_v21  ;;  %v2017_v21 = vld [vmem:[%s2712_s26 + $0x288] sm:$0xff] (%p2485_p9) }
 0x14d   : > { %1892 = vst [vmem:[%s2996_s30 + $0x90] sm:$0xff] (%p2485_p9), %v1891_v22  ;;  %v2019_v22 = vld [vmem:[%s2712_s26 + $0x290] sm:$0xff] (%p2485_p9) }
 0x14e   : > { %v1173_v24 = vpop.f32.mrf.mxu0  ;;  %v1196_v25 = vpop.f32.mrf.mxu1  ;;  %1894 = vst [vmem:[%s2996_s30 + $0x98] sm:$0xff] (%p2485_p9), %v1893_v23  ;;  %v2021_v23 = vld [vmem:[%s2712_s26 + $0x298] sm:$0xff] (%p2485_p9) }
 0x14f   : > { %1809 = vst [vmem:[%s2712_s26 + $0x340] sm:$0xf] %v1173_v24  ;;  %v1895_v24 = vld [vmem:[%s2712_s26 + $0xa0] sm:$0xff] (%p2485_p9) }
 0x150   : > { %1810 = vst [vmem:[%s2712_s26 + $0x348] sm:$0xf] %v1196_v25  ;;  %v1897_v25 = vld [vmem:[%s2712_s26 + $0xa8] sm:$0xff] (%p2485_p9) }
 0x151   : > { %v1219_v26 = vpop.f32.mrf.mxu2  ;;  %v1242_v27 = vpop.f32.mrf.mxu3  ;;  %1896 = vst [vmem:[%s2996_s30 + $0xa0] sm:$0xff] (%p2485_p9), %v1895_v24  ;;  %v2023_v24 = vld [vmem:[%s2712_s26 + $0x2a0] sm:$0xff] (%p2485_p9) }
 0x152   : > { %1811 = vst [vmem:[%s2712_s26 + $0x350] sm:$0xf] %v1219_v26  ;;  %v1899_v26 = vld [vmem:[%s2712_s26 + $0xb0] sm:$0xff] (%p2485_p9) }
 0x153   : > { %1812 = vst [vmem:[%s2712_s26 + $0x358] sm:$0xf] %v1242_v27  ;;  %v1901_v27 = vld [vmem:[%s2712_s26 + $0xb8] sm:$0xff] (%p2485_p9) }
 0x154   : > { %1898 = vst [vmem:[%s2996_s30 + $0xa8] sm:$0xff] (%p2485_p9), %v1897_v25  ;;  %v2025_v25 = vld [vmem:[%s2712_s26 + $0x2a8] sm:$0xff] (%p2485_p9) }
 0x155   : > { %1900 = vst [vmem:[%s2996_s30 + $0xb0] sm:$0xff] (%p2485_p9), %v1899_v26  ;;  %v2027_v26 = vld [vmem:[%s2712_s26 + $0x2b0] sm:$0xff] (%p2485_p9) }
 0x156   : > { %v1262_v28 = vpop.f32.mrf.mxu0  ;;  %v1285_v29 = vpop.f32.mrf.mxu1  ;;  %1902 = vst [vmem:[%s2996_s30 + $0xb8] sm:$0xff] (%p2485_p9), %v1901_v27  ;;  %v2029_v27 = vld [vmem:[%s2712_s26 + $0x2b8] sm:$0xff] (%p2485_p9) }
 0x157   : > { %1749 = vst [vmem:[%s2712_s26 + $0x160] sm:$0xff] %v1262_v28  ;;  %v1903_v28 = vld [vmem:[%s2712_s26 + $0xc0] sm:$0xff] (%p2485_p9) }
 0x158   : > { %1750 = vst [vmem:[%s2712_s26 + $0x168] sm:$0xff] %v1285_v29  ;;  %v1905_v29 = vld [vmem:[%s2712_s26 + $0xc8] sm:$0xff] (%p2485_p9) }
 0x159   : > { %v1308_v30 = vpop.f32.mrf.mxu2  ;;  %v1331_v31 = vpop.f32.mrf.mxu3  ;;  %1904 = vst [vmem:[%s2996_s30 + $0xc0] sm:$0xff] (%p2485_p9), %v1903_v28  ;;  %v2031_v28 = vld [vmem:[%s2712_s26 + $0x2c0] sm:$0xff] (%p2485_p9) }
 0x15a   : > { %1751 = vst [vmem:[%s2712_s26 + $0x170] sm:$0xff] %v1308_v30  ;;  %v1907_v30 = vld [vmem:[%s2712_s26 + $0xd0] sm:$0xff] (%p2485_p9) }
 0x15b   : > { %1752 = vst [vmem:[%s2712_s26 + $0x178] sm:$0xff] %v1331_v31  ;;  %v1909_v31 = vld [vmem:[%s2712_s26 + $0xd8] sm:$0xff] (%p2485_p9) }
 0x15c   : > { %1906 = vst [vmem:[%s2996_s30 + $0xc8] sm:$0xff] (%p2485_p9), %v1905_v29  ;;  %v2033_v29 = vld [vmem:[%s2712_s26 + $0x2c8] sm:$0xff] (%p2485_p9) }
 0x15d   : > { %1908 = vst [vmem:[%s2996_s30 + $0xd0] sm:$0xff] (%p2485_p9), %v1907_v30  ;;  %v2035_v30 = vld [vmem:[%s2712_s26 + $0x2d0] sm:$0xff] (%p2485_p9) }
 0x15e   : > { %v1265_v32 = vpop.f32.mrf.mxu0  ;;  %v1288_v33 = vpop.f32.mrf.mxu1  ;;  %1910 = vst [vmem:[%s2996_s30 + $0xd8] sm:$0xff] (%p2485_p9), %v1909_v31  ;;  %v2037_v31 = vld [vmem:[%s2712_s26 + $0x2d8] sm:$0xff] (%p2485_p9) }
 0x15f   : > { %1813 = vst [vmem:[%s2712_s26 + $0x360] sm:$0xf] %v1265_v32  ;;  %v1911_v32 = vld [vmem:[%s2712_s26 + $0xe0] sm:$0xff] (%p2485_p9) }
 0x160   : > { %1814 = vst [vmem:[%s2712_s26 + $0x368] sm:$0xf] %v1288_v33  ;;  %v1913_v33 = vld [vmem:[%s2712_s26 + $0xe8] sm:$0xff] (%p2485_p9) }
 0x161   : > { %v1311_v34 = vpop.f32.mrf.mxu2  ;;  %v1334_v35 = vpop.f32.mrf.mxu3  ;;  %1912 = vst [vmem:[%s2996_s30 + $0xe0] sm:$0xff] (%p2485_p9), %v1911_v32  ;;  %v2039_v32 = vld [vmem:[%s2712_s26 + $0x2e0] sm:$0xff] (%p2485_p9) }
 0x162   : > { %1815 = vst [vmem:[%s2712_s26 + $0x370] sm:$0xf] %v1311_v34  ;;  %v1915_v34 = vld [vmem:[%s2712_s26 + $0xf0] sm:$0xff] (%p2485_p9) }
 0x163   : > { %1816 = vst [vmem:[%s2712_s26 + $0x378] sm:$0xf] %v1334_v35  ;;  %v1917_v35 = vld [vmem:[%s2712_s26 + $0xf8] sm:$0xff] (%p2485_p9) }
 0x164   : > { %1914 = vst [vmem:[%s2996_s30 + $0xe8] sm:$0xff] (%p2485_p9), %v1913_v33  ;;  %v2041_v33 = vld [vmem:[%s2712_s26 + $0x2e8] sm:$0xff] (%p2485_p9) }
 0x165   : > { %1916 = vst [vmem:[%s2996_s30 + $0xf0] sm:$0xff] (%p2485_p9), %v1915_v34  ;;  %v2043_v34 = vld [vmem:[%s2712_s26 + $0x2f0] sm:$0xff] (%p2485_p9) }
 0x166   : > { %v1354_v36 = vpop.f32.mrf.mxu0  ;;  %v1377_v37 = vpop.f32.mrf.mxu1  ;;  %1918 = vst [vmem:[%s2996_s30 + $0xf8] sm:$0xff] (%p2485_p9), %v1917_v35  ;;  %v2045_v35 = vld [vmem:[%s2712_s26 + $0x2f8] sm:$0xff] (%p2485_p9) }
 0x167   : > { %1753 = vst [vmem:[%s2712_s26 + $0x180] sm:$0xff] %v1354_v36  ;;  %v1919_v36 = vld [vmem:[%s2712_s26 + $0x100] sm:$0xff] (%p2485_p9) }
 0x168   : > { %1754 = vst [vmem:[%s2712_s26 + $0x188] sm:$0xff] %v1377_v37  ;;  %v1921_v37 = vld [vmem:[%s2712_s26 + $0x108] sm:$0xff] (%p2485_p9) }
 0x169   : > { %v1400_v38 = vpop.f32.mrf.mxu2  ;;  %v1423_v39 = vpop.f32.mrf.mxu3  ;;  %1920 = vst [vmem:[%s2996_s30 + $0x100] sm:$0xff] (%p2485_p9), %v1919_v36  ;;  %v2047_v36 = vld [vmem:[%s2712_s26 + $0x300] sm:$0xff] (%p2485_p9) }
 0x16a   : > { %1755 = vst [vmem:[%s2712_s26 + $0x190] sm:$0xff] %v1400_v38  ;;  %v1923_v38 = vld [vmem:[%s2712_s26 + $0x110] sm:$0xff] (%p2485_p9) }
 0x16b   : > { %1756 = vst [vmem:[%s2712_s26 + $0x198] sm:$0xff] %v1423_v39  ;;  %v1925_v39 = vld [vmem:[%s2712_s26 + $0x118] sm:$0xff] (%p2485_p9) }
 0x16c   : > { %1922 = vst [vmem:[%s2996_s30 + $0x108] sm:$0xff] (%p2485_p9), %v1921_v37  ;;  %v2049_v37 = vld [vmem:[%s2712_s26 + $0x308] sm:$0xff] (%p2485_p9) }
 0x16d   : > { %1924 = vst [vmem:[%s2996_s30 + $0x110] sm:$0xff] (%p2485_p9), %v1923_v38  ;;  %v2051_v38 = vld [vmem:[%s2712_s26 + $0x310] sm:$0xff] (%p2485_p9) }
 0x16e   : > { %v1357_v40 = vpop.f32.mrf.mxu0  ;;  %v1380_v41 = vpop.f32.mrf.mxu1  ;;  %1926 = vst [vmem:[%s2996_s30 + $0x118] sm:$0xff] (%p2485_p9), %v1925_v39  ;;  %v2053_v39 = vld [vmem:[%s2712_s26 + $0x318] sm:$0xff] (%p2485_p9) }
 0x16f   : > { %1817 = vst [vmem:[%s2712_s26 + $0x380] sm:$0xf] %v1357_v40  ;;  %v1927_v40 = vld [vmem:[%s2712_s26 + $0x120] sm:$0xff] (%p2485_p9) }
 0x170   : > { %1818 = vst [vmem:[%s2712_s26 + $0x388] sm:$0xf] %v1380_v41  ;;  %v1929_v41 = vld [vmem:[%s2712_s26 + $0x128] sm:$0xff] (%p2485_p9) }
 0x171   : > { %v1403_v42 = vpop.f32.mrf.mxu2  ;;  %v1426_v43 = vpop.f32.mrf.mxu3  ;;  %1928 = vst [vmem:[%s2996_s30 + $0x120] sm:$0xff] (%p2485_p9), %v1927_v40  ;;  %v2055_v40 = vld [vmem:[%s2712_s26 + $0x320] sm:$0xff] (%p2485_p9) }
 0x172   : > { %1819 = vst [vmem:[%s2712_s26 + $0x390] sm:$0xf] %v1403_v42  ;;  %v1931_v42 = vld [vmem:[%s2712_s26 + $0x130] sm:$0xff] (%p2485_p9) }
 0x173   : > { %1820 = vst [vmem:[%s2712_s26 + $0x398] sm:$0xf] %v1426_v43  ;;  %v1933_v43 = vld [vmem:[%s2712_s26 + $0x138] sm:$0xff] (%p2485_p9) }
 0x174   : > { %1930 = vst [vmem:[%s2996_s30 + $0x128] sm:$0xff] (%p2485_p9), %v1929_v41  ;;  %v2057_v41 = vld [vmem:[%s2712_s26 + $0x328] sm:$0xff] (%p2485_p9) }
 0x175   : > { %1932 = vst [vmem:[%s2996_s30 + $0x130] sm:$0xff] (%p2485_p9), %v1931_v42  ;;  %v2059_v42 = vld [vmem:[%s2712_s26 + $0x330] sm:$0xff] (%p2485_p9) }
 0x176   : > { %v1446_v44 = vpop.f32.mrf.mxu0  ;;  %v1469_v45 = vpop.f32.mrf.mxu1  ;;  %1934 = vst [vmem:[%s2996_s30 + $0x138] sm:$0xff] (%p2485_p9), %v1933_v43  ;;  %v2061_v43 = vld [vmem:[%s2712_s26 + $0x338] sm:$0xff] (%p2485_p9) }
 0x177   : > { %1757 = vst [vmem:[%s2712_s26 + $0x1a0] sm:$0xff] %v1446_v44  ;;  %v1935_v44 = vld [vmem:[%s2712_s26 + $0x140] sm:$0xff] (%p2485_p9) }
 0x178   : > { %1758 = vst [vmem:[%s2712_s26 + $0x1a8] sm:$0xff] %v1469_v45  ;;  %v1937_v45 = vld [vmem:[%s2712_s26 + $0x148] sm:$0xff] (%p2485_p9) }
 0x179   : > { %v1492_v46 = vpop.f32.mrf.mxu2  ;;  %v1515_v47 = vpop.f32.mrf.mxu3  ;;  %1936 = vst [vmem:[%s2996_s30 + $0x140] sm:$0xff] (%p2485_p9), %v1935_v44  ;;  %v2063_v44 = vld [vmem:[%s2712_s26 + $0x340] sm:$0xff] (%p2485_p9) }
 0x17a   : > { %1759 = vst [vmem:[%s2712_s26 + $0x1b0] sm:$0xff] %v1492_v46  ;;  %v1939_v46 = vld [vmem:[%s2712_s26 + $0x150] sm:$0xff] (%p2485_p9) }
 0x17b   : > { %1760 = vst [vmem:[%s2712_s26 + $0x1b8] sm:$0xff] %v1515_v47  ;;  %v1941_v47 = vld [vmem:[%s2712_s26 + $0x158] sm:$0xff] (%p2485_p9) }
 0x17c   : > { %1938 = vst [vmem:[%s2996_s30 + $0x148] sm:$0xff] (%p2485_p9), %v1937_v45  ;;  %v2065_v45 = vld [vmem:[%s2712_s26 + $0x348] sm:$0xff] (%p2485_p9) }
 0x17d   : > { %1940 = vst [vmem:[%s2996_s30 + $0x150] sm:$0xff] (%p2485_p9), %v1939_v46  ;;  %v2067_v46 = vld [vmem:[%s2712_s26 + $0x350] sm:$0xff] (%p2485_p9) }
 0x17e   : > { %v1449_v48 = vpop.f32.mrf.mxu0  ;;  %v1472_v49 = vpop.f32.mrf.mxu1  ;;  %1942 = vst [vmem:[%s2996_s30 + $0x158] sm:$0xff] (%p2485_p9), %v1941_v47  ;;  %v2069_v47 = vld [vmem:[%s2712_s26 + $0x358] sm:$0xff] (%p2485_p9) }
 0x17f   : > { %1821 = vst [vmem:[%s2712_s26 + $0x3a0] sm:$0xf] %v1449_v48  ;;  %v1943_v48 = vld [vmem:[%s2712_s26 + $0x160] sm:$0xff] (%p2485_p9) }
 0x180   : > { %1822 = vst [vmem:[%s2712_s26 + $0x3a8] sm:$0xf] %v1472_v49  ;;  %v1945_v49 = vld [vmem:[%s2712_s26 + $0x168] sm:$0xff] (%p2485_p9) }
 0x181   : > { %v1495_v50 = vpop.f32.mrf.mxu2  ;;  %v1518_v51 = vpop.f32.mrf.mxu3  ;;  %1944 = vst [vmem:[%s2996_s30 + $0x160] sm:$0xff] (%p2485_p9), %v1943_v48  ;;  %v2071_v48 = vld [vmem:[%s2712_s26 + $0x360] sm:$0xff] (%p2485_p9) }
 0x182   : > { %1823 = vst [vmem:[%s2712_s26 + $0x3b0] sm:$0xf] %v1495_v50  ;;  %v1947_v50 = vld [vmem:[%s2712_s26 + $0x170] sm:$0xff] (%p2485_p9) }
 0x183   : > { %1824 = vst [vmem:[%s2712_s26 + $0x3b8] sm:$0xf] %v1518_v51  ;;  %v1949_v51 = vld [vmem:[%s2712_s26 + $0x178] sm:$0xff] (%p2485_p9) }
 0x184   : > { %1946 = vst [vmem:[%s2996_s30 + $0x168] sm:$0xff] (%p2485_p9), %v1945_v49  ;;  %v2073_v49 = vld [vmem:[%s2712_s26 + $0x368] sm:$0xff] (%p2485_p9) }
 0x185   : > { %1948 = vst [vmem:[%s2996_s30 + $0x170] sm:$0xff] (%p2485_p9), %v1947_v50  ;;  %v2075_v50 = vld [vmem:[%s2712_s26 + $0x370] sm:$0xff] (%p2485_p9) }
 0x186   : > { %v1538_v52 = vpop.f32.mrf.mxu0  ;;  %v1561_v53 = vpop.f32.mrf.mxu1  ;;  %1950 = vst [vmem:[%s2996_s30 + $0x178] sm:$0xff] (%p2485_p9), %v1949_v51  ;;  %v2077_v51 = vld [vmem:[%s2712_s26 + $0x378] sm:$0xff] (%p2485_p9) }
 0x187   : > { %1761 = vst [vmem:[%s2712_s26 + $0x1c0] sm:$0xff] %v1538_v52  ;;  %v1951_v52 = vld [vmem:[%s2712_s26 + $0x180] sm:$0xff] (%p2485_p9) }
 0x188   : > { %1762 = vst [vmem:[%s2712_s26 + $0x1c8] sm:$0xff] %v1561_v53  ;;  %v1953_v53 = vld [vmem:[%s2712_s26 + $0x188] sm:$0xff] (%p2485_p9) }
 0x189   : > { %v1584_v54 = vpop.f32.mrf.mxu2  ;;  %v1607_v55 = vpop.f32.mrf.mxu3  ;;  %1952 = vst [vmem:[%s2996_s30 + $0x180] sm:$0xff] (%p2485_p9), %v1951_v52  ;;  %v2079_v52 = vld [vmem:[%s2712_s26 + $0x380] sm:$0xff] (%p2485_p9) }
 0x18a   : > { %1763 = vst [vmem:[%s2712_s26 + $0x1d0] sm:$0xff] %v1584_v54  ;;  %v1955_v54 = vld [vmem:[%s2712_s26 + $0x190] sm:$0xff] (%p2485_p9) }
 0x18b   : > { %1764 = vst [vmem:[%s2712_s26 + $0x1d8] sm:$0xff] %v1607_v55  ;;  %v1957_v55 = vld [vmem:[%s2712_s26 + $0x198] sm:$0xff] (%p2485_p9) }
 0x18c   : > { %1954 = vst [vmem:[%s2996_s30 + $0x188] sm:$0xff] (%p2485_p9), %v1953_v53  ;;  %v2081_v53 = vld [vmem:[%s2712_s26 + $0x388] sm:$0xff] (%p2485_p9) }
 0x18d   : > { %1956 = vst [vmem:[%s2996_s30 + $0x190] sm:$0xff] (%p2485_p9), %v1955_v54  ;;  %v2083_v54 = vld [vmem:[%s2712_s26 + $0x390] sm:$0xff] (%p2485_p9) }
 0x18e   : > { %v1541_v56 = vpop.f32.mrf.mxu0  ;;  %v1564_v57 = vpop.f32.mrf.mxu1  ;;  %1958 = vst [vmem:[%s2996_s30 + $0x198] sm:$0xff] (%p2485_p9), %v1957_v55  ;;  %v2085_v55 = vld [vmem:[%s2712_s26 + $0x398] sm:$0xff] (%p2485_p9) }
 0x18f   : > { %1825 = vst [vmem:[%s2712_s26 + $0x3c0] sm:$0xf] %v1541_v56  ;;  %v1959_v56 = vld [vmem:[%s2712_s26 + $0x1a0] sm:$0xff] (%p2485_p9) }
 0x190   : > { %1826 = vst [vmem:[%s2712_s26 + $0x3c8] sm:$0xf] %v1564_v57  ;;  %v1961_v57 = vld [vmem:[%s2712_s26 + $0x1a8] sm:$0xff] (%p2485_p9) }
 0x191   : > { %v1587_v58 = vpop.f32.mrf.mxu2  ;;  %v1610_v59 = vpop.f32.mrf.mxu3  ;;  %1960 = vst [vmem:[%s2996_s30 + $0x1a0] sm:$0xff] (%p2485_p9), %v1959_v56  ;;  %v2087_v56 = vld [vmem:[%s2712_s26 + $0x3a0] sm:$0xff] (%p2485_p9) }
 0x192   : > { %1827 = vst [vmem:[%s2712_s26 + $0x3d0] sm:$0xf] %v1587_v58  ;;  %v1963_v58 = vld [vmem:[%s2712_s26 + $0x1b0] sm:$0xff] (%p2485_p9) }
 0x193   : > { %1828 = vst [vmem:[%s2712_s26 + $0x3d8] sm:$0xf] %v1610_v59  ;;  %v1965_v59 = vld [vmem:[%s2712_s26 + $0x1b8] sm:$0xff] (%p2485_p9) }
 0x194   : > { %1962 = vst [vmem:[%s2996_s30 + $0x1a8] sm:$0xff] (%p2485_p9), %v1961_v57  ;;  %v2089_v57 = vld [vmem:[%s2712_s26 + $0x3a8] sm:$0xff] (%p2485_p9) }
 0x195   : > { %1964 = vst [vmem:[%s2996_s30 + $0x1b0] sm:$0xff] (%p2485_p9), %v1963_v58  ;;  %v2091_v58 = vld [vmem:[%s2712_s26 + $0x3b0] sm:$0xff] (%p2485_p9) }
 0x196   : > { %v1630_v60 = vpop.f32.mrf.mxu0  ;;  %v1653_v61 = vpop.f32.mrf.mxu1  ;;  %1966 = vst [vmem:[%s2996_s30 + $0x1b8] sm:$0xff] (%p2485_p9), %v1965_v59  ;;  %v2093_v59 = vld [vmem:[%s2712_s26 + $0x3b8] sm:$0xff] (%p2485_p9) }
 0x197   : > { %1765 = vst [vmem:[%s2712_s26 + $0x1e0] sm:$0xff] %v1630_v60  ;;  %v1967_v60 = vld [vmem:[%s2712_s26 + $0x1c0] sm:$0xff] (%p2485_p9) }
 0x198   : > { %1766 = vst [vmem:[%s2712_s26 + $0x1e8] sm:$0xff] %v1653_v61  ;;  %v1969_v61 = vld [vmem:[%s2712_s26 + $0x1c8] sm:$0xff] (%p2485_p9) }
 0x199   : > { %v1676_v62 = vpop.f32.mrf.mxu2  ;;  %v1699_v63 = vpop.f32.mrf.mxu3  ;;  %1968 = vst [vmem:[%s2996_s30 + $0x1c0] sm:$0xff] (%p2485_p9), %v1967_v60  ;;  %v2095_v60 = vld [vmem:[%s2712_s26 + $0x3c0] sm:$0xff] (%p2485_p9) }
 0x19a   : > { %1767 = vst [vmem:[%s2712_s26 + $0x1f0] sm:$0xff] %v1676_v62  ;;  %v1971_v62 = vld [vmem:[%s2712_s26 + $0x1d0] sm:$0xff] (%p2485_p9) }
 0x19b   : > { %1768 = vst [vmem:[%s2712_s26 + $0x1f8] sm:$0xff] %v1699_v63  ;;  %v1973_v63 = vld [vmem:[%s2712_s26 + $0x1d8] sm:$0xff] (%p2485_p9) }
 0x19c   : > { %1970 = vst [vmem:[%s2996_s30 + $0x1c8] sm:$0xff] (%p2485_p9), %v1969_v61  ;;  %v2097_v61 = vld [vmem:[%s2712_s26 + $0x3c8] sm:$0xff] (%p2485_p9) }
 0x19d   : > { %1972 = vst [vmem:[%s2996_s30 + $0x1d0] sm:$0xff] (%p2485_p9), %v1971_v62  ;;  %v2099_v62 = vld [vmem:[%s2712_s26 + $0x3d0] sm:$0xff] (%p2485_p9) }
 0x19e   : > { %v1633_v0 = vpop.f32.mrf.mxu0  ;;  %v1656_v1 = vpop.f32.mrf.mxu1  ;;  %1974 = vst [vmem:[%s2996_s30 + $0x1d8] sm:$0xff] (%p2485_p9), %v1973_v63  ;;  %v2101_v63 = vld [vmem:[%s2712_s26 + $0x3d8] sm:$0xff] (%p2485_p9) }
 0x19f   : > { %1829 = vst [vmem:[%s2712_s26 + $0x3e0] sm:$0xf] %v1633_v0  ;;  %1839 = sbr.rel (!%p2485_p9) target bundleno = 487 (0x1e7), region = 36  ;;  %v1975_v0 = vld [vmem:[%s2712_s26 + $0x1e0] sm:$0xff] (%p2485_p9) }
 0x1a0   : > { %1830 = vst [vmem:[%s2712_s26 + $0x3e8] sm:$0xf] %v1656_v1  ;;  %v1977_v1 = vld [vmem:[%s2712_s26 + $0x1e8] sm:$0xff] (%p2485_p9) }
 0x1a1   : > { %v1679_v3 = vpop.f32.mrf.mxu2  ;;  %v1702_v4 = vpop.f32.mrf.mxu3  ;;  %1976 = vst [vmem:[%s2996_s30 + $0x1e0] sm:$0xff] (%p2485_p9), %v1975_v0 }
 0x1a2   : > { %1831 = vst [vmem:[%s2712_s26 + $0x3f0] sm:$0xf] %v1679_v3  ;;  %v1979_v3 = vld [vmem:[%s2712_s26 + $0x1f0] sm:$0xff] (%p2485_p9) }
 0x1a3   : > { %1832 = vst [vmem:[%s2712_s26 + $0x3f8] sm:$0xf] %v1702_v4  ;;  %v1981_v4 = vld [vmem:[%s2712_s26 + $0x1f8] sm:$0xff] (%p2485_p9) }
 0x1a4   : > { %1978 = vst [vmem:[%s2996_s30 + $0x1e8] sm:$0xff] %v1977_v1 }
 0x1a5   : > { %1980 = vst [vmem:[%s2996_s30 + $0x1f0] sm:$0xff] %v1979_v3 }
 0x1a6   : > { %1982 = vst [vmem:[%s2996_s30 + $0x1f8] sm:$0xff] %v1981_v4  ;;  %v2103_v0 = vld [vmem:[%s2712_s26 + $0x3e0] sm:$0xff] }
 0x1a7   : > { %1984 = vst [vmem:[%s2996_s30 + $0x800] sm:$0xff] %v1983_v2  ;;  %v2105_v1 = vld [vmem:[%s2712_s26 + $0x3e8] sm:$0xff] }
 0x1a8   : > { %1986 = vst [vmem:[%s2996_s30 + $0x808] sm:$0xff] %v1985_v5 }
 0x1a9   : > { %1988 = vst [vmem:[%s2996_s30 + $0x810] sm:$0xff] %v1987_v6  ;;  %v2107_v3 = vld [vmem:[%s2712_s26 + $0x3f0] sm:$0xff] }
 0x1aa   : > { %1990 = vst [vmem:[%s2996_s30 + $0x818] sm:$0xff] %v1989_v7  ;;  %v2109_v4 = vld [vmem:[%s2712_s26 + $0x3f8] sm:$0xff] }
 0x1ab   : > { %1992 = vst [vmem:[%s2996_s30 + $0x820] sm:$0xff] %v1991_v8 }
 0x1ac   : > { %1994 = vst [vmem:[%s2996_s30 + $0x828] sm:$0xff] %v1993_v9 }
 0x1ad   : > { %1996 = vst [vmem:[%s2996_s30 + $0x830] sm:$0xff] %v1995_v13 }
 0x1ae   : > { %1998 = vst [vmem:[%s2996_s30 + $0x838] sm:$0xff] %v1997_v10 }
 0x1af   : > { %2000 = vst [vmem:[%s2996_s30 + $0x840] sm:$0xff] %v1999_v11 }
 0x1b0   : > { %2002 = vst [vmem:[%s2996_s30 + $0x848] sm:$0xff] %v2001_v12 }
 0x1b1   : > { %2004 = vst [vmem:[%s2996_s30 + $0x850] sm:$0xff] %v2003_v14 }
 0x1b2   : > { %2006 = vst [vmem:[%s2996_s30 + $0x858] sm:$0xff] %v2005_v15 }
 0x1b3   : > { %2008 = vst [vmem:[%s2996_s30 + $0x860] sm:$0xff] %v2007_v16 }
 0x1b4   : > { %2010 = vst [vmem:[%s2996_s30 + $0x868] sm:$0xff] %v2009_v17 }
 0x1b5   : > { %2012 = vst [vmem:[%s2996_s30 + $0x870] sm:$0xff] %v2011_v18 }
 0x1b6   : > { %2014 = vst [vmem:[%s2996_s30 + $0x878] sm:$0xff] %v2013_v19 }
 0x1b7   : > { %2016 = vst [vmem:[%s2996_s30 + $0x880] sm:$0xff] %v2015_v20 }
 0x1b8   : > { %2018 = vst [vmem:[%s2996_s30 + $0x888] sm:$0xff] %v2017_v21 }
 0x1b9   : > { %2020 = vst [vmem:[%s2996_s30 + $0x890] sm:$0xff] %v2019_v22 }
 0x1ba   : > { %2022 = vst [vmem:[%s2996_s30 + $0x898] sm:$0xff] %v2021_v23 }
 0x1bb   : > { %2024 = vst [vmem:[%s2996_s30 + $0x8a0] sm:$0xff] %v2023_v24 }
 0x1bc   : > { %2026 = vst [vmem:[%s2996_s30 + $0x8a8] sm:$0xff] %v2025_v25 }
 0x1bd   : > { %2028 = vst [vmem:[%s2996_s30 + $0x8b0] sm:$0xff] %v2027_v26 }
 0x1be   : > { %2030 = vst [vmem:[%s2996_s30 + $0x8b8] sm:$0xff] %v2029_v27 }
 0x1bf   : > { %2032 = vst [vmem:[%s2996_s30 + $0x8c0] sm:$0xff] %v2031_v28 }
 0x1c0   : > { %2034 = vst [vmem:[%s2996_s30 + $0x8c8] sm:$0xff] %v2033_v29 }
 0x1c1   : > { %2036 = vst [vmem:[%s2996_s30 + $0x8d0] sm:$0xff] %v2035_v30 }
 0x1c2   : > { %2038 = vst [vmem:[%s2996_s30 + $0x8d8] sm:$0xff] %v2037_v31 }
 0x1c3   : > { %2040 = vst [vmem:[%s2996_s30 + $0x8e0] sm:$0xff] %v2039_v32 }
 0x1c4   : > { %2042 = vst [vmem:[%s2996_s30 + $0x8e8] sm:$0xff] %v2041_v33 }
 0x1c5   : > { %2044 = vst [vmem:[%s2996_s30 + $0x8f0] sm:$0xff] %v2043_v34 }
 0x1c6   : > { %2046 = vst [vmem:[%s2996_s30 + $0x8f8] sm:$0xff] %v2045_v35 }
 0x1c7   : > { %2048 = vst [vmem:[%s2996_s30 + $0x900] sm:$0xff] %v2047_v36 }
 0x1c8   : > { %2050 = vst [vmem:[%s2996_s30 + $0x908] sm:$0xff] %v2049_v37 }
 0x1c9   : > { %2052 = vst [vmem:[%s2996_s30 + $0x910] sm:$0xff] %v2051_v38 }
 0x1ca   : > { %2054 = vst [vmem:[%s2996_s30 + $0x918] sm:$0xff] %v2053_v39 }
 0x1cb   : > { %2056 = vst [vmem:[%s2996_s30 + $0x920] sm:$0xff] %v2055_v40 }
 0x1cc   : > { %2058 = vst [vmem:[%s2996_s30 + $0x928] sm:$0xff] %v2057_v41 }
 0x1cd   : > { %2060 = vst [vmem:[%s2996_s30 + $0x930] sm:$0xff] %v2059_v42 }
 0x1ce   : > { %2062 = vst [vmem:[%s2996_s30 + $0x938] sm:$0xff] %v2061_v43 }
 0x1cf   : > { %2064 = vst [vmem:[%s2996_s30 + $0x940] sm:$0xff] %v2063_v44 }
 0x1d0   : > { %2066 = vst [vmem:[%s2996_s30 + $0x948] sm:$0xff] %v2065_v45 }
 0x1d1   : > { %2068 = vst [vmem:[%s2996_s30 + $0x950] sm:$0xff] %v2067_v46 }
 0x1d2   : > { %2070 = vst [vmem:[%s2996_s30 + $0x958] sm:$0xff] %v2069_v47 }
 0x1d3   : > { %2072 = vst [vmem:[%s2996_s30 + $0x960] sm:$0xff] %v2071_v48 }
 0x1d4   : > { %2074 = vst [vmem:[%s2996_s30 + $0x968] sm:$0xff] %v2073_v49 }
 0x1d5   : > { %2076 = vst [vmem:[%s2996_s30 + $0x970] sm:$0xff] %v2075_v50 }
 0x1d6   : > { %2078 = vst [vmem:[%s2996_s30 + $0x978] sm:$0xff] %v2077_v51 }
 0x1d7   : > { %2080 = vst [vmem:[%s2996_s30 + $0x980] sm:$0xff] %v2079_v52 }
 0x1d8   : > { %2082 = vst [vmem:[%s2996_s30 + $0x988] sm:$0xff] %v2081_v53 }
 0x1d9   : > { %2084 = vst [vmem:[%s2996_s30 + $0x990] sm:$0xff] %v2083_v54 }
 0x1da   : > { %2086 = vst [vmem:[%s2996_s30 + $0x998] sm:$0xff] %v2085_v55 }
 0x1db   : > { %2088 = vst [vmem:[%s2996_s30 + $0x9a0] sm:$0xff] %v2087_v56 }
 0x1dc   : > { %2090 = vst [vmem:[%s2996_s30 + $0x9a8] sm:$0xff] %v2089_v57 }
 0x1dd   : > { %2092 = vst [vmem:[%s2996_s30 + $0x9b0] sm:$0xff] %v2091_v58 }
 0x1de   : > { %2094 = vst [vmem:[%s2996_s30 + $0x9b8] sm:$0xff] %v2093_v59 }
 0x1df   : > { %2096 = vst [vmem:[%s2996_s30 + $0x9c0] sm:$0xff] %v2095_v60 }
 0x1e0   : > { %2098 = vst [vmem:[%s2996_s30 + $0x9c8] sm:$0xff] %v2097_v61 }
 0x1e1   : > { %2100 = vst [vmem:[%s2996_s30 + $0x9d0] sm:$0xff] %v2099_v62 }
 0x1e2   : > { %2102 = vst [vmem:[%s2996_s30 + $0x9d8] sm:$0xff] %v2101_v63 }
 0x1e3   : > { %2104 = vst [vmem:[%s2996_s30 + $0x9e0] sm:$0xff] %v2103_v0 }
 0x1e4   : > { %2106 = vst [vmem:[%s2996_s30 + $0x9e8] sm:$0xff] %v2105_v1 }
 0x1e5   : > { %2108 = vst [vmem:[%s2996_s30 + $0x9f0] sm:$0xff] %v2107_v3 }
 0x1e6   : > { %2110 = vst [vmem:[%s2996_s30 + $0x9f8] sm:$0xff] %v2109_v4 }
 0x1e7 PF: > { %p12_p7 = scmp.ge.s32.totalorder %s2462_s14, 6   ;;  %s3272_s9 = smov %s2415_s10 }
 0x1e8   : > { %s3273_s10 = smov %s2419_s11  ;;  %s3274_s11 = smov %s2472_s17 }
 0x1e9   : > { %s3275_s12 = smov %s2462_s14  ;;  %14 = sbr.rel (!%p12_p7) target bundleno = 3 (0x3), region = 91 }
 0x1ee   :  { %2126 = vsyncpa [#allocation3], 1 }
 0x1ef   :  { %2128 = vsyncpa [#allocation3 + $0x1], 1 }

// kernel: affine_mix_warp_forward.5
= control target key start
LH: loop header
LB: loop body
LE: loop exit
PB: predicated region body
PF: predicated region fallthrough
CT: control target
= control target key end

     0   :  { %8 = vsyncpa [#allocation3], 0  ;;  %s7133_s0 = inlined_call_operand.vmem [shape: f32[2,64], index: 0, kind: input, shape index: {}]   ;;  %s7134_s1 = inlined_call_operand.hbm [shape: f32[64,65536], index: 1, kind: input, shape index: {}]   ;;  %s7135_s2 = inlined_call_operand.hbm [shape: f32[1,65536], index: 2, kind: input, shape index: {}]   ;;  %s7136_s3 = inlined_call_operand.vmem [shape: f32[2,65536], index: 3, kind: output, shape index: {}]  }
   0x1   :  { %10 = vsyncpa [#allocation3 + $0x1], 0 }
   0x2   :  { %11 = vsyncpa [#allocation5], 0 }
   0x3   :  { %13 = vsyncpa [#allocation5 + $0x1], 0  ;;  %s5421_s12 = smov 0   ;;  %s5423_s13 = smov 0  }
   0x4   :  { %s5425_s14 = smov 0   ;;  %s5427_s15 = smov 0  }
   0x5 LB: > { %s4845_s16 = sadd.s32 4294967295, %s5396_s15   ;;  %s5441_s17 = sadd.s32 1, %s5396_s15   ;;  %s5396_s15 = sphi %s5427_s15, %s7144_s15   ;;  %s5392_s14 = sphi %s5425_s14, %s7143_s14   ;;  %s5388_s13 = sphi %s5423_s13, %s7142_s13   ;;  %s5384_s12 = sphi %s5421_s12, %s7141_s12  }
   0x6   : > { %s44_s18 = ssub.s32 %s5396_s15, %s5441_s17  ;;  %s47_s19 = sadd.s32 1, %s5392_s14 }
   0x7   : > { %p45_p0 = scmp.eq.s32.totalorder %s44_s18, 0  ;;  %p54_p1 = scmp.ne.s32.totalorder %s5392_s14, %s5388_s13 }
   0x8   : > { %p55_p2 = scmp.eq.s32.totalorder %s5396_s15, 0  ;;  %p60_p3 = scmp.ne.s32.totalorder %s5388_s13, %s5384_s12 }
   0x9   : > { %s5451_s20 = scalar_select %p45_p0, %s5392_s14, %s47_s19  }
   0xa   : > { %p5453_p4 = por %p55_p2, %p54_p1  ;;  %p61_p5 = scmp.eq.s32.totalorder %s4845_s16, 0 }
   0xb   : > { %p5001_p6 = scmp.lt.s32.totalorder %s5396_s15, 4  ;;  %s5465_s23 = sand.u32 1, %s5392_s14  }
   0xc   : > { %p5460_p7 = por %p61_p5, %p60_p3  ;;  %s4849_s24 = sshll.u32 %s5465_s23, 13 }
   0xd   : > { %s4989_s25 = sshll.u32 %s5396_s15, 10  ;;  %s143_s29 = scalar_lea.vmem [#allocation2], %s4849_s24 }
   0xe   : > { %s148_s28 = scalar_lea.hbm %s7134_s1, %s4989_s25  ;;  %s151_s30 = sshll.u32 %s143_s29, 4  ;;  %s152_s30 = int_to_ptr.vmem [resolvable:$true] %s151_s30 }
   0xf   : > { %s149_s4 = sshll.u32 %s148_s28, 4  ;;  %p5474_p8 = pnand %p5001_p6, %p5453_p4  ;;  %s150_s4 = int_to_ptr.hbm [resolvable:$true] %s149_s4 }
  0x10   : > { %s140_s6 = scalar_lea.sflag [#allocation3], %s5465_s23  ;;  %s5298_s7 = sshra.s32 %s150_s4, 4  ;;  %s5299_s7 = int_to_ptr.hbm [resolvable:$true] %s5298_s7 }
  0x11   : > { %s5300_s8 = scalar_lea.hbm %s5299_s7, 8192  ;;  %p5302_p10 = pneg %p5474_p8 }
  0x12   : > { %p5301_p9 = scmp.ne.s32.totalorder %s5299_s7, %s5300_s8  ;;  %s5305_s11 = scalar_lea.hbm %s7134_s1, 32768 }
  0x13   : > { %p5306_p13 = scmp.lt.s32.totalorder %s5299_s7, %s7134_s1  ;;  %p5307_p0 = scmp.lt.s32.totalorder %s5305_s11, %s5300_s8 }
  0x14   : > { %p5303_p11 = pnand %p5302_p10, %p5301_p9 }
  0x15   : > { %p5308_p1 = por %p5307_p0, %p5306_p13 }
  0x16   : > { %p5304_p12 = pneg %p5303_p11 }
  0x18   : > { %p5309_p2 = pnand %p5308_p1, %p5304_p12 }
  0x1a   : > { %5312 = shalt.err (!%p5309_p2)
}
  0x1b   : > { %s5398_s19 = smov 65536   ;;  %s5399_s21 = smov 16384  }
  0x1c   : > { %s5400_s24 = smov 1024   ;;  %p4854_p3 = scmp.ge.s32.totalorder %s5396_s15, 1 }
  0x1d   : > { %4997 = dma.hbm_to_vmem [thread:$0]  (!%p5474_p8), %s150_s4, 131072, %s152_s30, %s140_s6, %s5398_s19, %s5399_s21, %s5400_s24  }
  0x1e   : > { %p178_p4 = scmp.lt.s32.totalorder %s5396_s15, 5  ;;  %s4852_s25 = sshll.u32 %s5465_s23, 7 }
  0x1f   : > { %s4853_s27 = sshll.u32 %s5396_s15, 7  ;;  %s165_s28 = scalar_lea.vmem [#allocation4], %s4852_s25 }
  0x20   : > { %p5495_p5 = pnand %p4854_p3, %p178_p4  ;;  %s173_s29 = sshll.u32 %s165_s28, 4  ;;  %s174_s29 = int_to_ptr.vmem [resolvable:$true] %s173_s29 }
  0x21   : > { %s169_s9 = scalar_lea.hbm %s7135_s2, %s4853_s27  ;;  %s162_s11 = scalar_lea.sflag [#allocation5], %s5465_s23 }
  0x22   : > { %s171_s10 = sshll.u32 %s169_s9, 4  ;;  %s5335_s18 = scalar_lea.hbm %s7135_s2, 512  ;;  %s172_s10 = int_to_ptr.hbm [resolvable:$true] %s171_s10 }
  0x23   : > { %s5328_s30 = sshra.s32 %s172_s10, 4  ;;  %s5329_s30 = int_to_ptr.hbm [resolvable:$true] %s5328_s30 }
  0x24   : > { %s5330_s4 = scalar_lea.hbm %s5329_s30, 128  ;;  %p5336_p12 = scmp.lt.s32.totalorder %s5329_s30, %s7135_s2 }
  0x25   : > { %p5331_p6 = scmp.ne.s32.totalorder %s5329_s30, %s5330_s4  ;;  %p5337_p13 = scmp.lt.s32.totalorder %s5335_s18, %s5330_s4 }
  0x27   : > { %p5333_p9 = pnand %p5331_p6, %p5302_p10  ;;  %p5338_p0 = por %p5337_p13, %p5336_p12 }
  0x29   : > { %p5334_p11 = pneg %p5333_p9 }
  0x2b   : > { %p5339_p1 = pnand %p5338_p0, %p5334_p11 }
  0x2d   : > { %5342 = shalt.err (!%p5339_p1)
}
  0x2e   : > { %5000 = dma.hbm_to_vmem [thread:$0]  (!%p5474_p8), %s172_s10, 2048, %s174_s29, %s162_s11  }
  0x2f   : > { %182 = sbr.rel (%p5495_p5) target bundleno = 778 (0x30a), region = 32  ;;  %s184_s23 = sand.u32 (!%p5495_p5), 1, %s5388_s13  }
  0x30   : > { %s4855_s24 = sshll.u32 (!%p5495_p5), %s184_s23, 13  ;;  %s185_s25 = scalar_lea.sflag (!%p5495_p5), [#allocation3], %s184_s23 }
  0x31   : > { %s5518_s27 = scalar_lea.vmem (!%p5495_p5), [#allocation2], %s4855_s24 }
  0x34   : > { %5375 = dma.done.wait (%p5460_p7), %s185_s25, 131072  }
  0x35   : > { %5377 = vsyncadd (%p5460_p7), %s185_s25, 4294836224  ;;  %s4856_s28 = sshll.u32 %s184_s23, 7  ;;  %s195_s7 = scalar_lea.sflag [#allocation5], %s184_s23 }
  0x36   : > { %s5524_s5 = scalar_lea.vmem [#allocation4], %s4856_s28 }
  0x37   : > { %5379 = dma.done.wait (%p5460_p7), %s195_s7, 2048  }
  0x38   : > { %5381 = vsyncadd (%p5460_p7), %s195_s7, 4294965248  ;;  %v1134_v0 = vld [vmem:[%s5518_s27 + $0x1c10] sm:$0xff]  ;;  %v1135_v1 = vld [vmem:[%s5518_s27 + $0x1c18] sm:$0xff]  ;;  %vm1548_vm0 = vcmask 523264   ;;  %s5900_s29 = sshll.u32 %s4845_s16, 7  ;;  %vm4594_vm1 = vcmask 1045508  }
  0x39   : > { %v1006_v2 = vld [vmem:[%s5518_s27 + $0x1810] sm:$0xff]  ;;  %1600 = vmatpush.msra.mxu2 %v1134_v0  ;;  %1620 = vmatpush.msra.mxu3 %v1135_v1  ;;  %v1007_v3 = vld [vmem:[%s5518_s27 + $0x1818] sm:$0xff]  ;;  %v1133_v6 = vld [vmem:[%s5518_s27 + $0x1c08] sm:$0xff]  ;;  %p230_p7 = scmp.lt.s32.totalorder %s5900_s29, 511  ;;  %vm4592_vm2 = vcmask 1041408   ;;  %vm4596_vm3 = vcmask 1043456  }
  0x3a   : > { %v878_v4 = vld [vmem:[%s5518_s27 + $0x1410] sm:$0xff]  ;;  %v879_v5 = vld [vmem:[%s5518_s27 + $0x1418] sm:$0xff]  ;;  %v1132_v7 = vld [vmem:[%s5518_s27 + $0x1c00] sm:$0xff]  ;;  %1580 = vmatpush.msra.mxu1 %v1133_v6 }
  0x3b   : > { %1601 = vmatpush.msra.mxu2 %v1006_v2  ;;  %1621 = vmatpush.msra.mxu3 %v1007_v3  ;;  %v1005_v8 = vld [vmem:[%s5518_s27 + $0x1808] sm:$0xff]  ;;  %v750_v9 = vld [vmem:[%s5518_s27 + $0x1010] sm:$0xff]  ;;  %v751_v10 = vld [vmem:[%s5518_s27 + $0x1018] sm:$0xff]  ;;  %s7146_s29 = smov (!%p230_p7, %s5900_s29), 511 }
  0x3c   : > { %1560 = vmatpush.msra.mxu0 %v1132_v7  ;;  %v1004_v11 = vld [vmem:[%s5518_s27 + $0x1800] sm:$0xff]  ;;  %v877_v12 = vld [vmem:[%s5518_s27 + $0x1408] sm:$0xff]  ;;  %1581 = vmatpush.msra.mxu1 %v1005_v8  ;;  %v622_v14 = vld [vmem:[%s5518_s27 + $0xc10] sm:$0xff]  ;;  %s4858_s15 = sshll.u32 %s7146_s29, 1 }
  0x3d   : > { %1602 = vmatpush.msra.mxu2 %v878_v4  ;;  %1622 = vmatpush.msra.mxu3 %v879_v5  ;;  %v876_v13 = vld [vmem:[%s5518_s27 + $0x1400] sm:$0xff]  ;;  %v623_v15 = vld [vmem:[%s5518_s27 + $0xc18] sm:$0xff]  ;;  %v749_v16 = vld [vmem:[%s5518_s27 + $0x1008] sm:$0xff]  ;;  %s5952_s11 = scalar_lea.vmem %s7136_s3, %s4858_s15 }
  0x3e   : > { %1561 = vmatpush.msra.mxu0 %v1004_v11  ;;  %v748_v17 = vld [vmem:[%s5518_s27 + $0x1000] sm:$0xff]  ;;  %1582 = vmatpush.msra.mxu1 %v877_v12  ;;  %v494_v18 = vld [vmem:[%s5518_s27 + $0x810] sm:$0xff]  ;;  %v495_v19 = vld [vmem:[%s5518_s27 + $0x818] sm:$0xff] }
  0x3f   : > { %1603 = vmatpush.msra.mxu2 %v750_v9  ;;  %1623 = vmatpush.msra.mxu3 %v751_v10  ;;  %v621_v20 = vld [vmem:[%s5518_s27 + $0xc08] sm:$0xff]  ;;  %v620_v21 = vld [vmem:[%s5518_s27 + $0xc00] sm:$0xff]  ;;  %v366_v22 = vld [vmem:[%s5518_s27 + $0x410] sm:$0xff] }
  0x40   : > { %1562 = vmatpush.msra.mxu0 %v876_v13  ;;  %1583 = vmatpush.msra.mxu1 %v749_v16  ;;  %v367_v23 = vld [vmem:[%s5518_s27 + $0x418] sm:$0xff]  ;;  %v493_v24 = vld [vmem:[%s5518_s27 + $0x808] sm:$0xff]  ;;  %v492_v25 = vld [vmem:[%s5518_s27 + $0x800] sm:$0xff] }
  0x41   : > { %1604 = vmatpush.msra.mxu2 %v622_v14  ;;  %1624 = vmatpush.msra.mxu3 %v623_v15  ;;  %v238_v26 = vld [vmem:[%s5518_s27 + $0x10] sm:$0xff]  ;;  %v239_v27 = vld [vmem:[%s5518_s27 + $0x18] sm:$0xff]  ;;  %v365_v30 = vld [vmem:[%s5518_s27 + $0x408] sm:$0xff] }
  0x42   : > { %1563 = vmatpush.msra.mxu0 %v748_v17  ;;  %1584 = vmatpush.msra.mxu1 %v621_v20  ;;  %v1138_v28 = vld [vmem:[%s5518_s27 + $0x1c30] sm:$0xff]  ;;  %v1139_v29 = vld [vmem:[%s5518_s27 + $0x1c38] sm:$0xff]  ;;  %v364_v31 = vld [vmem:[%s5518_s27 + $0x400] sm:$0xff] }
  0x43   : > { %1605 = vmatpush.msra.mxu2 %v494_v18  ;;  %1625 = vmatpush.msra.mxu3 %v495_v19  ;;  %v1010_v32 = vld [vmem:[%s5518_s27 + $0x1830] sm:$0xff]  ;;  %v1011_v33 = vld [vmem:[%s5518_s27 + $0x1838] sm:$0xff]  ;;  %v237_v34 = vld [vmem:[%s5518_s27 + $0x8] sm:$0xff] }
  0x44   : > { %1564 = vmatpush.msra.mxu0 %v620_v21  ;;  %1585 = vmatpush.msra.mxu1 %v493_v24  ;;  %v236_v35 = vld [vmem:[%s5518_s27] sm:$0xff]  ;;  %v882_v36 = vld [vmem:[%s5518_s27 + $0x1430] sm:$0xff]  ;;  %v883_v37 = vld [vmem:[%s5518_s27 + $0x1438] sm:$0xff] }
  0x45   : > { %1606 = vmatpush.msra.mxu2 %v366_v22  ;;  %1626 = vmatpush.msra.mxu3 %v367_v23  ;;  %v1137_v38 = vld [vmem:[%s5518_s27 + $0x1c28] sm:$0xff]  ;;  %v1136_v39 = vld [vmem:[%s5518_s27 + $0x1c20] sm:$0xff]  ;;  %v754_v40 = vld [vmem:[%s5518_s27 + $0x1030] sm:$0xff] }
  0x46   : > { %1565 = vmatpush.msra.mxu0 %v492_v25  ;;  %1586 = vmatpush.msra.mxu1 %v365_v30  ;;  %v755_v41 = vld [vmem:[%s5518_s27 + $0x1038] sm:$0xff]  ;;  %v1009_v42 = vld [vmem:[%s5518_s27 + $0x1828] sm:$0xff]  ;;  %v1008_v43 = vld [vmem:[%s5518_s27 + $0x1820] sm:$0xff] }
  0x47   : > { %1607 = vmatpush.msra.mxu2 %v238_v26  ;;  %1627 = vmatpush.msra.mxu3 %v239_v27  ;;  %v626_v44 = vld [vmem:[%s5518_s27 + $0xc30] sm:$0xff]  ;;  %v627_v45 = vld [vmem:[%s5518_s27 + $0xc38] sm:$0xff]  ;;  %v881_v46 = vld [vmem:[%s5518_s27 + $0x1428] sm:$0xff] }
  0x48   : > { %1566 = vmatpush.msra.mxu0 %v364_v31  ;;  %1587 = vmatpush.msra.mxu1 %v237_v34  ;;  %v880_v47 = vld [vmem:[%s5518_s27 + $0x1420] sm:$0xff]  ;;  %v498_v48 = vld [vmem:[%s5518_s27 + $0x830] sm:$0xff]  ;;  %v499_v49 = vld [vmem:[%s5518_s27 + $0x838] sm:$0xff] }
  0x49   : > { %1680 = vmatpush.msrb.mxu2 %v1138_v28  ;;  %1700 = vmatpush.msrb.mxu3 %v1139_v29  ;;  %v753_v50 = vld [vmem:[%s5518_s27 + $0x1028] sm:$0xff]  ;;  %v752_v51 = vld [vmem:[%s5518_s27 + $0x1020] sm:$0xff]  ;;  %v370_v52 = vld [vmem:[%s5518_s27 + $0x430] sm:$0xff] }
  0x4a   : > { %1567 = vmatpush.msra.mxu0 %v236_v35  ;;  %1660 = vmatpush.msrb.mxu1 %v1137_v38  ;;  %v371_v53 = vld [vmem:[%s5518_s27 + $0x438] sm:$0xff]  ;;  %v625_v54 = vld [vmem:[%s5518_s27 + $0xc28] sm:$0xff]  ;;  %v5588_v55 = vld [vmem:[%s7133_s0] sm:$0x3] }
  0x4b   : > { %1681 = vmatpush.msrb.mxu2 %v1010_v32  ;;  %1701 = vmatpush.msrb.mxu3 %v1011_v33  ;;  %v242_v56 = vld [vmem:[%s5518_s27 + $0x30] sm:$0xff]  ;;  %v243_v57 = vld [vmem:[%s5518_s27 + $0x38] sm:$0xff]  ;;  %v624_v60 = vld [vmem:[%s5518_s27 + $0xc20] sm:$0xff] }
  0x4c   : > { %1640 = vmatpush.msrb.mxu0 %v1136_v39  ;;  %1661 = vmatpush.msrb.mxu1 %v1009_v42  ;;  %v1142_v58 = vld [vmem:[%s5518_s27 + $0x1c50] sm:$0xff]  ;;  %v1143_v59 = vld [vmem:[%s5518_s27 + $0x1c58] sm:$0xff]  ;;  %v497_v61 = vld [vmem:[%s5518_s27 + $0x828] sm:$0xff] }
  0x4d   : > { %1682 = vmatpush.msrb.mxu2 %v882_v36  ;;  %1702 = vmatpush.msrb.mxu3 %v883_v37  ;;  %v1014_v62 = vld [vmem:[%s5518_s27 + $0x1850] sm:$0xff]  ;;  %v1015_v63 = vld [vmem:[%s5518_s27 + $0x1858] sm:$0xff]  ;;  %v496_v0 = vld [vmem:[%s5518_s27 + $0x820] sm:$0xff] }
  0x4e   : > { %1641 = vmatpush.msrb.mxu0 %v1008_v43  ;;  %1662 = vmatpush.msrb.mxu1 %v881_v46  ;;  %v369_v1 = vld [vmem:[%s5518_s27 + $0x428] sm:$0xff]  ;;  %v886_v2 = vld [vmem:[%s5518_s27 + $0x1450] sm:$0xff]  ;;  %v887_v3 = vld [vmem:[%s5518_s27 + $0x1458] sm:$0xff] }
  0x4f   : > { %1683 = vmatpush.msrb.mxu2 %v754_v40  ;;  %1703 = vmatpush.msrb.mxu3 %v755_v41  ;;  %v368_v4 = vld [vmem:[%s5518_s27 + $0x420] sm:$0xff]  ;;  %v241_v5 = vld [vmem:[%s5518_s27 + $0x28] sm:$0xff]  ;;  %v758_v6 = vld [vmem:[%s5518_s27 + $0x1050] sm:$0xff] }
  0x50   : > { %1642 = vmatpush.msrb.mxu0 %v880_v47  ;;  %1663 = vmatpush.msrb.mxu1 %v753_v50  ;;  %v759_v7 = vld [vmem:[%s5518_s27 + $0x1058] sm:$0xff]  ;;  %v1141_v8 = vld [vmem:[%s5518_s27 + $0x1c48] sm:$0xff]  ;;  %v240_v9 = vld [vmem:[%s5518_s27 + $0x20] sm:$0xff] }
  0x51   : > { %1684 = vmatpush.msrb.mxu2 %v626_v44  ;;  %1704 = vmatpush.msrb.mxu3 %v627_v45  ;;  %v630_v10 = vld [vmem:[%s5518_s27 + $0xc50] sm:$0xff]  ;;  %v1140_v11 = vld [vmem:[%s5518_s27 + $0x1c40] sm:$0xff]  ;;  %v1013_v12 = vld [vmem:[%s5518_s27 + $0x1848] sm:$0xff] }
  0x52   : > { %1643 = vmatpush.msrb.mxu0 %v752_v51  ;;  %1664 = vmatpush.msrb.mxu1 %v625_v54  ;;  %v631_v13 = vld [vmem:[%s5518_s27 + $0xc58] sm:$0xff]  ;;  %v502_v14 = vld [vmem:[%s5518_s27 + $0x850] sm:$0xff]  ;;  %v1012_v15 = vld [vmem:[%s5518_s27 + $0x1840] sm:$0xff] }
  0x53   : > { %1685 = vmatpush.msrb.mxu2 %v498_v48  ;;  %1705 = vmatpush.msrb.mxu3 %v499_v49  ;;  %v885_v16 = vld [vmem:[%s5518_s27 + $0x1448] sm:$0xff]  ;;  %v503_v17 = vld [vmem:[%s5518_s27 + $0x858] sm:$0xff]  ;;  %v374_v18 = vld [vmem:[%s5518_s27 + $0x450] sm:$0xff] }
  0x54   : > { %4861 = vmatmul.msk.f32.vlgmr.msra.gmra.mxu2 %vm1548_vm0, %v5588_v55  ;;  %4862 = vmatmul.msk.f32.vlgmr.msra.gmra.mxu3 %vm1548_vm0, %v5588_v55  ;;  %v884_v19 = vld [vmem:[%s5518_s27 + $0x1440] sm:$0xff]  ;;  %v757_v20 = vld [vmem:[%s5518_s27 + $0x1048] sm:$0xff]  ;;  %v375_v21 = vld [vmem:[%s5518_s27 + $0x458] sm:$0xff] }
  0x55   : > { %1686 = vmatpush.msrb.mxu2 %v370_v52  ;;  %1706 = vmatpush.msrb.mxu3 %v371_v53  ;;  %v246_v22 = vld [vmem:[%s5518_s27 + $0x50] sm:$0xff]  ;;  %v756_v23 = vld [vmem:[%s5518_s27 + $0x1040] sm:$0xff]  ;;  %v629_v24 = vld [vmem:[%s5518_s27 + $0xc48] sm:$0xff] }
  0x56   : > { %1644 = vmatpush.msrb.mxu0 %v624_v60  ;;  %1665 = vmatpush.msrb.mxu1 %v497_v61  ;;  %v247_v25 = vld [vmem:[%s5518_s27 + $0x58] sm:$0xff]  ;;  %v1146_v26 = vld [vmem:[%s5518_s27 + $0x1c70] sm:$0xff]  ;;  %v628_v28 = vld [vmem:[%s5518_s27 + $0xc40] sm:$0xff] }
  0x57   : > { %1687 = vmatpush.msrb.mxu2 %v242_v56  ;;  %1707 = vmatpush.msrb.mxu3 %v243_v57  ;;  %v1147_v27 = vld [vmem:[%s5518_s27 + $0x1c78] sm:$0xff]  ;;  %v501_v29 = vld [vmem:[%s5518_s27 + $0x848] sm:$0xff]  ;;  %v1018_v30 = vld [vmem:[%s5518_s27 + $0x1870] sm:$0xff] }
  0x58   : > { %1645 = vmatpush.msrb.mxu0 %v496_v0  ;;  %1666 = vmatpush.msrb.mxu1 %v369_v1  ;;  %v1019_v31 = vld [vmem:[%s5518_s27 + $0x1878] sm:$0xff]  ;;  %v500_v32 = vld [vmem:[%s5518_s27 + $0x840] sm:$0xff]  ;;  %v373_v33 = vld [vmem:[%s5518_s27 + $0x448] sm:$0xff] }
  0x59   : > { %1760 = vmatpush.msra.mxu2 %v1142_v58  ;;  %1780 = vmatpush.msra.mxu3 %v1143_v59  ;;  %v890_v34 = vld [vmem:[%s5518_s27 + $0x1470] sm:$0xff]  ;;  %v891_v35 = vld [vmem:[%s5518_s27 + $0x1478] sm:$0xff]  ;;  %v372_v36 = vld [vmem:[%s5518_s27 + $0x440] sm:$0xff] }
  0x5a   : > { %1646 = vmatpush.msrb.mxu0 %v368_v4  ;;  %1667 = vmatpush.msrb.mxu1 %v241_v5  ;;  %v245_v37 = vld [vmem:[%s5518_s27 + $0x48] sm:$0xff]  ;;  %v762_v38 = vld [vmem:[%s5518_s27 + $0x1070] sm:$0xff]  ;;  %v763_v39 = vld [vmem:[%s5518_s27 + $0x1078] sm:$0xff] }
  0x5b   : > { %1761 = vmatpush.msra.mxu2 %v1014_v62  ;;  %1781 = vmatpush.msra.mxu3 %v1015_v63  ;;  %v1145_v40 = vld [vmem:[%s5518_s27 + $0x1c68] sm:$0xff]  ;;  %v244_v41 = vld [vmem:[%s5518_s27 + $0x40] sm:$0xff]  ;;  %v634_v42 = vld [vmem:[%s5518_s27 + $0xc70] sm:$0xff] }
  0x5c   : > { %4860 = vmatmul.msk.f32.vlgmr.msra.gmra.mxu1 %vm1548_vm0, %v5588_v55  ;;  %1647 = vmatpush.msrb.mxu0 %v240_v9  ;;  %v1144_v43 = vld [vmem:[%s5518_s27 + $0x1c60] sm:$0xff]  ;;  %v1017_v44 = vld [vmem:[%s5518_s27 + $0x1868] sm:$0xff]  ;;  %v635_v45 = vld [vmem:[%s5518_s27 + $0xc78] sm:$0xff] }
  0x5d   : > { %1762 = vmatpush.msra.mxu2 %v886_v2  ;;  %1782 = vmatpush.msra.mxu3 %v887_v3  ;;  %v506_v46 = vld [vmem:[%s5518_s27 + $0x870] sm:$0xff]  ;;  %v1016_v47 = vld [vmem:[%s5518_s27 + $0x1860] sm:$0xff]  ;;  %v889_v48 = vld [vmem:[%s5518_s27 + $0x1468] sm:$0xff] }
  0x5e   : > { %1740 = vmatpush.msra.mxu1 %v1141_v8  ;;  %4859 = vmatmul.msk.f32.vlgmr.msra.gmra.mxu0 %vm1548_vm0, %v5588_v55  ;;  %v507_v49 = vld [vmem:[%s5518_s27 + $0x878] sm:$0xff]  ;;  %v378_v50 = vld [vmem:[%s5518_s27 + $0x470] sm:$0xff]  ;;  %v888_v51 = vld [vmem:[%s5518_s27 + $0x1460] sm:$0xff] }
  0x5f   : > { %1763 = vmatpush.msra.mxu2 %v758_v6  ;;  %1783 = vmatpush.msra.mxu3 %v759_v7  ;;  %v761_v52 = vld [vmem:[%s5518_s27 + $0x1068] sm:$0xff]  ;;  %v379_v53 = vld [vmem:[%s5518_s27 + $0x478] sm:$0xff]  ;;  %v250_v54 = vld [vmem:[%s5518_s27 + $0x70] sm:$0xff] }
  0x60   : > { %1720 = vmatpush.msra.mxu0 %v1140_v11  ;;  %1741 = vmatpush.msra.mxu1 %v1013_v12  ;;  %v760_v56 = vld [vmem:[%s5518_s27 + $0x1060] sm:$0xff]  ;;  %v633_v57 = vld [vmem:[%s5518_s27 + $0xc68] sm:$0xff]  ;;  %v251_v58 = vld [vmem:[%s5518_s27 + $0x78] sm:$0xff] }
  0x61   : > { %1764 = vmatpush.msra.mxu2 %v630_v10  ;;  %1784 = vmatpush.msra.mxu3 %v631_v13  ;;  %v1150_v59 = vld [vmem:[%s5518_s27 + $0x1c90] sm:$0xff]  ;;  %v1151_v60 = vld [vmem:[%s5518_s27 + $0x1c98] sm:$0xff]  ;;  %v632_v61 = vld [vmem:[%s5518_s27 + $0xc60] sm:$0xff] }
  0x62   : > { %1721 = vmatpush.msra.mxu0 %v1012_v15  ;;  %1742 = vmatpush.msra.mxu1 %v885_v16  ;;  %v505_v62 = vld [vmem:[%s5518_s27 + $0x868] sm:$0xff]  ;;  %v1022_v63 = vld [vmem:[%s5518_s27 + $0x1890] sm:$0xff]  ;;  %v1023_v0 = vld [vmem:[%s5518_s27 + $0x1898] sm:$0xff] }
  0x63   : > { %1765 = vmatpush.msra.mxu2 %v502_v14  ;;  %1785 = vmatpush.msra.mxu3 %v503_v17  ;;  %v504_v1 = vld [vmem:[%s5518_s27 + $0x860] sm:$0xff]  ;;  %v377_v2 = vld [vmem:[%s5518_s27 + $0x468] sm:$0xff]  ;;  %v894_v3 = vld [vmem:[%s5518_s27 + $0x1490] sm:$0xff] }
  0x64   : > { %1722 = vmatpush.msra.mxu0 %v884_v19  ;;  %1743 = vmatpush.msra.mxu1 %v757_v20  ;;  %v895_v4 = vld [vmem:[%s5518_s27 + $0x1498] sm:$0xff]  ;;  %v376_v5 = vld [vmem:[%s5518_s27 + $0x460] sm:$0xff]  ;;  %v249_v6 = vld [vmem:[%s5518_s27 + $0x68] sm:$0xff] }
  0x65   : > { %1766 = vmatpush.msra.mxu2 %v374_v18  ;;  %1786 = vmatpush.msra.mxu3 %v375_v21  ;;  %v766_v7 = vld [vmem:[%s5518_s27 + $0x1090] sm:$0xff]  ;;  %v767_v8 = vld [vmem:[%s5518_s27 + $0x1098] sm:$0xff]  ;;  %v1149_v9 = vld [vmem:[%s5518_s27 + $0x1c88] sm:$0xff] }
  0x66   : > { %1723 = vmatpush.msra.mxu0 %v756_v23  ;;  %1744 = vmatpush.msra.mxu1 %v629_v24  ;;  %v248_v10 = vld [vmem:[%s5518_s27 + $0x60] sm:$0xff]  ;;  %v638_v11 = vld [vmem:[%s5518_s27 + $0xc90] sm:$0xff]  ;;  %v1021_v13 = vld [vmem:[%s5518_s27 + $0x1888] sm:$0xff] }
  0x67   : > { %1767 = vmatpush.msra.mxu2 %v246_v22  ;;  %1787 = vmatpush.msra.mxu3 %v247_v25  ;;  %v1148_v12 = vld [vmem:[%s5518_s27 + $0x1c80] sm:$0xff]  ;;  %v639_v14 = vld [vmem:[%s5518_s27 + $0xc98] sm:$0xff]  ;;  %v510_v15 = vld [vmem:[%s5518_s27 + $0x890] sm:$0xff] }
  0x68   : > { %4865 = vmatmul.msk.f32.vlgmr.msrb.gmra.mxu2 %vm1548_vm0, %v5588_v55  ;;  %4866 = vmatmul.msk.f32.vlgmr.msrb.gmra.mxu3 %vm1548_vm0, %v5588_v55  ;;  %v1020_v16 = vld [vmem:[%s5518_s27 + $0x1880] sm:$0xff]  ;;  %v893_v17 = vld [vmem:[%s5518_s27 + $0x1488] sm:$0xff]  ;;  %v511_v18 = vld [vmem:[%s5518_s27 + $0x898] sm:$0xff] }
  0x69   : > { %1840 = vmatpush.msrb.mxu2 %v1146_v26  ;;  %1860 = vmatpush.msrb.mxu3 %v1147_v27  ;;  %v382_v19 = vld [vmem:[%s5518_s27 + $0x490] sm:$0xff]  ;;  %v892_v20 = vld [vmem:[%s5518_s27 + $0x1480] sm:$0xff]  ;;  %v765_v21 = vld [vmem:[%s5518_s27 + $0x1088] sm:$0xff] }
  0x6a   : > { %1724 = vmatpush.msra.mxu0 %v628_v28  ;;  %1745 = vmatpush.msra.mxu1 %v501_v29  ;;  %v383_v22 = vld [vmem:[%s5518_s27 + $0x498] sm:$0xff]  ;;  %v254_v23 = vld [vmem:[%s5518_s27 + $0x90] sm:$0xff]  ;;  %v764_v24 = vld [vmem:[%s5518_s27 + $0x1080] sm:$0xff] }
  0x6b   : > { %1841 = vmatpush.msrb.mxu2 %v1018_v30  ;;  %1861 = vmatpush.msrb.mxu3 %v1019_v31  ;;  %v637_v25 = vld [vmem:[%s5518_s27 + $0xc88] sm:$0xff]  ;;  %v255_v26 = vld [vmem:[%s5518_s27 + $0x98] sm:$0xff]  ;;  %v1154_v27 = vld [vmem:[%s5518_s27 + $0x1cb0] sm:$0xff] }
  0x6c   : > { %1725 = vmatpush.msra.mxu0 %v500_v32  ;;  %1746 = vmatpush.msra.mxu1 %v373_v33  ;;  %v1155_v28 = vld [vmem:[%s5518_s27 + $0x1cb8] sm:$0xff]  ;;  %v636_v29 = vld [vmem:[%s5518_s27 + $0xc80] sm:$0xff]  ;;  %v509_v30 = vld [vmem:[%s5518_s27 + $0x888] sm:$0xff] }
  0x6d   : > { %1842 = vmatpush.msrb.mxu2 %v890_v34  ;;  %1862 = vmatpush.msrb.mxu3 %v891_v35  ;;  %v1026_v31 = vld [vmem:[%s5518_s27 + $0x18b0] sm:$0xff]  ;;  %v1027_v32 = vld [vmem:[%s5518_s27 + $0x18b8] sm:$0xff]  ;;  %v508_v33 = vld [vmem:[%s5518_s27 + $0x880] sm:$0xff] }
  0x6e   : > { %1726 = vmatpush.msra.mxu0 %v372_v36  ;;  %1747 = vmatpush.msra.mxu1 %v245_v37  ;;  %v381_v34 = vld [vmem:[%s5518_s27 + $0x488] sm:$0xff]  ;;  %v898_v35 = vld [vmem:[%s5518_s27 + $0x14b0] sm:$0xff]  ;;  %v899_v36 = vld [vmem:[%s5518_s27 + $0x14b8] sm:$0xff] }
  0x6f   : > { %1843 = vmatpush.msrb.mxu2 %v762_v38  ;;  %4864 = vmatmul.msk.f32.vlgmr.msrb.gmra.mxu1 %vm1548_vm0, %v5588_v55  ;;  %v380_v37 = vld [vmem:[%s5518_s27 + $0x480] sm:$0xff]  ;;  %v253_v38 = vld [vmem:[%s5518_s27 + $0x88] sm:$0xff] }
  0x70   : > { %1863 = vmatpush.msrb.mxu3 %v763_v39  ;;  %1820 = vmatpush.msrb.mxu1 %v1145_v40  ;;  %v770_v39 = vld [vmem:[%s5518_s27 + $0x10b0] sm:$0xff]  ;;  %v771_v40 = vld [vmem:[%s5518_s27 + $0x10b8] sm:$0xff] }
  0x71   : > { %1727 = vmatpush.msra.mxu0 %v244_v41  ;;  %1844 = vmatpush.msrb.mxu2 %v634_v42  ;;  %v1153_v41 = vld [vmem:[%s5518_s27 + $0x1ca8] sm:$0xff]  ;;  %v252_v42 = vld [vmem:[%s5518_s27 + $0x80] sm:$0xff] }
  0x72   : > { %4863 = vmatmul.msk.f32.vlgmr.msrb.gmra.mxu0 %vm1548_vm0, %v5588_v55  ;;  %1821 = vmatpush.msrb.mxu1 %v1017_v44  ;;  %v1152_v44 = vld [vmem:[%s5518_s27 + $0x1ca0] sm:$0xff] }
  0x73   : > { %1800 = vmatpush.msrb.mxu0 %v1144_v43  ;;  %1864 = vmatpush.msrb.mxu3 %v635_v45  ;;  %v642_v43 = vld [vmem:[%s5518_s27 + $0xcb0] sm:$0xff]  ;;  %v1025_v45 = vld [vmem:[%s5518_s27 + $0x18a8] sm:$0xff] }
  0x74   : > { %1845 = vmatpush.msrb.mxu2 %v506_v46  ;;  %1822 = vmatpush.msrb.mxu1 %v889_v48  ;;  %v643_v46 = vld [vmem:[%s5518_s27 + $0xcb8] sm:$0xff]  ;;  %v1024_v48 = vld [vmem:[%s5518_s27 + $0x18a0] sm:$0xff] }
  0x75   : > { %1801 = vmatpush.msrb.mxu0 %v1016_v47  ;;  %1865 = vmatpush.msrb.mxu3 %v507_v49  ;;  %v514_v47 = vld [vmem:[%s5518_s27 + $0x8b0] sm:$0xff]  ;;  %v897_v49 = vld [vmem:[%s5518_s27 + $0x14a8] sm:$0xff] }
  0x76   : > { %1846 = vmatpush.msrb.mxu2 %v378_v50  ;;  %1823 = vmatpush.msrb.mxu1 %v761_v52  ;;  %v515_v50 = vld [vmem:[%s5518_s27 + $0x8b8] sm:$0xff]  ;;  %v896_v52 = vld [vmem:[%s5518_s27 + $0x14a0] sm:$0xff] }
  0x77   : > { %1802 = vmatpush.msrb.mxu0 %v888_v51  ;;  %1866 = vmatpush.msrb.mxu3 %v379_v53  ;;  %v386_v51 = vld [vmem:[%s5518_s27 + $0x4b0] sm:$0xff]  ;;  %v769_v53 = vld [vmem:[%s5518_s27 + $0x10a8] sm:$0xff] }
  0x78   : > { %1847 = vmatpush.msrb.mxu2 %v250_v54  ;;  %1824 = vmatpush.msrb.mxu1 %v633_v57  ;;  %v387_v54 = vld [vmem:[%s5518_s27 + $0x4b8] sm:$0xff]  ;;  %v768_v57 = vld [vmem:[%s5518_s27 + $0x10a0] sm:$0xff] }
  0x79   : > { %1803 = vmatpush.msrb.mxu0 %v760_v56  ;;  %1867 = vmatpush.msrb.mxu3 %v251_v58  ;;  %v258_v56 = vld [vmem:[%s5518_s27 + $0xb0] sm:$0xff]  ;;  %v641_v58 = vld [vmem:[%s5518_s27 + $0xca8] sm:$0xff] }
  0x7a   : > { %4869 = vmatmul.msk.f32.vlgmr.msra.gmra.mxu2 %vm1548_vm0, %v5588_v55  ;;  %4870 = vmatmul.msk.f32.vlgmr.msra.gmra.mxu3 %vm1548_vm0, %v5588_v55 }
  0x7b   : > { %1920 = vmatpush.msra.mxu2 %v1150_v59  ;;  %1940 = vmatpush.msra.mxu3 %v1151_v60  ;;  %v259_v59 = vld [vmem:[%s5518_s27 + $0xb8] sm:$0xff]  ;;  %v1158_v60 = vld [vmem:[%s5518_s27 + $0x1cd0] sm:$0xff] }
  0x7c   : > { %1804 = vmatpush.msrb.mxu0 %v632_v61  ;;  %1825 = vmatpush.msrb.mxu1 %v505_v62  ;;  %v1159_v61 = vld [vmem:[%s5518_s27 + $0x1cd8] sm:$0xff]  ;;  %v640_v62 = vld [vmem:[%s5518_s27 + $0xca0] sm:$0xff] }
  0x7d   : > { %1921 = vmatpush.msra.mxu2 %v1022_v63  ;;  %1941 = vmatpush.msra.mxu3 %v1023_v0  ;;  %v513_v63 = vld [vmem:[%s5518_s27 + $0x8a8] sm:$0xff]  ;;  %v1030_v0 = vld [vmem:[%s5518_s27 + $0x18d0] sm:$0xff] }
  0x7e   : > { %1805 = vmatpush.msrb.mxu0 %v504_v1  ;;  %1826 = vmatpush.msrb.mxu1 %v377_v2  ;;  %v1031_v1 = vld [vmem:[%s5518_s27 + $0x18d8] sm:$0xff]  ;;  %v512_v2 = vld [vmem:[%s5518_s27 + $0x8a0] sm:$0xff] }
  0x7f   : > { %1922 = vmatpush.msra.mxu2 %v894_v3  ;;  %1942 = vmatpush.msra.mxu3 %v895_v4  ;;  %v385_v3 = vld [vmem:[%s5518_s27 + $0x4a8] sm:$0xff]  ;;  %v902_v4 = vld [vmem:[%s5518_s27 + $0x14d0] sm:$0xff] }
  0x80   : > { %1806 = vmatpush.msrb.mxu0 %v376_v5  ;;  %1827 = vmatpush.msrb.mxu1 %v249_v6  ;;  %v903_v5 = vld [vmem:[%s5518_s27 + $0x14d8] sm:$0xff]  ;;  %v384_v6 = vld [vmem:[%s5518_s27 + $0x4a0] sm:$0xff] }
  0x81   : > { %1923 = vmatpush.msra.mxu2 %v766_v7  ;;  %4868 = vmatmul.msk.f32.vlgmr.msra.gmra.mxu1 %vm1548_vm0, %v5588_v55  ;;  %v257_v7 = vld [vmem:[%s5518_s27 + $0xa8] sm:$0xff] }
  0x82   : > { %1943 = vmatpush.msra.mxu3 %v767_v8  ;;  %1900 = vmatpush.msra.mxu1 %v1149_v9  ;;  %v774_v8 = vld [vmem:[%s5518_s27 + $0x10d0] sm:$0xff]  ;;  %v775_v9 = vld [vmem:[%s5518_s27 + $0x10d8] sm:$0xff] }
  0x83   : > { %1807 = vmatpush.msrb.mxu0 %v248_v10  ;;  %1924 = vmatpush.msra.mxu2 %v638_v11  ;;  %v1157_v10 = vld [vmem:[%s5518_s27 + $0x1cc8] sm:$0xff]  ;;  %v256_v11 = vld [vmem:[%s5518_s27 + $0xa0] sm:$0xff] }
  0x84   : > { %4867 = vmatmul.msk.f32.vlgmr.msra.gmra.mxu0 %vm1548_vm0, %v5588_v55  ;;  %1901 = vmatpush.msra.mxu1 %v1021_v13  ;;  %v1156_v13 = vld [vmem:[%s5518_s27 + $0x1cc0] sm:$0xff] }
  0x85   : > { %1880 = vmatpush.msra.mxu0 %v1148_v12  ;;  %1944 = vmatpush.msra.mxu3 %v639_v14  ;;  %v646_v12 = vld [vmem:[%s5518_s27 + $0xcd0] sm:$0xff]  ;;  %v1029_v14 = vld [vmem:[%s5518_s27 + $0x18c8] sm:$0xff] }
  0x86   : > { %1925 = vmatpush.msra.mxu2 %v510_v15  ;;  %1902 = vmatpush.msra.mxu1 %v893_v17  ;;  %v647_v15 = vld [vmem:[%s5518_s27 + $0xcd8] sm:$0xff]  ;;  %v1028_v17 = vld [vmem:[%s5518_s27 + $0x18c0] sm:$0xff] }
  0x87   : > { %1881 = vmatpush.msra.mxu0 %v1020_v16  ;;  %1945 = vmatpush.msra.mxu3 %v511_v18  ;;  %v518_v16 = vld [vmem:[%s5518_s27 + $0x8d0] sm:$0xff]  ;;  %v901_v18 = vld [vmem:[%s5518_s27 + $0x14c8] sm:$0xff] }
  0x88   : > { %1926 = vmatpush.msra.mxu2 %v382_v19  ;;  %1903 = vmatpush.msra.mxu1 %v765_v21  ;;  %v519_v19 = vld [vmem:[%s5518_s27 + $0x8d8] sm:$0xff]  ;;  %v900_v21 = vld [vmem:[%s5518_s27 + $0x14c0] sm:$0xff] }
  0x89   : > { %1882 = vmatpush.msra.mxu0 %v892_v20  ;;  %1946 = vmatpush.msra.mxu3 %v383_v22  ;;  %v390_v20 = vld [vmem:[%s5518_s27 + $0x4d0] sm:$0xff]  ;;  %v773_v22 = vld [vmem:[%s5518_s27 + $0x10c8] sm:$0xff] }
  0x8a   : > { %1927 = vmatpush.msra.mxu2 %v254_v23  ;;  %1904 = vmatpush.msra.mxu1 %v637_v25  ;;  %v391_v23 = vld [vmem:[%s5518_s27 + $0x4d8] sm:$0xff]  ;;  %v772_v25 = vld [vmem:[%s5518_s27 + $0x10c0] sm:$0xff] }
  0x8b   : > { %1883 = vmatpush.msra.mxu0 %v764_v24  ;;  %1947 = vmatpush.msra.mxu3 %v255_v26  ;;  %v262_v24 = vld [vmem:[%s5518_s27 + $0xd0] sm:$0xff]  ;;  %v645_v26 = vld [vmem:[%s5518_s27 + $0xcc8] sm:$0xff] }
  0x8c   : > { %4873 = vmatmul.msk.f32.vlgmr.msrb.gmra.mxu2 %vm1548_vm0, %v5588_v55  ;;  %4874 = vmatmul.msk.f32.vlgmr.msrb.gmra.mxu3 %vm1548_vm0, %v5588_v55 }
  0x8d   : > { %2000 = vmatpush.msrb.mxu2 %v1154_v27  ;;  %2020 = vmatpush.msrb.mxu3 %v1155_v28  ;;  %v263_v27 = vld [vmem:[%s5518_s27 + $0xd8] sm:$0xff]  ;;  %v1162_v28 = vld [vmem:[%s5518_s27 + $0x1cf0] sm:$0xff] }
  0x8e   : > { %1884 = vmatpush.msra.mxu0 %v636_v29  ;;  %1905 = vmatpush.msra.mxu1 %v509_v30  ;;  %v1163_v29 = vld [vmem:[%s5518_s27 + $0x1cf8] sm:$0xff]  ;;  %v644_v30 = vld [vmem:[%s5518_s27 + $0xcc0] sm:$0xff] }
  0x8f   : > { %2001 = vmatpush.msrb.mxu2 %v1026_v31  ;;  %2021 = vmatpush.msrb.mxu3 %v1027_v32  ;;  %v517_v31 = vld [vmem:[%s5518_s27 + $0x8c8] sm:$0xff]  ;;  %v1034_v32 = vld [vmem:[%s5518_s27 + $0x18f0] sm:$0xff] }
  0x90   : > { %1885 = vmatpush.msra.mxu0 %v508_v33  ;;  %1906 = vmatpush.msra.mxu1 %v381_v34  ;;  %v1035_v33 = vld [vmem:[%s5518_s27 + $0x18f8] sm:$0xff]  ;;  %v516_v34 = vld [vmem:[%s5518_s27 + $0x8c0] sm:$0xff] }
  0x91   : > { %2002 = vmatpush.msrb.mxu2 %v898_v35  ;;  %2022 = vmatpush.msrb.mxu3 %v899_v36  ;;  %v389_v35 = vld [vmem:[%s5518_s27 + $0x4c8] sm:$0xff]  ;;  %v906_v36 = vld [vmem:[%s5518_s27 + $0x14f0] sm:$0xff] }
  0x92   : > { %1886 = vmatpush.msra.mxu0 %v380_v37  ;;  %1907 = vmatpush.msra.mxu1 %v253_v38  ;;  %v907_v37 = vld [vmem:[%s5518_s27 + $0x14f8] sm:$0xff]  ;;  %v388_v38 = vld [vmem:[%s5518_s27 + $0x4c0] sm:$0xff] }
  0x93   : > { %2003 = vmatpush.msrb.mxu2 %v770_v39  ;;  %4872 = vmatmul.msk.f32.vlgmr.msrb.gmra.mxu1 %vm1548_vm0, %v5588_v55  ;;  %v261_v39 = vld [vmem:[%s5518_s27 + $0xc8] sm:$0xff] }
  0x94   : > { %2023 = vmatpush.msrb.mxu3 %v771_v40  ;;  %1980 = vmatpush.msrb.mxu1 %v1153_v41  ;;  %v778_v40 = vld [vmem:[%s5518_s27 + $0x10f0] sm:$0xff]  ;;  %v779_v41 = vld [vmem:[%s5518_s27 + $0x10f8] sm:$0xff] }
  0x95   : > { %1887 = vmatpush.msra.mxu0 %v252_v42  ;;  %2004 = vmatpush.msrb.mxu2 %v642_v43  ;;  %v1161_v42 = vld [vmem:[%s5518_s27 + $0x1ce8] sm:$0xff]  ;;  %v260_v43 = vld [vmem:[%s5518_s27 + $0xc0] sm:$0xff] }
  0x96   : > { %4871 = vmatmul.msk.f32.vlgmr.msrb.gmra.mxu0 %vm1548_vm0, %v5588_v55  ;;  %1981 = vmatpush.msrb.mxu1 %v1025_v45  ;;  %v1160_v45 = vld [vmem:[%s5518_s27 + $0x1ce0] sm:$0xff] }
  0x97   : > { %1960 = vmatpush.msrb.mxu0 %v1152_v44  ;;  %2024 = vmatpush.msrb.mxu3 %v643_v46  ;;  %v650_v44 = vld [vmem:[%s5518_s27 + $0xcf0] sm:$0xff]  ;;  %v1033_v46 = vld [vmem:[%s5518_s27 + $0x18e8] sm:$0xff] }
  0x98   : > { %2005 = vmatpush.msrb.mxu2 %v514_v47  ;;  %1982 = vmatpush.msrb.mxu1 %v897_v49  ;;  %v651_v47 = vld [vmem:[%s5518_s27 + $0xcf8] sm:$0xff]  ;;  %v1032_v49 = vld [vmem:[%s5518_s27 + $0x18e0] sm:$0xff] }
  0x99   : > { %1961 = vmatpush.msrb.mxu0 %v1024_v48  ;;  %2025 = vmatpush.msrb.mxu3 %v515_v50  ;;  %v522_v48 = vld [vmem:[%s5518_s27 + $0x8f0] sm:$0xff]  ;;  %v905_v50 = vld [vmem:[%s5518_s27 + $0x14e8] sm:$0xff] }
  0x9a   : > { %2006 = vmatpush.msrb.mxu2 %v386_v51  ;;  %1983 = vmatpush.msrb.mxu1 %v769_v53  ;;  %v523_v51 = vld [vmem:[%s5518_s27 + $0x8f8] sm:$0xff]  ;;  %v904_v53 = vld [vmem:[%s5518_s27 + $0x14e0] sm:$0xff] }
  0x9b   : > { %1962 = vmatpush.msrb.mxu0 %v896_v52  ;;  %2026 = vmatpush.msrb.mxu3 %v387_v54  ;;  %v394_v52 = vld [vmem:[%s5518_s27 + $0x4f0] sm:$0xff]  ;;  %v777_v54 = vld [vmem:[%s5518_s27 + $0x10e8] sm:$0xff] }
  0x9c   : > { %2007 = vmatpush.msrb.mxu2 %v258_v56  ;;  %1984 = vmatpush.msrb.mxu1 %v641_v58  ;;  %v395_v56 = vld [vmem:[%s5518_s27 + $0x4f8] sm:$0xff]  ;;  %v776_v58 = vld [vmem:[%s5518_s27 + $0x10e0] sm:$0xff] }
  0x9d   : > { %1963 = vmatpush.msrb.mxu0 %v768_v57  ;;  %2027 = vmatpush.msrb.mxu3 %v259_v59  ;;  %v266_v57 = vld [vmem:[%s5518_s27 + $0xf0] sm:$0xff]  ;;  %v649_v59 = vld [vmem:[%s5518_s27 + $0xce8] sm:$0xff] }
  0x9e   : > { %4877 = vmatmul.msk.f32.vlgmr.msra.gmra.mxu2 %vm1548_vm0, %v5588_v55  ;;  %4878 = vmatmul.msk.f32.vlgmr.msra.gmra.mxu3 %vm1548_vm0, %v5588_v55 }
  0x9f   : > { %2080 = vmatpush.msra.mxu2 %v1158_v60  ;;  %2100 = vmatpush.msra.mxu3 %v1159_v61  ;;  %v267_v60 = vld [vmem:[%s5518_s27 + $0xf8] sm:$0xff]  ;;  %v1166_v61 = vld [vmem:[%s5518_s27 + $0x1d10] sm:$0xff] }
  0xa0   : > { %1964 = vmatpush.msrb.mxu0 %v640_v62  ;;  %1985 = vmatpush.msrb.mxu1 %v513_v63  ;;  %v1167_v62 = vld [vmem:[%s5518_s27 + $0x1d18] sm:$0xff]  ;;  %v648_v63 = vld [vmem:[%s5518_s27 + $0xce0] sm:$0xff] }
  0xa1   : > { %2081 = vmatpush.msra.mxu2 %v1030_v0  ;;  %2101 = vmatpush.msra.mxu3 %v1031_v1  ;;  %v521_v0 = vld [vmem:[%s5518_s27 + $0x8e8] sm:$0xff]  ;;  %v1038_v1 = vld [vmem:[%s5518_s27 + $0x1910] sm:$0xff] }
  0xa2   : > { %1965 = vmatpush.msrb.mxu0 %v512_v2  ;;  %1986 = vmatpush.msrb.mxu1 %v385_v3  ;;  %v1039_v2 = vld [vmem:[%s5518_s27 + $0x1918] sm:$0xff]  ;;  %v520_v3 = vld [vmem:[%s5518_s27 + $0x8e0] sm:$0xff] }
  0xa3   : > { %2082 = vmatpush.msra.mxu2 %v902_v4  ;;  %2102 = vmatpush.msra.mxu3 %v903_v5  ;;  %v393_v4 = vld [vmem:[%s5518_s27 + $0x4e8] sm:$0xff]  ;;  %v910_v5 = vld [vmem:[%s5518_s27 + $0x1510] sm:$0xff] }
  0xa4   : > { %1966 = vmatpush.msrb.mxu0 %v384_v6  ;;  %1987 = vmatpush.msrb.mxu1 %v257_v7  ;;  %v911_v6 = vld [vmem:[%s5518_s27 + $0x1518] sm:$0xff]  ;;  %v392_v7 = vld [vmem:[%s5518_s27 + $0x4e0] sm:$0xff] }
  0xa5   : > { %2083 = vmatpush.msra.mxu2 %v774_v8  ;;  %4876 = vmatmul.msk.f32.vlgmr.msra.gmra.mxu1 %vm1548_vm0, %v5588_v55  ;;  %v265_v8 = vld [vmem:[%s5518_s27 + $0xe8] sm:$0xff] }
  0xa6   : > { %2103 = vmatpush.msra.mxu3 %v775_v9  ;;  %2060 = vmatpush.msra.mxu1 %v1157_v10  ;;  %v782_v9 = vld [vmem:[%s5518_s27 + $0x1110] sm:$0xff]  ;;  %v783_v10 = vld [vmem:[%s5518_s27 + $0x1118] sm:$0xff] }
  0xa7   : > { %1967 = vmatpush.msrb.mxu0 %v256_v11  ;;  %2084 = vmatpush.msra.mxu2 %v646_v12  ;;  %v1165_v11 = vld [vmem:[%s5518_s27 + $0x1d08] sm:$0xff]  ;;  %v264_v12 = vld [vmem:[%s5518_s27 + $0xe0] sm:$0xff] }
  0xa8   : > { %4875 = vmatmul.msk.f32.vlgmr.msra.gmra.mxu0 %vm1548_vm0, %v5588_v55  ;;  %2061 = vmatpush.msra.mxu1 %v1029_v14  ;;  %v1164_v14 = vld [vmem:[%s5518_s27 + $0x1d00] sm:$0xff] }
  0xa9   : > { %2040 = vmatpush.msra.mxu0 %v1156_v13  ;;  %2104 = vmatpush.msra.mxu3 %v647_v15  ;;  %v654_v13 = vld [vmem:[%s5518_s27 + $0xd10] sm:$0xff]  ;;  %v1037_v15 = vld [vmem:[%s5518_s27 + $0x1908] sm:$0xff] }
  0xaa   : > { %2085 = vmatpush.msra.mxu2 %v518_v16  ;;  %2062 = vmatpush.msra.mxu1 %v901_v18  ;;  %v655_v16 = vld [vmem:[%s5518_s27 + $0xd18] sm:$0xff]  ;;  %v1036_v18 = vld [vmem:[%s5518_s27 + $0x1900] sm:$0xff] }
  0xab   : > { %2041 = vmatpush.msra.mxu0 %v1028_v17  ;;  %2105 = vmatpush.msra.mxu3 %v519_v19  ;;  %v526_v17 = vld [vmem:[%s5518_s27 + $0x910] sm:$0xff]  ;;  %v909_v19 = vld [vmem:[%s5518_s27 + $0x1508] sm:$0xff] }
  0xac   : > { %2086 = vmatpush.msra.mxu2 %v390_v20  ;;  %2063 = vmatpush.msra.mxu1 %v773_v22  ;;  %v527_v20 = vld [vmem:[%s5518_s27 + $0x918] sm:$0xff]  ;;  %v908_v22 = vld [vmem:[%s5518_s27 + $0x1500] sm:$0xff] }
  0xad   : > { %2042 = vmatpush.msra.mxu0 %v900_v21  ;;  %2106 = vmatpush.msra.mxu3 %v391_v23  ;;  %v398_v21 = vld [vmem:[%s5518_s27 + $0x510] sm:$0xff]  ;;  %v781_v23 = vld [vmem:[%s5518_s27 + $0x1108] sm:$0xff] }
  0xae   : > { %2087 = vmatpush.msra.mxu2 %v262_v24  ;;  %2064 = vmatpush.msra.mxu1 %v645_v26  ;;  %v399_v24 = vld [vmem:[%s5518_s27 + $0x518] sm:$0xff]  ;;  %v780_v26 = vld [vmem:[%s5518_s27 + $0x1100] sm:$0xff] }
  0xaf   : > { %2043 = vmatpush.msra.mxu0 %v772_v25  ;;  %2107 = vmatpush.msra.mxu3 %v263_v27  ;;  %v270_v25 = vld [vmem:[%s5518_s27 + $0x110] sm:$0xff]  ;;  %v653_v27 = vld [vmem:[%s5518_s27 + $0xd08] sm:$0xff] }
  0xb0   : > { %4881 = vmatmul.msk.f32.vlgmr.msrb.gmra.mxu2 %vm1548_vm0, %v5588_v55  ;;  %4882 = vmatmul.msk.f32.vlgmr.msrb.gmra.mxu3 %vm1548_vm0, %v5588_v55 }
  0xb1   : > { %2160 = vmatpush.msrb.mxu2 %v1162_v28  ;;  %2180 = vmatpush.msrb.mxu3 %v1163_v29  ;;  %v271_v28 = vld [vmem:[%s5518_s27 + $0x118] sm:$0xff]  ;;  %v1170_v29 = vld [vmem:[%s5518_s27 + $0x1d30] sm:$0xff] }
  0xb2   : > { %2044 = vmatpush.msra.mxu0 %v644_v30  ;;  %2065 = vmatpush.msra.mxu1 %v517_v31  ;;  %v1171_v30 = vld [vmem:[%s5518_s27 + $0x1d38] sm:$0xff]  ;;  %v652_v31 = vld [vmem:[%s5518_s27 + $0xd00] sm:$0xff] }
  0xb3   : > { %2161 = vmatpush.msrb.mxu2 %v1034_v32  ;;  %2181 = vmatpush.msrb.mxu3 %v1035_v33  ;;  %v525_v32 = vld [vmem:[%s5518_s27 + $0x908] sm:$0xff]  ;;  %v1042_v33 = vld [vmem:[%s5518_s27 + $0x1930] sm:$0xff] }
  0xb4   : > { %2045 = vmatpush.msra.mxu0 %v516_v34  ;;  %2066 = vmatpush.msra.mxu1 %v389_v35  ;;  %v5880_v34 = vld [vmem:[%s5524_s5] sm:$0xff]  ;;  %v1043_v35 = vld [vmem:[%s5518_s27 + $0x1938] sm:$0xff] }
  0xb5   : > { %2162 = vmatpush.msrb.mxu2 %v906_v36  ;;  %2182 = vmatpush.msrb.mxu3 %v907_v37  ;;  %v524_v36 = vld [vmem:[%s5518_s27 + $0x900] sm:$0xff]  ;;  %v1294_v37 = vperm.slane %v5880_v34, 2 }
  0xb6   : > { %2046 = vmatpush.msra.mxu0 %v388_v38  ;;  %2067 = vmatpush.msra.mxu1 %v261_v39  ;;  %v397_v38 = vld [vmem:[%s5518_s27 + $0x508] sm:$0xff]  ;;  %v914_v39 = vld [vmem:[%s5518_s27 + $0x1530] sm:$0xff] }
  0xb7   : > { %2163 = vmatpush.msrb.mxu2 %v778_v40  ;;  %4880 = vmatmul.msk.f32.vlgmr.msrb.gmra.mxu1 %vm1548_vm0, %v5588_v55  ;;  %v915_v40 = vld [vmem:[%s5518_s27 + $0x1538] sm:$0xff] }
  0xb8   : > { %2183 = vmatpush.msrb.mxu3 %v779_v41  ;;  %2140 = vmatpush.msrb.mxu1 %v1161_v42  ;;  %v396_v41 = vld [vmem:[%s5518_s27 + $0x500] sm:$0xff]  ;;  %v269_v42 = vld [vmem:[%s5518_s27 + $0x108] sm:$0xff] }
  0xb9   : > { %2047 = vmatpush.msra.mxu0 %v260_v43  ;;  %2164 = vmatpush.msrb.mxu2 %v650_v44  ;;  %v786_v43 = vld [vmem:[%s5518_s27 + $0x1130] sm:$0xff]  ;;  %v1293_v44 = vperm.slane %v5880_v34, 1 }
  0xba   : > { %4879 = vmatmul.msk.f32.vlgmr.msrb.gmra.mxu0 %vm1548_vm0, %v5588_v55  ;;  %2141 = vmatpush.msrb.mxu1 %v1033_v46  ;;  %v787_v46 = vld [vmem:[%s5518_s27 + $0x1138] sm:$0xff] }
  0xbb   : > { %2120 = vmatpush.msrb.mxu0 %v1160_v45  ;;  %2184 = vmatpush.msrb.mxu3 %v651_v47 }
  0xbc   : > { %2165 = vmatpush.msrb.mxu2 %v522_v48  ;;  %2142 = vmatpush.msrb.mxu1 %v905_v50  ;;  %v1169_v48 = vld [vmem:[%s5518_s27 + $0x1d28] sm:$0xff] }
  0xbd   : > { %2121 = vmatpush.msrb.mxu0 %v1032_v49  ;;  %2185 = vmatpush.msrb.mxu3 %v523_v51  ;;  %v268_v49 = vld [vmem:[%s5518_s27 + $0x100] sm:$0xff]  ;;  %v1292_v51 = vperm.slane %v5880_v34, 0 }
  0xbe   : > { %2166 = vmatpush.msrb.mxu2 %v394_v52  ;;  %2143 = vmatpush.msrb.mxu1 %v777_v54  ;;  %v658_v52 = vld [vmem:[%s5518_s27 + $0xd30] sm:$0xff] }
  0xbf   : > { %2122 = vmatpush.msrb.mxu0 %v904_v53  ;;  %2186 = vmatpush.msrb.mxu3 %v395_v56 }
  0xc0   : > { %2167 = vmatpush.msrb.mxu2 %v266_v57  ;;  %2144 = vmatpush.msrb.mxu1 %v649_v59  ;;  %v5907_v57 = vld [vmem:[%s7133_s0] sm:$0x3]  ;;  %v1041_v59 = vld [vmem:[%s5518_s27 + $0x1928] sm:$0xff] }
  0xc1   : > { %2123 = vmatpush.msrb.mxu0 %v776_v58  ;;  %2187 = vmatpush.msrb.mxu3 %v267_v60  ;;  %v1168_v58 = vld [vmem:[%s5518_s27 + $0x1d20] sm:$0xff] }
  0xc2   : > { %4885 = vmatmul.msk.f32.vlgmr.msra.gmra.mxu2 %vm1548_vm0, %v5588_v55  ;;  %4886 = vmatmul.msk.f32.vlgmr.msra.gmra.mxu3 %vm1548_vm0, %v5588_v55 }
  0xc3   : > { %2240 = vmatpush.msra.mxu2 %v1166_v61  ;;  %2260 = vmatpush.msra.mxu3 %v1167_v62  ;;  %v659_v61 = vld [vmem:[%s5518_s27 + $0xd38] sm:$0xff]  ;;  %v530_v62 = vld [vmem:[%s5518_s27 + $0x930] sm:$0xff] }
  0xc4   : > { %2124 = vmatpush.msrb.mxu0 %v648_v63  ;;  %2145 = vmatpush.msrb.mxu1 %v521_v0 }
  0xc5   : > { %2241 = vmatpush.msra.mxu2 %v1038_v1  ;;  %2261 = vmatpush.msra.mxu3 %v1039_v2  ;;  %v1040_v1 = vld [vmem:[%s5518_s27 + $0x1920] sm:$0xff]  ;;  %v913_v2 = vld [vmem:[%s5518_s27 + $0x1528] sm:$0xff] }
  0xc6   : > { %2125 = vmatpush.msrb.mxu0 %v520_v3  ;;  %2146 = vmatpush.msrb.mxu1 %v393_v4 }
  0xc7   : > { %2242 = vmatpush.msra.mxu2 %v910_v5  ;;  %2262 = vmatpush.msra.mxu3 %v911_v6  ;;  %v531_v5 = vld [vmem:[%s5518_s27 + $0x938] sm:$0xff]  ;;  %v402_v6 = vld [vmem:[%s5518_s27 + $0x530] sm:$0xff] }
  0xc8   : > { %2126 = vmatpush.msrb.mxu0 %v392_v7  ;;  %2147 = vmatpush.msrb.mxu1 %v265_v8  ;;  %v912_v7 = vld [vmem:[%s5518_s27 + $0x1520] sm:$0xff]  ;;  %v785_v8 = vld [vmem:[%s5518_s27 + $0x1128] sm:$0xff] }
  0xc9   : > { %2243 = vmatpush.msra.mxu2 %v782_v9  ;;  %4884 = vmatmul.msk.f32.vlgmr.msra.gmra.mxu1 %vm1548_vm0, %v5588_v55 }
  0xca   : > { %2263 = vmatpush.msra.mxu3 %v783_v10  ;;  %2220 = vmatpush.msra.mxu1 %v1165_v11  ;;  %v403_v10 = vld [vmem:[%s5518_s27 + $0x538] sm:$0xff]  ;;  %v274_v11 = vld [vmem:[%s5518_s27 + $0x130] sm:$0xff] }
  0xcb   : > { %2127 = vmatpush.msrb.mxu0 %v264_v12  ;;  %2244 = vmatpush.msra.mxu2 %v654_v13  ;;  %v784_v12 = vld [vmem:[%s5518_s27 + $0x1120] sm:$0xff]  ;;  %v657_v13 = vld [vmem:[%s5518_s27 + $0xd28] sm:$0xff] }
  0xcc   : > { %4883 = vmatmul.msk.f32.vlgmr.msra.gmra.mxu0 %vm1548_vm0, %v5588_v55  ;;  %2221 = vmatpush.msra.mxu1 %v1037_v15  ;;  %v275_v15 = vld [vmem:[%s5518_s27 + $0x138] sm:$0xff] }
  0xcd   : > { %2200 = vmatpush.msra.mxu0 %v1164_v14  ;;  %2264 = vmatpush.msra.mxu3 %v655_v16  ;;  %v1174_v16 = vld [vmem:[%s5518_s27 + $0x1d50] sm:$0xff] }
  0xce   : > { %2245 = vmatpush.msra.mxu2 %v526_v17  ;;  %2222 = vmatpush.msra.mxu1 %v909_v19  ;;  %v1175_v19 = vld [vmem:[%s5518_s27 + $0x1d58] sm:$0xff] }
  0xcf   : > { %2201 = vmatpush.msra.mxu0 %v1036_v18  ;;  %2265 = vmatpush.msra.mxu3 %v527_v20  ;;  %v656_v20 = vld [vmem:[%s5518_s27 + $0xd20] sm:$0xff] }
  0xd0   : > { %2246 = vmatpush.msra.mxu2 %v398_v21  ;;  %2223 = vmatpush.msra.mxu1 %v781_v23  ;;  %v1046_v23 = vld [vmem:[%s5518_s27 + $0x1950] sm:$0xff] }
  0xd1   : > { %2202 = vmatpush.msra.mxu0 %v908_v22  ;;  %2266 = vmatpush.msra.mxu3 %v399_v24  ;;  %v529_v22 = vld [vmem:[%s5518_s27 + $0x928] sm:$0xff] }
  0xd2   : > { %2247 = vmatpush.msra.mxu2 %v270_v25  ;;  %2224 = vmatpush.msra.mxu1 %v653_v27  ;;  %v1047_v25 = vld [vmem:[%s5518_s27 + $0x1958] sm:$0xff] }
  0xd3   : > { %2203 = vmatpush.msra.mxu0 %v780_v26  ;;  %2267 = vmatpush.msra.mxu3 %v271_v28  ;;  %v528_v26 = vld [vmem:[%s5518_s27 + $0x920] sm:$0xff] }
  0xd4   : > { %4889 = vmatmul.msk.f32.vlgmr.msrb.gmra.mxu2 %vm1548_vm0, %v5588_v55  ;;  %4890 = vmatmul.msk.f32.vlgmr.msrb.gmra.mxu3 %vm1548_vm0, %v5588_v55  ;;  %v1295_v55 = vperm.slane %v5880_v34, 3 }
  0xd5   : > { %2320 = vmatpush.msrb.mxu2 %v1170_v29  ;;  %2340 = vmatpush.msrb.mxu3 %v1171_v30  ;;  %v401_v29 = vld [vmem:[%s5518_s27 + $0x528] sm:$0xff]  ;;  %v918_v30 = vld [vmem:[%s5518_s27 + $0x1550] sm:$0xff] }
  0xd6   : > { %2204 = vmatpush.msra.mxu0 %v652_v31  ;;  %2225 = vmatpush.msra.mxu1 %v525_v32  ;;  %v1298_v32 = vperm.slane %v5880_v34, 6 }
  0xd7   : > { %2321 = vmatpush.msrb.mxu2 %v1042_v33  ;;  %2341 = vmatpush.msrb.mxu3 %v1043_v35  ;;  %v1609_v45 = vpop.f32.mrf.mxu2  ;;  %v1629_v50 = vpop.f32.mrf.mxu3  ;;  %v919_v33 = vld [vmem:[%s5518_s27 + $0x1558] sm:$0xff]  ;;  %v400_v35 = vld [vmem:[%s5518_s27 + $0x520] sm:$0xff] }
  0xd8   : > { %2205 = vmatpush.msra.mxu0 %v524_v36  ;;  %2226 = vmatpush.msra.mxu1 %v397_v38  ;;  %v1610_v47 = vadd.f32 %v1609_v45, %v1294_v37  ;;  %v1630_v56 = vadd.f32 %v1629_v50, %v1295_v55  ;;  %v1299_v37 = vperm.slane %v5880_v34, 7  ;;  %v273_v38 = vld [vmem:[%s5518_s27 + $0x128] sm:$0xff]  ;;  %v791_v55 = vld [vmem:[%s5518_s27 + $0x1158] sm:$0xff] }
  0xd9   : > { %2322 = vmatpush.msrb.mxu2 %v914_v39  ;;  %2342 = vmatpush.msrb.mxu3 %v915_v40  ;;  %v1589_v53 = vpop.f32.mrf.mxu1  ;;  %v790_v39 = vld [vmem:[%s5518_s27 + $0x1150] sm:$0xff] }
  0xda   : > { %2206 = vmatpush.msra.mxu0 %v396_v41  ;;  %2227 = vmatpush.msra.mxu1 %v269_v42  ;;  %v4116_v54 = vmul.f32 1.442695, %v1610_v47  ;;  %v1590_v60 = vadd.f32 %v1589_v53, %v1293_v44  ;;  %v4118_v63 = vmul.f32 1.442695, %v1630_v56  ;;  %v1297_v41 = vperm.slane %v5880_v34, 5  ;;  %v272_v44 = vld [vmem:[%s5518_s27 + $0x120] sm:$0xff] }
  0xdb   : > { %2323 = vmatpush.msrb.mxu2 %v786_v43  ;;  %4888 = vmatmul.msk.f32.vlgmr.msrb.gmra.mxu1 %vm1548_vm0, %v5907_v57  ;;  %v1569_v0 = vpop.f32.mrf.mxu0  ;;  %v1173_v43 = vld [vmem:[%s5518_s27 + $0x1d48] sm:$0xff]  ;;  %v1296_v47 = vperm.slane %v5880_v34, 4  ;;  %v663_v34 = vld [vmem:[%s5518_s27 + $0xd58] sm:$0xff]  ;;  %v534_v56 = vld [vmem:[%s5518_s27 + $0x950] sm:$0xff] }
  0xdc   : > { %2343 = vmatpush.msrb.mxu3 %v787_v46  ;;  %2300 = vmatpush.msrb.mxu1 %v1169_v48  ;;  %5037 = vpow2.f32 %v4116_v54  ;;  %v4114_v3 = vmul.f32 1.442695, %v1590_v60  ;;  %v1570_v4 = vadd.f32 %v1569_v0, %v1292_v51  ;;  %v662_v48 = vld [vmem:[%s5518_s27 + $0xd50] sm:$0xff]  ;;  %v1172_v51 = vld [vmem:[%s5518_s27 + $0x1d40] sm:$0xff]  ;;  %v535_v0 = vld [vmem:[%s5518_s27 + $0x958] sm:$0xff] }
  0xdd   : > { %2207 = vmatpush.msra.mxu0 %v268_v49  ;;  %2324 = vmatpush.msrb.mxu2 %v658_v52  ;;  %5039 = vpow2.f32 %v4118_v63  ;;  %v1045_v52 = vld [vmem:[%s5518_s27 + $0x1948] sm:$0xff]  ;;  %v1044_v60 = vld [vmem:[%s5518_s27 + $0x1940] sm:$0xff] }
  0xde   : > { %4887 = vmatmul.msk.f32.vlgmr.msrb.gmra.mxu0 %vm1548_vm0, %v5907_v57  ;;  %2301 = vmatpush.msrb.mxu1 %v1041_v59  ;;  %5041 = vpow2.f32 %v4114_v3  ;;  %v4112_v9 = vmul.f32 1.442695, %v1570_v4  ;;  %v789_v3 = vld [vmem:[%s5518_s27 + $0x1148] sm:$0xff] }
  0xdf   : > { %2280 = vmatpush.msrb.mxu0 %v1168_v58  ;;  %2344 = vmatpush.msrb.mxu3 %v659_v61  ;;  %v917_v61 = vld [vmem:[%s5518_s27 + $0x1548] sm:$0xff] }
  0xe0   : > { %2325 = vmatpush.msrb.mxu2 %v530_v62  ;;  %2302 = vmatpush.msrb.mxu1 %v913_v2  ;;  %5043 = vpow2.f32 %v4112_v9  ;;  %v916_v2 = vld [vmem:[%s5518_s27 + $0x1540] sm:$0xff]  ;;  %v279_v9 = vld [vmem:[%s5518_s27 + $0x158] sm:$0xff] }
  0xe1   : > { %2281 = vmatpush.msrb.mxu0 %v1040_v1  ;;  %2345 = vmatpush.msrb.mxu3 %v531_v5  ;;  %v406_v1 = vld [vmem:[%s5518_s27 + $0x550] sm:$0xff]  ;;  %v407_v5 = vld [vmem:[%s5518_s27 + $0x558] sm:$0xff] }
  0xe2   : > { %2326 = vmatpush.msrb.mxu2 %v402_v6  ;;  %v5038_v14 = vpop.eup %5037  ;;  %2303 = vmatpush.msrb.mxu1 %v785_v8  ;;  %v278_v6 = vld [vmem:[%s5518_s27 + $0x150] sm:$0xff]  ;;  %v661_v8 = vld [vmem:[%s5518_s27 + $0xd48] sm:$0xff] }
  0xe3   : > { %2282 = vmatpush.msrb.mxu0 %v912_v7  ;;  %2346 = vmatpush.msrb.mxu3 %v403_v10  ;;  %v4497_v17 = vrot.slane %v5038_v14, 4  ;;  %v5040_v18 = vpop.eup %5039  ;;  %v788_v7 = vld [vmem:[%s5518_s27 + $0x1140] sm:$0xff] }
  0xe4   : > { %2327 = vmatpush.msrb.mxu2 %v274_v11  ;;  %2304 = vmatpush.msrb.mxu1 %v657_v13  ;;  %v5042_v21 = vpop.eup %5041  ;;  %v4498_v24 = vrot.slane %v5040_v18, 2  ;;  %v1178_v11 = vld [vmem:[%s5518_s27 + $0x1d70] sm:$0xff]  ;;  %v1179_v13 = vld [vmem:[%s5518_s27 + $0x1d78] sm:$0xff]  ;;  %v660_v14 = vld [vmem:[%s5518_s27 + $0xd40] sm:$0xff] }
  0xe5   : > { %2283 = vmatpush.msrb.mxu0 %v784_v12  ;;  %2347 = vmatpush.msrb.mxu3 %v275_v15  ;;  %v4496_v27 = vrot.slane %v5042_v21, 6  ;;  %v1050_v18 = vld [vmem:[%s5518_s27 + $0x1970] sm:$0xff]  ;;  %v1051_v21 = vld [vmem:[%s5518_s27 + $0x1978] sm:$0xff] }
  0xe6   : > { %4893 = vmatmul.msk.f32.vlgmr.msra.gmra.mxu2 %vm1548_vm0, %v5907_v57  ;;  %4894 = vmatmul.msk.f32.vlgmr.msra.gmra.mxu3 %vm1548_vm0, %v5907_v57  ;;  %v5044_v28 = vpop.eup %5043  ;;  %v4595_v31 = vsel %vm4594_vm1, %v4497_v17, %v4498_v24  ;;  %v533_v17 = vld [vmem:[%s5518_s27 + $0x948] sm:$0xff] }
  0xe7   : > { %2400 = vmatpush.msra.mxu2 %v1174_v16  ;;  %2420 = vmatpush.msra.mxu3 %v1175_v19  ;;  %v4593_v36 = vsel %vm4592_vm2, %v5044_v28, %v4496_v27 }
  0xe8   : > { %2284 = vmatpush.msrb.mxu0 %v656_v20  ;;  %2305 = vmatpush.msrb.mxu1 %v529_v22  ;;  %v4597_v40 = vsel %vm4596_vm3, %v4593_v36, %v4595_v31  ;;  %v5996_v20 = vld [vmem:[%s5524_s5 + $0x8] sm:$0xff]  ;;  %v532_v22 = vld [vmem:[%s5518_s27 + $0x940] sm:$0xff] }
  0xe9   : > { %2401 = vmatpush.msra.mxu2 %v1046_v23  ;;  %2421 = vmatpush.msra.mxu3 %v1047_v25  ;;  %4723 = vst [vmem:[%s5952_s11] sm:$0xff] %v4597_v40  ;;  %v405_v25 = vld [vmem:[%s5518_s27 + $0x548] sm:$0xff]  ;;  %v1302_v28 = vperm.slane %v5996_v20, 2 }
  0xea   : > { %2285 = vmatpush.msrb.mxu0 %v528_v26  ;;  %2306 = vmatpush.msrb.mxu1 %v401_v29  ;;  %v922_v26 = vld [vmem:[%s5518_s27 + $0x1570] sm:$0xff]  ;;  %v923_v29 = vld [vmem:[%s5518_s27 + $0x1578] sm:$0xff]  ;;  %v1177_v40 = vld [vmem:[%s5518_s27 + $0x1d68] sm:$0xff] }
  0xeb   : > { %2402 = vmatpush.msra.mxu2 %v918_v30  ;;  %v1689_v42 = vpop.f32.mrf.mxu2  ;;  %2422 = vmatpush.msra.mxu3 %v919_v33  ;;  %v1709_v46 = vpop.f32.mrf.mxu3  ;;  %v404_v30 = vld [vmem:[%s5518_s27 + $0x540] sm:$0xff]  ;;  %v277_v33 = vld [vmem:[%s5518_s27 + $0x148] sm:$0xff] }
  0xec   : > { %2286 = vmatpush.msrb.mxu0 %v400_v35  ;;  %v1690_v45 = vadd.f32 %v1689_v42, %v1298_v32  ;;  %2307 = vmatpush.msrb.mxu1 %v273_v38  ;;  %v1669_v49 = vpop.f32.mrf.mxu1  ;;  %v1710_v50 = vadd.f32 %v1709_v46, %v1299_v37  ;;  %v1303_v32 = vperm.slane %v5996_v20, 3  ;;  %v794_v35 = vld [vmem:[%s5518_s27 + $0x1170] sm:$0xff]  ;;  %v1301_v37 = vperm.slane %v5996_v20, 1  ;;  %v795_v38 = vld [vmem:[%s5518_s27 + $0x1178] sm:$0xff] }
  0xed   : > { %2403 = vmatpush.msra.mxu2 %v790_v39  ;;  %4892 = vmatmul.msk.f32.vlgmr.msra.gmra.mxu1 %vm1548_vm0, %v5907_v57  ;;  %v1670_v53 = vadd.f32 %v1669_v49, %v1297_v41  ;;  %v276_v41 = vld [vmem:[%s5518_s27 + $0x140] sm:$0xff] }
  0xee   : > { %2423 = vmatpush.msra.mxu3 %v791_v55  ;;  %v4124_v54 = vmul.f32 1.442695, %v1690_v45  ;;  %2380 = vmatpush.msra.mxu1 %v1173_v43  ;;  %v4126_v58 = vmul.f32 1.442695, %v1710_v50  ;;  %v1300_v43 = vperm.slane %v5996_v20, 0 }
  0xef   : > { %2287 = vmatpush.msrb.mxu0 %v272_v44  ;;  %v1649_v59 = vpop.f32.mrf.mxu0  ;;  %2404 = vmatpush.msra.mxu2 %v662_v48  ;;  %v4122_v62 = vmul.f32 1.442695, %v1670_v53  ;;  %v666_v44 = vld [vmem:[%s5518_s27 + $0xd70] sm:$0xff]  ;;  %v1049_v48 = vld [vmem:[%s5518_s27 + $0x1968] sm:$0xff] }
  0xf0   : > { %4891 = vmatmul.msk.f32.vlgmr.msra.gmra.mxu0 %vm1548_vm0, %v5907_v57  ;;  %5045 = vpow2.f32 %v4124_v54  ;;  %v1650_v63 = vadd.f32 %v1649_v59, %v1296_v47  ;;  %2381 = vmatpush.msra.mxu1 %v1045_v52  ;;  %v1176_v47 = vld [vmem:[%s5518_s27 + $0x1d60] sm:$0xff]  ;;  %v538_v52 = vld [vmem:[%s5518_s27 + $0x970] sm:$0xff] }
  0xf1   : > { %2360 = vmatpush.msra.mxu0 %v1172_v51  ;;  %5047 = vpow2.f32 %v4126_v58  ;;  %2424 = vmatpush.msra.mxu3 %v663_v34  ;;  %v667_v51 = vld [vmem:[%s5518_s27 + $0xd78] sm:$0xff]  ;;  %v1048_v34 = vld [vmem:[%s5518_s27 + $0x1960] sm:$0xff] }
  0xf2   : > { %2405 = vmatpush.msra.mxu2 %v534_v56  ;;  %5049 = vpow2.f32 %v4122_v62  ;;  %v4120_v4 = vmul.f32 1.442695, %v1650_v63  ;;  %2382 = vmatpush.msra.mxu1 %v917_v61  ;;  %v921_v56 = vld [vmem:[%s5518_s27 + $0x1568] sm:$0xff]  ;;  %v410_v61 = vld [vmem:[%s5518_s27 + $0x570] sm:$0xff]  ;;  %v920_v62 = vld [vmem:[%s5518_s27 + $0x1560] sm:$0xff] }
  0xf3   : > { %2361 = vmatpush.msra.mxu0 %v1044_v60  ;;  %2425 = vmatpush.msra.mxu3 %v535_v0  ;;  %v539_v60 = vld [vmem:[%s5518_s27 + $0x978] sm:$0xff]  ;;  %v793_v63 = vld [vmem:[%s5518_s27 + $0x1168] sm:$0xff] }
  0xf4   : > { %2406 = vmatpush.msra.mxu2 %v406_v1  ;;  %5051 = vpow2.f32 %v4120_v4  ;;  %2383 = vmatpush.msra.mxu1 %v789_v3  ;;  %v411_v1 = vld [vmem:[%s5518_s27 + $0x578] sm:$0xff]  ;;  %v792_v3 = vld [vmem:[%s5518_s27 + $0x1160] sm:$0xff]  ;;  %v665_v4 = vld [vmem:[%s5518_s27 + $0xd68] sm:$0xff] }
  0xf5   : > { %2362 = vmatpush.msra.mxu0 %v916_v2  ;;  %2426 = vmatpush.msra.mxu3 %v407_v5  ;;  %v282_v2 = vld [vmem:[%s5518_s27 + $0x170] sm:$0xff]  ;;  %v283_v5 = vld [vmem:[%s5518_s27 + $0x178] sm:$0xff] }
  0xf6   : > { %v5046_v10 = vpop.eup %5045  ;;  %2407 = vmatpush.msra.mxu2 %v278_v6  ;;  %2384 = vmatpush.msra.mxu1 %v661_v8 }
  0xf7   : > { %v5048_v12 = vpop.eup %5047  ;;  %2363 = vmatpush.msra.mxu0 %v788_v7  ;;  %v4500_v15 = vrot.slane %v5046_v10, 4  ;;  %2427 = vmatpush.msra.mxu3 %v279_v9  ;;  %v1182_v7 = vld [vmem:[%s5518_s27 + $0x1d90] sm:$0xff]  ;;  %v1183_v9 = vld [vmem:[%s5518_s27 + $0x1d98] sm:$0xff]  ;;  %v664_v10 = vld [vmem:[%s5518_s27 + $0xd60] sm:$0xff] }
  0xf8   : > { %v5050_v16 = vpop.eup %5049  ;;  %4897 = vmatmul.msk.f32.vlgmr.msrb.gmra.mxu2 %vm1548_vm0, %v5907_v57  ;;  %v4501_v19 = vrot.slane %v5048_v12, 2  ;;  %4898 = vmatmul.msk.f32.vlgmr.msrb.gmra.mxu3 %vm1548_vm0, %v5907_v57 }
  0xf9   : > { %2480 = vmatpush.msrb.mxu2 %v1178_v11  ;;  %v4499_v23 = vrot.slane %v5050_v16, 6  ;;  %2500 = vmatpush.msrb.mxu3 %v1179_v13  ;;  %v537_v13 = vld [vmem:[%s5518_s27 + $0x968] sm:$0xff]  ;;  %v1055_v16 = vld [vmem:[%s5518_s27 + $0x1998] sm:$0xff] }
  0xfa   : > { %v5052_v24 = vpop.eup %5051  ;;  %2364 = vmatpush.msra.mxu0 %v660_v14  ;;  %v4599_v27 = vsel %vm4594_vm1, %v4500_v15, %v4501_v19  ;;  %2385 = vmatpush.msra.mxu1 %v533_v17  ;;  %v1054_v14 = vld [vmem:[%s5518_s27 + $0x1990] sm:$0xff]  ;;  %v536_v17 = vld [vmem:[%s5518_s27 + $0x960] sm:$0xff] }
  0xfb   : > { %2481 = vmatpush.msrb.mxu2 %v1050_v18  ;;  %v4598_v31 = vsel %vm4592_vm2, %v5052_v24, %v4499_v23  ;;  %2501 = vmatpush.msrb.mxu3 %v1051_v21  ;;  %v409_v21 = vld [vmem:[%s5518_s27 + $0x568] sm:$0xff]  ;;  %v1306_v24 = vperm.slane %v5996_v20, 6 }
  0xfc   : > { %2365 = vmatpush.msra.mxu0 %v532_v22  ;;  %v4600_v36 = vsel %vm4596_vm3, %v4598_v31, %v4599_v27  ;;  %2386 = vmatpush.msra.mxu1 %v405_v25  ;;  %v926_v22 = vld [vmem:[%s5518_s27 + $0x1590] sm:$0xff]  ;;  %v927_v25 = vld [vmem:[%s5518_s27 + $0x1598] sm:$0xff] }
  0xfd   : > { %2482 = vmatpush.msrb.mxu2 %v922_v26  ;;  %4724 = vst [vmem:[%s5952_s11 + $0x8] sm:$0xff] %v4600_v36  ;;  %v1769_v39 = vpop.f32.mrf.mxu2  ;;  %2502 = vmatpush.msrb.mxu3 %v923_v29  ;;  %v1789_v42 = vpop.f32.mrf.mxu3  ;;  %v408_v26 = vld [vmem:[%s5518_s27 + $0x560] sm:$0xff]  ;;  %v281_v29 = vld [vmem:[%s5518_s27 + $0x168] sm:$0xff] }
  0xfe   : > { %2366 = vmatpush.msra.mxu0 %v404_v30  ;;  %v1770_v55 = vadd.f32 %v1769_v39, %v1302_v28  ;;  %2387 = vmatpush.msra.mxu1 %v277_v33  ;;  %v1749_v45 = vpop.f32.mrf.mxu1  ;;  %v1790_v46 = vadd.f32 %v1789_v42, %v1303_v32  ;;  %v1307_v28 = vperm.slane %v5996_v20, 7  ;;  %v798_v30 = vld [vmem:[%s5518_s27 + $0x1190] sm:$0xff]  ;;  %v1305_v32 = vperm.slane %v5996_v20, 5  ;;  %v799_v33 = vld [vmem:[%s5518_s27 + $0x1198] sm:$0xff]  ;;  %v1181_v36 = vld [vmem:[%s5518_s27 + $0x1d88] sm:$0xff] }
  0xff   : > { %2483 = vmatpush.msrb.mxu2 %v794_v35  ;;  %4896 = vmatmul.msk.f32.vlgmr.msrb.gmra.mxu1 %vm1548_vm0, %v5907_v57  ;;  %v1750_v49 = vadd.f32 %v1749_v45, %v1301_v37  ;;  %v280_v37 = vld [vmem:[%s5518_s27 + $0x160] sm:$0xff] }
 0x100   : > { %2503 = vmatpush.msrb.mxu3 %v795_v38  ;;  %v4132_v50 = vmul.f32 1.442695, %v1770_v55  ;;  %2460 = vmatpush.msrb.mxu1 %v1177_v40  ;;  %v4134_v53 = vmul.f32 1.442695, %v1790_v46  ;;  %v1304_v40 = vperm.slane %v5996_v20, 4  ;;  %v671_v20 = vld [vmem:[%s5518_s27 + $0xd98] sm:$0xff] }
 0x101   : > { %2367 = vmatpush.msra.mxu0 %v276_v41  ;;  %v1729_v54 = vpop.f32.mrf.mxu0  ;;  %2484 = vmatpush.msrb.mxu2 %v666_v44  ;;  %v4130_v58 = vmul.f32 1.442695, %v1750_v49  ;;  %v670_v41 = vld [vmem:[%s5518_s27 + $0xd90] sm:$0xff]  ;;  %v1053_v44 = vld [vmem:[%s5518_s27 + $0x1988] sm:$0xff] }
 0x102   : > { %4895 = vmatmul.msk.f32.vlgmr.msrb.gmra.mxu0 %vm1548_vm0, %v5907_v57  ;;  %5053 = vpow2.f32 %v4132_v50  ;;  %v1730_v59 = vadd.f32 %v1729_v54, %v1300_v43  ;;  %2461 = vmatpush.msrb.mxu1 %v1049_v48  ;;  %v1180_v43 = vld [vmem:[%s5518_s27 + $0x1d80] sm:$0xff]  ;;  %v543_v54 = vld [vmem:[%s5518_s27 + $0x998] sm:$0xff] }
 0x103   : > { %2440 = vmatpush.msrb.mxu0 %v1176_v47  ;;  %5055 = vpow2.f32 %v4134_v53  ;;  %2504 = vmatpush.msrb.mxu3 %v667_v51  ;;  %v542_v47 = vld [vmem:[%s5518_s27 + $0x990] sm:$0xff]  ;;  %v1052_v50 = vld [vmem:[%s5518_s27 + $0x1980] sm:$0xff]  ;;  %v925_v51 = vld [vmem:[%s5518_s27 + $0x1588] sm:$0xff] }
 0x104   : > { %2485 = vmatpush.msrb.mxu2 %v538_v52  ;;  %5057 = vpow2.f32 %v4130_v58  ;;  %v4128_v0 = vmul.f32 1.442695, %v1730_v59  ;;  %2462 = vmatpush.msrb.mxu1 %v921_v56  ;;  %v924_v56 = vld [vmem:[%s5518_s27 + $0x1580] sm:$0xff]  ;;  %v797_v58 = vld [vmem:[%s5518_s27 + $0x1188] sm:$0xff] }
 0x105   : > { %2441 = vmatpush.msrb.mxu0 %v1048_v34  ;;  %2505 = vmatpush.msrb.mxu3 %v539_v60  ;;  %v414_v34 = vld [vmem:[%s5518_s27 + $0x590] sm:$0xff]  ;;  %v415_v60 = vld [vmem:[%s5518_s27 + $0x598] sm:$0xff] }
 0x106   : > { %2486 = vmatpush.msrb.mxu2 %v410_v61  ;;  %5059 = vpow2.f32 %v4128_v0  ;;  %2463 = vmatpush.msrb.mxu1 %v793_v63  ;;  %v286_v61 = vld [vmem:[%s5518_s27 + $0x190] sm:$0xff]  ;;  %v669_v63 = vld [vmem:[%s5518_s27 + $0xd88] sm:$0xff]  ;;  %v287_v0 = vld [vmem:[%s5518_s27 + $0x198] sm:$0xff] }
 0x107   : > { %2442 = vmatpush.msrb.mxu0 %v920_v62  ;;  %2506 = vmatpush.msrb.mxu3 %v411_v1  ;;  %v796_v62 = vld [vmem:[%s5518_s27 + $0x1180] sm:$0xff] }
 0x108   : > { %v5054_v6 = vpop.eup %5053  ;;  %2487 = vmatpush.msrb.mxu2 %v282_v2  ;;  %2464 = vmatpush.msrb.mxu1 %v665_v4  ;;  %v1186_v2 = vld [vmem:[%s5518_s27 + $0x1db0] sm:$0xff]  ;;  %v1187_v4 = vld [vmem:[%s5518_s27 + $0x1db8] sm:$0xff] }
 0x109   : > { %v5056_v8 = vpop.eup %5055  ;;  %2443 = vmatpush.msrb.mxu0 %v792_v3  ;;  %v4503_v11 = vrot.slane %v5054_v6, 4  ;;  %2507 = vmatpush.msrb.mxu3 %v283_v5  ;;  %v668_v5 = vld [vmem:[%s5518_s27 + $0xd80] sm:$0xff] }
 0x10a   : > { %v5058_v12 = vpop.eup %5057  ;;  %4901 = vmatmul.msk.f32.vlgmr.msra.gmra.mxu2 %vm1548_vm0, %v5907_v57  ;;  %v4504_v15 = vrot.slane %v5056_v8, 2  ;;  %4902 = vmatmul.msk.f32.vlgmr.msra.gmra.mxu3 %vm1548_vm0, %v5907_v57  ;;  %v541_v8 = vld [vmem:[%s5518_s27 + $0x988] sm:$0xff] }
 0x10b   : > { %2560 = vmatpush.msra.mxu2 %v1182_v7  ;;  %v4502_v18 = vrot.slane %v5058_v12, 6  ;;  %2580 = vmatpush.msra.mxu3 %v1183_v9  ;;  %v1058_v9 = vld [vmem:[%s5518_s27 + $0x19b0] sm:$0xff]  ;;  %v1059_v12 = vld [vmem:[%s5518_s27 + $0x19b8] sm:$0xff] }
 0x10c   : > { %v5060_v19 = vpop.eup %5059  ;;  %2444 = vmatpush.msrb.mxu0 %v664_v10  ;;  %v4602_v23 = vsel %vm4594_vm1, %v4503_v11, %v4504_v15  ;;  %2465 = vmatpush.msrb.mxu1 %v537_v13  ;;  %v6095_v11 = vld [vmem:[%s5524_s5 + $0x10] sm:$0xff]  ;;  %v540_v13 = vld [vmem:[%s5518_s27 + $0x980] sm:$0xff] }
 0x10d   : > { %2561 = vmatpush.msra.mxu2 %v1054_v14  ;;  %v4601_v27 = vsel %vm4592_vm2, %v5060_v19, %v4502_v18  ;;  %2581 = vmatpush.msra.mxu3 %v1055_v16  ;;  %v413_v16 = vld [vmem:[%s5518_s27 + $0x588] sm:$0xff]  ;;  %v1310_v19 = vperm.slane %v6095_v11, 2 }
 0x10e   : > { %2445 = vmatpush.msrb.mxu0 %v536_v17  ;;  %v4603_v31 = vsel %vm4596_vm3, %v4601_v27, %v4602_v23  ;;  %2466 = vmatpush.msrb.mxu1 %v409_v21  ;;  %v930_v17 = vld [vmem:[%s5518_s27 + $0x15b0] sm:$0xff]  ;;  %v931_v21 = vld [vmem:[%s5518_s27 + $0x15b8] sm:$0xff] }
 0x10f   : > { %2562 = vmatpush.msra.mxu2 %v926_v22  ;;  %4725 = vst [vmem:[%s5952_s11 + $0x10] sm:$0xff] %v4603_v31  ;;  %v1849_v35 = vpop.f32.mrf.mxu2  ;;  %2582 = vmatpush.msra.mxu3 %v927_v25  ;;  %v1869_v39 = vpop.f32.mrf.mxu3  ;;  %v412_v22 = vld [vmem:[%s5518_s27 + $0x580] sm:$0xff]  ;;  %v285_v25 = vld [vmem:[%s5518_s27 + $0x188] sm:$0xff] }
 0x110   : > { %2446 = vmatpush.msrb.mxu0 %v408_v26  ;;  %v1850_v38 = vadd.f32 %v1849_v35, %v1306_v24  ;;  %2467 = vmatpush.msrb.mxu1 %v281_v29  ;;  %v1829_v55 = vpop.f32.mrf.mxu1  ;;  %v1870_v42 = vadd.f32 %v1869_v39, %v1307_v28  ;;  %v1311_v24 = vperm.slane %v6095_v11, 3  ;;  %v802_v26 = vld [vmem:[%s5518_s27 + $0x11b0] sm:$0xff]  ;;  %v1309_v28 = vperm.slane %v6095_v11, 1  ;;  %v803_v29 = vld [vmem:[%s5518_s27 + $0x11b8] sm:$0xff]  ;;  %v1185_v31 = vld [vmem:[%s5518_s27 + $0x1da8] sm:$0xff] }
 0x111   : > { %2563 = vmatpush.msra.mxu2 %v798_v30  ;;  %4900 = vmatmul.msk.f32.vlgmr.msra.gmra.mxu1 %vm1548_vm0, %v5907_v57  ;;  %v1830_v45 = vadd.f32 %v1829_v55, %v1305_v32  ;;  %v284_v32 = vld [vmem:[%s5518_s27 + $0x180] sm:$0xff] }
 0x112   : > { %2583 = vmatpush.msra.mxu3 %v799_v33  ;;  %v4140_v46 = vmul.f32 1.442695, %v1850_v38  ;;  %2540 = vmatpush.msra.mxu1 %v1181_v36  ;;  %v4142_v48 = vmul.f32 1.442695, %v1870_v42  ;;  %v1308_v36 = vperm.slane %v6095_v11, 0 }
 0x113   : > { %2447 = vmatpush.msrb.mxu0 %v280_v37  ;;  %v1809_v49 = vpop.f32.mrf.mxu0  ;;  %2564 = vmatpush.msra.mxu2 %v670_v41  ;;  %v4138_v52 = vmul.f32 1.442695, %v1830_v45  ;;  %v674_v37 = vld [vmem:[%s5518_s27 + $0xdb0] sm:$0xff]  ;;  %v1057_v41 = vld [vmem:[%s5518_s27 + $0x19a8] sm:$0xff] }
 0x114   : > { %4899 = vmatmul.msk.f32.vlgmr.msra.gmra.mxu0 %vm1548_vm0, %v5907_v57  ;;  %5061 = vpow2.f32 %v4140_v46  ;;  %v1810_v53 = vadd.f32 %v1809_v49, %v1304_v40  ;;  %2541 = vmatpush.msra.mxu1 %v1053_v44  ;;  %v1184_v40 = vld [vmem:[%s5518_s27 + $0x1da0] sm:$0xff]  ;;  %v546_v44 = vld [vmem:[%s5518_s27 + $0x9b0] sm:$0xff] }
 0x115   : > { %2520 = vmatpush.msra.mxu0 %v1180_v43  ;;  %5063 = vpow2.f32 %v4142_v48  ;;  %2584 = vmatpush.msra.mxu3 %v671_v20  ;;  %v675_v43 = vld [vmem:[%s5518_s27 + $0xdb8] sm:$0xff]  ;;  %v1056_v20 = vld [vmem:[%s5518_s27 + $0x19a0] sm:$0xff] }
 0x116   : > { %2565 = vmatpush.msra.mxu2 %v542_v47  ;;  %5065 = vpow2.f32 %v4138_v52  ;;  %v4136_v59 = vmul.f32 1.442695, %v1810_v53  ;;  %2542 = vmatpush.msra.mxu1 %v925_v51  ;;  %v929_v47 = vld [vmem:[%s5518_s27 + $0x15a8] sm:$0xff]  ;;  %v418_v51 = vld [vmem:[%s5518_s27 + $0x5b0] sm:$0xff]  ;;  %v928_v52 = vld [vmem:[%s5518_s27 + $0x15a0] sm:$0xff] }
 0x117   : > { %2521 = vmatpush.msra.mxu0 %v1052_v50  ;;  %2585 = vmatpush.msra.mxu3 %v543_v54  ;;  %v547_v50 = vld [vmem:[%s5518_s27 + $0x9b8] sm:$0xff]  ;;  %v801_v53 = vld [vmem:[%s5518_s27 + $0x11a8] sm:$0xff] }
 0x118   : > { %2566 = vmatpush.msra.mxu2 %v414_v34  ;;  %5067 = vpow2.f32 %v4136_v59  ;;  %2543 = vmatpush.msra.mxu1 %v797_v58  ;;  %v419_v34 = vld [vmem:[%s5518_s27 + $0x5b8] sm:$0xff]  ;;  %v800_v58 = vld [vmem:[%s5518_s27 + $0x11a0] sm:$0xff]  ;;  %v673_v59 = vld [vmem:[%s5518_s27 + $0xda8] sm:$0xff] }
 0x119   : > { %2522 = vmatpush.msra.mxu0 %v924_v56  ;;  %2586 = vmatpush.msra.mxu3 %v415_v60  ;;  %v290_v56 = vld [vmem:[%s5518_s27 + $0x1b0] sm:$0xff]  ;;  %v291_v60 = vld [vmem:[%s5518_s27 + $0x1b8] sm:$0xff] }
 0x11a   : > { %v5062_v1 = vpop.eup %5061  ;;  %2567 = vmatpush.msra.mxu2 %v286_v61  ;;  %2544 = vmatpush.msra.mxu1 %v669_v63 }
 0x11b   : > { %v5064_v3 = vpop.eup %5063  ;;  %2523 = vmatpush.msra.mxu0 %v796_v62  ;;  %v4506_v6 = vrot.slane %v5062_v1, 4  ;;  %2587 = vmatpush.msra.mxu3 %v287_v0  ;;  %v1190_v62 = vld [vmem:[%s5518_s27 + $0x1dd0] sm:$0xff]  ;;  %v1191_v0 = vld [vmem:[%s5518_s27 + $0x1dd8] sm:$0xff]  ;;  %v672_v1 = vld [vmem:[%s5518_s27 + $0xda0] sm:$0xff] }
 0x11c   : > { %v5066_v7 = vpop.eup %5065  ;;  %4905 = vmatmul.msk.f32.vlgmr.msrb.gmra.mxu2 %vm1548_vm0, %v5907_v57  ;;  %v4507_v10 = vrot.slane %v5064_v3, 2  ;;  %4906 = vmatmul.msk.f32.vlgmr.msrb.gmra.mxu3 %vm1548_vm0, %v5907_v57 }
 0x11d   : > { %2640 = vmatpush.msrb.mxu2 %v1186_v2  ;;  %v4505_v14 = vrot.slane %v5066_v7, 6  ;;  %2660 = vmatpush.msrb.mxu3 %v1187_v4  ;;  %v545_v4 = vld [vmem:[%s5518_s27 + $0x9a8] sm:$0xff]  ;;  %v1063_v7 = vld [vmem:[%s5518_s27 + $0x19d8] sm:$0xff] }
 0x11e   : > { %v5068_v15 = vpop.eup %5067  ;;  %2524 = vmatpush.msra.mxu0 %v668_v5  ;;  %v4605_v18 = vsel %vm4594_vm1, %v4506_v6, %v4507_v10  ;;  %2545 = vmatpush.msra.mxu1 %v541_v8  ;;  %v1062_v5 = vld [vmem:[%s5518_s27 + $0x19d0] sm:$0xff]  ;;  %v544_v8 = vld [vmem:[%s5518_s27 + $0x9a0] sm:$0xff] }
 0x11f   : > { %2641 = vmatpush.msrb.mxu2 %v1058_v9  ;;  %v4604_v23 = vsel %vm4592_vm2, %v5068_v15, %v4505_v14  ;;  %2661 = vmatpush.msrb.mxu3 %v1059_v12  ;;  %v417_v12 = vld [vmem:[%s5518_s27 + $0x5a8] sm:$0xff]  ;;  %v1314_v15 = vperm.slane %v6095_v11, 6 }
 0x120   : > { %2525 = vmatpush.msra.mxu0 %v540_v13  ;;  %v4606_v27 = vsel %vm4596_vm3, %v4604_v23, %v4605_v18  ;;  %2546 = vmatpush.msra.mxu1 %v413_v16  ;;  %v934_v13 = vld [vmem:[%s5518_s27 + $0x15d0] sm:$0xff]  ;;  %v935_v16 = vld [vmem:[%s5518_s27 + $0x15d8] sm:$0xff] }
 0x121   : > { %2642 = vmatpush.msrb.mxu2 %v930_v17  ;;  %4726 = vst [vmem:[%s5952_s11 + $0x18] sm:$0xff] %v4606_v27  ;;  %v1929_v30 = vpop.f32.mrf.mxu2  ;;  %2662 = vmatpush.msrb.mxu3 %v931_v21  ;;  %v1949_v35 = vpop.f32.mrf.mxu3  ;;  %v416_v17 = vld [vmem:[%s5518_s27 + $0x5a0] sm:$0xff]  ;;  %v289_v21 = vld [vmem:[%s5518_s27 + $0x1a8] sm:$0xff] }
 0x122   : > { %2526 = vmatpush.msra.mxu0 %v412_v22  ;;  %v1930_v33 = vadd.f32 %v1929_v30, %v1310_v19  ;;  %2547 = vmatpush.msra.mxu1 %v285_v25  ;;  %v1909_v38 = vpop.f32.mrf.mxu1  ;;  %v1950_v39 = vadd.f32 %v1949_v35, %v1311_v24  ;;  %v1315_v19 = vperm.slane %v6095_v11, 7  ;;  %v806_v22 = vld [vmem:[%s5518_s27 + $0x11d0] sm:$0xff]  ;;  %v1313_v24 = vperm.slane %v6095_v11, 5  ;;  %v807_v25 = vld [vmem:[%s5518_s27 + $0x11d8] sm:$0xff]  ;;  %v1189_v27 = vld [vmem:[%s5518_s27 + $0x1dc8] sm:$0xff] }
 0x123   : > { %2643 = vmatpush.msrb.mxu2 %v802_v26  ;;  %4904 = vmatmul.msk.f32.vlgmr.msrb.gmra.mxu1 %vm1548_vm0, %v5907_v57  ;;  %v1910_v55 = vadd.f32 %v1909_v38, %v1309_v28  ;;  %v288_v28 = vld [vmem:[%s5518_s27 + $0x1a0] sm:$0xff] }
 0x124   : > { %2663 = vmatpush.msrb.mxu3 %v803_v29  ;;  %v4148_v42 = vmul.f32 1.442695, %v1930_v33  ;;  %2620 = vmatpush.msrb.mxu1 %v1185_v31  ;;  %v4150_v45 = vmul.f32 1.442695, %v1950_v39  ;;  %v1312_v31 = vperm.slane %v6095_v11, 4  ;;  %v679_v11 = vld [vmem:[%s5518_s27 + $0xdd8] sm:$0xff] }
 0x125   : > { %2527 = vmatpush.msra.mxu0 %v284_v32  ;;  %v1889_v46 = vpop.f32.mrf.mxu0  ;;  %2644 = vmatpush.msrb.mxu2 %v674_v37  ;;  %v4146_v48 = vmul.f32 1.442695, %v1910_v55  ;;  %v678_v32 = vld [vmem:[%s5518_s27 + $0xdd0] sm:$0xff]  ;;  %v1061_v37 = vld [vmem:[%s5518_s27 + $0x19c8] sm:$0xff] }
 0x126   : > { %4903 = vmatmul.msk.f32.vlgmr.msrb.gmra.mxu0 %vm1548_vm0, %v5907_v57  ;;  %5069 = vpow2.f32 %v4148_v42  ;;  %v1890_v49 = vadd.f32 %v1889_v46, %v1308_v36  ;;  %2621 = vmatpush.msrb.mxu1 %v1057_v41  ;;  %v1188_v36 = vld [vmem:[%s5518_s27 + $0x1dc0] sm:$0xff]  ;;  %v551_v46 = vld [vmem:[%s5518_s27 + $0x9d8] sm:$0xff] }
 0x127   : > { %2600 = vmatpush.msrb.mxu0 %v1184_v40  ;;  %5071 = vpow2.f32 %v4150_v45  ;;  %2664 = vmatpush.msrb.mxu3 %v675_v43  ;;  %v550_v40 = vld [vmem:[%s5518_s27 + $0x9d0] sm:$0xff]  ;;  %v6176_v42 = vld [vmem:[%s7133_s0] sm:$0x3]  ;;  %v933_v43 = vld [vmem:[%s5518_s27 + $0x15c8] sm:$0xff] }
 0x128   : > { %2645 = vmatpush.msrb.mxu2 %v546_v44  ;;  %5073 = vpow2.f32 %v4146_v48  ;;  %v4144_v54 = vmul.f32 1.442695, %v1890_v49  ;;  %2622 = vmatpush.msrb.mxu1 %v929_v47  ;;  %v932_v47 = vld [vmem:[%s5518_s27 + $0x15c0] sm:$0xff]  ;;  %v805_v48 = vld [vmem:[%s5518_s27 + $0x11c8] sm:$0xff] }
 0x129   : > { %2601 = vmatpush.msrb.mxu0 %v1056_v20  ;;  %2665 = vmatpush.msrb.mxu3 %v547_v50  ;;  %v422_v20 = vld [vmem:[%s5518_s27 + $0x5d0] sm:$0xff]  ;;  %v423_v50 = vld [vmem:[%s5518_s27 + $0x5d8] sm:$0xff] }
 0x12a   : > { %2646 = vmatpush.msrb.mxu2 %v418_v51  ;;  %5075 = vpow2.f32 %v4144_v54  ;;  %2623 = vmatpush.msrb.mxu1 %v801_v53  ;;  %v294_v51 = vld [vmem:[%s5518_s27 + $0x1d0] sm:$0xff]  ;;  %v677_v53 = vld [vmem:[%s5518_s27 + $0xdc8] sm:$0xff]  ;;  %v295_v54 = vld [vmem:[%s5518_s27 + $0x1d8] sm:$0xff] }
 0x12b   : > { %2602 = vmatpush.msrb.mxu0 %v928_v52  ;;  %2666 = vmatpush.msrb.mxu3 %v419_v34  ;;  %v804_v52 = vld [vmem:[%s5518_s27 + $0x11c0] sm:$0xff] }
 0x12c   : > { %v5070_v61 = vpop.eup %5069  ;;  %2647 = vmatpush.msrb.mxu2 %v290_v56  ;;  %2624 = vmatpush.msrb.mxu1 %v673_v59  ;;  %v1194_v56 = vld [vmem:[%s5518_s27 + $0x1df0] sm:$0xff]  ;;  %v1195_v59 = vld [vmem:[%s5518_s27 + $0x1df8] sm:$0xff] }
 0x12d   : > { %v5072_v63 = vpop.eup %5071  ;;  %2603 = vmatpush.msrb.mxu0 %v800_v58  ;;  %v4509_v2 = vrot.slane %v5070_v61, 4  ;;  %2667 = vmatpush.msrb.mxu3 %v291_v60  ;;  %v676_v60 = vld [vmem:[%s5518_s27 + $0xdc0] sm:$0xff] }
 0x12e   : > { %v5074_v3 = vpop.eup %5073  ;;  %4909 = vmatmul.msk.f32.vlgmr.msra.gmra.mxu2 %vm1548_vm0, %v5907_v57  ;;  %v4510_v6 = vrot.slane %v5072_v63, 2  ;;  %4910 = vmatmul.msk.f32.vlgmr.msra.gmra.mxu3 %vm1548_vm0, %v5907_v57  ;;  %v549_v63 = vld [vmem:[%s5518_s27 + $0x9c8] sm:$0xff] }
 0x12f   : > { %2720 = vmatpush.msra.mxu2 %v1190_v62  ;;  %v4508_v9 = vrot.slane %v5074_v3, 6  ;;  %2740 = vmatpush.msra.mxu3 %v1191_v0  ;;  %v1066_v0 = vld [vmem:[%s5518_s27 + $0x19f0] sm:$0xff]  ;;  %v1067_v3 = vld [vmem:[%s5518_s27 + $0x19f8] sm:$0xff] }
 0x130   : > { %v5076_v10 = vpop.eup %5075  ;;  %2604 = vmatpush.msrb.mxu0 %v672_v1  ;;  %v4608_v14 = vsel %vm4594_vm1, %v4509_v2, %v4510_v6  ;;  %2625 = vmatpush.msrb.mxu1 %v545_v4  ;;  %v6199_v2 = vld [vmem:[%s5524_s5 + $0x18] sm:$0xff]  ;;  %v548_v4 = vld [vmem:[%s5518_s27 + $0x9c0] sm:$0xff] }
 0x131   : > { %2721 = vmatpush.msra.mxu2 %v1062_v5  ;;  %v4607_v18 = vsel %vm4592_vm2, %v5076_v10, %v4508_v9  ;;  %2741 = vmatpush.msra.mxu3 %v1063_v7  ;;  %v421_v7 = vld [vmem:[%s5518_s27 + $0x5c8] sm:$0xff]  ;;  %v1318_v10 = vperm.slane %v6199_v2, 2 }
 0x132   : > { %2605 = vmatpush.msrb.mxu0 %v544_v8  ;;  %v4609_v23 = vsel %vm4596_vm3, %v4607_v18, %v4608_v14  ;;  %2626 = vmatpush.msrb.mxu1 %v417_v12  ;;  %v938_v8 = vld [vmem:[%s5518_s27 + $0x15f0] sm:$0xff]  ;;  %v939_v12 = vld [vmem:[%s5518_s27 + $0x15f8] sm:$0xff] }
 0x133   : > { %2722 = vmatpush.msra.mxu2 %v934_v13  ;;  %4727 = vst [vmem:[%s5952_s11 + $0x20] sm:$0xff] %v4609_v23  ;;  %v2009_v26 = vpop.f32.mrf.mxu2  ;;  %2742 = vmatpush.msra.mxu3 %v935_v16  ;;  %v2029_v30 = vpop.f32.mrf.mxu3  ;;  %v420_v13 = vld [vmem:[%s5518_s27 + $0x5c0] sm:$0xff]  ;;  %v293_v16 = vld [vmem:[%s5518_s27 + $0x1c8] sm:$0xff] }
 0x134   : > { %2606 = vmatpush.msrb.mxu0 %v416_v17  ;;  %v2010_v29 = vadd.f32 %v2009_v26, %v1314_v15  ;;  %2627 = vmatpush.msrb.mxu1 %v289_v21  ;;  %v1989_v33 = vpop.f32.mrf.mxu1  ;;  %v2030_v35 = vadd.f32 %v2029_v30, %v1315_v19  ;;  %v1319_v15 = vperm.slane %v6199_v2, 3  ;;  %v810_v17 = vld [vmem:[%s5518_s27 + $0x11f0] sm:$0xff]  ;;  %v1317_v19 = vperm.slane %v6199_v2, 1  ;;  %v811_v21 = vld [vmem:[%s5518_s27 + $0x11f8] sm:$0xff]  ;;  %v1193_v23 = vld [vmem:[%s5518_s27 + $0x1de8] sm:$0xff] }
 0x135   : > { %2723 = vmatpush.msra.mxu2 %v806_v22  ;;  %4908 = vmatmul.msk.f32.vlgmr.msra.gmra.mxu1 %vm1548_vm0, %v5907_v57  ;;  %v1990_v38 = vadd.f32 %v1989_v33, %v1313_v24  ;;  %v1060_v57 = vld [vmem:[%s5518_s27 + $0x19c0] sm:$0xff] }
 0x136   : > { %2743 = vmatpush.msra.mxu3 %v807_v25  ;;  %v4156_v39 = vmul.f32 1.442695, %v2010_v29  ;;  %2700 = vmatpush.msra.mxu1 %v1189_v27  ;;  %v4158_v41 = vmul.f32 1.442695, %v2030_v35  ;;  %v292_v24 = vld [vmem:[%s5518_s27 + $0x1c0] sm:$0xff]  ;;  %v1316_v27 = vperm.slane %v6199_v2, 0 }
 0x137   : > { %2607 = vmatpush.msrb.mxu0 %v288_v28  ;;  %v1969_v55 = vpop.f32.mrf.mxu0  ;;  %2724 = vmatpush.msra.mxu2 %v678_v32  ;;  %v4154_v44 = vmul.f32 1.442695, %v1990_v38  ;;  %v682_v28 = vld [vmem:[%s5518_s27 + $0xdf0] sm:$0xff]  ;;  %v1065_v32 = vld [vmem:[%s5518_s27 + $0x19e8] sm:$0xff] }
 0x138   : > { %4907 = vmatmul.msk.f32.vlgmr.msra.gmra.mxu0 %vm1548_vm0, %v6176_v42  ;;  %5077 = vpow2.f32 %v4156_v39  ;;  %v1970_v45 = vadd.f32 %v1969_v55, %v1312_v31  ;;  %2701 = vmatpush.msra.mxu1 %v1061_v37  ;;  %v1192_v31 = vld [vmem:[%s5518_s27 + $0x1de0] sm:$0xff]  ;;  %v554_v37 = vld [vmem:[%s5518_s27 + $0x9f0] sm:$0xff] }
 0x139   : > { %2680 = vmatpush.msra.mxu0 %v1188_v36  ;;  %5079 = vpow2.f32 %v4158_v41  ;;  %2744 = vmatpush.msra.mxu3 %v679_v11  ;;  %v683_v36 = vld [vmem:[%s5518_s27 + $0xdf8] sm:$0xff]  ;;  %v1064_v11 = vld [vmem:[%s5518_s27 + $0x19e0] sm:$0xff] }
 0x13a   : > { %2725 = vmatpush.msra.mxu2 %v550_v40  ;;  %5081 = vpow2.f32 %v4154_v44  ;;  %v4152_v49 = vmul.f32 1.442695, %v1970_v45  ;;  %2702 = vmatpush.msra.mxu1 %v933_v43  ;;  %v937_v40 = vld [vmem:[%s5518_s27 + $0x15e8] sm:$0xff]  ;;  %v426_v43 = vld [vmem:[%s5518_s27 + $0x5f0] sm:$0xff]  ;;  %v936_v44 = vld [vmem:[%s5518_s27 + $0x15e0] sm:$0xff] }
 0x13b   : > { %2681 = vmatpush.msra.mxu0 %v1060_v57  ;;  %2745 = vmatpush.msra.mxu3 %v551_v46  ;;  %v555_v57 = vld [vmem:[%s5518_s27 + $0x9f8] sm:$0xff]  ;;  %v809_v45 = vld [vmem:[%s5518_s27 + $0x11e8] sm:$0xff] }
 0x13c   : > { %2726 = vmatpush.msra.mxu2 %v422_v20  ;;  %5083 = vpow2.f32 %v4152_v49  ;;  %2703 = vmatpush.msra.mxu1 %v805_v48  ;;  %v427_v20 = vld [vmem:[%s5518_s27 + $0x5f8] sm:$0xff]  ;;  %v808_v48 = vld [vmem:[%s5518_s27 + $0x11e0] sm:$0xff]  ;;  %v681_v49 = vld [vmem:[%s5518_s27 + $0xde8] sm:$0xff] }
 0x13d   : > { %2682 = vmatpush.msra.mxu0 %v932_v47  ;;  %2746 = vmatpush.msra.mxu3 %v423_v50  ;;  %v298_v47 = vld [vmem:[%s5518_s27 + $0x1f0] sm:$0xff]  ;;  %v299_v50 = vld [vmem:[%s5518_s27 + $0x1f8] sm:$0xff] }
 0x13e   : > { %v5078_v34 = vpop.eup %5077  ;;  %2727 = vmatpush.msra.mxu2 %v294_v51  ;;  %2704 = vmatpush.msra.mxu1 %v677_v53 }
 0x13f   : > { %v5080_v58 = vpop.eup %5079  ;;  %2683 = vmatpush.msra.mxu0 %v804_v52  ;;  %v4512_v61 = vrot.slane %v5078_v34, 4  ;;  %2747 = vmatpush.msra.mxu3 %v295_v54  ;;  %v1198_v52 = vld [vmem:[%s5518_s27 + $0x1e10] sm:$0xff]  ;;  %v1199_v54 = vld [vmem:[%s5518_s27 + $0x1e18] sm:$0xff]  ;;  %v680_v34 = vld [vmem:[%s5518_s27 + $0xde0] sm:$0xff] }
 0x140   : > { %v5082_v62 = vpop.eup %5081  ;;  %4913 = vmatmul.msk.f32.vlgmr.msrb.gmra.mxu2 %vm1548_vm0, %v6176_v42  ;;  %v4513_v1 = vrot.slane %v5080_v58, 2  ;;  %4914 = vmatmul.msk.f32.vlgmr.msrb.gmra.mxu3 %vm1548_vm0, %v6176_v42 }
 0x141   : > { %2800 = vmatpush.msrb.mxu2 %v1194_v56  ;;  %v4511_v5 = vrot.slane %v5082_v62, 6  ;;  %2820 = vmatpush.msrb.mxu3 %v1195_v59  ;;  %v553_v59 = vld [vmem:[%s5518_s27 + $0x9e8] sm:$0xff]  ;;  %v1071_v62 = vld [vmem:[%s5518_s27 + $0x1a18] sm:$0xff] }
 0x142   : > { %v5084_v6 = vpop.eup %5083  ;;  %2684 = vmatpush.msra.mxu0 %v676_v60  ;;  %v4611_v9 = vsel %vm4594_vm1, %v4512_v61, %v4513_v1  ;;  %2705 = vmatpush.msra.mxu1 %v549_v63  ;;  %v1070_v60 = vld [vmem:[%s5518_s27 + $0x1a10] sm:$0xff]  ;;  %v552_v63 = vld [vmem:[%s5518_s27 + $0x9e0] sm:$0xff] }
 0x143   : > { %2801 = vmatpush.msrb.mxu2 %v1066_v0  ;;  %v4610_v14 = vsel %vm4592_vm2, %v5084_v6, %v4511_v5  ;;  %2821 = vmatpush.msrb.mxu3 %v1067_v3  ;;  %v425_v3 = vld [vmem:[%s5518_s27 + $0x5e8] sm:$0xff]  ;;  %v1322_v6 = vperm.slane %v6199_v2, 6 }
 0x144   : > { %2685 = vmatpush.msra.mxu0 %v548_v4  ;;  %v4612_v18 = vsel %vm4596_vm3, %v4610_v14, %v4611_v9  ;;  %2706 = vmatpush.msra.mxu1 %v421_v7  ;;  %v942_v4 = vld [vmem:[%s5518_s27 + $0x1610] sm:$0xff]  ;;  %v943_v7 = vld [vmem:[%s5518_s27 + $0x1618] sm:$0xff] }
 0x145   : > { %2802 = vmatpush.msrb.mxu2 %v938_v8  ;;  %4728 = vst [vmem:[%s5952_s11 + $0x28] sm:$0xff] %v4612_v18  ;;  %v2089_v22 = vpop.f32.mrf.mxu2  ;;  %2822 = vmatpush.msrb.mxu3 %v939_v12  ;;  %v2109_v26 = vpop.f32.mrf.mxu3  ;;  %v424_v8 = vld [vmem:[%s5518_s27 + $0x5e0] sm:$0xff]  ;;  %v297_v12 = vld [vmem:[%s5518_s27 + $0x1e8] sm:$0xff] }
 0x146   : > { %2686 = vmatpush.msra.mxu0 %v420_v13  ;;  %v2090_v25 = vadd.f32 %v2089_v22, %v1318_v10  ;;  %2707 = vmatpush.msra.mxu1 %v293_v16  ;;  %v2069_v29 = vpop.f32.mrf.mxu1  ;;  %v2110_v30 = vadd.f32 %v2109_v26, %v1319_v15  ;;  %v1323_v10 = vperm.slane %v6199_v2, 7  ;;  %v814_v13 = vld [vmem:[%s5518_s27 + $0x1210] sm:$0xff]  ;;  %v1321_v15 = vperm.slane %v6199_v2, 5  ;;  %v815_v16 = vld [vmem:[%s5518_s27 + $0x1218] sm:$0xff]  ;;  %v1197_v18 = vld [vmem:[%s5518_s27 + $0x1e08] sm:$0xff] }
 0x147   : > { %2803 = vmatpush.msrb.mxu2 %v810_v17  ;;  %4912 = vmatmul.msk.f32.vlgmr.msrb.gmra.mxu1 %vm1548_vm0, %v6176_v42  ;;  %v2070_v33 = vadd.f32 %v2069_v29, %v1317_v19  ;;  %v296_v19 = vld [vmem:[%s5518_s27 + $0x1e0] sm:$0xff] }
 0x148   : > { %2823 = vmatpush.msrb.mxu3 %v811_v21  ;;  %v4164_v35 = vmul.f32 1.442695, %v2090_v25  ;;  %2780 = vmatpush.msrb.mxu1 %v1193_v23  ;;  %v4166_v38 = vmul.f32 1.442695, %v2110_v30  ;;  %v1320_v23 = vperm.slane %v6199_v2, 4  ;;  %v687_v2 = vld [vmem:[%s5518_s27 + $0xe18] sm:$0xff] }
 0x149   : > { %2687 = vmatpush.msra.mxu0 %v292_v24  ;;  %v2049_v39 = vpop.f32.mrf.mxu0  ;;  %2804 = vmatpush.msrb.mxu2 %v682_v28  ;;  %v4162_v41 = vmul.f32 1.442695, %v2070_v33  ;;  %v686_v24 = vld [vmem:[%s5518_s27 + $0xe10] sm:$0xff]  ;;  %v1069_v28 = vld [vmem:[%s5518_s27 + $0x1a08] sm:$0xff] }
 0x14a   : > { %4911 = vmatmul.msk.f32.vlgmr.msrb.gmra.mxu0 %vm1548_vm0, %v6176_v42  ;;  %5085 = vpow2.f32 %v4164_v35  ;;  %v2050_v55 = vadd.f32 %v2049_v39, %v1316_v27  ;;  %2781 = vmatpush.msrb.mxu1 %v1065_v32  ;;  %v1196_v27 = vld [vmem:[%s5518_s27 + $0x1e00] sm:$0xff]  ;;  %v559_v39 = vld [vmem:[%s5518_s27 + $0xa18] sm:$0xff] }
 0x14b   : > { %2760 = vmatpush.msrb.mxu0 %v1192_v31  ;;  %5087 = vpow2.f32 %v4166_v38  ;;  %2824 = vmatpush.msrb.mxu3 %v683_v36  ;;  %v558_v31 = vld [vmem:[%s5518_s27 + $0xa10] sm:$0xff]  ;;  %v1068_v35 = vld [vmem:[%s5518_s27 + $0x1a00] sm:$0xff]  ;;  %v941_v36 = vld [vmem:[%s5518_s27 + $0x1608] sm:$0xff] }
 0x14c   : > { %2805 = vmatpush.msrb.mxu2 %v554_v37  ;;  %5089 = vpow2.f32 %v4162_v41  ;;  %v4160_v46 = vmul.f32 1.442695, %v2050_v55  ;;  %2782 = vmatpush.msrb.mxu1 %v937_v40  ;;  %v940_v40 = vld [vmem:[%s5518_s27 + $0x1600] sm:$0xff]  ;;  %v813_v41 = vld [vmem:[%s5518_s27 + $0x1208] sm:$0xff] }
 0x14d   : > { %2761 = vmatpush.msrb.mxu0 %v1064_v11  ;;  %2825 = vmatpush.msrb.mxu3 %v555_v57  ;;  %v430_v11 = vld [vmem:[%s5518_s27 + $0x610] sm:$0xff]  ;;  %v431_v57 = vld [vmem:[%s5518_s27 + $0x618] sm:$0xff] }
 0x14e   : > { %2806 = vmatpush.msrb.mxu2 %v426_v43  ;;  %5091 = vpow2.f32 %v4160_v46  ;;  %2783 = vmatpush.msrb.mxu1 %v809_v45  ;;  %v302_v43 = vld [vmem:[%s5518_s27 + $0x210] sm:$0xff]  ;;  %v685_v45 = vld [vmem:[%s5518_s27 + $0xe08] sm:$0xff]  ;;  %v303_v46 = vld [vmem:[%s5518_s27 + $0x218] sm:$0xff] }
 0x14f   : > { %2762 = vmatpush.msrb.mxu0 %v936_v44  ;;  %2826 = vmatpush.msrb.mxu3 %v427_v20  ;;  %v812_v44 = vld [vmem:[%s5518_s27 + $0x1200] sm:$0xff] }
 0x150   : > { %v5086_v51 = vpop.eup %5085  ;;  %2807 = vmatpush.msrb.mxu2 %v298_v47  ;;  %2784 = vmatpush.msrb.mxu1 %v681_v49  ;;  %v1202_v47 = vld [vmem:[%s5518_s27 + $0x1e30] sm:$0xff]  ;;  %v1203_v49 = vld [vmem:[%s5518_s27 + $0x1e38] sm:$0xff] }
 0x151   : > { %v5088_v53 = vpop.eup %5087  ;;  %2763 = vmatpush.msrb.mxu0 %v808_v48  ;;  %v4515_v56 = vrot.slane %v5086_v51, 4  ;;  %2827 = vmatpush.msrb.mxu3 %v299_v50  ;;  %v684_v50 = vld [vmem:[%s5518_s27 + $0xe00] sm:$0xff] }
 0x152   : > { %v5090_v58 = vpop.eup %5089  ;;  %4917 = vmatmul.msk.f32.vlgmr.msra.gmra.mxu2 %vm1548_vm0, %v6176_v42  ;;  %v4516_v61 = vrot.slane %v5088_v53, 2  ;;  %4918 = vmatmul.msk.f32.vlgmr.msra.gmra.mxu3 %vm1548_vm0, %v6176_v42  ;;  %v557_v53 = vld [vmem:[%s5518_s27 + $0xa08] sm:$0xff] }
 0x153   : > { %2880 = vmatpush.msra.mxu2 %v1198_v52  ;;  %v4514_v0 = vrot.slane %v5090_v58, 6  ;;  %2900 = vmatpush.msra.mxu3 %v1199_v54  ;;  %v1074_v54 = vld [vmem:[%s5518_s27 + $0x1a30] sm:$0xff]  ;;  %v1075_v58 = vld [vmem:[%s5518_s27 + $0x1a38] sm:$0xff] }
 0x154   : > { %v5092_v1 = vpop.eup %5091  ;;  %2764 = vmatpush.msrb.mxu0 %v680_v34  ;;  %v4614_v5 = vsel %vm4594_vm1, %v4515_v56, %v4516_v61  ;;  %2785 = vmatpush.msrb.mxu1 %v553_v59  ;;  %v6298_v56 = vld [vmem:[%s5524_s5 + $0x20] sm:$0xff] }
 0x155   : > { %2881 = vmatpush.msra.mxu2 %v1070_v60  ;;  %v4613_v9 = vsel %vm4592_vm2, %v5092_v1, %v4514_v0  ;;  %2901 = vmatpush.msra.mxu3 %v1071_v62  ;;  %v556_v59 = vld [vmem:[%s5518_s27 + $0xa00] sm:$0xff]  ;;  %v429_v62 = vld [vmem:[%s5518_s27 + $0x608] sm:$0xff]  ;;  %v1326_v1 = vperm.slane %v6298_v56, 2 }
 0x156   : > { %2765 = vmatpush.msrb.mxu0 %v552_v63  ;;  %v4615_v14 = vsel %vm4596_vm3, %v4613_v9, %v4614_v5  ;;  %2786 = vmatpush.msrb.mxu1 %v425_v3  ;;  %v946_v63 = vld [vmem:[%s5518_s27 + $0x1630] sm:$0xff]  ;;  %v947_v3 = vld [vmem:[%s5518_s27 + $0x1638] sm:$0xff] }
 0x157   : > { %2882 = vmatpush.msra.mxu2 %v942_v4  ;;  %4729 = vst [vmem:[%s5952_s11 + $0x30] sm:$0xff] %v4615_v14  ;;  %v2169_v17 = vpop.f32.mrf.mxu2  ;;  %2902 = vmatpush.msra.mxu3 %v943_v7  ;;  %v2189_v22 = vpop.f32.mrf.mxu3  ;;  %v428_v4 = vld [vmem:[%s5518_s27 + $0x600] sm:$0xff]  ;;  %v301_v7 = vld [vmem:[%s5518_s27 + $0x208] sm:$0xff] }
 0x158   : > { %2766 = vmatpush.msrb.mxu0 %v424_v8  ;;  %v2170_v21 = vadd.f32 %v2169_v17, %v1322_v6  ;;  %2787 = vmatpush.msrb.mxu1 %v297_v12  ;;  %v2149_v25 = vpop.f32.mrf.mxu1  ;;  %v2190_v26 = vadd.f32 %v2189_v22, %v1323_v10  ;;  %v1327_v6 = vperm.slane %v6298_v56, 3  ;;  %v818_v8 = vld [vmem:[%s5518_s27 + $0x1230] sm:$0xff]  ;;  %v1325_v10 = vperm.slane %v6298_v56, 1  ;;  %v819_v12 = vld [vmem:[%s5518_s27 + $0x1238] sm:$0xff]  ;;  %v1201_v14 = vld [vmem:[%s5518_s27 + $0x1e28] sm:$0xff] }
 0x159   : > { %2883 = vmatpush.msra.mxu2 %v814_v13  ;;  %4916 = vmatmul.msk.f32.vlgmr.msra.gmra.mxu1 %vm1548_vm0, %v6176_v42  ;;  %v2150_v29 = vadd.f32 %v2149_v25, %v1321_v15  ;;  %v300_v15 = vld [vmem:[%s5518_s27 + $0x200] sm:$0xff] }
 0x15a   : > { %2903 = vmatpush.msra.mxu3 %v815_v16  ;;  %v4172_v30 = vmul.f32 1.442695, %v2170_v21  ;;  %2860 = vmatpush.msra.mxu1 %v1197_v18  ;;  %v4174_v32 = vmul.f32 1.442695, %v2190_v26  ;;  %v1324_v18 = vperm.slane %v6298_v56, 0 }
 0x15b   : > { %2767 = vmatpush.msrb.mxu0 %v296_v19  ;;  %v2129_v33 = vpop.f32.mrf.mxu0  ;;  %2884 = vmatpush.msra.mxu2 %v686_v24  ;;  %v4170_v37 = vmul.f32 1.442695, %v2150_v29  ;;  %v690_v19 = vld [vmem:[%s5518_s27 + $0xe30] sm:$0xff]  ;;  %v1073_v24 = vld [vmem:[%s5518_s27 + $0x1a28] sm:$0xff] }
 0x15c   : > { %4915 = vmatmul.msk.f32.vlgmr.msra.gmra.mxu0 %vm1548_vm0, %v6176_v42  ;;  %5093 = vpow2.f32 %v4172_v30  ;;  %v2130_v38 = vadd.f32 %v2129_v33, %v1320_v23  ;;  %2861 = vmatpush.msra.mxu1 %v1069_v28  ;;  %v1200_v23 = vld [vmem:[%s5518_s27 + $0x1e20] sm:$0xff]  ;;  %v562_v28 = vld [vmem:[%s5518_s27 + $0xa30] sm:$0xff] }
 0x15d   : > { %2840 = vmatpush.msra.mxu0 %v1196_v27  ;;  %5095 = vpow2.f32 %v4174_v32  ;;  %2904 = vmatpush.msra.mxu3 %v687_v2  ;;  %v691_v27 = vld [vmem:[%s5518_s27 + $0xe38] sm:$0xff]  ;;  %v1072_v2 = vld [vmem:[%s5518_s27 + $0x1a20] sm:$0xff] }
 0x15e   : > { %2885 = vmatpush.msra.mxu2 %v558_v31  ;;  %5097 = vpow2.f32 %v4170_v37  ;;  %v4168_v55 = vmul.f32 1.442695, %v2130_v38  ;;  %2862 = vmatpush.msra.mxu1 %v941_v36  ;;  %v945_v31 = vld [vmem:[%s5518_s27 + $0x1628] sm:$0xff]  ;;  %v434_v36 = vld [vmem:[%s5518_s27 + $0x630] sm:$0xff]  ;;  %v944_v37 = vld [vmem:[%s5518_s27 + $0x1620] sm:$0xff] }
 0x15f   : > { %2841 = vmatpush.msra.mxu0 %v1068_v35  ;;  %2905 = vmatpush.msra.mxu3 %v559_v39  ;;  %v563_v35 = vld [vmem:[%s5518_s27 + $0xa38] sm:$0xff]  ;;  %v817_v38 = vld [vmem:[%s5518_s27 + $0x1228] sm:$0xff] }
 0x160   : > { %2886 = vmatpush.msra.mxu2 %v430_v11  ;;  %5099 = vpow2.f32 %v4168_v55  ;;  %2863 = vmatpush.msra.mxu1 %v813_v41  ;;  %v435_v11 = vld [vmem:[%s5518_s27 + $0x638] sm:$0xff]  ;;  %v816_v41 = vld [vmem:[%s5518_s27 + $0x1220] sm:$0xff]  ;;  %v689_v55 = vld [vmem:[%s5518_s27 + $0xe28] sm:$0xff] }
 0x161   : > { %2842 = vmatpush.msra.mxu0 %v940_v40  ;;  %2906 = vmatpush.msra.mxu3 %v431_v57  ;;  %v306_v40 = vld [vmem:[%s5518_s27 + $0x230] sm:$0xff]  ;;  %v307_v57 = vld [vmem:[%s5518_s27 + $0x238] sm:$0xff] }
 0x162   : > { %v5094_v20 = vpop.eup %5093  ;;  %2887 = vmatpush.msra.mxu2 %v302_v43  ;;  %2864 = vmatpush.msra.mxu1 %v685_v45 }
 0x163   : > { %v5096_v48 = vpop.eup %5095  ;;  %2843 = vmatpush.msra.mxu0 %v812_v44  ;;  %v4518_v51 = vrot.slane %v5094_v20, 4  ;;  %2907 = vmatpush.msra.mxu3 %v303_v46  ;;  %v1206_v44 = vld [vmem:[%s5518_s27 + $0x1e50] sm:$0xff]  ;;  %v1207_v46 = vld [vmem:[%s5518_s27 + $0x1e58] sm:$0xff]  ;;  %v688_v20 = vld [vmem:[%s5518_s27 + $0xe20] sm:$0xff] }
 0x164   : > { %v5098_v52 = vpop.eup %5097  ;;  %4921 = vmatmul.msk.f32.vlgmr.msrb.gmra.mxu2 %vm1548_vm0, %v6176_v42  ;;  %v4519_v34 = vrot.slane %v5096_v48, 2  ;;  %4922 = vmatmul.msk.f32.vlgmr.msrb.gmra.mxu3 %vm1548_vm0, %v6176_v42 }
 0x165   : > { %2960 = vmatpush.msrb.mxu2 %v1202_v47  ;;  %v4517_v60 = vrot.slane %v5098_v52, 6  ;;  %2980 = vmatpush.msrb.mxu3 %v1203_v49  ;;  %v561_v49 = vld [vmem:[%s5518_s27 + $0xa28] sm:$0xff]  ;;  %v1079_v52 = vld [vmem:[%s5518_s27 + $0x1a58] sm:$0xff] }
 0x166   : > { %v5100_v61 = vpop.eup %5099  ;;  %2844 = vmatpush.msra.mxu0 %v684_v50  ;;  %v4617_v0 = vsel %vm4594_vm1, %v4518_v51, %v4519_v34  ;;  %2865 = vmatpush.msra.mxu1 %v557_v53  ;;  %v1078_v50 = vld [vmem:[%s5518_s27 + $0x1a50] sm:$0xff]  ;;  %v560_v53 = vld [vmem:[%s5518_s27 + $0xa20] sm:$0xff] }
 0x167   : > { %2961 = vmatpush.msrb.mxu2 %v1074_v54  ;;  %v4616_v5 = vsel %vm4592_vm2, %v5100_v61, %v4517_v60  ;;  %2981 = vmatpush.msrb.mxu3 %v1075_v58  ;;  %v433_v58 = vld [vmem:[%s5518_s27 + $0x628] sm:$0xff]  ;;  %v1330_v61 = vperm.slane %v6298_v56, 6 }
 0x168   : > { %2845 = vmatpush.msra.mxu0 %v556_v59  ;;  %v4618_v9 = vsel %vm4596_vm3, %v4616_v5, %v4617_v0  ;;  %2866 = vmatpush.msra.mxu1 %v429_v62  ;;  %v950_v59 = vld [vmem:[%s5518_s27 + $0x1650] sm:$0xff]  ;;  %v951_v62 = vld [vmem:[%s5518_s27 + $0x1658] sm:$0xff] }
 0x169   : > { %2962 = vmatpush.msrb.mxu2 %v946_v63  ;;  %4730 = vst [vmem:[%s5952_s11 + $0x38] sm:$0xff] %v4618_v9  ;;  %v2249_v13 = vpop.f32.mrf.mxu2  ;;  %2982 = vmatpush.msrb.mxu3 %v947_v3  ;;  %v2269_v17 = vpop.f32.mrf.mxu3  ;;  %v432_v63 = vld [vmem:[%s5518_s27 + $0x620] sm:$0xff]  ;;  %v305_v3 = vld [vmem:[%s5518_s27 + $0x228] sm:$0xff] }
 0x16a   : > { %2846 = vmatpush.msra.mxu0 %v428_v4  ;;  %v2250_v16 = vadd.f32 %v2249_v13, %v1326_v1  ;;  %2867 = vmatpush.msra.mxu1 %v301_v7  ;;  %v2229_v21 = vpop.f32.mrf.mxu1  ;;  %v2270_v22 = vadd.f32 %v2269_v17, %v1327_v6  ;;  %v1331_v1 = vperm.slane %v6298_v56, 7  ;;  %v822_v4 = vld [vmem:[%s5518_s27 + $0x1250] sm:$0xff]  ;;  %v1329_v6 = vperm.slane %v6298_v56, 5  ;;  %v823_v7 = vld [vmem:[%s5518_s27 + $0x1258] sm:$0xff]  ;;  %v1205_v9 = vld [vmem:[%s5518_s27 + $0x1e48] sm:$0xff] }
 0x16b   : > { %2963 = vmatpush.msrb.mxu2 %v818_v8  ;;  %4920 = vmatmul.msk.f32.vlgmr.msrb.gmra.mxu1 %vm1548_vm0, %v6176_v42  ;;  %v2230_v25 = vadd.f32 %v2229_v21, %v1325_v10  ;;  %v304_v10 = vld [vmem:[%s5518_s27 + $0x220] sm:$0xff] }
 0x16c   : > { %2983 = vmatpush.msrb.mxu3 %v819_v12  ;;  %v4180_v26 = vmul.f32 1.442695, %v2250_v16  ;;  %2940 = vmatpush.msrb.mxu1 %v1201_v14  ;;  %v4182_v29 = vmul.f32 1.442695, %v2270_v22  ;;  %v1328_v14 = vperm.slane %v6298_v56, 4  ;;  %v695_v56 = vld [vmem:[%s5518_s27 + $0xe58] sm:$0xff] }
 0x16d   : > { %2847 = vmatpush.msra.mxu0 %v300_v15  ;;  %v2209_v30 = vpop.f32.mrf.mxu0  ;;  %2964 = vmatpush.msrb.mxu2 %v690_v19  ;;  %v4178_v32 = vmul.f32 1.442695, %v2230_v25  ;;  %v694_v15 = vld [vmem:[%s5518_s27 + $0xe50] sm:$0xff]  ;;  %v1077_v19 = vld [vmem:[%s5518_s27 + $0x1a48] sm:$0xff] }
 0x16e   : > { %4919 = vmatmul.msk.f32.vlgmr.msrb.gmra.mxu0 %vm1548_vm0, %v6176_v42  ;;  %5101 = vpow2.f32 %v4180_v26  ;;  %v2210_v33 = vadd.f32 %v2209_v30, %v1324_v18  ;;  %2941 = vmatpush.msrb.mxu1 %v1073_v24  ;;  %v1204_v18 = vld [vmem:[%s5518_s27 + $0x1e40] sm:$0xff]  ;;  %v567_v30 = vld [vmem:[%s5518_s27 + $0xa58] sm:$0xff] }
 0x16f   : > { %2920 = vmatpush.msrb.mxu0 %v1200_v23  ;;  %5103 = vpow2.f32 %v4182_v29  ;;  %2984 = vmatpush.msrb.mxu3 %v691_v27  ;;  %v566_v23 = vld [vmem:[%s5518_s27 + $0xa50] sm:$0xff]  ;;  %v1076_v26 = vld [vmem:[%s5518_s27 + $0x1a40] sm:$0xff]  ;;  %v949_v27 = vld [vmem:[%s5518_s27 + $0x1648] sm:$0xff] }
 0x170   : > { %2965 = vmatpush.msrb.mxu2 %v562_v28  ;;  %5105 = vpow2.f32 %v4178_v32  ;;  %v4176_v39 = vmul.f32 1.442695, %v2210_v33  ;;  %2942 = vmatpush.msrb.mxu1 %v945_v31  ;;  %v948_v31 = vld [vmem:[%s5518_s27 + $0x1640] sm:$0xff]  ;;  %v821_v32 = vld [vmem:[%s5518_s27 + $0x1248] sm:$0xff] }
 0x171   : > { %2921 = vmatpush.msrb.mxu0 %v1072_v2  ;;  %2985 = vmatpush.msrb.mxu3 %v563_v35  ;;  %v438_v2 = vld [vmem:[%s5518_s27 + $0x650] sm:$0xff]  ;;  %v439_v35 = vld [vmem:[%s5518_s27 + $0x658] sm:$0xff] }
 0x172   : > { %2966 = vmatpush.msrb.mxu2 %v434_v36  ;;  %5107 = vpow2.f32 %v4176_v39  ;;  %2943 = vmatpush.msrb.mxu1 %v817_v38  ;;  %v310_v36 = vld [vmem:[%s5518_s27 + $0x250] sm:$0xff]  ;;  %v693_v38 = vld [vmem:[%s5518_s27 + $0xe48] sm:$0xff]  ;;  %v311_v39 = vld [vmem:[%s5518_s27 + $0x258] sm:$0xff] }
 0x173   : > { %2922 = vmatpush.msrb.mxu0 %v944_v37  ;;  %2986 = vmatpush.msrb.mxu3 %v435_v11  ;;  %v820_v37 = vld [vmem:[%s5518_s27 + $0x1240] sm:$0xff] }
 0x174   : > { %v5102_v43 = vpop.eup %5101  ;;  %2967 = vmatpush.msrb.mxu2 %v306_v40  ;;  %2944 = vmatpush.msrb.mxu1 %v689_v55  ;;  %v1210_v40 = vld [vmem:[%s5518_s27 + $0x1e70] sm:$0xff]  ;;  %v1211_v55 = vld [vmem:[%s5518_s27 + $0x1e78] sm:$0xff] }
 0x175   : > { %v5104_v45 = vpop.eup %5103  ;;  %2923 = vmatpush.msrb.mxu0 %v816_v41  ;;  %v4521_v47 = vrot.slane %v5102_v43, 4  ;;  %2987 = vmatpush.msrb.mxu3 %v307_v57  ;;  %v692_v57 = vld [vmem:[%s5518_s27 + $0xe40] sm:$0xff] }
 0x176   : > { %v5106_v48 = vpop.eup %5105  ;;  %4925 = vmatmul.msk.f32.vlgmr.msra.gmra.mxu2 %vm1548_vm0, %v6176_v42  ;;  %v4522_v51 = vrot.slane %v5104_v45, 2  ;;  %4926 = vmatmul.msk.f32.vlgmr.msra.gmra.mxu3 %vm1548_vm0, %v6176_v42  ;;  %v565_v45 = vld [vmem:[%s5518_s27 + $0xa48] sm:$0xff] }
 0x177   : > { %3040 = vmatpush.msra.mxu2 %v1206_v44  ;;  %v4520_v54 = vrot.slane %v5106_v48, 6  ;;  %3060 = vmatpush.msra.mxu3 %v1207_v46  ;;  %v1082_v46 = vld [vmem:[%s5518_s27 + $0x1a70] sm:$0xff]  ;;  %v1083_v48 = vld [vmem:[%s5518_s27 + $0x1a78] sm:$0xff] }
 0x178   : > { %v5108_v34 = vpop.eup %5107  ;;  %2924 = vmatpush.msrb.mxu0 %v688_v20  ;;  %v4620_v60 = vsel %vm4594_vm1, %v4521_v47, %v4522_v51  ;;  %2945 = vmatpush.msrb.mxu1 %v561_v49  ;;  %v6397_v47 = vld [vmem:[%s5524_s5 + $0x28] sm:$0xff]  ;;  %v564_v49 = vld [vmem:[%s5518_s27 + $0xa40] sm:$0xff] }
 0x179   : > { %3041 = vmatpush.msra.mxu2 %v1078_v50  ;;  %v4619_v0 = vsel %vm4592_vm2, %v5108_v34, %v4520_v54  ;;  %3061 = vmatpush.msra.mxu3 %v1079_v52  ;;  %v437_v52 = vld [vmem:[%s5518_s27 + $0x648] sm:$0xff]  ;;  %v1334_v34 = vperm.slane %v6397_v47, 2 }
 0x17a   : > { %2925 = vmatpush.msrb.mxu0 %v560_v53  ;;  %v4621_v5 = vsel %vm4596_vm3, %v4619_v0, %v4620_v60  ;;  %2946 = vmatpush.msrb.mxu1 %v433_v58  ;;  %v954_v53 = vld [vmem:[%s5518_s27 + $0x1670] sm:$0xff]  ;;  %v955_v58 = vld [vmem:[%s5518_s27 + $0x1678] sm:$0xff] }
 0x17b   : > { %3042 = vmatpush.msra.mxu2 %v950_v59  ;;  %4731 = vst [vmem:[%s5952_s11 + $0x40] sm:$0xff] %v4621_v5  ;;  %v2329_v8 = vpop.f32.mrf.mxu2  ;;  %3062 = vmatpush.msra.mxu3 %v951_v62  ;;  %v2349_v13 = vpop.f32.mrf.mxu3  ;;  %v436_v59 = vld [vmem:[%s5518_s27 + $0x640] sm:$0xff]  ;;  %v309_v62 = vld [vmem:[%s5518_s27 + $0x248] sm:$0xff] }
 0x17c   : > { %2926 = vmatpush.msrb.mxu0 %v432_v63  ;;  %v2330_v12 = vadd.f32 %v2329_v8, %v1330_v61  ;;  %2947 = vmatpush.msrb.mxu1 %v305_v3  ;;  %v2309_v16 = vpop.f32.mrf.mxu1  ;;  %v2350_v17 = vadd.f32 %v2349_v13, %v1331_v1  ;;  %v1335_v61 = vperm.slane %v6397_v47, 3  ;;  %v826_v63 = vld [vmem:[%s5518_s27 + $0x1270] sm:$0xff]  ;;  %v1333_v1 = vperm.slane %v6397_v47, 1  ;;  %v827_v3 = vld [vmem:[%s5518_s27 + $0x1278] sm:$0xff]  ;;  %v1209_v5 = vld [vmem:[%s5518_s27 + $0x1e68] sm:$0xff] }
 0x17d   : > { %3043 = vmatpush.msra.mxu2 %v822_v4  ;;  %4924 = vmatmul.msk.f32.vlgmr.msra.gmra.mxu1 %vm1548_vm0, %v6176_v42  ;;  %v2310_v21 = vadd.f32 %v2309_v16, %v1329_v6  ;;  %v308_v6 = vld [vmem:[%s5518_s27 + $0x240] sm:$0xff] }
 0x17e   : > { %3063 = vmatpush.msra.mxu3 %v823_v7  ;;  %v4188_v22 = vmul.f32 1.442695, %v2330_v12  ;;  %3020 = vmatpush.msra.mxu1 %v1205_v9  ;;  %v4190_v24 = vmul.f32 1.442695, %v2350_v17  ;;  %v1332_v9 = vperm.slane %v6397_v47, 0 }
 0x17f   : > { %2927 = vmatpush.msrb.mxu0 %v304_v10  ;;  %v2289_v25 = vpop.f32.mrf.mxu0  ;;  %3044 = vmatpush.msra.mxu2 %v694_v15  ;;  %v4186_v28 = vmul.f32 1.442695, %v2310_v21  ;;  %v698_v10 = vld [vmem:[%s5518_s27 + $0xe70] sm:$0xff]  ;;  %v1081_v15 = vld [vmem:[%s5518_s27 + $0x1a68] sm:$0xff] }
 0x180   : > { %4923 = vmatmul.msk.f32.vlgmr.msra.gmra.mxu0 %vm1548_vm0, %v6176_v42  ;;  %5109 = vpow2.f32 %v4188_v22  ;;  %v2290_v29 = vadd.f32 %v2289_v25, %v1328_v14  ;;  %3021 = vmatpush.msra.mxu1 %v1077_v19  ;;  %v1208_v14 = vld [vmem:[%s5518_s27 + $0x1e60] sm:$0xff]  ;;  %v570_v19 = vld [vmem:[%s5518_s27 + $0xa70] sm:$0xff] }
 0x181   : > { %3000 = vmatpush.msra.mxu0 %v1204_v18  ;;  %5111 = vpow2.f32 %v4190_v24  ;;  %3064 = vmatpush.msra.mxu3 %v695_v56  ;;  %v699_v18 = vld [vmem:[%s5518_s27 + $0xe78] sm:$0xff]  ;;  %v1080_v56 = vld [vmem:[%s5518_s27 + $0x1a60] sm:$0xff] }
 0x182   : > { %3045 = vmatpush.msra.mxu2 %v566_v23  ;;  %5113 = vpow2.f32 %v4186_v28  ;;  %v4184_v33 = vmul.f32 1.442695, %v2290_v29  ;;  %3022 = vmatpush.msra.mxu1 %v949_v27  ;;  %v953_v23 = vld [vmem:[%s5518_s27 + $0x1668] sm:$0xff]  ;;  %v442_v27 = vld [vmem:[%s5518_s27 + $0x670] sm:$0xff]  ;;  %v952_v28 = vld [vmem:[%s5518_s27 + $0x1660] sm:$0xff] }
 0x183   : > { %3001 = vmatpush.msra.mxu0 %v1076_v26  ;;  %3065 = vmatpush.msra.mxu3 %v567_v30  ;;  %v571_v26 = vld [vmem:[%s5518_s27 + $0xa78] sm:$0xff] }
 0x184   : > { %3046 = vmatpush.msra.mxu2 %v438_v2  ;;  %5115 = vpow2.f32 %v4184_v33  ;;  %3023 = vmatpush.msra.mxu1 %v821_v32  ;;  %v443_v30 = vld [vmem:[%s5518_s27 + $0x678] sm:$0xff]  ;;  %v314_v2 = vld [vmem:[%s5518_s27 + $0x270] sm:$0xff]  ;;  %v697_v32 = vld [vmem:[%s5518_s27 + $0xe68] sm:$0xff] }
 0x185   : > { %3002 = vmatpush.msra.mxu0 %v948_v31  ;;  %3066 = vmatpush.msra.mxu3 %v439_v35  ;;  %v824_v31 = vld [vmem:[%s5518_s27 + $0x1260] sm:$0xff]  ;;  %v315_v33 = vld [vmem:[%s5518_s27 + $0x278] sm:$0xff] }
 0x186   : > { %v5110_v11 = vpop.eup %5109  ;;  %3047 = vmatpush.msra.mxu2 %v310_v36  ;;  %3024 = vmatpush.msra.mxu1 %v693_v38  ;;  %v1214_v36 = vld [vmem:[%s5518_s27 + $0x1e90] sm:$0xff]  ;;  %v1215_v38 = vld [vmem:[%s5518_s27 + $0x1e98] sm:$0xff] }
 0x187   : > { %v5112_v41 = vpop.eup %5111  ;;  %3003 = vmatpush.msra.mxu0 %v820_v37  ;;  %v4524_v43 = vrot.slane %v5110_v11, 4  ;;  %3067 = vmatpush.msra.mxu3 %v311_v39  ;;  %v696_v39 = vld [vmem:[%s5518_s27 + $0xe60] sm:$0xff] }
 0x188   : > { %v5114_v44 = vpop.eup %5113  ;;  %4929 = vmatmul.msk.f32.vlgmr.msrb.gmra.mxu2 %vm1548_vm0, %v6176_v42  ;;  %v4525_v20 = vrot.slane %v5112_v41, 2  ;;  %4930 = vmatmul.msk.f32.vlgmr.msrb.gmra.mxu3 %vm1548_vm0, %v6176_v42  ;;  %v6446_v41 = vld [vmem:[%s7133_s0] sm:$0x3] }
 0x189   : > { %3120 = vmatpush.msrb.mxu2 %v1210_v40  ;;  %v4523_v50 = vrot.slane %v5114_v44, 6  ;;  %3140 = vmatpush.msrb.mxu3 %v1211_v55  ;;  %v569_v55 = vld [vmem:[%s5518_s27 + $0xa68] sm:$0xff]  ;;  %v1087_v44 = vld [vmem:[%s5518_s27 + $0x1a98] sm:$0xff] }
 0x18a   : > { %v5116_v51 = vpop.eup %5115  ;;  %3004 = vmatpush.msra.mxu0 %v692_v57  ;;  %v4623_v54 = vsel %vm4594_vm1, %v4524_v43, %v4525_v20  ;;  %3025 = vmatpush.msra.mxu1 %v565_v45  ;;  %v1086_v57 = vld [vmem:[%s5518_s27 + $0x1a90] sm:$0xff]  ;;  %v568_v45 = vld [vmem:[%s5518_s27 + $0xa60] sm:$0xff] }
 0x18b   : > { %3121 = vmatpush.msrb.mxu2 %v1082_v46  ;;  %v4622_v60 = vsel %vm4592_vm2, %v5116_v51, %v4523_v50  ;;  %3141 = vmatpush.msrb.mxu3 %v1083_v48  ;;  %v441_v48 = vld [vmem:[%s5518_s27 + $0x668] sm:$0xff]  ;;  %v1338_v51 = vperm.slane %v6397_v47, 6 }
 0x18c   : > { %3005 = vmatpush.msra.mxu0 %v564_v49  ;;  %v4624_v0 = vsel %vm4596_vm3, %v4622_v60, %v4623_v54  ;;  %3026 = vmatpush.msra.mxu1 %v437_v52  ;;  %v958_v49 = vld [vmem:[%s5518_s27 + $0x1690] sm:$0xff]  ;;  %v959_v52 = vld [vmem:[%s5518_s27 + $0x1698] sm:$0xff] }
 0x18d   : > { %3122 = vmatpush.msrb.mxu2 %v954_v53  ;;  %4732 = vst [vmem:[%s5952_s11 + $0x48] sm:$0xff] %v4624_v0  ;;  %v2409_v4 = vpop.f32.mrf.mxu2  ;;  %3142 = vmatpush.msrb.mxu3 %v955_v58  ;;  %v2429_v8 = vpop.f32.mrf.mxu3  ;;  %v440_v53 = vld [vmem:[%s5518_s27 + $0x660] sm:$0xff]  ;;  %v313_v58 = vld [vmem:[%s5518_s27 + $0x268] sm:$0xff] }
 0x18e   : > { %3006 = vmatpush.msra.mxu0 %v436_v59  ;;  %v2410_v7 = vadd.f32 %v2409_v4, %v1334_v34  ;;  %3027 = vmatpush.msra.mxu1 %v309_v62  ;;  %v2389_v12 = vpop.f32.mrf.mxu1  ;;  %v2430_v13 = vadd.f32 %v2429_v8, %v1335_v61  ;;  %v1339_v34 = vperm.slane %v6397_v47, 7  ;;  %v830_v59 = vld [vmem:[%s5518_s27 + $0x1290] sm:$0xff]  ;;  %v1337_v61 = vperm.slane %v6397_v47, 5  ;;  %v831_v62 = vld [vmem:[%s5518_s27 + $0x1298] sm:$0xff]  ;;  %v1213_v0 = vld [vmem:[%s5518_s27 + $0x1e88] sm:$0xff] }
 0x18f   : > { %3123 = vmatpush.msrb.mxu2 %v826_v63  ;;  %4928 = vmatmul.msk.f32.vlgmr.msrb.gmra.mxu1 %vm1548_vm0, %v6176_v42  ;;  %v2390_v16 = vadd.f32 %v2389_v12, %v1333_v1  ;;  %v312_v1 = vld [vmem:[%s5518_s27 + $0x260] sm:$0xff] }
 0x190   : > { %3143 = vmatpush.msrb.mxu3 %v827_v3  ;;  %v4196_v17 = vmul.f32 1.442695, %v2410_v7  ;;  %3100 = vmatpush.msrb.mxu1 %v1209_v5  ;;  %v4198_v21 = vmul.f32 1.442695, %v2430_v13  ;;  %v1336_v5 = vperm.slane %v6397_v47, 4  ;;  %v703_v47 = vld [vmem:[%s5518_s27 + $0xe98] sm:$0xff] }
 0x191   : > { %3007 = vmatpush.msra.mxu0 %v308_v6  ;;  %v2369_v22 = vpop.f32.mrf.mxu0  ;;  %3124 = vmatpush.msrb.mxu2 %v698_v10  ;;  %v4194_v24 = vmul.f32 1.442695, %v2390_v16  ;;  %v702_v6 = vld [vmem:[%s5518_s27 + $0xe90] sm:$0xff]  ;;  %v1085_v10 = vld [vmem:[%s5518_s27 + $0x1a88] sm:$0xff] }
 0x192   : > { %4927 = vmatmul.msk.f32.vlgmr.msrb.gmra.mxu0 %vm1548_vm0, %v6176_v42  ;;  %5117 = vpow2.f32 %v4196_v17  ;;  %v2370_v25 = vadd.f32 %v2369_v22, %v1332_v9  ;;  %3101 = vmatpush.msrb.mxu1 %v1081_v15  ;;  %v825_v42 = vld [vmem:[%s5518_s27 + $0x1268] sm:$0xff]  ;;  %v1212_v9 = vld [vmem:[%s5518_s27 + $0x1e80] sm:$0xff]  ;;  %v575_v22 = vld [vmem:[%s5518_s27 + $0xa98] sm:$0xff] }
 0x193   : > { %3080 = vmatpush.msrb.mxu0 %v1208_v14  ;;  %5119 = vpow2.f32 %v4198_v21  ;;  %3144 = vmatpush.msrb.mxu3 %v699_v18  ;;  %v574_v14 = vld [vmem:[%s5518_s27 + $0xa90] sm:$0xff]  ;;  %v1084_v17 = vld [vmem:[%s5518_s27 + $0x1a80] sm:$0xff]  ;;  %v957_v18 = vld [vmem:[%s5518_s27 + $0x1688] sm:$0xff] }
 0x194   : > { %3125 = vmatpush.msrb.mxu2 %v570_v19  ;;  %5121 = vpow2.f32 %v4194_v24  ;;  %v4192_v29 = vmul.f32 1.442695, %v2370_v25  ;;  %3102 = vmatpush.msrb.mxu1 %v953_v23  ;;  %v956_v23 = vld [vmem:[%s5518_s27 + $0x1680] sm:$0xff]  ;;  %v829_v24 = vld [vmem:[%s5518_s27 + $0x1288] sm:$0xff] }
 0x195   : > { %3081 = vmatpush.msrb.mxu0 %v1080_v56  ;;  %3145 = vmatpush.msrb.mxu3 %v571_v26  ;;  %v446_v56 = vld [vmem:[%s5518_s27 + $0x690] sm:$0xff]  ;;  %v447_v26 = vld [vmem:[%s5518_s27 + $0x698] sm:$0xff] }
 0x196   : > { %3126 = vmatpush.msrb.mxu2 %v442_v27  ;;  %5123 = vpow2.f32 %v4192_v29  ;;  %3103 = vmatpush.msrb.mxu1 %v825_v42  ;;  %v318_v27 = vld [vmem:[%s5518_s27 + $0x290] sm:$0xff]  ;;  %v701_v42 = vld [vmem:[%s5518_s27 + $0xe88] sm:$0xff]  ;;  %v319_v29 = vld [vmem:[%s5518_s27 + $0x298] sm:$0xff] }
 0x197   : > { %3082 = vmatpush.msrb.mxu0 %v952_v28  ;;  %3146 = vmatpush.msrb.mxu3 %v443_v30  ;;  %v828_v28 = vld [vmem:[%s5518_s27 + $0x1280] sm:$0xff] }
 0x198   : > { %v5118_v35 = vpop.eup %5117  ;;  %3127 = vmatpush.msrb.mxu2 %v314_v2  ;;  %3104 = vmatpush.msrb.mxu1 %v697_v32  ;;  %v1218_v2 = vld [vmem:[%s5518_s27 + $0x1eb0] sm:$0xff]  ;;  %v1219_v32 = vld [vmem:[%s5518_s27 + $0x1eb8] sm:$0xff] }
 0x199   : > { %v5120_v37 = vpop.eup %5119  ;;  %3083 = vmatpush.msrb.mxu0 %v824_v31  ;;  %v4527_v11 = vrot.slane %v5118_v35, 4  ;;  %3147 = vmatpush.msrb.mxu3 %v315_v33  ;;  %v700_v33 = vld [vmem:[%s5518_s27 + $0xe80] sm:$0xff] }
 0x19a   : > { %v5122_v40 = vpop.eup %5121  ;;  %4933 = vmatmul.msk.f32.vlgmr.msra.gmra.mxu2 %vm1548_vm0, %v6446_v41  ;;  %v4528_v43 = vrot.slane %v5120_v37, 2  ;;  %4934 = vmatmul.msk.f32.vlgmr.msra.gmra.mxu3 %vm1548_vm0, %v6446_v41  ;;  %v573_v37 = vld [vmem:[%s5518_s27 + $0xa88] sm:$0xff] }
 0x19b   : > { %3200 = vmatpush.msra.mxu2 %v1214_v36  ;;  %v4526_v46 = vrot.slane %v5122_v40, 6  ;;  %3220 = vmatpush.msra.mxu3 %v1215_v38  ;;  %v1090_v38 = vld [vmem:[%s5518_s27 + $0x1ab0] sm:$0xff]  ;;  %v1091_v40 = vld [vmem:[%s5518_s27 + $0x1ab8] sm:$0xff] }
 0x19c   : > { %v5124_v20 = vpop.eup %5123  ;;  %3084 = vmatpush.msrb.mxu0 %v696_v39  ;;  %v4626_v50 = vsel %vm4594_vm1, %v4527_v11, %v4528_v43  ;;  %3105 = vmatpush.msrb.mxu1 %v569_v55  ;;  %v6501_v11 = vld [vmem:[%s5524_s5 + $0x30] sm:$0xff]  ;;  %v572_v55 = vld [vmem:[%s5518_s27 + $0xa80] sm:$0xff] }
 0x19d   : > { %3201 = vmatpush.msra.mxu2 %v1086_v57  ;;  %v4625_v54 = vsel %vm4592_vm2, %v5124_v20, %v4526_v46  ;;  %3221 = vmatpush.msra.mxu3 %v1087_v44  ;;  %v445_v44 = vld [vmem:[%s5518_s27 + $0x688] sm:$0xff]  ;;  %v1342_v20 = vperm.slane %v6501_v11, 2 }
 0x19e   : > { %3085 = vmatpush.msrb.mxu0 %v568_v45  ;;  %v4627_v60 = vsel %vm4596_vm3, %v4625_v54, %v4626_v50  ;;  %3106 = vmatpush.msrb.mxu1 %v441_v48  ;;  %v962_v45 = vld [vmem:[%s5518_s27 + $0x16b0] sm:$0xff]  ;;  %v963_v48 = vld [vmem:[%s5518_s27 + $0x16b8] sm:$0xff] }
 0x19f   : > { %3202 = vmatpush.msra.mxu2 %v958_v49  ;;  %4733 = vst [vmem:[%s5952_s11 + $0x50] sm:$0xff] %v4627_v60  ;;  %v2489_v63 = vpop.f32.mrf.mxu2  ;;  %3222 = vmatpush.msra.mxu3 %v959_v52  ;;  %v2509_v4 = vpop.f32.mrf.mxu3  ;;  %v444_v49 = vld [vmem:[%s5518_s27 + $0x680] sm:$0xff]  ;;  %v317_v52 = vld [vmem:[%s5518_s27 + $0x288] sm:$0xff] }
 0x1a0   : > { %3086 = vmatpush.msrb.mxu0 %v440_v53  ;;  %v2490_v3 = vadd.f32 %v2489_v63, %v1338_v51  ;;  %3107 = vmatpush.msrb.mxu1 %v313_v58  ;;  %v2469_v7 = vpop.f32.mrf.mxu1  ;;  %v2510_v8 = vadd.f32 %v2509_v4, %v1339_v34  ;;  %v1343_v51 = vperm.slane %v6501_v11, 3  ;;  %v834_v53 = vld [vmem:[%s5518_s27 + $0x12b0] sm:$0xff]  ;;  %v1341_v34 = vperm.slane %v6501_v11, 1  ;;  %v835_v58 = vld [vmem:[%s5518_s27 + $0x12b8] sm:$0xff]  ;;  %v1217_v60 = vld [vmem:[%s5518_s27 + $0x1ea8] sm:$0xff] }
 0x1a1   : > { %3203 = vmatpush.msra.mxu2 %v830_v59  ;;  %4932 = vmatmul.msk.f32.vlgmr.msra.gmra.mxu1 %vm1548_vm0, %v6446_v41  ;;  %v2470_v12 = vadd.f32 %v2469_v7, %v1337_v61  ;;  %v316_v61 = vld [vmem:[%s5518_s27 + $0x280] sm:$0xff] }
 0x1a2   : > { %3223 = vmatpush.msra.mxu3 %v831_v62  ;;  %v4204_v13 = vmul.f32 1.442695, %v2490_v3  ;;  %3180 = vmatpush.msra.mxu1 %v1213_v0  ;;  %v4206_v15 = vmul.f32 1.442695, %v2510_v8  ;;  %v1340_v0 = vperm.slane %v6501_v11, 0 }
 0x1a3   : > { %3087 = vmatpush.msrb.mxu0 %v312_v1  ;;  %v2449_v16 = vpop.f32.mrf.mxu0  ;;  %3204 = vmatpush.msra.mxu2 %v702_v6  ;;  %v4202_v19 = vmul.f32 1.442695, %v2470_v12  ;;  %v706_v1 = vld [vmem:[%s5518_s27 + $0xeb0] sm:$0xff]  ;;  %v1089_v6 = vld [vmem:[%s5518_s27 + $0x1aa8] sm:$0xff] }
 0x1a4   : > { %4931 = vmatmul.msk.f32.vlgmr.msra.gmra.mxu0 %vm1548_vm0, %v6446_v41  ;;  %5125 = vpow2.f32 %v4204_v13  ;;  %v2450_v21 = vadd.f32 %v2449_v16, %v1336_v5  ;;  %3181 = vmatpush.msra.mxu1 %v1085_v10  ;;  %v1216_v5 = vld [vmem:[%s5518_s27 + $0x1ea0] sm:$0xff]  ;;  %v578_v10 = vld [vmem:[%s5518_s27 + $0xab0] sm:$0xff] }
 0x1a5   : > { %3160 = vmatpush.msra.mxu0 %v1212_v9  ;;  %5127 = vpow2.f32 %v4206_v15  ;;  %3224 = vmatpush.msra.mxu3 %v703_v47  ;;  %v707_v9 = vld [vmem:[%s5518_s27 + $0xeb8] sm:$0xff]  ;;  %v1088_v47 = vld [vmem:[%s5518_s27 + $0x1aa0] sm:$0xff] }
 0x1a6   : > { %3205 = vmatpush.msra.mxu2 %v574_v14  ;;  %5129 = vpow2.f32 %v4202_v19  ;;  %v4200_v25 = vmul.f32 1.442695, %v2450_v21  ;;  %3182 = vmatpush.msra.mxu1 %v957_v18  ;;  %v961_v14 = vld [vmem:[%s5518_s27 + $0x16a8] sm:$0xff]  ;;  %v450_v18 = vld [vmem:[%s5518_s27 + $0x6b0] sm:$0xff]  ;;  %v960_v19 = vld [vmem:[%s5518_s27 + $0x16a0] sm:$0xff] }
 0x1a7   : > { %3161 = vmatpush.msra.mxu0 %v1084_v17  ;;  %3225 = vmatpush.msra.mxu3 %v575_v22  ;;  %v579_v17 = vld [vmem:[%s5518_s27 + $0xab8] sm:$0xff]  ;;  %v833_v21 = vld [vmem:[%s5518_s27 + $0x12a8] sm:$0xff] }
 0x1a8   : > { %3206 = vmatpush.msra.mxu2 %v446_v56  ;;  %5131 = vpow2.f32 %v4200_v25  ;;  %3183 = vmatpush.msra.mxu1 %v829_v24  ;;  %v451_v56 = vld [vmem:[%s5518_s27 + $0x6b8] sm:$0xff]  ;;  %v832_v24 = vld [vmem:[%s5518_s27 + $0x12a0] sm:$0xff]  ;;  %v705_v25 = vld [vmem:[%s5518_s27 + $0xea8] sm:$0xff] }
 0x1a9   : > { %3162 = vmatpush.msra.mxu0 %v956_v23  ;;  %3226 = vmatpush.msra.mxu3 %v447_v26  ;;  %v322_v23 = vld [vmem:[%s5518_s27 + $0x2b0] sm:$0xff]  ;;  %v323_v26 = vld [vmem:[%s5518_s27 + $0x2b8] sm:$0xff] }
 0x1aa   : > { %v5126_v30 = vpop.eup %5125  ;;  %3207 = vmatpush.msra.mxu2 %v318_v27  ;;  %3184 = vmatpush.msra.mxu1 %v701_v42 }
 0x1ab   : > { %v5128_v31 = vpop.eup %5127  ;;  %3163 = vmatpush.msra.mxu0 %v828_v28  ;;  %v4530_v35 = vrot.slane %v5126_v30, 4  ;;  %3227 = vmatpush.msra.mxu3 %v319_v29  ;;  %v1222_v28 = vld [vmem:[%s5518_s27 + $0x1ed0] sm:$0xff]  ;;  %v1223_v29 = vld [vmem:[%s5518_s27 + $0x1ed8] sm:$0xff]  ;;  %v704_v30 = vld [vmem:[%s5518_s27 + $0xea0] sm:$0xff] }
 0x1ac   : > { %v5130_v36 = vpop.eup %5129  ;;  %4937 = vmatmul.msk.f32.vlgmr.msrb.gmra.mxu2 %vm1548_vm0, %v6446_v41  ;;  %v4531_v39 = vrot.slane %v5128_v31, 2  ;;  %4938 = vmatmul.msk.f32.vlgmr.msrb.gmra.mxu3 %vm1548_vm0, %v6446_v41 }
 0x1ad   : > { %3280 = vmatpush.msrb.mxu2 %v1218_v2  ;;  %v4529_v57 = vrot.slane %v5130_v36, 6  ;;  %3300 = vmatpush.msrb.mxu3 %v1219_v32  ;;  %v577_v32 = vld [vmem:[%s5518_s27 + $0xaa8] sm:$0xff]  ;;  %v1095_v36 = vld [vmem:[%s5518_s27 + $0x1ad8] sm:$0xff] }
 0x1ae   : > { %v5132_v43 = vpop.eup %5131  ;;  %3164 = vmatpush.msra.mxu0 %v700_v33  ;;  %v4629_v46 = vsel %vm4594_vm1, %v4530_v35, %v4531_v39  ;;  %3185 = vmatpush.msra.mxu1 %v573_v37  ;;  %v1094_v33 = vld [vmem:[%s5518_s27 + $0x1ad0] sm:$0xff]  ;;  %v576_v37 = vld [vmem:[%s5518_s27 + $0xaa0] sm:$0xff] }
 0x1af   : > { %3281 = vmatpush.msrb.mxu2 %v1090_v38  ;;  %v4628_v50 = vsel %vm4592_vm2, %v5132_v43, %v4529_v57  ;;  %3301 = vmatpush.msrb.mxu3 %v1091_v40  ;;  %v449_v40 = vld [vmem:[%s5518_s27 + $0x6a8] sm:$0xff]  ;;  %v1346_v43 = vperm.slane %v6501_v11, 6 }
 0x1b0   : > { %3165 = vmatpush.msra.mxu0 %v572_v55  ;;  %v4630_v54 = vsel %vm4596_vm3, %v4628_v50, %v4629_v46  ;;  %3186 = vmatpush.msra.mxu1 %v445_v44  ;;  %v966_v55 = vld [vmem:[%s5518_s27 + $0x16d0] sm:$0xff]  ;;  %v967_v44 = vld [vmem:[%s5518_s27 + $0x16d8] sm:$0xff] }
 0x1b1   : > { %3282 = vmatpush.msrb.mxu2 %v962_v45  ;;  %4734 = vst [vmem:[%s5952_s11 + $0x58] sm:$0xff] %v4630_v54  ;;  %v2569_v59 = vpop.f32.mrf.mxu2  ;;  %3302 = vmatpush.msrb.mxu3 %v963_v48  ;;  %v2589_v63 = vpop.f32.mrf.mxu3  ;;  %v448_v45 = vld [vmem:[%s5518_s27 + $0x6a0] sm:$0xff]  ;;  %v321_v48 = vld [vmem:[%s5518_s27 + $0x2a8] sm:$0xff] }
 0x1b2   : > { %3166 = vmatpush.msra.mxu0 %v444_v49  ;;  %v2570_v62 = vadd.f32 %v2569_v59, %v1342_v20  ;;  %3187 = vmatpush.msra.mxu1 %v317_v52  ;;  %v2549_v3 = vpop.f32.mrf.mxu1  ;;  %v2590_v4 = vadd.f32 %v2589_v63, %v1343_v51  ;;  %v1347_v20 = vperm.slane %v6501_v11, 7  ;;  %v838_v49 = vld [vmem:[%s5518_s27 + $0x12d0] sm:$0xff]  ;;  %v1345_v51 = vperm.slane %v6501_v11, 5  ;;  %v839_v52 = vld [vmem:[%s5518_s27 + $0x12d8] sm:$0xff]  ;;  %v1221_v54 = vld [vmem:[%s5518_s27 + $0x1ec8] sm:$0xff] }
 0x1b3   : > { %3283 = vmatpush.msrb.mxu2 %v834_v53  ;;  %4936 = vmatmul.msk.f32.vlgmr.msrb.gmra.mxu1 %vm1548_vm0, %v6446_v41  ;;  %v2550_v7 = vadd.f32 %v2549_v3, %v1341_v34  ;;  %v320_v34 = vld [vmem:[%s5518_s27 + $0x2a0] sm:$0xff] }
 0x1b4   : > { %3303 = vmatpush.msrb.mxu3 %v835_v58  ;;  %v4212_v8 = vmul.f32 1.442695, %v2570_v62  ;;  %3260 = vmatpush.msrb.mxu1 %v1217_v60  ;;  %v4214_v12 = vmul.f32 1.442695, %v2590_v4  ;;  %v1344_v60 = vperm.slane %v6501_v11, 4  ;;  %v711_v11 = vld [vmem:[%s5518_s27 + $0xed8] sm:$0xff] }
 0x1b5   : > { %3167 = vmatpush.msra.mxu0 %v316_v61  ;;  %v2529_v13 = vpop.f32.mrf.mxu0  ;;  %3284 = vmatpush.msrb.mxu2 %v706_v1  ;;  %v4210_v15 = vmul.f32 1.442695, %v2550_v7  ;;  %v710_v61 = vld [vmem:[%s5518_s27 + $0xed0] sm:$0xff]  ;;  %v1093_v1 = vld [vmem:[%s5518_s27 + $0x1ac8] sm:$0xff] }
 0x1b6   : > { %4935 = vmatmul.msk.f32.vlgmr.msrb.gmra.mxu0 %vm1548_vm0, %v6446_v41  ;;  %5133 = vpow2.f32 %v4212_v8  ;;  %v2530_v16 = vadd.f32 %v2529_v13, %v1340_v0  ;;  %3261 = vmatpush.msrb.mxu1 %v1089_v6  ;;  %v1220_v0 = vld [vmem:[%s5518_s27 + $0x1ec0] sm:$0xff]  ;;  %v583_v13 = vld [vmem:[%s5518_s27 + $0xad8] sm:$0xff] }
 0x1b7   : > { %3240 = vmatpush.msrb.mxu0 %v1216_v5  ;;  %5135 = vpow2.f32 %v4214_v12  ;;  %3304 = vmatpush.msrb.mxu3 %v707_v9  ;;  %v582_v5 = vld [vmem:[%s5518_s27 + $0xad0] sm:$0xff]  ;;  %v1092_v8 = vld [vmem:[%s5518_s27 + $0x1ac0] sm:$0xff]  ;;  %v965_v9 = vld [vmem:[%s5518_s27 + $0x16c8] sm:$0xff] }
 0x1b8   : > { %3285 = vmatpush.msrb.mxu2 %v578_v10  ;;  %5137 = vpow2.f32 %v4210_v15  ;;  %v4208_v22 = vmul.f32 1.442695, %v2530_v16  ;;  %3262 = vmatpush.msrb.mxu1 %v961_v14  ;;  %v964_v14 = vld [vmem:[%s5518_s27 + $0x16c0] sm:$0xff]  ;;  %v837_v15 = vld [vmem:[%s5518_s27 + $0x12c8] sm:$0xff] }
 0x1b9   : > { %3241 = vmatpush.msrb.mxu0 %v1088_v47  ;;  %3305 = vmatpush.msrb.mxu3 %v579_v17  ;;  %v454_v47 = vld [vmem:[%s5518_s27 + $0x6d0] sm:$0xff]  ;;  %v455_v17 = vld [vmem:[%s5518_s27 + $0x6d8] sm:$0xff] }
 0x1ba   : > { %3286 = vmatpush.msrb.mxu2 %v450_v18  ;;  %5139 = vpow2.f32 %v4208_v22  ;;  %3263 = vmatpush.msrb.mxu1 %v833_v21  ;;  %v326_v18 = vld [vmem:[%s5518_s27 + $0x2d0] sm:$0xff]  ;;  %v709_v21 = vld [vmem:[%s5518_s27 + $0xec8] sm:$0xff]  ;;  %v327_v22 = vld [vmem:[%s5518_s27 + $0x2d8] sm:$0xff] }
 0x1bb   : > { %3242 = vmatpush.msrb.mxu0 %v960_v19  ;;  %3306 = vmatpush.msrb.mxu3 %v451_v56  ;;  %v836_v19 = vld [vmem:[%s5518_s27 + $0x12c0] sm:$0xff] }
 0x1bc   : > { %v5134_v27 = vpop.eup %5133  ;;  %3287 = vmatpush.msrb.mxu2 %v322_v23  ;;  %3264 = vmatpush.msrb.mxu1 %v705_v25  ;;  %v1226_v23 = vld [vmem:[%s5518_s27 + $0x1ef0] sm:$0xff]  ;;  %v1227_v25 = vld [vmem:[%s5518_s27 + $0x1ef8] sm:$0xff] }
 0x1bd   : > { %v5136_v42 = vpop.eup %5135  ;;  %3243 = vmatpush.msrb.mxu0 %v832_v24  ;;  %v4533_v2 = vrot.slane %v5134_v27, 4  ;;  %3307 = vmatpush.msrb.mxu3 %v323_v26  ;;  %v708_v26 = vld [vmem:[%s5518_s27 + $0xec0] sm:$0xff] }
 0x1be   : > { %v5138_v31 = vpop.eup %5137  ;;  %4941 = vmatmul.msk.f32.vlgmr.msra.gmra.mxu2 %vm1548_vm0, %v6446_v41  ;;  %v4534_v35 = vrot.slane %v5136_v42, 2  ;;  %4942 = vmatmul.msk.f32.vlgmr.msra.gmra.mxu3 %vm1548_vm0, %v6446_v41  ;;  %v581_v42 = vld [vmem:[%s5518_s27 + $0xac8] sm:$0xff] }
 0x1bf   : > { %3360 = vmatpush.msra.mxu2 %v1222_v28  ;;  %v4532_v38 = vrot.slane %v5138_v31, 6  ;;  %3380 = vmatpush.msra.mxu3 %v1223_v29  ;;  %v1098_v29 = vld [vmem:[%s5518_s27 + $0x1af0] sm:$0xff]  ;;  %v1099_v31 = vld [vmem:[%s5518_s27 + $0x1af8] sm:$0xff] }
 0x1c0   : > { %v5140_v39 = vpop.eup %5139  ;;  %3244 = vmatpush.msrb.mxu0 %v704_v30  ;;  %v4632_v57 = vsel %vm4594_vm1, %v4533_v2, %v4534_v35  ;;  %3265 = vmatpush.msrb.mxu1 %v577_v32  ;;  %v6600_v2 = vld [vmem:[%s5524_s5 + $0x38] sm:$0xff]  ;;  %v580_v32 = vld [vmem:[%s5518_s27 + $0xac0] sm:$0xff] }
 0x1c1   : > { %3361 = vmatpush.msra.mxu2 %v1094_v33  ;;  %v4631_v46 = vsel %vm4592_vm2, %v5140_v39, %v4532_v38  ;;  %3381 = vmatpush.msra.mxu3 %v1095_v36  ;;  %v453_v36 = vld [vmem:[%s5518_s27 + $0x6c8] sm:$0xff]  ;;  %v1350_v39 = vperm.slane %v6600_v2, 2 }
 0x1c2   : > { %3245 = vmatpush.msrb.mxu0 %v576_v37  ;;  %v4633_v50 = vsel %vm4596_vm3, %v4631_v46, %v4632_v57  ;;  %3266 = vmatpush.msrb.mxu1 %v449_v40  ;;  %v970_v37 = vld [vmem:[%s5518_s27 + $0x16f0] sm:$0xff]  ;;  %v971_v40 = vld [vmem:[%s5518_s27 + $0x16f8] sm:$0xff] }
 0x1c3   : > { %3362 = vmatpush.msra.mxu2 %v966_v55  ;;  %4735 = vst [vmem:[%s5952_s11 + $0x60] sm:$0xff] %v4633_v50  ;;  %v2649_v53 = vpop.f32.mrf.mxu2  ;;  %3382 = vmatpush.msra.mxu3 %v967_v44  ;;  %v2669_v59 = vpop.f32.mrf.mxu3  ;;  %v452_v55 = vld [vmem:[%s5518_s27 + $0x6c0] sm:$0xff]  ;;  %v325_v44 = vld [vmem:[%s5518_s27 + $0x2c8] sm:$0xff] }
 0x1c4   : > { %3246 = vmatpush.msrb.mxu0 %v448_v45  ;;  %v2650_v58 = vadd.f32 %v2649_v53, %v1346_v43  ;;  %3267 = vmatpush.msrb.mxu1 %v321_v48  ;;  %v2629_v62 = vpop.f32.mrf.mxu1  ;;  %v2670_v63 = vadd.f32 %v2669_v59, %v1347_v20  ;;  %v1351_v43 = vperm.slane %v6600_v2, 3  ;;  %v842_v45 = vld [vmem:[%s5518_s27 + $0x12f0] sm:$0xff]  ;;  %v1349_v20 = vperm.slane %v6600_v2, 1  ;;  %v843_v48 = vld [vmem:[%s5518_s27 + $0x12f8] sm:$0xff]  ;;  %v1225_v50 = vld [vmem:[%s5518_s27 + $0x1ee8] sm:$0xff] }
 0x1c5   : > { %3363 = vmatpush.msra.mxu2 %v838_v49  ;;  %4940 = vmatmul.msk.f32.vlgmr.msra.gmra.mxu1 %vm1548_vm0, %v6446_v41  ;;  %v2630_v3 = vadd.f32 %v2629_v62, %v1345_v51  ;;  %v324_v51 = vld [vmem:[%s5518_s27 + $0x2c0] sm:$0xff] }
 0x1c6   : > { %3383 = vmatpush.msra.mxu3 %v839_v52  ;;  %v4220_v4 = vmul.f32 1.442695, %v2650_v58  ;;  %3340 = vmatpush.msra.mxu1 %v1221_v54  ;;  %v4222_v6 = vmul.f32 1.442695, %v2670_v63  ;;  %v1348_v54 = vperm.slane %v6600_v2, 0 }
 0x1c7   : > { %3247 = vmatpush.msrb.mxu0 %v320_v34  ;;  %v2609_v7 = vpop.f32.mrf.mxu0  ;;  %3364 = vmatpush.msra.mxu2 %v710_v61  ;;  %v4218_v10 = vmul.f32 1.442695, %v2630_v3  ;;  %v714_v34 = vld [vmem:[%s5518_s27 + $0xef0] sm:$0xff]  ;;  %v1097_v61 = vld [vmem:[%s5518_s27 + $0x1ae8] sm:$0xff] }
 0x1c8   : > { %4939 = vmatmul.msk.f32.vlgmr.msra.gmra.mxu0 %vm1548_vm0, %v6446_v41  ;;  %5141 = vpow2.f32 %v4220_v4  ;;  %v2610_v12 = vadd.f32 %v2609_v7, %v1344_v60  ;;  %3341 = vmatpush.msra.mxu1 %v1093_v1  ;;  %v1224_v60 = vld [vmem:[%s5518_s27 + $0x1ee0] sm:$0xff]  ;;  %v586_v1 = vld [vmem:[%s5518_s27 + $0xaf0] sm:$0xff] }
 0x1c9   : > { %3320 = vmatpush.msra.mxu0 %v1220_v0  ;;  %5143 = vpow2.f32 %v4222_v6  ;;  %3384 = vmatpush.msra.mxu3 %v711_v11  ;;  %v715_v0 = vld [vmem:[%s5518_s27 + $0xef8] sm:$0xff]  ;;  %v1096_v11 = vld [vmem:[%s5518_s27 + $0x1ae0] sm:$0xff] }
 0x1ca   : > { %3365 = vmatpush.msra.mxu2 %v582_v5  ;;  %5145 = vpow2.f32 %v4218_v10  ;;  %v4216_v16 = vmul.f32 1.442695, %v2610_v12  ;;  %3342 = vmatpush.msra.mxu1 %v965_v9  ;;  %v969_v5 = vld [vmem:[%s5518_s27 + $0x16e8] sm:$0xff]  ;;  %v458_v9 = vld [vmem:[%s5518_s27 + $0x6f0] sm:$0xff]  ;;  %v968_v10 = vld [vmem:[%s5518_s27 + $0x16e0] sm:$0xff] }
 0x1cb   : > { %3321 = vmatpush.msra.mxu0 %v1092_v8  ;;  %3385 = vmatpush.msra.mxu3 %v583_v13  ;;  %v587_v8 = vld [vmem:[%s5518_s27 + $0xaf8] sm:$0xff]  ;;  %v841_v12 = vld [vmem:[%s5518_s27 + $0x12e8] sm:$0xff] }
 0x1cc   : > { %3366 = vmatpush.msra.mxu2 %v454_v47  ;;  %5147 = vpow2.f32 %v4216_v16  ;;  %3343 = vmatpush.msra.mxu1 %v837_v15  ;;  %v459_v47 = vld [vmem:[%s5518_s27 + $0x6f8] sm:$0xff]  ;;  %v840_v15 = vld [vmem:[%s5518_s27 + $0x12e0] sm:$0xff]  ;;  %v713_v16 = vld [vmem:[%s5518_s27 + $0xee8] sm:$0xff] }
 0x1cd   : > { %3322 = vmatpush.msra.mxu0 %v964_v14  ;;  %3386 = vmatpush.msra.mxu3 %v455_v17  ;;  %v330_v14 = vld [vmem:[%s5518_s27 + $0x2f0] sm:$0xff]  ;;  %v331_v17 = vld [vmem:[%s5518_s27 + $0x2f8] sm:$0xff] }
 0x1ce   : > { %v5142_v56 = vpop.eup %5141  ;;  %3367 = vmatpush.msra.mxu2 %v326_v18  ;;  %3344 = vmatpush.msra.mxu1 %v709_v21 }
 0x1cf   : > { %v5144_v24 = vpop.eup %5143  ;;  %3323 = vmatpush.msra.mxu0 %v836_v19  ;;  %v4536_v27 = vrot.slane %v5142_v56, 4  ;;  %3387 = vmatpush.msra.mxu3 %v327_v22  ;;  %v1230_v19 = vld [vmem:[%s5518_s27 + $0x1f10] sm:$0xff]  ;;  %v1231_v22 = vld [vmem:[%s5518_s27 + $0x1f18] sm:$0xff]  ;;  %v712_v56 = vld [vmem:[%s5518_s27 + $0xee0] sm:$0xff] }
 0x1d0   : > { %v5146_v28 = vpop.eup %5145  ;;  %4945 = vmatmul.msk.f32.vlgmr.msrb.gmra.mxu2 %vm1548_vm0, %v6446_v41  ;;  %v4537_v30 = vrot.slane %v5144_v24, 2  ;;  %4946 = vmatmul.msk.f32.vlgmr.msrb.gmra.mxu3 %vm1548_vm0, %v6446_v41 }
 0x1d1   : > { %3440 = vmatpush.msrb.mxu2 %v1226_v23  ;;  %v4535_v33 = vrot.slane %v5146_v28, 6  ;;  %3460 = vmatpush.msrb.mxu3 %v1227_v25  ;;  %v585_v25 = vld [vmem:[%s5518_s27 + $0xae8] sm:$0xff]  ;;  %v1103_v28 = vld [vmem:[%s5518_s27 + $0x1b18] sm:$0xff] }
 0x1d2   : > { %v5148_v35 = vpop.eup %5147  ;;  %3324 = vmatpush.msra.mxu0 %v708_v26  ;;  %v4635_v38 = vsel %vm4594_vm1, %v4536_v27, %v4537_v30  ;;  %3345 = vmatpush.msra.mxu1 %v581_v42  ;;  %v1102_v26 = vld [vmem:[%s5518_s27 + $0x1b10] sm:$0xff]  ;;  %v584_v42 = vld [vmem:[%s5518_s27 + $0xae0] sm:$0xff] }
 0x1d3   : > { %3441 = vmatpush.msrb.mxu2 %v1098_v29  ;;  %v4634_v57 = vsel %vm4592_vm2, %v5148_v35, %v4535_v33  ;;  %3461 = vmatpush.msrb.mxu3 %v1099_v31  ;;  %v457_v31 = vld [vmem:[%s5518_s27 + $0x6e8] sm:$0xff]  ;;  %v1354_v35 = vperm.slane %v6600_v2, 6 }
 0x1d4   : > { %3325 = vmatpush.msra.mxu0 %v580_v32  ;;  %v4636_v46 = vsel %vm4596_vm3, %v4634_v57, %v4635_v38  ;;  %3346 = vmatpush.msra.mxu1 %v453_v36  ;;  %v974_v32 = vld [vmem:[%s5518_s27 + $0x1710] sm:$0xff]  ;;  %v975_v36 = vld [vmem:[%s5518_s27 + $0x1718] sm:$0xff] }
 0x1d5   : > { %3442 = vmatpush.msrb.mxu2 %v970_v37  ;;  %4736 = vst [vmem:[%s5952_s11 + $0x68] sm:$0xff] %v4636_v46  ;;  %v2729_v49 = vpop.f32.mrf.mxu2  ;;  %3462 = vmatpush.msrb.mxu3 %v971_v40  ;;  %v2749_v53 = vpop.f32.mrf.mxu3  ;;  %v456_v37 = vld [vmem:[%s5518_s27 + $0x6e0] sm:$0xff]  ;;  %v329_v40 = vld [vmem:[%s5518_s27 + $0x2e8] sm:$0xff] }
 0x1d6   : > { %3326 = vmatpush.msra.mxu0 %v452_v55  ;;  %v2730_v52 = vadd.f32 %v2729_v49, %v1350_v39  ;;  %3347 = vmatpush.msra.mxu1 %v325_v44  ;;  %v2709_v58 = vpop.f32.mrf.mxu1  ;;  %v2750_v59 = vadd.f32 %v2749_v53, %v1351_v43  ;;  %v1355_v39 = vperm.slane %v6600_v2, 7  ;;  %v846_v55 = vld [vmem:[%s5518_s27 + $0x1310] sm:$0xff]  ;;  %v1353_v43 = vperm.slane %v6600_v2, 5  ;;  %v847_v44 = vld [vmem:[%s5518_s27 + $0x1318] sm:$0xff]  ;;  %v1229_v46 = vld [vmem:[%s5518_s27 + $0x1f08] sm:$0xff] }
 0x1d7   : > { %3443 = vmatpush.msrb.mxu2 %v842_v45  ;;  %4944 = vmatmul.msk.f32.vlgmr.msrb.gmra.mxu1 %vm1548_vm0, %v6446_v41  ;;  %v2710_v62 = vadd.f32 %v2709_v58, %v1349_v20  ;;  %v328_v20 = vld [vmem:[%s5518_s27 + $0x2e0] sm:$0xff] }
 0x1d8   : > { %3463 = vmatpush.msrb.mxu3 %v843_v48  ;;  %v4228_v63 = vmul.f32 1.442695, %v2730_v52  ;;  %3420 = vmatpush.msrb.mxu1 %v1225_v50  ;;  %v4230_v3 = vmul.f32 1.442695, %v2750_v59  ;;  %v1352_v50 = vperm.slane %v6600_v2, 4  ;;  %v719_v2 = vld [vmem:[%s5518_s27 + $0xf18] sm:$0xff] }
 0x1d9   : > { %3327 = vmatpush.msra.mxu0 %v324_v51  ;;  %v2689_v4 = vpop.f32.mrf.mxu0  ;;  %3444 = vmatpush.msrb.mxu2 %v714_v34  ;;  %v4226_v6 = vmul.f32 1.442695, %v2710_v62  ;;  %v718_v51 = vld [vmem:[%s5518_s27 + $0xf10] sm:$0xff]  ;;  %v1101_v34 = vld [vmem:[%s5518_s27 + $0x1b08] sm:$0xff] }
 0x1da   : > { %4943 = vmatmul.msk.f32.vlgmr.msrb.gmra.mxu0 %vm1548_vm0, %v6446_v41  ;;  %5149 = vpow2.f32 %v4228_v63  ;;  %v2690_v7 = vadd.f32 %v2689_v4, %v1348_v54  ;;  %3421 = vmatpush.msrb.mxu1 %v1097_v61  ;;  %v1228_v54 = vld [vmem:[%s5518_s27 + $0x1f00] sm:$0xff]  ;;  %v591_v4 = vld [vmem:[%s5518_s27 + $0xb18] sm:$0xff] }
 0x1db   : > { %3400 = vmatpush.msrb.mxu0 %v1224_v60  ;;  %5151 = vpow2.f32 %v4230_v3  ;;  %3464 = vmatpush.msrb.mxu3 %v715_v0  ;;  %v590_v60 = vld [vmem:[%s5518_s27 + $0xb10] sm:$0xff]  ;;  %v1100_v63 = vld [vmem:[%s5518_s27 + $0x1b00] sm:$0xff]  ;;  %v973_v0 = vld [vmem:[%s5518_s27 + $0x1708] sm:$0xff] }
 0x1dc   : > { %3445 = vmatpush.msrb.mxu2 %v586_v1  ;;  %5153 = vpow2.f32 %v4226_v6  ;;  %v4224_v13 = vmul.f32 1.442695, %v2690_v7  ;;  %3422 = vmatpush.msrb.mxu1 %v969_v5  ;;  %v972_v5 = vld [vmem:[%s5518_s27 + $0x1700] sm:$0xff]  ;;  %v845_v6 = vld [vmem:[%s5518_s27 + $0x1308] sm:$0xff] }
 0x1dd   : > { %3401 = vmatpush.msrb.mxu0 %v1096_v11  ;;  %3465 = vmatpush.msrb.mxu3 %v587_v8  ;;  %v462_v11 = vld [vmem:[%s5518_s27 + $0x710] sm:$0xff]  ;;  %v463_v8 = vld [vmem:[%s5518_s27 + $0x718] sm:$0xff] }
 0x1de   : > { %3446 = vmatpush.msrb.mxu2 %v458_v9  ;;  %5155 = vpow2.f32 %v4224_v13  ;;  %3423 = vmatpush.msrb.mxu1 %v841_v12  ;;  %v334_v9 = vld [vmem:[%s5518_s27 + $0x310] sm:$0xff]  ;;  %v717_v12 = vld [vmem:[%s5518_s27 + $0xf08] sm:$0xff]  ;;  %v335_v13 = vld [vmem:[%s5518_s27 + $0x318] sm:$0xff] }
 0x1df   : > { %3402 = vmatpush.msrb.mxu0 %v968_v10  ;;  %3466 = vmatpush.msrb.mxu3 %v459_v47  ;;  %v844_v10 = vld [vmem:[%s5518_s27 + $0x1300] sm:$0xff] }
 0x1e0   : > { %v5150_v18 = vpop.eup %5149  ;;  %3447 = vmatpush.msrb.mxu2 %v330_v14  ;;  %3424 = vmatpush.msrb.mxu1 %v713_v16  ;;  %v1234_v14 = vld [vmem:[%s5518_s27 + $0x1f30] sm:$0xff]  ;;  %v1235_v16 = vld [vmem:[%s5518_s27 + $0x1f38] sm:$0xff] }
 0x1e1   : > { %v5152_v21 = vpop.eup %5151  ;;  %3403 = vmatpush.msrb.mxu0 %v840_v15  ;;  %v4539_v23 = vrot.slane %v5150_v18, 4  ;;  %3467 = vmatpush.msrb.mxu3 %v331_v17  ;;  %v716_v17 = vld [vmem:[%s5518_s27 + $0xf00] sm:$0xff] }
 0x1e2   : > { %v5154_v24 = vpop.eup %5153  ;;  %4949 = vmatmul.msk.f32.vlgmr.msra.gmra.mxu2 %vm1548_vm0, %v6446_v41  ;;  %v4540_v27 = vrot.slane %v5152_v21, 2  ;;  %4950 = vmatmul.msk.f32.vlgmr.msra.gmra.mxu3 %vm1548_vm0, %v6446_v41  ;;  %v589_v21 = vld [vmem:[%s5518_s27 + $0xb08] sm:$0xff] }
 0x1e3   : > { %3520 = vmatpush.msra.mxu2 %v1230_v19  ;;  %v4538_v29 = vrot.slane %v5154_v24, 6  ;;  %3540 = vmatpush.msra.mxu3 %v1231_v22  ;;  %v1106_v22 = vld [vmem:[%s5518_s27 + $0x1b30] sm:$0xff]  ;;  %v1107_v24 = vld [vmem:[%s5518_s27 + $0x1b38] sm:$0xff] }
 0x1e4   : > { %v5156_v30 = vpop.eup %5155  ;;  %3404 = vmatpush.msrb.mxu0 %v712_v56  ;;  %v4638_v33 = vsel %vm4594_vm1, %v4539_v23, %v4540_v27  ;;  %3425 = vmatpush.msrb.mxu1 %v585_v25  ;;  %v6699_v23 = vld [vmem:[%s5524_s5 + $0x40] sm:$0xff] }
 0x1e5   : > { %3521 = vmatpush.msra.mxu2 %v1102_v26  ;;  %v4637_v38 = vsel %vm4592_vm2, %v5156_v30, %v4538_v29  ;;  %3541 = vmatpush.msra.mxu3 %v1103_v28  ;;  %v588_v25 = vld [vmem:[%s5518_s27 + $0xb00] sm:$0xff]  ;;  %v461_v28 = vld [vmem:[%s5518_s27 + $0x708] sm:$0xff]  ;;  %v1358_v30 = vperm.slane %v6699_v23, 2 }
 0x1e6   : > { %3405 = vmatpush.msrb.mxu0 %v584_v42  ;;  %v4639_v57 = vsel %vm4596_vm3, %v4637_v38, %v4638_v33  ;;  %3426 = vmatpush.msrb.mxu1 %v457_v31  ;;  %v978_v42 = vld [vmem:[%s5518_s27 + $0x1730] sm:$0xff]  ;;  %v460_v31 = vld [vmem:[%s5518_s27 + $0x700] sm:$0xff]  ;;  %v1359_v33 = vperm.slane %v6699_v23, 3  ;;  %v1357_v38 = vperm.slane %v6699_v23, 1 }
 0x1e7   : > { %3522 = vmatpush.msra.mxu2 %v974_v32  ;;  %4737 = vst [vmem:[%s5952_s11 + $0x70] sm:$0xff] %v4639_v57  ;;  %v2809_v45 = vpop.f32.mrf.mxu2  ;;  %3542 = vmatpush.msra.mxu3 %v975_v36  ;;  %v2829_v49 = vpop.f32.mrf.mxu3  ;;  %v850_v36 = vld [vmem:[%s5518_s27 + $0x1330] sm:$0xff]  ;;  %v332_v57 = vld [vmem:[%s5518_s27 + $0x300] sm:$0xff] }
 0x1e8   : > { %3406 = vmatpush.msrb.mxu0 %v456_v37  ;;  %v2810_v48 = vadd.f32 %v2809_v45, %v1354_v35  ;;  %3427 = vmatpush.msrb.mxu1 %v329_v40  ;;  %v2789_v52 = vpop.f32.mrf.mxu1  ;;  %v2830_v53 = vadd.f32 %v2829_v49, %v1355_v39  ;;  %v333_v35 = vld [vmem:[%s5518_s27 + $0x308] sm:$0xff]  ;;  %v851_v39 = vld [vmem:[%s5518_s27 + $0x1338] sm:$0xff]  ;;  %v1356_v45 = vperm.slane %v6699_v23, 0  ;;  %v6726_v49 = vld [vmem:[%s7133_s0] sm:$0x3] }
 0x1e9   : > { %3523 = vmatpush.msra.mxu2 %v846_v55  ;;  %4948 = vmatmul.msk.f32.vlgmr.msra.gmra.mxu1 %vm1548_vm0, %v6446_v41  ;;  %v2790_v58 = vadd.f32 %v2789_v52, %v1353_v43  ;;  %v1233_v55 = vld [vmem:[%s5518_s27 + $0x1f28] sm:$0xff] }
 0x1ea   : > { %3543 = vmatpush.msra.mxu3 %v847_v44  ;;  %v4236_v59 = vmul.f32 1.442695, %v2810_v48  ;;  %3500 = vmatpush.msra.mxu1 %v1229_v46  ;;  %v4238_v61 = vmul.f32 1.442695, %v2830_v53  ;;  %v722_v46 = vld [vmem:[%s5518_s27 + $0xf30] sm:$0xff] }
 0x1eb   : > { %3407 = vmatpush.msrb.mxu0 %v328_v20  ;;  %v2769_v62 = vpop.f32.mrf.mxu0  ;;  %3524 = vmatpush.msra.mxu2 %v718_v51  ;;  %v4234_v1 = vmul.f32 1.442695, %v2790_v58  ;;  %v1105_v51 = vld [vmem:[%s5518_s27 + $0x1b28] sm:$0xff] }
 0x1ec   : > { %4947 = vmatmul.msk.f32.vlgmr.msra.gmra.mxu0 %vm1548_vm0, %v6446_v41  ;;  %5157 = vpow2.f32 %v4236_v59  ;;  %v2770_v3 = vadd.f32 %v2769_v62, %v1352_v50  ;;  %3501 = vmatpush.msra.mxu1 %v1101_v34  ;;  %v1232_v50 = vld [vmem:[%s5518_s27 + $0x1f20] sm:$0xff]  ;;  %v594_v34 = vld [vmem:[%s5518_s27 + $0xb30] sm:$0xff] }
 0x1ed   : > { %3480 = vmatpush.msra.mxu0 %v1228_v54  ;;  %5159 = vpow2.f32 %v4238_v61  ;;  %3544 = vmatpush.msra.mxu3 %v719_v2  ;;  %v723_v54 = vld [vmem:[%s5518_s27 + $0xf38] sm:$0xff]  ;;  %v1104_v2 = vld [vmem:[%s5518_s27 + $0x1b20] sm:$0xff] }
 0x1ee   : > { %3525 = vmatpush.msra.mxu2 %v590_v60  ;;  %5161 = vpow2.f32 %v4234_v1  ;;  %v4232_v7 = vmul.f32 1.442695, %v2770_v3  ;;  %3502 = vmatpush.msra.mxu1 %v973_v0  ;;  %v977_v60 = vld [vmem:[%s5518_s27 + $0x1728] sm:$0xff]  ;;  %v466_v0 = vld [vmem:[%s5518_s27 + $0x730] sm:$0xff]  ;;  %v976_v1 = vld [vmem:[%s5518_s27 + $0x1720] sm:$0xff] }
 0x1ef   : > { %3481 = vmatpush.msra.mxu0 %v1100_v63  ;;  %3545 = vmatpush.msra.mxu3 %v591_v4  ;;  %v595_v63 = vld [vmem:[%s5518_s27 + $0xb38] sm:$0xff]  ;;  %v849_v3 = vld [vmem:[%s5518_s27 + $0x1328] sm:$0xff] }
 0x1f0   : > { %3526 = vmatpush.msra.mxu2 %v462_v11  ;;  %5163 = vpow2.f32 %v4232_v7  ;;  %3503 = vmatpush.msra.mxu1 %v845_v6  ;;  %v467_v11 = vld [vmem:[%s5518_s27 + $0x738] sm:$0xff]  ;;  %v848_v6 = vld [vmem:[%s5518_s27 + $0x1320] sm:$0xff]  ;;  %v721_v7 = vld [vmem:[%s5518_s27 + $0xf28] sm:$0xff] }
 0x1f1   : > { %3482 = vmatpush.msra.mxu0 %v972_v5  ;;  %3546 = vmatpush.msra.mxu3 %v463_v8  ;;  %v338_v5 = vld [vmem:[%s5518_s27 + $0x330] sm:$0xff]  ;;  %v339_v8 = vld [vmem:[%s5518_s27 + $0x338] sm:$0xff] }
 0x1f2   : > { %v5158_v47 = vpop.eup %5157  ;;  %3527 = vmatpush.msra.mxu2 %v334_v9  ;;  %3504 = vmatpush.msra.mxu1 %v717_v12 }
 0x1f3   : > { %v5160_v15 = vpop.eup %5159  ;;  %3483 = vmatpush.msra.mxu0 %v844_v10  ;;  %v4542_v18 = vrot.slane %v5158_v47, 4  ;;  %3547 = vmatpush.msra.mxu3 %v335_v13  ;;  %v1238_v10 = vld [vmem:[%s5518_s27 + $0x1f50] sm:$0xff]  ;;  %v1239_v13 = vld [vmem:[%s5518_s27 + $0x1f58] sm:$0xff]  ;;  %v720_v47 = vld [vmem:[%s5518_s27 + $0xf20] sm:$0xff] }
 0x1f4   : > { %v5162_v19 = vpop.eup %5161  ;;  %4953 = vmatmul.msk.f32.vlgmr.msrb.gmra.mxu2 %vm1548_vm0, %v6446_v41  ;;  %v4543_v56 = vrot.slane %v5160_v15, 2  ;;  %4954 = vmatmul.msk.f32.vlgmr.msrb.gmra.mxu3 %vm1548_vm0, %v6446_v41  ;;  %v979_v41 = vld [vmem:[%s5518_s27 + $0x1738] sm:$0xff] }
 0x1f5   : > { %3600 = vmatpush.msrb.mxu2 %v1234_v14  ;;  %v4541_v26 = vrot.slane %v5162_v19, 6  ;;  %3620 = vmatpush.msrb.mxu3 %v1235_v16  ;;  %v593_v16 = vld [vmem:[%s5518_s27 + $0xb28] sm:$0xff]  ;;  %v1111_v19 = vld [vmem:[%s5518_s27 + $0x1b58] sm:$0xff] }
 0x1f6   : > { %v5164_v27 = vpop.eup %5163  ;;  %3484 = vmatpush.msra.mxu0 %v716_v17  ;;  %v4641_v29 = vsel %vm4594_vm1, %v4542_v18, %v4543_v56  ;;  %3505 = vmatpush.msra.mxu1 %v589_v21  ;;  %v1110_v17 = vld [vmem:[%s5518_s27 + $0x1b50] sm:$0xff]  ;;  %v592_v21 = vld [vmem:[%s5518_s27 + $0xb20] sm:$0xff] }
 0x1f7   : > { %3601 = vmatpush.msrb.mxu2 %v1106_v22  ;;  %v4640_v32 = vsel %vm4592_vm2, %v5164_v27, %v4541_v26  ;;  %3621 = vmatpush.msrb.mxu3 %v1107_v24  ;;  %v465_v24 = vld [vmem:[%s5518_s27 + $0x728] sm:$0xff]  ;;  %v1362_v27 = vperm.slane %v6699_v23, 6 }
 0x1f8   : > { %3485 = vmatpush.msra.mxu0 %v588_v25  ;;  %v4642_v37 = vsel %vm4596_vm3, %v4640_v32, %v4641_v29  ;;  %3506 = vmatpush.msra.mxu1 %v461_v28  ;;  %v982_v25 = vld [vmem:[%s5518_s27 + $0x1750] sm:$0xff]  ;;  %v983_v28 = vld [vmem:[%s5518_s27 + $0x1758] sm:$0xff] }
 0x1f9   : > { %3602 = vmatpush.msrb.mxu2 %v978_v42  ;;  %4738 = vst [vmem:[%s5952_s11 + $0x78] sm:$0xff] %v4642_v37  ;;  %v2889_v40 = vpop.f32.mrf.mxu2  ;;  %3622 = vmatpush.msrb.mxu3 %v979_v41  ;;  %v2909_v44 = vpop.f32.mrf.mxu3  ;;  %v464_v42 = vld [vmem:[%s5518_s27 + $0x720] sm:$0xff]  ;;  %v337_v41 = vld [vmem:[%s5518_s27 + $0x328] sm:$0xff] }
 0x1fa   : > { %3486 = vmatpush.msra.mxu0 %v460_v31  ;;  %v2890_v43 = vadd.f32 %v2889_v40, %v1358_v30  ;;  %3507 = vmatpush.msra.mxu1 %v333_v35  ;;  %v2869_v20 = vpop.f32.mrf.mxu1  ;;  %v2910_v48 = vadd.f32 %v2909_v44, %v1359_v33  ;;  %v1363_v30 = vperm.slane %v6699_v23, 7  ;;  %v854_v31 = vld [vmem:[%s5518_s27 + $0x1350] sm:$0xff]  ;;  %v1361_v33 = vperm.slane %v6699_v23, 5  ;;  %v855_v35 = vld [vmem:[%s5518_s27 + $0x1358] sm:$0xff]  ;;  %v1237_v37 = vld [vmem:[%s5518_s27 + $0x1f48] sm:$0xff] }
 0x1fb   : > { %3603 = vmatpush.msrb.mxu2 %v850_v36  ;;  %4952 = vmatmul.msk.f32.vlgmr.msrb.gmra.mxu1 %vm1548_vm0, %v6726_v49  ;;  %v2870_v52 = vadd.f32 %v2869_v20, %v1357_v38  ;;  %v336_v38 = vld [vmem:[%s5518_s27 + $0x320] sm:$0xff] }
 0x1fc   : > { %3623 = vmatpush.msrb.mxu3 %v851_v39  ;;  %v4244_v53 = vmul.f32 1.442695, %v2890_v43  ;;  %3580 = vmatpush.msrb.mxu1 %v1233_v55  ;;  %v4246_v58 = vmul.f32 1.442695, %v2910_v48  ;;  %v1360_v55 = vperm.slane %v6699_v23, 4  ;;  %v727_v23 = vld [vmem:[%s5518_s27 + $0xf58] sm:$0xff] }
 0x1fd   : > { %3487 = vmatpush.msra.mxu0 %v332_v57  ;;  %v2849_v59 = vpop.f32.mrf.mxu0  ;;  %3604 = vmatpush.msrb.mxu2 %v722_v46  ;;  %v4242_v61 = vmul.f32 1.442695, %v2870_v52  ;;  %v726_v57 = vld [vmem:[%s5518_s27 + $0xf50] sm:$0xff]  ;;  %v1109_v46 = vld [vmem:[%s5518_s27 + $0x1b48] sm:$0xff] }
 0x1fe   : > { %4951 = vmatmul.msk.f32.vlgmr.msrb.gmra.mxu0 %vm1548_vm0, %v6726_v49  ;;  %5165 = vpow2.f32 %v4244_v53  ;;  %v2850_v62 = vadd.f32 %v2849_v59, %v1356_v45  ;;  %3581 = vmatpush.msrb.mxu1 %v1105_v51  ;;  %v1236_v45 = vld [vmem:[%s5518_s27 + $0x1f40] sm:$0xff]  ;;  %v599_v59 = vld [vmem:[%s5518_s27 + $0xb58] sm:$0xff] }
 0x1ff   : > { %3560 = vmatpush.msrb.mxu0 %v1232_v50  ;;  %5167 = vpow2.f32 %v4246_v58  ;;  %3624 = vmatpush.msrb.mxu3 %v723_v54  ;;  %v598_v50 = vld [vmem:[%s5518_s27 + $0xb50] sm:$0xff]  ;;  %v1108_v53 = vld [vmem:[%s5518_s27 + $0x1b40] sm:$0xff]  ;;  %v981_v54 = vld [vmem:[%s5518_s27 + $0x1748] sm:$0xff] }
 0x200   : > { %3605 = vmatpush.msrb.mxu2 %v594_v34  ;;  %5169 = vpow2.f32 %v4242_v61  ;;  %v4240_v4 = vmul.f32 1.442695, %v2850_v62  ;;  %3582 = vmatpush.msrb.mxu1 %v977_v60  ;;  %v980_v60 = vld [vmem:[%s5518_s27 + $0x1740] sm:$0xff]  ;;  %v853_v61 = vld [vmem:[%s5518_s27 + $0x1348] sm:$0xff] }
 0x201   : > { %3561 = vmatpush.msrb.mxu0 %v1104_v2  ;;  %3625 = vmatpush.msrb.mxu3 %v595_v63  ;;  %v470_v2 = vld [vmem:[%s5518_s27 + $0x750] sm:$0xff]  ;;  %v471_v63 = vld [vmem:[%s5518_s27 + $0x758] sm:$0xff] }
 0x202   : > { %3606 = vmatpush.msrb.mxu2 %v466_v0  ;;  %5171 = vpow2.f32 %v4240_v4  ;;  %3583 = vmatpush.msrb.mxu1 %v849_v3  ;;  %v342_v0 = vld [vmem:[%s5518_s27 + $0x350] sm:$0xff]  ;;  %v725_v3 = vld [vmem:[%s5518_s27 + $0xf48] sm:$0xff]  ;;  %v343_v4 = vld [vmem:[%s5518_s27 + $0x358] sm:$0xff] }
 0x203   : > { %3562 = vmatpush.msrb.mxu0 %v976_v1  ;;  %3626 = vmatpush.msrb.mxu3 %v467_v11  ;;  %v852_v1 = vld [vmem:[%s5518_s27 + $0x1340] sm:$0xff] }
 0x204   : > { %v5166_v9 = vpop.eup %5165  ;;  %3607 = vmatpush.msrb.mxu2 %v338_v5  ;;  %3584 = vmatpush.msrb.mxu1 %v721_v7  ;;  %v1242_v5 = vld [vmem:[%s5518_s27 + $0x1f70] sm:$0xff]  ;;  %v1243_v7 = vld [vmem:[%s5518_s27 + $0x1f78] sm:$0xff] }
 0x205   : > { %v5168_v12 = vpop.eup %5167  ;;  %3563 = vmatpush.msrb.mxu0 %v848_v6  ;;  %v4545_v14 = vrot.slane %v5166_v9, 4  ;;  %3627 = vmatpush.msrb.mxu3 %v339_v8  ;;  %v724_v8 = vld [vmem:[%s5518_s27 + $0xf40] sm:$0xff] }
 0x206   : > { %v5170_v15 = vpop.eup %5169  ;;  %4957 = vmatmul.msk.f32.vlgmr.msra.gmra.mxu2 %vm1548_vm0, %v6726_v49  ;;  %v4546_v18 = vrot.slane %v5168_v12, 2  ;;  %4958 = vmatmul.msk.f32.vlgmr.msra.gmra.mxu3 %vm1548_vm0, %v6726_v49  ;;  %v597_v12 = vld [vmem:[%s5518_s27 + $0xb48] sm:$0xff] }
 0x207   : > { %3680 = vmatpush.msra.mxu2 %v1238_v10  ;;  %v4544_v22 = vrot.slane %v5170_v15, 6  ;;  %3700 = vmatpush.msra.mxu3 %v1239_v13  ;;  %v1114_v13 = vld [vmem:[%s5518_s27 + $0x1b70] sm:$0xff]  ;;  %v1115_v15 = vld [vmem:[%s5518_s27 + $0x1b78] sm:$0xff] }
 0x208   : > { %v5172_v56 = vpop.eup %5171  ;;  %3564 = vmatpush.msrb.mxu0 %v720_v47  ;;  %v4644_v26 = vsel %vm4594_vm1, %v4545_v14, %v4546_v18  ;;  %3585 = vmatpush.msrb.mxu1 %v593_v16  ;;  %v6803_v14 = vld [vmem:[%s5524_s5 + $0x48] sm:$0xff]  ;;  %v596_v16 = vld [vmem:[%s5518_s27 + $0xb40] sm:$0xff] }
 0x209   : > { %3681 = vmatpush.msra.mxu2 %v1110_v17  ;;  %v4643_v29 = vsel %vm4592_vm2, %v5172_v56, %v4544_v22  ;;  %3701 = vmatpush.msra.mxu3 %v1111_v19  ;;  %v469_v19 = vld [vmem:[%s5518_s27 + $0x748] sm:$0xff]  ;;  %v1366_v56 = vperm.slane %v6803_v14, 2 }
 0x20a   : > { %3565 = vmatpush.msrb.mxu0 %v592_v21  ;;  %v4645_v32 = vsel %vm4596_vm3, %v4643_v29, %v4644_v26  ;;  %3586 = vmatpush.msrb.mxu1 %v465_v24  ;;  %v986_v21 = vld [vmem:[%s5518_s27 + $0x1770] sm:$0xff]  ;;  %v987_v24 = vld [vmem:[%s5518_s27 + $0x1778] sm:$0xff] }
 0x20b   : > { %3682 = vmatpush.msra.mxu2 %v982_v25  ;;  %4739 = vst [vmem:[%s5952_s11 + $0x80] sm:$0xff] %v4645_v32  ;;  %v2969_v36 = vpop.f32.mrf.mxu2  ;;  %3702 = vmatpush.msra.mxu3 %v983_v28  ;;  %v2989_v40 = vpop.f32.mrf.mxu3  ;;  %v468_v25 = vld [vmem:[%s5518_s27 + $0x740] sm:$0xff]  ;;  %v341_v28 = vld [vmem:[%s5518_s27 + $0x348] sm:$0xff] }
 0x20c   : > { %3566 = vmatpush.msrb.mxu0 %v464_v42  ;;  %v2970_v39 = vadd.f32 %v2969_v36, %v1362_v27  ;;  %3587 = vmatpush.msrb.mxu1 %v337_v41  ;;  %v2949_v43 = vpop.f32.mrf.mxu1  ;;  %v2990_v44 = vadd.f32 %v2989_v40, %v1363_v30  ;;  %v1367_v27 = vperm.slane %v6803_v14, 3  ;;  %v858_v42 = vld [vmem:[%s5518_s27 + $0x1370] sm:$0xff]  ;;  %v1365_v30 = vperm.slane %v6803_v14, 1  ;;  %v859_v41 = vld [vmem:[%s5518_s27 + $0x1378] sm:$0xff]  ;;  %v1241_v32 = vld [vmem:[%s5518_s27 + $0x1f68] sm:$0xff] }
 0x20d   : > { %3683 = vmatpush.msra.mxu2 %v854_v31  ;;  %4956 = vmatmul.msk.f32.vlgmr.msra.gmra.mxu1 %vm1548_vm0, %v6726_v49  ;;  %v2950_v20 = vadd.f32 %v2949_v43, %v1361_v33  ;;  %v340_v33 = vld [vmem:[%s5518_s27 + $0x340] sm:$0xff] }
 0x20e   : > { %3703 = vmatpush.msra.mxu3 %v855_v35  ;;  %v4252_v48 = vmul.f32 1.442695, %v2970_v39  ;;  %3660 = vmatpush.msra.mxu1 %v1237_v37  ;;  %v4254_v51 = vmul.f32 1.442695, %v2990_v44  ;;  %v1364_v37 = vperm.slane %v6803_v14, 0 }
 0x20f   : > { %3567 = vmatpush.msrb.mxu0 %v336_v38  ;;  %v2929_v52 = vpop.f32.mrf.mxu0  ;;  %3684 = vmatpush.msra.mxu2 %v726_v57  ;;  %v4250_v34 = vmul.f32 1.442695, %v2950_v20  ;;  %v730_v38 = vld [vmem:[%s5518_s27 + $0xf70] sm:$0xff]  ;;  %v1113_v57 = vld [vmem:[%s5518_s27 + $0x1b68] sm:$0xff] }
 0x210   : > { %4955 = vmatmul.msk.f32.vlgmr.msra.gmra.mxu0 %vm1548_vm0, %v6726_v49  ;;  %5173 = vpow2.f32 %v4252_v48  ;;  %v2930_v58 = vadd.f32 %v2929_v52, %v1360_v55  ;;  %3661 = vmatpush.msra.mxu1 %v1109_v46  ;;  %v1240_v55 = vld [vmem:[%s5518_s27 + $0x1f60] sm:$0xff]  ;;  %v602_v46 = vld [vmem:[%s5518_s27 + $0xb70] sm:$0xff] }
 0x211   : > { %3640 = vmatpush.msra.mxu0 %v1236_v45  ;;  %5175 = vpow2.f32 %v4254_v51  ;;  %3704 = vmatpush.msra.mxu3 %v727_v23  ;;  %v731_v45 = vld [vmem:[%s5518_s27 + $0xf78] sm:$0xff]  ;;  %v1112_v23 = vld [vmem:[%s5518_s27 + $0x1b60] sm:$0xff] }
 0x212   : > { %3685 = vmatpush.msra.mxu2 %v598_v50  ;;  %5177 = vpow2.f32 %v4250_v34  ;;  %v4248_v62 = vmul.f32 1.442695, %v2930_v58  ;;  %3662 = vmatpush.msra.mxu1 %v981_v54  ;;  %v985_v50 = vld [vmem:[%s5518_s27 + $0x1768] sm:$0xff]  ;;  %v474_v54 = vld [vmem:[%s5518_s27 + $0x770] sm:$0xff]  ;;  %v984_v34 = vld [vmem:[%s5518_s27 + $0x1760] sm:$0xff] }
 0x213   : > { %3641 = vmatpush.msra.mxu0 %v1108_v53  ;;  %3705 = vmatpush.msra.mxu3 %v599_v59  ;;  %v603_v53 = vld [vmem:[%s5518_s27 + $0xb78] sm:$0xff]  ;;  %v857_v58 = vld [vmem:[%s5518_s27 + $0x1368] sm:$0xff] }
 0x214   : > { %3686 = vmatpush.msra.mxu2 %v470_v2  ;;  %5179 = vpow2.f32 %v4248_v62  ;;  %3663 = vmatpush.msra.mxu1 %v853_v61  ;;  %v475_v2 = vld [vmem:[%s5518_s27 + $0x778] sm:$0xff]  ;;  %v856_v61 = vld [vmem:[%s5518_s27 + $0x1360] sm:$0xff]  ;;  %v729_v62 = vld [vmem:[%s5518_s27 + $0xf68] sm:$0xff] }
 0x215   : > { %3642 = vmatpush.msra.mxu0 %v980_v60  ;;  %3706 = vmatpush.msra.mxu3 %v471_v63  ;;  %v346_v60 = vld [vmem:[%s5518_s27 + $0x370] sm:$0xff]  ;;  %v347_v63 = vld [vmem:[%s5518_s27 + $0x378] sm:$0xff] }
 0x216   : > { %v5174_v11 = vpop.eup %5173  ;;  %3687 = vmatpush.msra.mxu2 %v342_v0  ;;  %3664 = vmatpush.msra.mxu1 %v725_v3 }
 0x217   : > { %v5176_v6 = vpop.eup %5175  ;;  %3643 = vmatpush.msra.mxu0 %v852_v1  ;;  %v4548_v9 = vrot.slane %v5174_v11, 4  ;;  %3707 = vmatpush.msra.mxu3 %v343_v4  ;;  %v1246_v1 = vld [vmem:[%s5518_s27 + $0x1f90] sm:$0xff]  ;;  %v1247_v4 = vld [vmem:[%s5518_s27 + $0x1f98] sm:$0xff]  ;;  %v728_v11 = vld [vmem:[%s5518_s27 + $0xf60] sm:$0xff] }
 0x218   : > { %v5178_v10 = vpop.eup %5177  ;;  %4961 = vmatmul.msk.f32.vlgmr.msrb.gmra.mxu2 %vm1548_vm0, %v6726_v49  ;;  %v4549_v47 = vrot.slane %v5176_v6, 2  ;;  %4962 = vmatmul.msk.f32.vlgmr.msrb.gmra.mxu3 %vm1548_vm0, %v6726_v49 }
 0x219   : > { %3760 = vmatpush.msrb.mxu2 %v1242_v5  ;;  %v4547_v17 = vrot.slane %v5178_v10, 6  ;;  %3780 = vmatpush.msrb.mxu3 %v1243_v7  ;;  %v601_v7 = vld [vmem:[%s5518_s27 + $0xb68] sm:$0xff]  ;;  %v1119_v10 = vld [vmem:[%s5518_s27 + $0x1b98] sm:$0xff] }
 0x21a   : > { %v5180_v18 = vpop.eup %5179  ;;  %3644 = vmatpush.msra.mxu0 %v724_v8  ;;  %v4647_v22 = vsel %vm4594_vm1, %v4548_v9, %v4549_v47  ;;  %3665 = vmatpush.msra.mxu1 %v597_v12  ;;  %v1118_v8 = vld [vmem:[%s5518_s27 + $0x1b90] sm:$0xff]  ;;  %v600_v12 = vld [vmem:[%s5518_s27 + $0xb60] sm:$0xff] }
 0x21b   : > { %3761 = vmatpush.msrb.mxu2 %v1114_v13  ;;  %v4646_v26 = vsel %vm4592_vm2, %v5180_v18, %v4547_v17  ;;  %3781 = vmatpush.msrb.mxu3 %v1115_v15  ;;  %v473_v15 = vld [vmem:[%s5518_s27 + $0x768] sm:$0xff]  ;;  %v1370_v18 = vperm.slane %v6803_v14, 6 }
 0x21c   : > { %3645 = vmatpush.msra.mxu0 %v596_v16  ;;  %v4648_v29 = vsel %vm4596_vm3, %v4646_v26, %v4647_v22  ;;  %3666 = vmatpush.msra.mxu1 %v469_v19  ;;  %v990_v16 = vld [vmem:[%s5518_s27 + $0x1790] sm:$0xff]  ;;  %v991_v19 = vld [vmem:[%s5518_s27 + $0x1798] sm:$0xff] }
 0x21d   : > { %3762 = vmatpush.msrb.mxu2 %v986_v21  ;;  %4740 = vst [vmem:[%s5952_s11 + $0x88] sm:$0xff] %v4648_v29  ;;  %v3049_v31 = vpop.f32.mrf.mxu2  ;;  %3782 = vmatpush.msrb.mxu3 %v987_v24  ;;  %v3069_v36 = vpop.f32.mrf.mxu3  ;;  %v472_v21 = vld [vmem:[%s5518_s27 + $0x760] sm:$0xff]  ;;  %v345_v24 = vld [vmem:[%s5518_s27 + $0x368] sm:$0xff] }
 0x21e   : > { %3646 = vmatpush.msra.mxu0 %v468_v25  ;;  %v3050_v35 = vadd.f32 %v3049_v31, %v1366_v56  ;;  %3667 = vmatpush.msra.mxu1 %v341_v28  ;;  %v3029_v39 = vpop.f32.mrf.mxu1  ;;  %v3070_v40 = vadd.f32 %v3069_v36, %v1367_v27  ;;  %v1371_v56 = vperm.slane %v6803_v14, 7  ;;  %v862_v25 = vld [vmem:[%s5518_s27 + $0x1390] sm:$0xff]  ;;  %v1369_v27 = vperm.slane %v6803_v14, 5  ;;  %v863_v28 = vld [vmem:[%s5518_s27 + $0x1398] sm:$0xff]  ;;  %v1245_v29 = vld [vmem:[%s5518_s27 + $0x1f88] sm:$0xff] }
 0x21f   : > { %3763 = vmatpush.msrb.mxu2 %v858_v42  ;;  %4960 = vmatmul.msk.f32.vlgmr.msrb.gmra.mxu1 %vm1548_vm0, %v6726_v49  ;;  %v3030_v43 = vadd.f32 %v3029_v39, %v1365_v30  ;;  %v344_v30 = vld [vmem:[%s5518_s27 + $0x360] sm:$0xff] }
 0x220   : > { %3783 = vmatpush.msrb.mxu3 %v859_v41  ;;  %v4260_v44 = vmul.f32 1.442695, %v3050_v35  ;;  %3740 = vmatpush.msrb.mxu1 %v1241_v32  ;;  %v4262_v20 = vmul.f32 1.442695, %v3070_v40  ;;  %v1368_v32 = vperm.slane %v6803_v14, 4  ;;  %v735_v14 = vld [vmem:[%s5518_s27 + $0xf98] sm:$0xff] }
 0x221   : > { %3647 = vmatpush.msra.mxu0 %v340_v33  ;;  %v3009_v48 = vpop.f32.mrf.mxu0  ;;  %3764 = vmatpush.msrb.mxu2 %v730_v38  ;;  %v4258_v51 = vmul.f32 1.442695, %v3030_v43  ;;  %v734_v33 = vld [vmem:[%s5518_s27 + $0xf90] sm:$0xff]  ;;  %v1117_v38 = vld [vmem:[%s5518_s27 + $0x1b88] sm:$0xff] }
 0x222   : > { %4959 = vmatmul.msk.f32.vlgmr.msrb.gmra.mxu0 %vm1548_vm0, %v6726_v49  ;;  %5181 = vpow2.f32 %v4260_v44  ;;  %v3010_v52 = vadd.f32 %v3009_v48, %v1364_v37  ;;  %3741 = vmatpush.msrb.mxu1 %v1113_v57  ;;  %v1244_v37 = vld [vmem:[%s5518_s27 + $0x1f80] sm:$0xff]  ;;  %v607_v48 = vld [vmem:[%s5518_s27 + $0xb98] sm:$0xff] }
 0x223   : > { %3720 = vmatpush.msrb.mxu0 %v1240_v55  ;;  %5183 = vpow2.f32 %v4262_v20  ;;  %3784 = vmatpush.msrb.mxu3 %v731_v45  ;;  %v606_v55 = vld [vmem:[%s5518_s27 + $0xb90] sm:$0xff]  ;;  %v1116_v44 = vld [vmem:[%s5518_s27 + $0x1b80] sm:$0xff]  ;;  %v989_v45 = vld [vmem:[%s5518_s27 + $0x1788] sm:$0xff] }
 0x224   : > { %3765 = vmatpush.msrb.mxu2 %v602_v46  ;;  %5185 = vpow2.f32 %v4258_v51  ;;  %v4256_v59 = vmul.f32 1.442695, %v3010_v52  ;;  %3742 = vmatpush.msrb.mxu1 %v985_v50  ;;  %v988_v50 = vld [vmem:[%s5518_s27 + $0x1780] sm:$0xff]  ;;  %v861_v51 = vld [vmem:[%s5518_s27 + $0x1388] sm:$0xff] }
 0x225   : > { %3721 = vmatpush.msrb.mxu0 %v1112_v23  ;;  %3785 = vmatpush.msrb.mxu3 %v603_v53  ;;  %v478_v23 = vld [vmem:[%s5518_s27 + $0x790] sm:$0xff]  ;;  %v479_v53 = vld [vmem:[%s5518_s27 + $0x798] sm:$0xff] }
 0x226   : > { %3766 = vmatpush.msrb.mxu2 %v474_v54  ;;  %5187 = vpow2.f32 %v4256_v59  ;;  %3743 = vmatpush.msrb.mxu1 %v857_v58  ;;  %v350_v54 = vld [vmem:[%s5518_s27 + $0x390] sm:$0xff]  ;;  %v733_v58 = vld [vmem:[%s5518_s27 + $0xf88] sm:$0xff]  ;;  %v351_v59 = vld [vmem:[%s5518_s27 + $0x398] sm:$0xff] }
 0x227   : > { %3722 = vmatpush.msrb.mxu0 %v984_v34  ;;  %3786 = vmatpush.msrb.mxu3 %v475_v2  ;;  %v860_v34 = vld [vmem:[%s5518_s27 + $0x1380] sm:$0xff] }
 0x228   : > { %v5182_v0 = vpop.eup %5181  ;;  %3767 = vmatpush.msrb.mxu2 %v346_v60  ;;  %3744 = vmatpush.msrb.mxu1 %v729_v62  ;;  %v1250_v60 = vld [vmem:[%s5518_s27 + $0x1fb0] sm:$0xff]  ;;  %v1251_v62 = vld [vmem:[%s5518_s27 + $0x1fb8] sm:$0xff] }
 0x229   : > { %v5184_v3 = vpop.eup %5183  ;;  %3723 = vmatpush.msrb.mxu0 %v856_v61  ;;  %v4551_v5 = vrot.slane %v5182_v0, 4  ;;  %3787 = vmatpush.msrb.mxu3 %v347_v63  ;;  %v732_v63 = vld [vmem:[%s5518_s27 + $0xf80] sm:$0xff] }
 0x22a   : > { %v5186_v6 = vpop.eup %5185  ;;  %4965 = vmatmul.msk.f32.vlgmr.msra.gmra.mxu2 %vm1548_vm0, %v6726_v49  ;;  %v4552_v9 = vrot.slane %v5184_v3, 2  ;;  %4966 = vmatmul.msk.f32.vlgmr.msra.gmra.mxu3 %vm1548_vm0, %v6726_v49  ;;  %v605_v3 = vld [vmem:[%s5518_s27 + $0xb88] sm:$0xff] }
 0x22b   : > { %3840 = vmatpush.msra.mxu2 %v1246_v1  ;;  %v4550_v13 = vrot.slane %v5186_v6, 6  ;;  %3860 = vmatpush.msra.mxu3 %v1247_v4  ;;  %v1122_v4 = vld [vmem:[%s5518_s27 + $0x1bb0] sm:$0xff]  ;;  %v1123_v6 = vld [vmem:[%s5518_s27 + $0x1bb8] sm:$0xff] }
 0x22c   : > { %v5188_v47 = vpop.eup %5187  ;;  %3724 = vmatpush.msrb.mxu0 %v728_v11  ;;  %v4650_v17 = vsel %vm4594_vm1, %v4551_v5, %v4552_v9  ;;  %3745 = vmatpush.msrb.mxu1 %v601_v7  ;;  %v6902_v5 = vld [vmem:[%s5524_s5 + $0x50] sm:$0xff]  ;;  %v604_v7 = vld [vmem:[%s5518_s27 + $0xb80] sm:$0xff] }
 0x22d   : > { %3841 = vmatpush.msra.mxu2 %v1118_v8  ;;  %v4649_v22 = vsel %vm4592_vm2, %v5188_v47, %v4550_v13  ;;  %3861 = vmatpush.msra.mxu3 %v1119_v10  ;;  %v477_v10 = vld [vmem:[%s5518_s27 + $0x788] sm:$0xff]  ;;  %v1374_v47 = vperm.slane %v6902_v5, 2 }
 0x22e   : > { %3725 = vmatpush.msrb.mxu0 %v600_v12  ;;  %v4651_v26 = vsel %vm4596_vm3, %v4649_v22, %v4650_v17  ;;  %3746 = vmatpush.msrb.mxu1 %v473_v15  ;;  %v994_v12 = vld [vmem:[%s5518_s27 + $0x17b0] sm:$0xff]  ;;  %v995_v15 = vld [vmem:[%s5518_s27 + $0x17b8] sm:$0xff] }
 0x22f   : > { %3842 = vmatpush.msra.mxu2 %v990_v16  ;;  %4741 = vst [vmem:[%s5952_s11 + $0x90] sm:$0xff] %v4651_v26  ;;  %v3129_v42 = vpop.f32.mrf.mxu2  ;;  %3862 = vmatpush.msra.mxu3 %v991_v19  ;;  %v3149_v31 = vpop.f32.mrf.mxu3  ;;  %v476_v16 = vld [vmem:[%s5518_s27 + $0x780] sm:$0xff]  ;;  %v349_v19 = vld [vmem:[%s5518_s27 + $0x388] sm:$0xff] }
 0x230   : > { %3726 = vmatpush.msrb.mxu0 %v472_v21  ;;  %v3130_v41 = vadd.f32 %v3129_v42, %v1370_v18  ;;  %3747 = vmatpush.msrb.mxu1 %v345_v24  ;;  %v3109_v35 = vpop.f32.mrf.mxu1  ;;  %v3150_v36 = vadd.f32 %v3149_v31, %v1371_v56  ;;  %v1375_v18 = vperm.slane %v6902_v5, 3  ;;  %v866_v21 = vld [vmem:[%s5518_s27 + $0x13b0] sm:$0xff]  ;;  %v1373_v56 = vperm.slane %v6902_v5, 1  ;;  %v867_v24 = vld [vmem:[%s5518_s27 + $0x13b8] sm:$0xff]  ;;  %v1249_v26 = vld [vmem:[%s5518_s27 + $0x1fa8] sm:$0xff] }
 0x231   : > { %3843 = vmatpush.msra.mxu2 %v862_v25  ;;  %4964 = vmatmul.msk.f32.vlgmr.msra.gmra.mxu1 %vm1548_vm0, %v6726_v49  ;;  %v3110_v39 = vadd.f32 %v3109_v35, %v1369_v27  ;;  %v348_v27 = vld [vmem:[%s5518_s27 + $0x380] sm:$0xff] }
 0x232   : > { %3863 = vmatpush.msra.mxu3 %v863_v28  ;;  %v4268_v40 = vmul.f32 1.442695, %v3130_v41  ;;  %3820 = vmatpush.msra.mxu1 %v1245_v29  ;;  %v4270_v57 = vmul.f32 1.442695, %v3150_v36  ;;  %v1372_v29 = vperm.slane %v6902_v5, 0 }
 0x233   : > { %3727 = vmatpush.msrb.mxu0 %v344_v30  ;;  %v3089_v43 = vpop.f32.mrf.mxu0  ;;  %3844 = vmatpush.msra.mxu2 %v734_v33  ;;  %v4266_v46 = vmul.f32 1.442695, %v3110_v39  ;;  %v738_v30 = vld [vmem:[%s5518_s27 + $0xfb0] sm:$0xff]  ;;  %v1121_v33 = vld [vmem:[%s5518_s27 + $0x1ba8] sm:$0xff] }
 0x234   : > { %4963 = vmatmul.msk.f32.vlgmr.msra.gmra.mxu0 %vm1548_vm0, %v6726_v49  ;;  %5189 = vpow2.f32 %v4268_v40  ;;  %v3090_v20 = vadd.f32 %v3089_v43, %v1368_v32  ;;  %3821 = vmatpush.msra.mxu1 %v1117_v38  ;;  %v1248_v32 = vld [vmem:[%s5518_s27 + $0x1fa0] sm:$0xff]  ;;  %v610_v38 = vld [vmem:[%s5518_s27 + $0xbb0] sm:$0xff] }
 0x235   : > { %3800 = vmatpush.msra.mxu0 %v1244_v37  ;;  %5191 = vpow2.f32 %v4270_v57  ;;  %3864 = vmatpush.msra.mxu3 %v735_v14  ;;  %v739_v37 = vld [vmem:[%s5518_s27 + $0xfb8] sm:$0xff]  ;;  %v1120_v14 = vld [vmem:[%s5518_s27 + $0x1ba0] sm:$0xff] }
 0x236   : > { %3845 = vmatpush.msra.mxu2 %v606_v55  ;;  %5193 = vpow2.f32 %v4266_v46  ;;  %v4264_v52 = vmul.f32 1.442695, %v3090_v20  ;;  %3822 = vmatpush.msra.mxu1 %v989_v45  ;;  %v993_v55 = vld [vmem:[%s5518_s27 + $0x17a8] sm:$0xff]  ;;  %v482_v45 = vld [vmem:[%s5518_s27 + $0x7b0] sm:$0xff]  ;;  %v992_v46 = vld [vmem:[%s5518_s27 + $0x17a0] sm:$0xff] }
 0x237   : > { %3801 = vmatpush.msra.mxu0 %v1116_v44  ;;  %3865 = vmatpush.msra.mxu3 %v607_v48  ;;  %v611_v44 = vld [vmem:[%s5518_s27 + $0xbb8] sm:$0xff]  ;;  %v865_v20 = vld [vmem:[%s5518_s27 + $0x13a8] sm:$0xff] }
 0x238   : > { %3846 = vmatpush.msra.mxu2 %v478_v23  ;;  %5195 = vpow2.f32 %v4264_v52  ;;  %3823 = vmatpush.msra.mxu1 %v861_v51  ;;  %v483_v23 = vld [vmem:[%s5518_s27 + $0x7b8] sm:$0xff]  ;;  %v864_v51 = vld [vmem:[%s5518_s27 + $0x13a0] sm:$0xff]  ;;  %v737_v52 = vld [vmem:[%s5518_s27 + $0xfa8] sm:$0xff] }
 0x239   : > { %3802 = vmatpush.msra.mxu0 %v988_v50  ;;  %3866 = vmatpush.msra.mxu3 %v479_v53  ;;  %v354_v50 = vld [vmem:[%s5518_s27 + $0x3b0] sm:$0xff]  ;;  %v355_v53 = vld [vmem:[%s5518_s27 + $0x3b8] sm:$0xff] }
 0x23a   : > { %v5190_v2 = vpop.eup %5189  ;;  %3847 = vmatpush.msra.mxu2 %v350_v54  ;;  %3824 = vmatpush.msra.mxu1 %v733_v58 }
 0x23b   : > { %v5192_v61 = vpop.eup %5191  ;;  %3803 = vmatpush.msra.mxu0 %v860_v34  ;;  %v4554_v0 = vrot.slane %v5190_v2, 4  ;;  %3867 = vmatpush.msra.mxu3 %v351_v59  ;;  %v1254_v34 = vld [vmem:[%s5518_s27 + $0x1fd0] sm:$0xff]  ;;  %v1255_v59 = vld [vmem:[%s5518_s27 + $0x1fd8] sm:$0xff]  ;;  %v736_v2 = vld [vmem:[%s5518_s27 + $0xfa0] sm:$0xff] }
 0x23c   : > { %v5194_v1 = vpop.eup %5193  ;;  %4969 = vmatmul.msk.f32.vlgmr.msrb.gmra.mxu2 %vm1548_vm0, %v6726_v49  ;;  %v4555_v11 = vrot.slane %v5192_v61, 2  ;;  %4970 = vmatmul.msk.f32.vlgmr.msrb.gmra.mxu3 %vm1548_vm0, %v6726_v49 }
 0x23d   : > { %3920 = vmatpush.msrb.mxu2 %v1250_v60  ;;  %v4553_v8 = vrot.slane %v5194_v1, 6  ;;  %3940 = vmatpush.msrb.mxu3 %v1251_v62  ;;  %v609_v62 = vld [vmem:[%s5518_s27 + $0xba8] sm:$0xff]  ;;  %v1127_v1 = vld [vmem:[%s5518_s27 + $0x1bd8] sm:$0xff] }
 0x23e   : > { %v5196_v9 = vpop.eup %5195  ;;  %3804 = vmatpush.msra.mxu0 %v732_v63  ;;  %v4653_v13 = vsel %vm4594_vm1, %v4554_v0, %v4555_v11  ;;  %3825 = vmatpush.msra.mxu1 %v605_v3  ;;  %v1126_v63 = vld [vmem:[%s5518_s27 + $0x1bd0] sm:$0xff]  ;;  %v608_v3 = vld [vmem:[%s5518_s27 + $0xba0] sm:$0xff] }
 0x23f   : > { %3921 = vmatpush.msrb.mxu2 %v1122_v4  ;;  %v4652_v17 = vsel %vm4592_vm2, %v5196_v9, %v4553_v8  ;;  %3941 = vmatpush.msrb.mxu3 %v1123_v6  ;;  %v481_v6 = vld [vmem:[%s5518_s27 + $0x7a8] sm:$0xff]  ;;  %v1378_v9 = vperm.slane %v6902_v5, 6 }
 0x240   : > { %3805 = vmatpush.msra.mxu0 %v604_v7  ;;  %v4654_v22 = vsel %vm4596_vm3, %v4652_v17, %v4653_v13  ;;  %3826 = vmatpush.msra.mxu1 %v477_v10  ;;  %v998_v7 = vld [vmem:[%s5518_s27 + $0x17d0] sm:$0xff]  ;;  %v999_v10 = vld [vmem:[%s5518_s27 + $0x17d8] sm:$0xff] }
 0x241   : > { %3922 = vmatpush.msrb.mxu2 %v994_v12  ;;  %4742 = vst [vmem:[%s5952_s11 + $0x98] sm:$0xff] %v4654_v22  ;;  %v3209_v25 = vpop.f32.mrf.mxu2  ;;  %3942 = vmatpush.msrb.mxu3 %v995_v15  ;;  %v3229_v42 = vpop.f32.mrf.mxu3  ;;  %v480_v12 = vld [vmem:[%s5518_s27 + $0x7a0] sm:$0xff]  ;;  %v353_v15 = vld [vmem:[%s5518_s27 + $0x3a8] sm:$0xff] }
 0x242   : > { %3806 = vmatpush.msra.mxu0 %v476_v16  ;;  %v3210_v28 = vadd.f32 %v3209_v25, %v1374_v47  ;;  %3827 = vmatpush.msra.mxu1 %v349_v19  ;;  %v3189_v41 = vpop.f32.mrf.mxu1  ;;  %v3230_v31 = vadd.f32 %v3229_v42, %v1375_v18  ;;  %v1379_v47 = vperm.slane %v6902_v5, 7  ;;  %v870_v16 = vld [vmem:[%s5518_s27 + $0x13d0] sm:$0xff]  ;;  %v1377_v18 = vperm.slane %v6902_v5, 5  ;;  %v871_v19 = vld [vmem:[%s5518_s27 + $0x13d8] sm:$0xff]  ;;  %v1253_v22 = vld [vmem:[%s5518_s27 + $0x1fc8] sm:$0xff] }
 0x243   : > { %3923 = vmatpush.msrb.mxu2 %v866_v21  ;;  %4968 = vmatmul.msk.f32.vlgmr.msrb.gmra.mxu1 %vm1548_vm0, %v6726_v49  ;;  %v3190_v35 = vadd.f32 %v3189_v41, %v1373_v56  ;;  %v352_v56 = vld [vmem:[%s5518_s27 + $0x3a0] sm:$0xff] }
 0x244   : > { %3943 = vmatpush.msrb.mxu3 %v867_v24  ;;  %v4276_v36 = vmul.f32 1.442695, %v3210_v28  ;;  %3900 = vmatpush.msrb.mxu1 %v1249_v26  ;;  %v4278_v39 = vmul.f32 1.442695, %v3230_v31  ;;  %v1376_v26 = vperm.slane %v6902_v5, 4  ;;  %v743_v5 = vld [vmem:[%s5518_s27 + $0xfd8] sm:$0xff] }
 0x245   : > { %3807 = vmatpush.msra.mxu0 %v348_v27  ;;  %v3169_v40 = vpop.f32.mrf.mxu0  ;;  %3924 = vmatpush.msrb.mxu2 %v738_v30  ;;  %v4274_v57 = vmul.f32 1.442695, %v3190_v35  ;;  %v742_v27 = vld [vmem:[%s5518_s27 + $0xfd0] sm:$0xff]  ;;  %v1125_v30 = vld [vmem:[%s5518_s27 + $0x1bc8] sm:$0xff] }
 0x246   : > { %4967 = vmatmul.msk.f32.vlgmr.msrb.gmra.mxu0 %vm1548_vm0, %v6726_v49  ;;  %5197 = vpow2.f32 %v4276_v36  ;;  %v3170_v43 = vadd.f32 %v3169_v40, %v1372_v29  ;;  %3901 = vmatpush.msrb.mxu1 %v1121_v33  ;;  %v1252_v29 = vld [vmem:[%s5518_s27 + $0x1fc0] sm:$0xff]  ;;  %v615_v40 = vld [vmem:[%s5518_s27 + $0xbd8] sm:$0xff] }
 0x247   : > { %3880 = vmatpush.msrb.mxu0 %v1248_v32  ;;  %5199 = vpow2.f32 %v4278_v39  ;;  %3944 = vmatpush.msrb.mxu3 %v739_v37  ;;  %v614_v32 = vld [vmem:[%s5518_s27 + $0xbd0] sm:$0xff]  ;;  %v1124_v36 = vld [vmem:[%s5518_s27 + $0x1bc0] sm:$0xff]  ;;  %v997_v37 = vld [vmem:[%s5518_s27 + $0x17c8] sm:$0xff] }
 0x248   : > { %3925 = vmatpush.msrb.mxu2 %v610_v38  ;;  %5201 = vpow2.f32 %v4274_v57  ;;  %v4272_v48 = vmul.f32 1.442695, %v3170_v43  ;;  %3902 = vmatpush.msrb.mxu1 %v993_v55  ;;  %v996_v55 = vld [vmem:[%s5518_s27 + $0x17c0] sm:$0xff]  ;;  %v869_v57 = vld [vmem:[%s5518_s27 + $0x13c8] sm:$0xff]  ;;  %v487_v43 = vld [vmem:[%s5518_s27 + $0x7d8] sm:$0xff] }
 0x249   : > { %3881 = vmatpush.msrb.mxu0 %v1120_v14  ;;  %3945 = vmatpush.msrb.mxu3 %v611_v44  ;;  %v486_v14 = vld [vmem:[%s5518_s27 + $0x7d0] sm:$0xff]  ;;  %v868_v44 = vld [vmem:[%s5518_s27 + $0x13c0] sm:$0xff] }
 0x24a   : > { %3926 = vmatpush.msrb.mxu2 %v482_v45  ;;  %5203 = vpow2.f32 %v4272_v48  ;;  %3903 = vmatpush.msrb.mxu1 %v865_v20  ;;  %v741_v45 = vld [vmem:[%s5518_s27 + $0xfc8] sm:$0xff]  ;;  %v6995_v48 = vld [vmem:[%s7133_s0] sm:$0x3] }
 0x24b   : > { %3882 = vmatpush.msrb.mxu0 %v992_v46  ;;  %3946 = vmatpush.msrb.mxu3 %v483_v23  ;;  %v358_v46 = vld [vmem:[%s5518_s27 + $0x3d0] sm:$0xff]  ;;  %v359_v23 = vld [vmem:[%s5518_s27 + $0x3d8] sm:$0xff] }
 0x24c   : > { %v5198_v54 = vpop.eup %5197  ;;  %3927 = vmatpush.msrb.mxu2 %v354_v50  ;;  %3904 = vmatpush.msrb.mxu1 %v737_v52  ;;  %v1258_v50 = vld [vmem:[%s5518_s27 + $0x1ff0] sm:$0xff]  ;;  %v1259_v52 = vld [vmem:[%s5518_s27 + $0x1ff8] sm:$0xff] }
 0x24d   : > { %v5200_v58 = vpop.eup %5199  ;;  %3883 = vmatpush.msrb.mxu0 %v864_v51  ;;  %v4557_v60 = vrot.slane %v5198_v54, 4  ;;  %3947 = vmatpush.msrb.mxu3 %v355_v53  ;;  %v740_v53 = vld [vmem:[%s5518_s27 + $0xfc0] sm:$0xff] }
 0x24e   : > { %v5202_v61 = vpop.eup %5201  ;;  %4973 = vmatmul.msk.f32.vlgmr.msra.gmra.mxu2 %vm1548_vm0, %v6726_v49  ;;  %v4558_v0 = vrot.slane %v5200_v58, 2  ;;  %4974 = vmatmul.msk.f32.vlgmr.msra.gmra.mxu3 %vm1548_vm0, %v6726_v49 }
 0x24f   : > { %4000 = vmatpush.msra.mxu2 %v1254_v34  ;;  %v4556_v4 = vrot.slane %v5202_v61, 6  ;;  %4020 = vmatpush.msra.mxu3 %v1255_v59  ;;  %v7006_v34 = vld [vmem:[%s5524_s5 + $0x58] sm:$0xff]  ;;  %v613_v59 = vld [vmem:[%s5518_s27 + $0xbc8] sm:$0xff] }
 0x250   : > { %v5204_v11 = vpop.eup %5203  ;;  %3884 = vmatpush.msrb.mxu0 %v736_v2  ;;  %v4656_v8 = vsel %vm4594_vm1, %v4557_v60, %v4558_v0  ;;  %3905 = vmatpush.msrb.mxu1 %v609_v62  ;;  %v1130_v2 = vld [vmem:[%s5518_s27 + $0x1bf0] sm:$0xff]  ;;  %v1131_v61 = vld [vmem:[%s5518_s27 + $0x1bf8] sm:$0xff]  ;;  %v612_v62 = vld [vmem:[%s5518_s27 + $0xbc0] sm:$0xff] }
 0x251   : > { %4001 = vmatpush.msra.mxu2 %v1126_v63  ;;  %v4655_v13 = vsel %vm4592_vm2, %v5204_v11, %v4556_v4  ;;  %4021 = vmatpush.msra.mxu3 %v1127_v1  ;;  %v485_v1 = vld [vmem:[%s5518_s27 + $0x7c8] sm:$0xff]  ;;  %v1382_v11 = vperm.slane %v7006_v34, 2 }
 0x252   : > { %3885 = vmatpush.msrb.mxu0 %v608_v3  ;;  %v4657_v17 = vsel %vm4596_vm3, %v4655_v13, %v4656_v8  ;;  %3906 = vmatpush.msrb.mxu1 %v481_v6  ;;  %v1002_v3 = vld [vmem:[%s5518_s27 + $0x17f0] sm:$0xff]  ;;  %v1003_v6 = vld [vmem:[%s5518_s27 + $0x17f8] sm:$0xff]  ;;  %v1383_v8 = vperm.slane %v7006_v34, 3  ;;  %v1381_v13 = vperm.slane %v7006_v34, 1 }
 0x253   : > { %4002 = vmatpush.msra.mxu2 %v998_v7  ;;  %4743 = vst [vmem:[%s5952_s11 + $0xa0] sm:$0xff] %v4657_v17  ;;  %v3289_v21 = vpop.f32.mrf.mxu2  ;;  %4022 = vmatpush.msra.mxu3 %v999_v10  ;;  %v3309_v25 = vpop.f32.mrf.mxu3  ;;  %v357_v10 = vld [vmem:[%s5518_s27 + $0x3c8] sm:$0xff]  ;;  %v875_v17 = vld [vmem:[%s5518_s27 + $0x13f8] sm:$0xff] }
 0x254   : > { %3886 = vmatpush.msrb.mxu0 %v480_v12  ;;  %v3290_v24 = vadd.f32 %v3289_v21, %v1378_v9  ;;  %3907 = vmatpush.msrb.mxu1 %v353_v15  ;;  %v3269_v28 = vpop.f32.mrf.mxu1  ;;  %v3310_v42 = vadd.f32 %v3309_v25, %v1379_v47  ;;  %v484_v9 = vld [vmem:[%s5518_s27 + $0x7c0] sm:$0xff]  ;;  %v1257_v47 = vld [vmem:[%s5518_s27 + $0x1fe8] sm:$0xff]  ;;  %v874_v15 = vld [vmem:[%s5518_s27 + $0x13f0] sm:$0xff]  ;;  %v1380_v21 = vperm.slane %v7006_v34, 0 }
 0x255   : > { %4003 = vmatpush.msra.mxu2 %v870_v16  ;;  %4972 = vmatmul.msk.f32.vlgmr.msra.gmra.mxu1 %vm1548_vm0, %v6726_v49  ;;  %v3270_v41 = vadd.f32 %v3269_v28, %v1377_v18  ;;  %v1256_v25 = vld [vmem:[%s5518_s27 + $0x1fe0] sm:$0xff]  ;;  %v1129_v28 = vld [vmem:[%s5518_s27 + $0x1be8] sm:$0xff] }
 0x256   : > { %4023 = vmatpush.msra.mxu3 %v871_v19  ;;  %v4284_v31 = vmul.f32 1.442695, %v3290_v24  ;;  %3980 = vmatpush.msra.mxu1 %v1253_v22  ;;  %v4286_v33 = vmul.f32 1.442695, %v3310_v42  ;;  %v356_v22 = vld [vmem:[%s5518_s27 + $0x3c0] sm:$0xff]  ;;  %v746_v42 = vld [vmem:[%s5518_s27 + $0xff0] sm:$0xff] }
 0x257   : > { %3887 = vmatpush.msrb.mxu0 %v352_v56  ;;  %v3249_v35 = vpop.f32.mrf.mxu0  ;;  %4004 = vmatpush.msra.mxu2 %v742_v27  ;;  %v4282_v38 = vmul.f32 1.442695, %v3270_v41  ;;  %v747_v41 = vld [vmem:[%s5518_s27 + $0xff8] sm:$0xff] }
 0x258   : > { %4971 = vmatmul.msk.f32.vlgmr.msra.gmra.mxu0 %vm1548_vm0, %v6726_v49  ;;  %5205 = vpow2.f32 %v4284_v31  ;;  %v3250_v39 = vadd.f32 %v3249_v35, %v1376_v26  ;;  %3981 = vmatpush.msra.mxu1 %v1125_v30  ;;  %v1128_v31 = vld [vmem:[%s5518_s27 + $0x1be0] sm:$0xff]  ;;  %v618_v35 = vld [vmem:[%s5518_s27 + $0xbf0] sm:$0xff] }
 0x259   : > { %3960 = vmatpush.msra.mxu0 %v1252_v29  ;;  %5207 = vpow2.f32 %v4286_v33  ;;  %4024 = vmatpush.msra.mxu3 %v743_v5  ;;  %v1001_v33 = vld [vmem:[%s5518_s27 + $0x17e8] sm:$0xff] }
 0x25a   : > { %4005 = vmatpush.msra.mxu2 %v614_v32  ;;  %5209 = vpow2.f32 %v4282_v38  ;;  %v4280_v49 = vmul.f32 1.442695, %v3250_v39  ;;  %3982 = vmatpush.msra.mxu1 %v997_v37  ;;  %v1000_v37 = vld [vmem:[%s5518_s27 + $0x17e0] sm:$0xff]  ;;  %v873_v39 = vld [vmem:[%s5518_s27 + $0x13e8] sm:$0xff] }
 0x25b   : > { %3961 = vmatpush.msra.mxu0 %v1124_v36  ;;  %4025 = vmatpush.msra.mxu3 %v615_v40  ;;  %v619_v36 = vld [vmem:[%s5518_s27 + $0xbf8] sm:$0xff]  ;;  %v490_v40 = vld [vmem:[%s5518_s27 + $0x7f0] sm:$0xff] }
 0x25c   : > { %4006 = vmatpush.msra.mxu2 %v486_v14  ;;  %5211 = vpow2.f32 %v4280_v49  ;;  %3983 = vmatpush.msra.mxu1 %v869_v57  ;;  %v491_v14 = vld [vmem:[%s5518_s27 + $0x7f8] sm:$0xff]  ;;  %v745_v57 = vld [vmem:[%s5518_s27 + $0xfe8] sm:$0xff] }
 0x25d   : > { %3962 = vmatpush.msra.mxu0 %v996_v55  ;;  %4026 = vmatpush.msra.mxu3 %v487_v43  ;;  %v872_v55 = vld [vmem:[%s5518_s27 + $0x13e0] sm:$0xff]  ;;  %v362_v43 = vld [vmem:[%s5518_s27 + $0x3f0] sm:$0xff] }
 0x25e   : > { %v5206_v20 = vpop.eup %5205  ;;  %4977 = vmatmul.msk.f32.vlgmr.msrb.gmra.mxu2 %vm1548_vm0, %v6995_v48  ;;  %4978 = vmatmul.msk.f32.vlgmr.msrb.gmra.mxu3 %vm1548_vm0, %v6995_v48 }
 0x25f   : > { %v5208_v51 = vpop.eup %5207  ;;  %3963 = vmatpush.msra.mxu0 %v868_v44  ;;  %v4560_v54 = vrot.slane %v5206_v20, 4  ;;  %3984 = vmatpush.msra.mxu1 %v741_v45  ;;  %v363_v44 = vld [vmem:[%s5518_s27 + $0x3f8] sm:$0xff] }
 0x260   : > { %v5210_v58 = vpop.eup %5209  ;;  %4007 = vmatpush.msra.mxu2 %v358_v46  ;;  %v4561_v60 = vrot.slane %v5208_v51, 2  ;;  %4027 = vmatpush.msra.mxu3 %v359_v23  ;;  %v744_v23 = vld [vmem:[%s5518_s27 + $0xfe0] sm:$0xff]  ;;  %v617_v51 = vld [vmem:[%s5518_s27 + $0xbe8] sm:$0xff] }
 0x261   : > { %v4559_v63 = vrot.slane %v5210_v58, 6  ;;  %3964 = vmatpush.msra.mxu0 %v740_v53  ;;  %3985 = vmatpush.msra.mxu1 %v613_v59  ;;  %v1386_v59 = vperm.slane %v7006_v34, 6 }
 0x262   : > { %4080 = vmatpush.msrb.mxu2 %v1258_v50  ;;  %v5212_v0 = vpop.eup %5211  ;;  %4100 = vmatpush.msrb.mxu3 %v1259_v52  ;;  %v4659_v4 = vsel %vm4594_vm1, %v4560_v54, %v4561_v60  ;;  %v616_v54 = vld [vmem:[%s5518_s27 + $0xbe0] sm:$0xff] }
 0x263   : > { %v4658_v7 = vsel %vm4592_vm2, %v5212_v0, %v4559_v63  ;;  %3965 = vmatpush.msra.mxu0 %v612_v62  ;;  %3986 = vmatpush.msra.mxu1 %v485_v1  ;;  %v488_v62 = vld [vmem:[%s5518_s27 + $0x7e0] sm:$0xff]  ;;  %v1385_v0 = vperm.slane %v7006_v34, 5  ;;  %v361_v1 = vld [vmem:[%s5518_s27 + $0x3e8] sm:$0xff] }
 0x264   : > { %4081 = vmatpush.msrb.mxu2 %v1130_v2  ;;  %4101 = vmatpush.msrb.mxu3 %v1131_v61  ;;  %v4660_v12 = vsel %vm4596_vm3, %v4658_v7, %v4659_v4  ;;  %v489_v2 = vld [vmem:[%s5518_s27 + $0x7e8] sm:$0xff]  ;;  %v1387_v61 = vperm.slane %v7006_v34, 7  ;;  %v360_v4 = vld [vmem:[%s5518_s27 + $0x3e0] sm:$0xff]  ;;  %v1384_v7 = vperm.slane %v7006_v34, 4 }
 0x265   : > { %4744 = vst [vmem:[%s5952_s11 + $0xa8] sm:$0xff] %v4660_v12  ;;  %v3369_v16 = vpop.f32.mrf.mxu2  ;;  %4976 = vmatmul.msk.f32.vlgmr.msrb.gmra.mxu1 %vm1548_vm0, %v6995_v48  ;;  %v3389_v19 = vpop.f32.mrf.mxu3  ;;  %3966 = vmatpush.msra.mxu0 %v484_v9 }
 0x266   : > { %4082 = vmatpush.msrb.mxu2 %v1002_v3  ;;  %4102 = vmatpush.msrb.mxu3 %v1003_v6  ;;  %v3370_v18 = vadd.f32 %v3369_v16, %v1382_v11  ;;  %v3349_v56 = vpop.f32.mrf.mxu1  ;;  %v3390_v24 = vadd.f32 %v3389_v19, %v1383_v8 }
 0x267   : > { %3987 = vmatpush.msra.mxu1 %v357_v10  ;;  %v3350_v26 = vadd.f32 %v3349_v56, %v1381_v13  ;;  %4975 = vmatmul.msk.f32.vlgmr.msrb.gmra.mxu0 %vm1548_vm0, %v6995_v48 }
 0x268   : > { %4083 = vmatpush.msrb.mxu2 %v874_v15  ;;  %v4292_v27 = vmul.f32 1.442695, %v3370_v18  ;;  %4103 = vmatpush.msrb.mxu3 %v875_v17  ;;  %v4294_v29 = vmul.f32 1.442695, %v3390_v24 }
 0x269   : > { %4060 = vmatpush.msrb.mxu1 %v1257_v47  ;;  %v3329_v30 = vpop.f32.mrf.mxu0  ;;  %3967 = vmatpush.msra.mxu0 %v356_v22  ;;  %v4290_v5 = vmul.f32 1.442695, %v3350_v26 }
 0x26a   : > { %4981 = vmatmul.msk.f32.vlgmr.msra.gmra.mxu2 %vm1548_vm0, %v6995_v48  ;;  %5213 = vpow2.f32 %v4292_v27  ;;  %v3330_v32 = vadd.f32 %v3329_v30, %v1380_v21  ;;  %4982 = vmatmul.msk.f32.vlgmr.msra.gmra.mxu3 %vm1548_vm0, %v6995_v48  ;;  %v1272_v21 = vld [vmem:[%s5524_s5 + $0x60] sm:$0xff] }
 0x26b   : > { %4040 = vmatpush.msrb.mxu0 %v1256_v25  ;;  %5215 = vpow2.f32 %v4294_v29  ;;  %4061 = vmatpush.msrb.mxu1 %v1129_v28  ;;  %v1390_v27 = vperm.slane %v1272_v21, 2  ;;  %v1391_v28 = vperm.slane %v1272_v21, 3  ;;  %v1389_v29 = vperm.slane %v1272_v21, 1 }
 0x26c   : > { %4084 = vmatpush.msrb.mxu2 %v746_v42  ;;  %5217 = vpow2.f32 %v4290_v5  ;;  %v4288_v38 = vmul.f32 1.442695, %v3330_v32  ;;  %4104 = vmatpush.msrb.mxu3 %v747_v41  ;;  %v1388_v5 = vperm.slane %v1272_v21, 0 }
 0x26d   : > { %4041 = vmatpush.msrb.mxu0 %v1128_v31  ;;  %4062 = vmatpush.msrb.mxu1 %v1001_v33 }
 0x26e   : > { %4085 = vmatpush.msrb.mxu2 %v618_v35  ;;  %5219 = vpow2.f32 %v4288_v38  ;;  %4105 = vmatpush.msrb.mxu3 %v619_v36 }
 0x26f   : > { %4042 = vmatpush.msrb.mxu0 %v1000_v37  ;;  %4063 = vmatpush.msrb.mxu1 %v873_v39 }
 0x270   : > { %v5214_v49 = vpop.eup %5213  ;;  %4086 = vmatpush.msrb.mxu2 %v490_v40  ;;  %4106 = vmatpush.msrb.mxu3 %v491_v14 }
 0x271   : > { %v5216_v45 = vpop.eup %5215  ;;  %4980 = vmatmul.msk.f32.vlgmr.msra.gmra.mxu1 %vm1548_vm0, %v6995_v48  ;;  %v4563_v46 = vrot.slane %v5214_v49, 4  ;;  %4043 = vmatpush.msrb.mxu0 %v872_v55 }
 0x272   : > { %v5218_v20 = vpop.eup %5217  ;;  %4064 = vmatpush.msrb.mxu1 %v745_v57  ;;  %v4564_v50 = vrot.slane %v5216_v45, 2  ;;  %4087 = vmatpush.msrb.mxu2 %v362_v43 }
 0x273   : > { %4107 = vmatpush.msrb.mxu3 %v363_v44  ;;  %v4562_v52 = vrot.slane %v5218_v20, 6  ;;  %4979 = vmatmul.msk.f32.vlgmr.msra.gmra.mxu0 %vm1548_vm0, %v6995_v48 }
 0x274   : > { %v5220_v53 = vpop.eup %5219  ;;  %4985 = vmatmul.msk.f32.vlgmr.msrb.gmra.mxu2 %vm1548_vm0, %v6995_v48  ;;  %v4662_v58 = vsel %vm4594_vm1, %v4563_v46, %v4564_v50  ;;  %4986 = vmatmul.msk.f32.vlgmr.msrb.gmra.mxu3 %vm1548_vm0, %v6995_v48 }
 0x275   : > { %4044 = vmatpush.msrb.mxu0 %v744_v23  ;;  %v4661_v60 = vsel %vm4592_vm2, %v5220_v53, %v4562_v52  ;;  %4065 = vmatpush.msrb.mxu1 %v617_v51  ;;  %v1394_v23 = vperm.slane %v1272_v21, 6  ;;  %v1395_v51 = vperm.slane %v1272_v21, 7  ;;  %v1393_v53 = vperm.slane %v1272_v21, 5 }
 0x276   : > { %v4663_v63 = vsel %vm4596_vm3, %v4661_v60, %v4662_v58 }
 0x277   : > { %4045 = vmatpush.msrb.mxu0 %v616_v54  ;;  %4745 = vst [vmem:[%s5952_s11 + $0xb0] sm:$0xff] %v4663_v63  ;;  %v3449_v3 = vpop.f32.mrf.mxu2  ;;  %4066 = vmatpush.msrb.mxu1 %v489_v2  ;;  %v3469_v6 = vpop.f32.mrf.mxu3  ;;  %v1392_v2 = vperm.slane %v1272_v21, 4 }
 0x278   : > { %v3450_v11 = vadd.f32 %v3449_v3, %v1386_v59  ;;  %v3429_v8 = vpop.f32.mrf.mxu1  ;;  %v3470_v9 = vadd.f32 %v3469_v6, %v1387_v61 }
 0x279   : > { %4046 = vmatpush.msrb.mxu0 %v488_v62  ;;  %4067 = vmatpush.msrb.mxu1 %v361_v1  ;;  %v3430_v10 = vadd.f32 %v3429_v8, %v1385_v0 }
 0x27a   : > { %v4300_v12 = vmul.f32 1.442695, %v3450_v11  ;;  %4984 = vmatmul.msk.f32.vlgmr.msrb.gmra.mxu1 %vm1548_vm0, %v6995_v48  ;;  %v4302_v13 = vmul.f32 1.442695, %v3470_v9  ;;  %v1273_v9 = vld [vmem:[%s5524_s5 + $0x68] sm:$0xff] }
 0x27b   : > { %4047 = vmatpush.msrb.mxu0 %v360_v4  ;;  %v3409_v47 = vpop.f32.mrf.mxu0  ;;  %v4298_v15 = vmul.f32 1.442695, %v3430_v10 }
 0x27c   : > { %4983 = vmatmul.msk.f32.vlgmr.msrb.gmra.mxu0 %vm1548_vm0, %v6995_v48  ;;  %5221 = vpow2.f32 %v4300_v12  ;;  %v3410_v16 = vadd.f32 %v3409_v47, %v1384_v7 }
 0x27d   : > { %5223 = vpow2.f32 %v4302_v13 }
 0x27e   : > { %5225 = vpow2.f32 %v4298_v15  ;;  %v4296_v34 = vmul.f32 1.442695, %v3410_v16  ;;  %v1398_v16 = vperm.slane %v1273_v9, 2 }
 0x280   : > { %5227 = vpow2.f32 %v4296_v34 }
 0x282   : > { %v5222_v17 = vpop.eup %5221 }
 0x283   : > { %v5224_v18 = vpop.eup %5223  ;;  %v4566_v19 = vrot.slane %v5222_v17, 4  ;;  %v1399_v17 = vperm.slane %v1273_v9, 3 }
 0x284   : > { %v5226_v22 = vpop.eup %5225  ;;  %v4567_v56 = vrot.slane %v5224_v18, 2 }
 0x285   : > { %v4565_v24 = vrot.slane %v5226_v22, 6 }
 0x286   : > { %v5228_v25 = vpop.eup %5227  ;;  %v4665_v26 = vsel %vm4594_vm1, %v4566_v19, %v4567_v56  ;;  %v1397_v19 = vperm.slane %v1273_v9, 1 }
 0x287   : > { %v4664_v48 = vsel %vm4592_vm2, %v5228_v25, %v4565_v24  ;;  %v1396_v24 = vperm.slane %v1273_v9, 0 }
 0x288   : > { %v4666_v42 = vsel %vm4596_vm3, %v4664_v48, %v4665_v26 }
 0x289   : > { %4746 = vst [vmem:[%s5952_s11 + $0xb8] sm:$0xff] %v4666_v42  ;;  %v3529_v30 = vpop.f32.mrf.mxu2  ;;  %v3549_v31 = vpop.f32.mrf.mxu3 }
 0x28a   : > { %v3530_v41 = vadd.f32 %v3529_v30, %v1390_v27  ;;  %v3509_v32 = vpop.f32.mrf.mxu1  ;;  %v3550_v33 = vadd.f32 %v3549_v31, %v1391_v28 }
 0x28b   : > { %v3510_v35 = vadd.f32 %v3509_v32, %v1389_v29 }
 0x28c   : > { %v4308_v36 = vmul.f32 1.442695, %v3530_v41  ;;  %v4310_v37 = vmul.f32 1.442695, %v3550_v33 }
 0x28d   : > { %v3489_v38 = vpop.f32.mrf.mxu0  ;;  %v4306_v39 = vmul.f32 1.442695, %v3510_v35 }
 0x28e   : > { %5229 = vpow2.f32 %v4308_v36  ;;  %v3490_v40 = vadd.f32 %v3489_v38, %v1388_v5 }
 0x28f   : > { %5231 = vpow2.f32 %v4310_v37 }
 0x290   : > { %5233 = vpow2.f32 %v4306_v39  ;;  %v4304_v14 = vmul.f32 1.442695, %v3490_v40  ;;  %v1402_v39 = vperm.slane %v1273_v9, 6 }
 0x292   : > { %5235 = vpow2.f32 %v4304_v14  ;;  %v1403_v14 = vperm.slane %v1273_v9, 7 }
 0x294   : > { %v5230_v55 = vpop.eup %5229 }
 0x295   : > { %v5232_v57 = vpop.eup %5231  ;;  %v4569_v49 = vrot.slane %v5230_v55, 4 }
 0x296   : > { %v5234_v43 = vpop.eup %5233  ;;  %v4570_v44 = vrot.slane %v5232_v57, 2  ;;  %v1401_v57 = vperm.slane %v1273_v9, 5 }
 0x297   : > { %v4568_v45 = vrot.slane %v5234_v43, 6 }
 0x298   : > { %v5236_v46 = vpop.eup %5235  ;;  %v4668_v20 = vsel %vm4594_vm1, %v4569_v49, %v4570_v44 }
 0x299   : > { %v4667_v50 = vsel %vm4592_vm2, %v5236_v46, %v4568_v45  ;;  %v1400_v45 = vperm.slane %v1273_v9, 4 }
 0x29a   : > { %v4669_v52 = vsel %vm4596_vm3, %v4667_v50, %v4668_v20 }
 0x29b   : > { %4747 = vst [vmem:[%s5952_s11 + $0xc0] sm:$0xff] %v4669_v52  ;;  %v3609_v54 = vpop.f32.mrf.mxu2  ;;  %v3629_v59 = vpop.f32.mrf.mxu3 }
 0x29c   : > { %v3610_v58 = vadd.f32 %v3609_v54, %v1394_v23  ;;  %v3589_v60 = vpop.f32.mrf.mxu1  ;;  %v3630_v61 = vadd.f32 %v3629_v59, %v1395_v51 }
 0x29d   : > { %v3590_v62 = vadd.f32 %v3589_v60, %v1393_v53 }
 0x29e   : > { %v4316_v63 = vmul.f32 1.442695, %v3610_v58  ;;  %v4318_v0 = vmul.f32 1.442695, %v3630_v61  ;;  %v1274_v61 = vld [vmem:[%s5524_s5 + $0x70] sm:$0xff] }
 0x29f   : > { %v3569_v1 = vpop.f32.mrf.mxu0  ;;  %v4314_v3 = vmul.f32 1.442695, %v3590_v62 }
 0x2a0   : > { %5237 = vpow2.f32 %v4316_v63  ;;  %v3570_v4 = vadd.f32 %v3569_v1, %v1392_v2 }
 0x2a1   : > { %5239 = vpow2.f32 %v4318_v0 }
 0x2a2   : > { %5241 = vpow2.f32 %v4314_v3  ;;  %v4312_v11 = vmul.f32 1.442695, %v3570_v4  ;;  %v1406_v4 = vperm.slane %v1274_v61, 2 }
 0x2a4   : > { %5243 = vpow2.f32 %v4312_v11 }
 0x2a6   : > { %v5238_v6 = vpop.eup %5237 }
 0x2a7   : > { %v5240_v7 = vpop.eup %5239  ;;  %v4572_v8 = vrot.slane %v5238_v6, 4  ;;  %v1407_v6 = vperm.slane %v1274_v61, 3 }
 0x2a8   : > { %v5242_v10 = vpop.eup %5241  ;;  %v4573_v12 = vrot.slane %v5240_v7, 2 }
 0x2a9   : > { %v4571_v13 = vrot.slane %v5242_v10, 6 }
 0x2aa   : > { %v5244_v47 = vpop.eup %5243  ;;  %v4671_v15 = vsel %vm4594_vm1, %v4572_v8, %v4573_v12  ;;  %v1405_v8 = vperm.slane %v1274_v61, 1 }
 0x2ab   : > { %v4670_v34 = vsel %vm4592_vm2, %v5244_v47, %v4571_v13  ;;  %v1404_v13 = vperm.slane %v1274_v61, 0 }
 0x2ac   : > { %v4672_v18 = vsel %vm4596_vm3, %v4670_v34, %v4671_v15 }
 0x2ad   : > { %4748 = vst [vmem:[%s5952_s11 + $0xc8] sm:$0xff] %v4672_v18  ;;  %v3689_v21 = vpop.f32.mrf.mxu2  ;;  %v3709_v56 = vpop.f32.mrf.mxu3 }
 0x2ae   : > { %v3690_v22 = vadd.f32 %v3689_v21, %v1398_v16  ;;  %v3669_v25 = vpop.f32.mrf.mxu1  ;;  %v3710_v26 = vadd.f32 %v3709_v56, %v1399_v17 }
 0x2af   : > { %v3670_v27 = vadd.f32 %v3669_v25, %v1397_v19 }
 0x2b0   : > { %v4324_v48 = vmul.f32 1.442695, %v3690_v22  ;;  %v4326_v28 = vmul.f32 1.442695, %v3710_v26 }
 0x2b1   : > { %v3649_v42 = vpop.f32.mrf.mxu0  ;;  %v4322_v29 = vmul.f32 1.442695, %v3670_v27 }
 0x2b2   : > { %5245 = vpow2.f32 %v4324_v48  ;;  %v3650_v30 = vadd.f32 %v3649_v42, %v1396_v24  ;;  %v1410_v48 = vperm.slane %v1274_v61, 6  ;;  %v1411_v42 = vperm.slane %v1274_v61, 7 }
 0x2b3   : > { %5247 = vpow2.f32 %v4326_v28 }
 0x2b4   : > { %5249 = vpow2.f32 %v4322_v29  ;;  %v4320_v41 = vmul.f32 1.442695, %v3650_v30 }
 0x2b6   : > { %5251 = vpow2.f32 %v4320_v41  ;;  %v1409_v41 = vperm.slane %v1274_v61, 5 }
 0x2b8   : > { %v5246_v31 = vpop.eup %5245 }
 0x2b9   : > { %v5248_v5 = vpop.eup %5247  ;;  %v4575_v32 = vrot.slane %v5246_v31, 4 }
 0x2ba   : > { %v5250_v33 = vpop.eup %5249  ;;  %v4576_v35 = vrot.slane %v5248_v5, 2 }
 0x2bb   : > { %v4574_v36 = vrot.slane %v5250_v33, 6 }
 0x2bc   : > { %v5252_v37 = vpop.eup %5251  ;;  %v4674_v38 = vsel %vm4594_vm1, %v4575_v32, %v4576_v35 }
 0x2bd   : > { %v4673_v40 = vsel %vm4592_vm2, %v5252_v37, %v4574_v36 }
 0x2be   : > { %v4675_v55 = vsel %vm4596_vm3, %v4673_v40, %v4674_v38  ;;  %v1408_v38 = vperm.slane %v1274_v61, 4 }
 0x2bf   : > { %4749 = vst [vmem:[%s5952_s11 + $0xd0] sm:$0xff] %v4675_v55  ;;  %v3769_v49 = vpop.f32.mrf.mxu2  ;;  %v3789_v44 = vpop.f32.mrf.mxu3 }
 0x2c0   : > { %v3770_v43 = vadd.f32 %v3769_v49, %v1402_v39  ;;  %v3749_v46 = vpop.f32.mrf.mxu1  ;;  %v3790_v20 = vadd.f32 %v3789_v44, %v1403_v14 }
 0x2c1   : > { %v3750_v23 = vadd.f32 %v3749_v46, %v1401_v57 }
 0x2c2   : > { %v4332_v50 = vmul.f32 1.442695, %v3770_v43  ;;  %v4334_v51 = vmul.f32 1.442695, %v3790_v20  ;;  %v1275_v43 = vld [vmem:[%s5524_s5 + $0x78] sm:$0xff] }
 0x2c3   : > { %v3729_v52 = vpop.f32.mrf.mxu0  ;;  %v4330_v53 = vmul.f32 1.442695, %v3750_v23  ;;  %v1413_v46 = vperm.slane %v1275_v43, 1  ;;  %v1415_v20 = vperm.slane %v1275_v43, 3 }
 0x2c4   : > { %5253 = vpow2.f32 %v4332_v50  ;;  %v3730_v54 = vadd.f32 %v3729_v52, %v1400_v45  ;;  %v1414_v45 = vperm.slane %v1275_v43, 2 }
 0x2c5   : > { %5255 = vpow2.f32 %v4334_v51 }
 0x2c6   : > { %5257 = vpow2.f32 %v4330_v53  ;;  %v4328_v58 = vmul.f32 1.442695, %v3730_v54 }
 0x2c8   : > { %5259 = vpow2.f32 %v4328_v58 }
 0x2ca   : > { %v5254_v59 = vpop.eup %5253 }
 0x2cb   : > { %v5256_v2 = vpop.eup %5255  ;;  %v4578_v60 = vrot.slane %v5254_v59, 4 }
 0x2cc   : > { %v5258_v62 = vpop.eup %5257  ;;  %v4579_v63 = vrot.slane %v5256_v2, 2 }
 0x2cd   : > { %v4577_v0 = vrot.slane %v5258_v62, 6 }
 0x2ce   : > { %v5260_v1 = vpop.eup %5259  ;;  %v4677_v3 = vsel %vm4594_vm1, %v4578_v60, %v4579_v63  ;;  %v1412_v60 = vperm.slane %v1275_v43, 0 }
 0x2cf   : > { %v4676_v11 = vsel %vm4592_vm2, %v5260_v1, %v4577_v0 }
 0x2d0   : > { %v4678_v7 = vsel %vm4596_vm3, %v4676_v11, %v4677_v3 }
 0x2d1   : > { %4750 = vst [vmem:[%s5952_s11 + $0xd8] sm:$0xff] %v4678_v7  ;;  %v3849_v9 = vpop.f32.mrf.mxu2  ;;  %v3869_v12 = vpop.f32.mrf.mxu3 }
 0x2d2   : > { %v3850_v10 = vadd.f32 %v3849_v9, %v1406_v4  ;;  %v3829_v47 = vpop.f32.mrf.mxu1  ;;  %v3870_v15 = vadd.f32 %v3869_v12, %v1407_v6  ;;  %v1418_v12 = vperm.slane %v1275_v43, 6 }
 0x2d3   : > { %v3830_v16 = vadd.f32 %v3829_v47, %v1405_v8  ;;  %v1419_v47 = vperm.slane %v1275_v43, 7 }
 0x2d4   : > { %v4340_v34 = vmul.f32 1.442695, %v3850_v10  ;;  %v4342_v17 = vmul.f32 1.442695, %v3870_v15  ;;  %v1416_v15 = vperm.slane %v1275_v43, 4 }
 0x2d5   : > { %v3809_v18 = vpop.f32.mrf.mxu0  ;;  %v4338_v19 = vmul.f32 1.442695, %v3830_v16 }
 0x2d6   : > { %5261 = vpow2.f32 %v4340_v34  ;;  %v3810_v21 = vadd.f32 %v3809_v18, %v1404_v13  ;;  %v1417_v13 = vperm.slane %v1275_v43, 5 }
 0x2d7   : > { %5263 = vpow2.f32 %v4342_v17 }
 0x2d8   : > { %5265 = vpow2.f32 %v4338_v19  ;;  %v4336_v22 = vmul.f32 1.442695, %v3810_v21 }
 0x2da   : > { %5267 = vpow2.f32 %v4336_v22 }
 0x2dc   : > { %v5262_v56 = vpop.eup %5261 }
 0x2dd   : > { %v5264_v24 = vpop.eup %5263  ;;  %v4581_v25 = vrot.slane %v5262_v56, 4 }
 0x2de   : > { %v5266_v26 = vpop.eup %5265  ;;  %v4582_v27 = vrot.slane %v5264_v24, 2 }
 0x2df   : > { %v4580_v28 = vrot.slane %v5266_v26, 6 }
 0x2e0   : > { %v5268_v29 = vpop.eup %5267  ;;  %v4680_v30 = vsel %vm4594_vm1, %v4581_v25, %v4582_v27 }
 0x2e1   : > { %v4679_v31 = vsel %vm4592_vm2, %v5268_v29, %v4580_v28  ;;  %v3929_v5 = vpop.f32.mrf.mxu2  ;;  %v3949_v35 = vpop.f32.mrf.mxu3 }
 0x2e2   : > { %v4681_v32 = vsel %vm4596_vm3, %v4679_v31, %v4680_v30  ;;  %v3930_v33 = vadd.f32 %v3929_v5, %v1410_v48  ;;  %v3909_v36 = vpop.f32.mrf.mxu1  ;;  %v3950_v37 = vadd.f32 %v3949_v35, %v1411_v42 }
 0x2e3   : > { %4751 = vst [vmem:[%s5952_s11 + $0xe0] sm:$0xff] %v4681_v32  ;;  %v3910_v39 = vadd.f32 %v3909_v36, %v1409_v41 }
 0x2e4   : > { %v4348_v40 = vmul.f32 1.442695, %v3930_v33  ;;  %v4350_v14 = vmul.f32 1.442695, %v3950_v37  ;;  %v3889_v57 = vpop.f32.mrf.mxu0 }
 0x2e5   : > { %v4346_v55 = vmul.f32 1.442695, %v3910_v39  ;;  %v3890_v49 = vadd.f32 %v3889_v57, %v1408_v38 }
 0x2e6   : > { %5269 = vpow2.f32 %v4348_v40 }
 0x2e7   : > { %5271 = vpow2.f32 %v4350_v14  ;;  %v4344_v44 = vmul.f32 1.442695, %v3890_v49 }
 0x2e8   : > { %5273 = vpow2.f32 %v4346_v55 }
 0x2e9   : > { %5275 = vpow2.f32 %v4344_v44 }
 0x2ec   : > { %v5270_v23 = vpop.eup %5269 }
 0x2ed   : > { %v5272_v50 = vpop.eup %5271  ;;  %v4584_v51 = vrot.slane %v5270_v23, 4  ;;  %v4009_v52 = vpop.f32.mrf.mxu2 }
 0x2ee   : > { %v5274_v53 = vpop.eup %5273  ;;  %v4585_v54 = vrot.slane %v5272_v50, 2  ;;  %v3989_v58 = vpop.f32.mrf.mxu1  ;;  %v4010_v59 = vadd.f32 %v4009_v52, %v1414_v45 }
 0x2ef   : > { %v4029_v2 = vpop.f32.mrf.mxu3  ;;  %v4583_v61 = vrot.slane %v5274_v53, 6  ;;  %v3990_v62 = vadd.f32 %v3989_v58, %v1413_v46  ;;  %v5276_v3 = vpop.eup %5275 }
 0x2f0   : > { %v4030_v63 = vadd.f32 %v4029_v2, %v1415_v20  ;;  %v4683_v0 = vsel %vm4594_vm1, %v4584_v51, %v4585_v54  ;;  %v4356_v1 = vmul.f32 1.442695, %v4010_v59  ;;  %v3969_v6 = vpop.f32.mrf.mxu0 }
 0x2f1   : > { %v4354_v4 = vmul.f32 1.442695, %v3990_v62  ;;  %v4682_v7 = vsel %vm4592_vm2, %v5276_v3, %v4583_v61  ;;  %v3970_v8 = vadd.f32 %v3969_v6, %v1412_v60 }
 0x2f2   : > { %v4358_v11 = vmul.f32 1.442695, %v4030_v63  ;;  %5277 = vpow2.f32 %v4356_v1  ;;  %v4684_v9 = vsel %vm4596_vm3, %v4682_v7, %v4683_v0 }
 0x2f3   : > { %5279 = vpow2.f32 %v4354_v4  ;;  %4752 = vst [vmem:[%s5952_s11 + $0xe8] sm:$0xff] %v4684_v9  ;;  %v4352_v10 = vmul.f32 1.442695, %v3970_v8 }
 0x2f4   : > { %5281 = vpow2.f32 %v4358_v11 }
 0x2f5   : > { %5283 = vpow2.f32 %v4352_v10 }
 0x2f7   : > { %v4089_v16 = vpop.f32.mrf.mxu2  ;;  %v4069_v17 = vpop.f32.mrf.mxu1 }
 0x2f8   : > { %v5278_v34 = vpop.eup %5277  ;;  %v4090_v18 = vadd.f32 %v4089_v16, %v1418_v12  ;;  %v4109_v19 = vpop.f32.mrf.mxu3  ;;  %v4070_v56 = vadd.f32 %v4069_v17, %v1417_v13 }
 0x2f9   : > { %v5280_v21 = vpop.eup %5279  ;;  %v4587_v22 = vrot.slane %v5278_v34, 4  ;;  %v4110_v24 = vadd.f32 %v4109_v19, %v1419_v47  ;;  %v4049_v25 = vpop.f32.mrf.mxu0 }
 0x2fa   : > { %v5282_v26 = vpop.eup %5281  ;;  %v4586_v27 = vrot.slane %v5280_v21, 6  ;;  %v4364_v48 = vmul.f32 1.442695, %v4090_v18  ;;  %v4050_v28 = vadd.f32 %v4049_v25, %v1416_v15  ;;  %v4362_v29 = vmul.f32 1.442695, %v4070_v56 }
 0x2fb   : > { %v4588_v42 = vrot.slane %v5282_v26, 2  ;;  %v4366_v30 = vmul.f32 1.442695, %v4110_v24  ;;  %v5284_v41 = vpop.eup %5283 }
 0x2fc   : > { %5285 = vpow2.f32 %v4364_v48  ;;  %v4360_v31 = vmul.f32 1.442695, %v4050_v28  ;;  %v4685_v32 = vsel %vm4592_vm2, %v5284_v41, %v4586_v27 }
 0x2fd   : > { %v4686_v5 = vsel %vm4594_vm1, %v4587_v22, %v4588_v42  ;;  %5287 = vpow2.f32 %v4362_v29 }
 0x2fe   : > { %v4687_v33 = vsel %vm4596_vm3, %v4685_v32, %v4686_v5  ;;  %5289 = vpow2.f32 %v4366_v30 }
 0x2ff   : > { %4753 = vst [vmem:[%s5952_s11 + $0xf0] sm:$0xff] %v4687_v33  ;;  %5291 = vpow2.f32 %v4360_v31 }
 0x302   : > { %v5286_v35 = vpop.eup %5285 }
 0x303   : > { %v5288_v36 = vpop.eup %5287  ;;  %v4590_v37 = vrot.slane %v5286_v35, 4 }
 0x304   : > { %v5290_v38 = vpop.eup %5289  ;;  %v4589_v39 = vrot.slane %v5288_v36, 6 }
 0x305   : > { %v5292_v40 = vpop.eup %5291  ;;  %v4591_v14 = vrot.slane %v5290_v38, 2 }
 0x306   : > { %v4688_v55 = vsel %vm4592_vm2, %v5292_v40, %v4589_v39 }
 0x307   : > { %v4689_v57 = vsel %vm4594_vm1, %v4590_v37, %v4591_v14 }
 0x308   : > { %v4690_v49 = vsel %vm4596_vm3, %v4688_v55, %v4689_v57 }
 0x309   : > { %4754 = vst [vmem:[%s5952_s11 + $0xf8] sm:$0xff] %v4690_v49 }
 0x30a PF: > { %p16_p8 = scmp.ge.s32.totalorder %s5441_s17, 6   ;;  %s7141_s12 = smov %s5388_s13 }
 0x30b   : > { %s7142_s13 = smov %s5392_s14  ;;  %s7143_s14 = smov %s5451_s20 }
 0x30c   : > { %s7144_s15 = smov %s5441_s17  ;;  %18 = sbr.rel (!%p16_p8) target bundleno = 5 (0x5), region = 85 }
 0x311   :  { %4777 = vsyncpa [#allocation3], 1 }
 0x312   :  { %4779 = vsyncpa [#allocation3 + $0x1], 1 }
 0x313   :  { %4780 = vsyncpa [#allocation5], 1 }
 0x314   :  { %4782 = vsyncpa [#allocation5 + $0x1], 1 }

// kernel: affine_mix_warp_forward.7
= control target key start
LH: loop header
LB: loop body
LE: loop exit
PB: predicated region body
PF: predicated region fallthrough
CT: control target
= control target key end

     0   :  { %8 = vsyncpa [#allocation3], 0  ;;  %s2907_s12 = smov 0   ;;  %s5409_s0 = inlined_call_operand.vmem [shape: f32[2,24], index: 0, kind: input, shape index: {}]   ;;  %s5410_s1 = inlined_call_operand.vmem [shape: f32[3,256,128], index: 1, kind: input, shape index: {}]   ;;  %s5411_s2 = inlined_call_operand.vmem [shape: f32[2,2,256,128], index: 2, kind: input, shape index: {}]   ;;  %s5412_s3 = inlined_call_operand.vmem [shape: f32[2,3,256,128], index: 3, kind: output, shape index: {}]  }
   0x1 LB: > { %s2345_s13 = sadd.s32 4294967295, %s2884_s12   ;;  %p2347_p0 = scmp.ge.s32.totalorder %s2884_s12, 1  ;;  %s2884_s12 = sphi %s2907_s12, %s14_s12  }
   0x2   : > { %p113_p1 = scmp.lt.s32.totalorder %s2884_s12, 3  ;;  %s125_s16 = sshll.u32 %s5409_s0, 4  ;;  %s126_s16 = int_to_ptr.vmem [resolvable:$true] %s125_s16 }
   0x3   : > { %p2592_p3 = scmp.eq.s32.totalorder %s2345_s13, 0  ;;  %s2886_s17 = smov [#allocation2]  }
   0x4   : > { %p114_p2 = pnand %p2347_p0, %p113_p1 }
   0x6   : > { %p2588_p4 = pneg %p114_p2  ;;  %149 = sbr.rel (%p114_p2) target bundleno = 445 (0x1bd), region = 32 }
   0x8   : > { %p2589_p5 = pnand %p2592_p3, %p2588_p4 }
   0xa   : > { %2591 = dma.vmem_to_smem (!%p2589_p5), %s126_s16, 32, %s2886_s17, [#allocation3]  }
   0xb   : > { %2879 = dma.done.wait (%p2592_p3), [#allocation3], 32  }
   0xc   : > { %2881 = vsyncadd (%p2592_p3), [#allocation3], 4294967264 }
   0xd   : > { %156 = sfence }
   0xe   : > { %p175_p6 = scmp.lt.s32.totalorder %s2345_s13, 1  ;;  %s2918_s18 = sshll.u32 %s2345_s13, 7  ;;  %v185_v0 = vld [vmem:[%s5410_s1] sm:$0xff]  ;;  %v186_v2 = vld [vmem:[%s5410_s1 + $0x8] sm:$0xff]  ;;  %v2950_v4 = vld [vmem:[%s5410_s1 + $0x10] sm:$0xff] }
   0xf   : > { %s445_s19 = sld [smem:[#allocation2 + %s2918_s18]]  ;;  %s479_s20 = sadd.s32 1, %s2918_s18  ;;  %v2355_v1 = vld [vmem:[%s5410_s1 + $0x100] sm:$0xff]  ;;  %v2356_v3 = vld [vmem:[%s5410_s1 + $0x108] sm:$0xff]  ;;  %v2357_v16 = vld [vmem:[%s5410_s1 + $0x110] sm:$0xff] }
  0x10   : > { %s5434_s13 = smov (!%p175_p6, %s2345_s13), 1  ;;  %s2924_s21 = sld [smem:[#allocation2 + %s479_s20]]  ;;  %v2387_v20 = vld [vmem:[%s5410_s1 + $0x200] sm:$0xff]  ;;  %v2388_v23 = vld [vmem:[%s5410_s1 + $0x208] sm:$0xff]  ;;  %v2389_v31 = vld [vmem:[%s5410_s1 + $0x210] sm:$0xff] }
  0x11   : > { %s546_s22 = sadd.s32 2, %s2918_s18  ;;  %s2582_s23 = sshll.u32 %s5434_s13, 9  ;;  %v188_v56 = vld [vmem:[%s5410_s1 + $0x18] sm:$0xff] }
  0x12   : > { %s2934_s28 = scalar_lea.vmem %s5411_s2, %s2582_s23  ;;  %s2939_s4 = sld [smem:[#allocation2 + %s546_s22]]  ;;  %v2358_v62 = vld [vmem:[%s5410_s1 + $0x118] sm:$0xff] }
  0x13   : > { %v2953_v5 = vld [vmem:[%s2934_s28] sm:$0xff]  ;;  %s613_s11 = sadd.s32 3, %s2918_s18  ;;  %v2960_v7 = vld [vmem:[%s2934_s28 + $0x8] sm:$0xff]  ;;  %s680_s15 = sadd.s32 12, %s2918_s18  ;;  %v2973_v11 = vld [vmem:[%s2934_s28 + $0x10] sm:$0xff] }
  0x14   : > { %v2956_v6 = vld [vmem:[%s2934_s28 + $0x100] sm:$0xff]  ;;  %s2966_s14 = sld [smem:[#allocation2 + %s613_s11]]  ;;  %v2970_v10 = vld [vmem:[%s2934_s28 + $0x108] sm:$0xff]  ;;  %v2976_v12 = vld [vmem:[%s2934_s28 + $0x110] sm:$0xff]  ;;  %s715_s17 = sadd.s32 13, %s2918_s18 }
  0x15   : > { %v348_v8 = vadd.f32 %v2956_v6, %v2953_v5  ;;  %v2964_v9 = vstv %s445_s19  ;;  %s2979_s16 = sld [smem:[#allocation2 + %s680_s15]]  ;;  %v349_v14 = vadd.f32 %v2970_v10, %v2960_v7  ;;  %v350_v17 = vadd.f32 %v2976_v12, %v2973_v11  ;;  %v2991_v18 = vld [vmem:[%s2934_s28 + $0x18] sm:$0xff]  ;;  %s782_s25 = sadd.s32 14, %s2918_s18 }
  0x16   : > { %v447_v13 = vmul.f32 %v2964_v9, %v185_v0  ;;  %v448_v15 = vmul.f32 %v2964_v9, %v186_v2  ;;  %v2994_v19 = vld [vmem:[%s2934_s28 + $0x118] sm:$0xff]  ;;  %v3000_v22 = vstv %s2924_s21  ;;  %s716_s24 = sld [smem:[#allocation2 + %s715_s17]]  ;;  %v449_v24 = vmul.f32 %v2964_v9, %v2950_v4  ;;  %s849_s30 = sadd.s32 15, %s2918_s18 }
  0x17   : > { %v380_v21 = vmax.f32 %v348_v8, 0.001  ;;  %v351_v25 = vadd.f32 %v2994_v19, %v2991_v18  ;;  %v482_v26 = vmul.f32 %v2355_v1, %v3000_v22  ;;  %s783_s29 = sld [smem:[#allocation2 + %s782_s25]]  ;;  %v381_v27 = vmax.f32 %v349_v14, 0.001  ;;  %v2390_v63 = vld [vmem:[%s5410_s1 + $0x218] sm:$0xff] }
  0x18   : > { %v483_v28 = vmul.f32 %v2356_v3, %v3000_v22  ;;  %v382_v29 = vmax.f32 %v350_v17, 0.001  ;;  %v3014_v30 = vstv %s2939_s4  ;;  %s850_s21 = sld [smem:[#allocation2 + %s849_s30]]  ;;  %v484_v32 = vmul.f32 %v2357_v16, %v3000_v22  ;;  %s2583_s19 = smul.u32 768, %s5434_s13 }
  0x19   : > { %2603 = vrcp.f32 %v380_v21  ;;  %v383_v33 = vmax.f32 %v351_v25, 0.001  ;;  %v514_v34 = vadd.f32 %v482_v26, %v447_v13  ;;  %v549_v35 = vmul.f32 %v2387_v20, %v3014_v30  ;;  %v3072_v21 = vld [vmem:[%s2934_s28 + $0x120] sm:$0xff]  ;;  %s1012_s10 = sadd.s32 4, %s2918_s18  ;;  %s1047_s15 = sadd.s32 5, %s2918_s18 }
  0x1a   : > { %2605 = vrcp.f32 %v381_v27  ;;  %v515_v36 = vadd.f32 %v483_v28, %v448_v15  ;;  %v3022_v37 = vstv %s2966_s14  ;;  %v550_v38 = vmul.f32 %v2388_v23, %v3014_v30  ;;  %s1280_s22 = sadd.s32 16, %s2918_s18  ;;  %s3909_s13 = sld [smem:[#allocation2 + %s1012_s10]] }
  0x1b   : > { %2607 = vrcp.f32 %v382_v29  ;;  %v516_v39 = vadd.f32 %v484_v32, %v449_v24  ;;  %v581_v40 = vadd.f32 %v549_v35, %v514_v34  ;;  %v3026_v41 = vstv %s2979_s16  ;;  %v189_v24 = vld [vmem:[%s5410_s1 + $0x20] sm:$0xff]  ;;  %s1114_s23 = sadd.s32 6, %s2918_s18  ;;  %s3916_s25 = sld [smem:[#allocation2 + %s1047_s15]] }
  0x1c   : > { %v551_v42 = vmul.f32 %v2389_v31, %v3014_v30  ;;  %2609 = vrcp.f32 %v383_v33  ;;  %v683_v43 = vmul.f32 %v3026_v41, %v185_v0  ;;  %v3030_v44 = vstv %s716_s24  ;;  %v2359_v29 = vld [vmem:[%s5410_s1 + $0x120] sm:$0xff]  ;;  %s3103_s24 = scalar_lea.vmem %s5412_s3, %s2583_s19  ;;  %s1315_s26 = sadd.s32 17, %s2918_s18 }
  0x1d   : > { %v582_v45 = vadd.f32 %v550_v38, %v515_v36  ;;  %v684_v46 = vmul.f32 %v3026_v41, %v186_v2  ;;  %v616_v47 = vadd.f32 %v3022_v37, %v581_v40  ;;  %v718_v48 = vmul.f32 %v2355_v1, %v3030_v44  ;;  %v2391_v34 = vld [vmem:[%s5410_s1 + $0x220] sm:$0xff]  ;;  %s1181_s27 = sadd.s32 7, %s2918_s18  ;;  %s3941_s4 = sld [smem:[#allocation2 + %s1114_s23]] }
  0x1e   : > { %v3035_v49 = vstv %s783_s29  ;;  %v719_v50 = vmul.f32 %v2356_v3, %v3030_v44  ;;  %v3041_v53 = vstv %s850_s21  ;;  %v583_v61 = vadd.f32 %v551_v42, %v516_v39  ;;  %s3929_s29 = sld [smem:[#allocation2 + %s1280_s22]]  ;;  %s1382_s7 = sadd.s32 18, %s2918_s18 }
  0x1f   : > { %v3038_v51 = vpop.eup %2603  ;;  %v785_v52 = vmul.f32 %v2387_v20, %v3035_v49  ;;  %v617_v54 = vadd.f32 %v3022_v37, %v582_v45  ;;  %v786_v55 = vmul.f32 %v2388_v23, %v3035_v49  ;;  %v648_v58 = vmul.f32 %v616_v47, %v2953_v5  ;;  %v3069_v20 = vld [vmem:[%s2934_s28 + $0x20] sm:$0xff]  ;;  %s3948_s10 = sld [smem:[#allocation2 + %s1315_s26]]  ;;  %s1449_s11 = sadd.s32 19, %s2918_s18 }
  0x20   : > { %v3048_v57 = vpop.eup %2605  ;;  %v750_v59 = vadd.f32 %v718_v48, %v683_v43  ;;  %v751_v60 = vadd.f32 %v719_v50, %v684_v46  ;;  %v685_v2 = vmul.f32 %v3026_v41, %v2950_v4  ;;  %v720_v3 = vmul.f32 %v2357_v16, %v3030_v44  ;;  %s3955_s14 = sld [smem:[#allocation2 + %s1181_s27]]  ;;  %s1747_s17 = sadd.s32 10, %s2918_s18 }
  0x21   : > { %v3057_v0 = vpop.eup %2607  ;;  %v649_v1 = vmul.f32 %v617_v54, %v2960_v7  ;;  %v787_v5 = vmul.f32 %v2389_v31, %v3035_v49  ;;  %v618_v15 = vadd.f32 %v3022_v37, %v583_v61  ;;  %v450_v17 = vmul.f32 %v2964_v9, %v188_v56  ;;  %v190_v54 = vld [vmem:[%s5410_s1 + $0x28] sm:$0xff]  ;;  %s3962_s15 = sld [smem:[#allocation2 + %s1382_s7]]  ;;  %s1645_s7 = sadd.s32 8, %s2918_s18 }
  0x22   : > { %v3064_v8 = vpop.eup %2609  ;;  %v817_v13 = vadd.f32 %v785_v52, %v750_v59  ;;  %v818_v14 = vadd.f32 %v786_v55, %v751_v60  ;;  %v752_v7 = vadd.f32 %v720_v3, %v685_v2  ;;  %v485_v4 = vmul.f32 %v2358_v62, %v3000_v22  ;;  %v3111_v55 = vld [vmem:[%s2934_s28 + $0x28] sm:$0xff]  ;;  %s3966_s16 = sld [smem:[#allocation2 + %s1449_s11]]  ;;  %s1814_s26 = sadd.s32 11, %s2918_s18 }
  0x23   : > { %v552_v16 = vmul.f32 %v2390_v63, %v3014_v30  ;;  %v686_v23 = vmul.f32 %v3026_v41, %v188_v56  ;;  %v650_v27 = vmul.f32 %v618_v15, %v2973_v11  ;;  %v721_v28 = vmul.f32 %v2358_v62, %v3030_v44  ;;  %v3114_v56 = vld [vmem:[%s2934_s28 + $0x128] sm:$0xff]  ;;  %s4660_s21 = sld [smem:[#allocation2 + %s1747_s17]]  ;;  %s2015_s5 = sadd.s32 22, %s2918_s18 }
  0x24   : > { %v852_v25 = vadd.f32 %v3041_v53, %v817_v13  ;;  %v853_v26 = vadd.f32 %v3041_v53, %v818_v14  ;;  %v819_v31 = vadd.f32 %v787_v5, %v752_v7  ;;  %v517_v32 = vadd.f32 %v485_v4, %v450_v17  ;;  %v2360_v61 = vld [vmem:[%s5410_s1 + $0x128] sm:$0xff]  ;;  %s4676_s9 = sld [smem:[#allocation2 + %s1814_s26]] }
  0x25   : > { %v788_v33 = vmul.f32 %v2390_v63, %v3035_v49  ;;  %v352_v35 = vadd.f32 %v3072_v21, %v3069_v20  ;;  %v753_v38 = vadd.f32 %v721_v28, %v686_v23  ;;  %v451_v39 = vmul.f32 %v2964_v9, %v189_v24  ;;  %v2392_v3 = vld [vmem:[%s5410_s1 + $0x228] sm:$0xff]  ;;  %v3142_v23 = vld [vmem:[%s2934_s28 + $0x130] sm:$0xff]  ;;  %s4683_s11 = sld [smem:[#allocation2 + %s2015_s5]] }
  0x26   : > { %v884_v11 = vmul.f32 %v2956_v6, %v852_v25  ;;  %v885_v36 = vmul.f32 %v2970_v10, %v853_v26  ;;  %v854_v40 = vadd.f32 %v3041_v53, %v819_v31  ;;  %v584_v42 = vadd.f32 %v552_v16, %v517_v32  ;;  %v3139_v16 = vld [vmem:[%s2934_s28 + $0x30] sm:$0xff] }
  0x27   : > { %v384_v43 = vmax.f32 %v352_v35, 0.001  ;;  %v486_v45 = vmul.f32 %v2359_v29, %v3000_v22  ;;  %v820_v48 = vadd.f32 %v788_v33, %v753_v38  ;;  %v553_v50 = vmul.f32 %v2391_v34, %v3014_v30  ;;  %v2393_v35 = vld [vmem:[%s5410_s1 + $0x230] sm:$0xff] }
  0x28   : > { %v916_v46 = vadd.f32 %v884_v11, %v648_v58  ;;  %v917_v47 = vadd.f32 %v885_v36, %v649_v1  ;;  %v886_v6 = vmul.f32 %v2976_v12, %v854_v40  ;;  %v619_v10 = vadd.f32 %v3022_v37, %v584_v42 }
  0x29   : > { %2611 = vrcp.f32 %v384_v43  ;;  %v518_v52 = vadd.f32 %v486_v45, %v451_v39  ;;  %v855_v12 = vadd.f32 %v3041_v53, %v820_v48  ;;  %v687_v60 = vmul.f32 %v3026_v41, %v189_v24  ;;  %v3167_v43 = vld [vmem:[%s2934_s28 + $0x38] sm:$0xff] }
  0x2a   : > { %v948_v58 = vmul.f32 %v3038_v51, %v916_v46  ;;  %v949_v59 = vmul.f32 %v3048_v57, %v917_v47  ;;  %v918_v62 = vadd.f32 %v886_v6, %v650_v27  ;;  %v651_v63 = vmul.f32 %v619_v10, %v2991_v18  ;;  %v191_v27 = vld [vmem:[%s5410_s1 + $0x30] sm:$0xff]  ;;  %v3170_v45 = vld [vmem:[%s2934_s28 + $0x138] sm:$0xff] }
  0x2b   : > { %v585_v1 = vadd.f32 %v553_v50, %v518_v52  ;;  %v722_v2 = vmul.f32 %v2359_v29, %v3030_v44  ;;  %v887_v5 = vmul.f32 %v2994_v19, %v855_v12  ;;  %v789_v13 = vmul.f32 %v2391_v34, %v3035_v49  ;;  %v2361_v34 = vld [vmem:[%s5410_s1 + $0x130] sm:$0xff] }
  0x2c   : > { %980 = vst [vmem:[%s3103_s24] sm:$0xff] %v948_v58  ;;  %v353_v14 = vadd.f32 %v3114_v56, %v3111_v55  ;;  %v452_v15 = vmul.f32 %v2964_v9, %v190_v54  ;;  %v950_v18 = vmul.f32 %v3057_v0, %v918_v62  ;;  %v487_v4 = vmul.f32 %v2360_v61, %v3000_v22  ;;  %v192_v58 = vld [vmem:[%s5410_s1 + $0x38] sm:$0xff] }
  0x2d   : > { %981 = vst [vmem:[%s3103_s24 + $0x8] sm:$0xff] %v949_v59  ;;  %v620_v17 = vadd.f32 %v3022_v37, %v585_v1  ;;  %v754_v7 = vadd.f32 %v722_v2, %v687_v60  ;;  %v919_v19 = vadd.f32 %v887_v5, %v651_v63  ;;  %v554_v25 = vmul.f32 %v2392_v3, %v3014_v30  ;;  %v2362_v59 = vld [vmem:[%s5410_s1 + $0x138] sm:$0xff] }
  0x2e   : > { %v385_v24 = vmax.f32 %v353_v14, 0.001  ;;  %v688_v26 = vmul.f32 %v3026_v41, %v190_v54  ;;  %982 = vst [vmem:[%s3103_s24 + $0x10] sm:$0xff] %v950_v18  ;;  %v519_v32 = vadd.f32 %v487_v4, %v452_v15  ;;  %v723_v33 = vmul.f32 %v2360_v61, %v3030_v44 }
  0x2f   : > { %v3149_v28 = vpop.eup %2611  ;;  %v652_v29 = vmul.f32 %v620_v17, %v3069_v20  ;;  %v821_v31 = vadd.f32 %v789_v13, %v754_v7  ;;  %v951_v11 = vmul.f32 %v3064_v8, %v919_v19  ;;  %v790_v36 = vmul.f32 %v2392_v3, %v3035_v49  ;;  %v3204_v19 = vld [vmem:[%s2934_s28 + $0x40] sm:$0xff] }
  0x30   : > { %2613 = vrcp.f32 %v385_v24  ;;  %v354_v20 = vadd.f32 %v3142_v23, %v3139_v16  ;;  %v586_v39 = vadd.f32 %v554_v25, %v519_v32  ;;  %v755_v40 = vadd.f32 %v723_v33, %v688_v26  ;;  %v3207_v24 = vld [vmem:[%s2934_s28 + $0x140] sm:$0xff] }
  0x31   : > { %v856_v38 = vadd.f32 %v3041_v53, %v821_v31  ;;  %v453_v42 = vmul.f32 %v2964_v9, %v191_v27  ;;  %983 = vst [vmem:[%s3103_s24 + $0x18] sm:$0xff] %v951_v11  ;;  %v488_v47 = vmul.f32 %v2361_v34, %v3000_v22  ;;  %v555_v48 = vmul.f32 %v2393_v35, %v3014_v30 }
  0x32   : > { %v386_v46 = vmax.f32 %v354_v20, 0.001  ;;  %v689_v50 = vmul.f32 %v3026_v41, %v191_v27  ;;  %v621_v10 = vadd.f32 %v3022_v37, %v586_v39  ;;  %v822_v52 = vadd.f32 %v790_v36, %v755_v40 }
  0x33   : > { %v888_v6 = vmul.f32 %v3072_v21, %v856_v38  ;;  %v724_v54 = vmul.f32 %v2361_v34, %v3030_v44  ;;  %v520_v12 = vadd.f32 %v488_v47, %v453_v42  ;;  %v791_v60 = vmul.f32 %v2393_v35, %v3035_v49  ;;  %v2394_v21 = vld [vmem:[%s5410_s1 + $0x238] sm:$0xff]  ;;  %v2395_v34 = vld [vmem:[%s5410_s1 + $0x240] sm:$0xff]  ;;  %v3231_v47 = vld [vmem:[%s2934_s28 + $0x48] sm:$0xff] }
  0x34   : > { %2615 = vrcp.f32 %v386_v46  ;;  %v355_v61 = vadd.f32 %v3170_v45, %v3167_v43  ;;  %v653_v63 = vmul.f32 %v621_v10, %v3111_v55  ;;  %v857_v1 = vadd.f32 %v3041_v53, %v822_v52  ;;  %v193_v55 = vld [vmem:[%s5410_s1 + $0x40] sm:$0xff] }
  0x35   : > { %v920_v62 = vadd.f32 %v888_v6, %v652_v29  ;;  %v756_v2 = vadd.f32 %v724_v54, %v689_v50  ;;  %v587_v5 = vadd.f32 %v555_v48, %v520_v12  ;;  %v454_v14 = vmul.f32 %v2964_v9, %v192_v58  ;;  %v3234_v48 = vld [vmem:[%s2934_s28 + $0x148] sm:$0xff] }
  0x36   : > { %v3193_v3 = vpop.eup %2613  ;;  %v387_v13 = vmax.f32 %v355_v61, 0.001  ;;  %v489_v15 = vmul.f32 %v2362_v59, %v3000_v22  ;;  %v889_v17 = vmul.f32 %v3114_v56, %v857_v1  ;;  %v556_v4 = vmul.f32 %v2394_v21, %v3014_v30  ;;  %v2363_v56 = vld [vmem:[%s5410_s1 + $0x140] sm:$0xff]  ;;  %v2364_v12 = vld [vmem:[%s5410_s1 + $0x148] sm:$0xff] }
  0x37   : > { %v952_v18 = vmul.f32 %v3149_v28, %v920_v62  ;;  %v823_v7 = vadd.f32 %v791_v60, %v756_v2  ;;  %v622_v25 = vadd.f32 %v3022_v37, %v587_v5  ;;  %v690_v27 = vmul.f32 %v3026_v41, %v192_v58  ;;  %v2396_v60 = vld [vmem:[%s5410_s1 + $0x248] sm:$0xff] }
  0x38   : > { %2617 = vrcp.f32 %v387_v13  ;;  %v521_v26 = vadd.f32 %v489_v15, %v454_v14  ;;  %v921_v29 = vadd.f32 %v889_v17, %v653_v63  ;;  %v725_v32 = vmul.f32 %v2362_v59, %v3030_v44  ;;  %v194_v59 = vld [vmem:[%s5410_s1 + $0x48] sm:$0xff] }
  0x39   : > { %984 = vst [vmem:[%s3103_s24 + $0x20] sm:$0xff] %v952_v18  ;;  %v858_v31 = vadd.f32 %v3041_v53, %v823_v7  ;;  %v792_v33 = vmul.f32 %v2394_v21, %v3035_v49  ;;  %v654_v11 = vmul.f32 %v622_v25, %v3139_v16  ;;  %v356_v20 = vadd.f32 %v3207_v24, %v3204_v19  ;;  %v3265_v7 = vld [vmem:[%s2934_s28 + $0x150] sm:$0xff] }
  0x3a   : > { %v3221_v35 = vpop.eup %2615  ;;  %v588_v36 = vadd.f32 %v556_v4, %v521_v26  ;;  %v455_v38 = vmul.f32 %v2964_v9, %v193_v55  ;;  %v953_v39 = vmul.f32 %v3193_v3, %v921_v29  ;;  %v757_v42 = vadd.f32 %v725_v32, %v690_v27  ;;  %v195_v27 = vld [vmem:[%s5410_s1 + $0x50] sm:$0xff] }
  0x3b   : > { %v890_v40 = vmul.f32 %v3142_v23, %v858_v31  ;;  %v490_v46 = vmul.f32 %v2363_v56, %v3000_v22  ;;  %v388_v16 = vmax.f32 %v356_v20, 0.001  ;;  %v557_v6 = vmul.f32 %v2395_v34, %v3014_v30  ;;  %v2397_v32 = vld [vmem:[%s5410_s1 + $0x250] sm:$0xff] }
  0x3c   : > { %v623_v50 = vadd.f32 %v3022_v37, %v588_v36  ;;  %v691_v10 = vmul.f32 %v3026_v41, %v193_v55  ;;  %985 = vst [vmem:[%s3103_s24 + $0x28] sm:$0xff] %v953_v39  ;;  %v824_v54 = vadd.f32 %v792_v33, %v757_v42  ;;  %v726_v23 = vmul.f32 %v2363_v56, %v3030_v44  ;;  %v2365_v56 = vld [vmem:[%s5410_s1 + $0x150] sm:$0xff] }
  0x3d   : > { %v922_v52 = vadd.f32 %v890_v40, %v654_v11  ;;  %v522_v58 = vadd.f32 %v490_v46, %v455_v38  ;;  %2619 = vrcp.f32 %v388_v16  ;;  %v793_v62 = vmul.f32 %v2395_v34, %v3035_v49 }
  0x3e   : > { %v3250_v21 = vpop.eup %2617  ;;  %v655_v61 = vmul.f32 %v623_v50, %v3167_v43  ;;  %v357_v63 = vadd.f32 %v3234_v48, %v3231_v47  ;;  %v859_v2 = vadd.f32 %v3041_v53, %v824_v54  ;;  %v758_v13 = vadd.f32 %v726_v23, %v691_v10  ;;  %v3262_v43 = vld [vmem:[%s2934_s28 + $0x50] sm:$0xff]  ;;  %v3297_v10 = vld [vmem:[%s2934_s28 + $0x158] sm:$0xff] }
  0x3f   : > { %v954_v1 = vmul.f32 %v3221_v35, %v922_v52  ;;  %v589_v5 = vadd.f32 %v557_v6, %v522_v58  ;;  %v456_v15 = vmul.f32 %v2964_v9, %v194_v59  ;;  %v491_v18 = vmul.f32 %v2364_v12, %v3000_v22  ;;  %v3294_v6 = vld [vmem:[%s2934_s28 + $0x58] sm:$0xff] }
  0x40   : > { %v389_v14 = vmax.f32 %v357_v63, 0.001  ;;  %v558_v17 = vmul.f32 %v2396_v60, %v3014_v30  ;;  %v891_v4 = vmul.f32 %v3170_v45, %v859_v2  ;;  %v825_v25 = vadd.f32 %v793_v62, %v758_v13  ;;  %v2398_v62 = vld [vmem:[%s5410_s1 + $0x258] sm:$0xff] }
  0x41   : > { %986 = vst [vmem:[%s3103_s24 + $0x30] sm:$0xff] %v954_v1  ;;  %v624_v55 = vadd.f32 %v3022_v37, %v589_v5  ;;  %v692_v26 = vmul.f32 %v3026_v41, %v194_v59  ;;  %v523_v29 = vadd.f32 %v491_v18, %v456_v15  ;;  %v727_v31 = vmul.f32 %v2364_v12, %v3030_v44  ;;  %v196_v59 = vld [vmem:[%s5410_s1 + $0x58] sm:$0xff] }
  0x42   : > { %2621 = vrcp.f32 %v389_v14  ;;  %v794_v45 = vmul.f32 %v2396_v60, %v3035_v49  ;;  %v923_v33 = vadd.f32 %v891_v4, %v655_v61  ;;  %v860_v11 = vadd.f32 %v3041_v53, %v825_v25 }
  0x43   : > { %v656_v34 = vmul.f32 %v624_v55, %v3204_v19  ;;  %v358_v36 = vadd.f32 %v3265_v7, %v3262_v43  ;;  %v3286_v20 = vpop.eup %2619  ;;  %v590_v38 = vadd.f32 %v558_v17, %v523_v29  ;;  %v759_v39 = vadd.f32 %v727_v31, %v692_v26  ;;  %v3326_v26 = vld [vmem:[%s2934_s28 + $0x60] sm:$0xff] }
  0x44   : > { %v457_v40 = vmul.f32 %v2964_v9, %v195_v27  ;;  %v492_v42 = vmul.f32 %v2365_v56, %v3000_v22  ;;  %v955_v46 = vmul.f32 %v3250_v21, %v923_v33  ;;  %v892_v50 = vmul.f32 %v3207_v24, %v860_v11  ;;  %v2366_v24 = vld [vmem:[%s5410_s1 + $0x158] sm:$0xff]  ;;  %v2399_v33 = vld [vmem:[%s5410_s1 + $0x260] sm:$0xff] }
  0x45   : > { %v390_v16 = vmax.f32 %v358_v36, 0.001  ;;  %v559_v19 = vmul.f32 %v2397_v32, %v3014_v30  ;;  %v625_v52 = vadd.f32 %v3022_v37, %v590_v38  ;;  %v826_v54 = vadd.f32 %v794_v45, %v759_v39 }
  0x46   : > { %v524_v58 = vadd.f32 %v492_v42, %v457_v40  ;;  %v693_v23 = vmul.f32 %v3026_v41, %v195_v27  ;;  %987 = vst [vmem:[%s3103_s24 + $0x38] sm:$0xff] %v955_v46  ;;  %v924_v12 = vadd.f32 %v892_v50, %v656_v34  ;;  %v728_v60 = vmul.f32 %v2365_v56, %v3030_v44  ;;  %v3329_v27 = vld [vmem:[%s2934_s28 + $0x160] sm:$0xff] }
  0x47   : > { %2623 = vrcp.f32 %v390_v16  ;;  %v795_v61 = vmul.f32 %v2397_v32, %v3035_v49  ;;  %v657_v1 = vmul.f32 %v625_v52, %v3231_v47  ;;  %v861_v2 = vadd.f32 %v3041_v53, %v826_v54  ;;  %v2367_v32 = vld [vmem:[%s5410_s1 + $0x160] sm:$0xff] }
  0x48   : > { %v3313_v63 = vpop.eup %2621  ;;  %v591_v5 = vadd.f32 %v559_v19, %v524_v58  ;;  %v359_v13 = vadd.f32 %v3297_v10, %v3294_v6  ;;  %v956_v14 = vmul.f32 %v3286_v20, %v924_v12  ;;  %v760_v15 = vadd.f32 %v728_v60, %v693_v23  ;;  %v3363_v12 = vld [vmem:[%s2934_s28 + $0x168] sm:$0xff] }
  0x49   : > { %v458_v18 = vmul.f32 %v2964_v9, %v196_v59  ;;  %v493_v17 = vmul.f32 %v2366_v24, %v3000_v22  ;;  %v893_v4 = vmul.f32 %v3234_v48, %v861_v2  ;;  %v560_v47 = vmul.f32 %v2398_v62, %v3014_v30  ;;  %v197_v48 = vld [vmem:[%s5410_s1 + $0x60] sm:$0xff]  ;;  %v2400_v2 = vld [vmem:[%s5410_s1 + $0x268] sm:$0xff] }
  0x4a   : > { %v626_v55 = vadd.f32 %v3022_v37, %v591_v5  ;;  %v391_v25 = vmax.f32 %v359_v13, 0.001  ;;  %988 = vst [vmem:[%s3103_s24 + $0x40] sm:$0xff] %v956_v14  ;;  %v827_v56 = vadd.f32 %v795_v61, %v760_v15  ;;  %v694_v31 = vmul.f32 %v3026_v41, %v196_v59  ;;  %v198_v59 = vld [vmem:[%s5410_s1 + $0x68] sm:$0xff] }
  0x4b   : > { %v525_v29 = vadd.f32 %v493_v17, %v458_v18  ;;  %v729_v45 = vmul.f32 %v2366_v24, %v3030_v44  ;;  %v925_v34 = vadd.f32 %v893_v4, %v657_v1  ;;  %v796_v36 = vmul.f32 %v2398_v62, %v3035_v49  ;;  %v3360_v24 = vld [vmem:[%s2934_s28 + $0x68] sm:$0xff] }
  0x4c   : > { %v658_v11 = vmul.f32 %v626_v55, %v3262_v43  ;;  %2625 = vrcp.f32 %v391_v25  ;;  %v862_v39 = vadd.f32 %v3041_v53, %v827_v56  ;;  %v360_v46 = vadd.f32 %v3329_v27, %v3326_v26  ;;  %v2368_v1 = vld [vmem:[%s5410_s1 + $0x168] sm:$0xff] }
  0x4d   : > { %v3345_v38 = vpop.eup %2623  ;;  %v592_v40 = vadd.f32 %v560_v47, %v525_v29  ;;  %v761_v42 = vadd.f32 %v729_v45, %v694_v31  ;;  %v957_v50 = vmul.f32 %v3313_v63, %v925_v34  ;;  %v459_v16 = vmul.f32 %v2964_v9, %v197_v48  ;;  %v3387_v29 = vld [vmem:[%s2934_s28 + $0x70] sm:$0xff] }
  0x4e   : > { %v494_v43 = vmul.f32 %v2367_v32, %v3000_v22  ;;  %v561_v19 = vmul.f32 %v2399_v33, %v3014_v30  ;;  %v894_v52 = vmul.f32 %v3265_v7, %v862_v39  ;;  %v392_v23 = vmax.f32 %v360_v46, 0.001  ;;  %v3390_v31 = vld [vmem:[%s2934_s28 + $0x170] sm:$0xff] }
  0x4f   : > { %v627_v54 = vadd.f32 %v3022_v37, %v592_v40  ;;  %v828_v58 = vadd.f32 %v796_v36, %v761_v42  ;;  %989 = vst [vmem:[%s3103_s24 + $0x48] sm:$0xff] %v957_v50  ;;  %v695_v61 = vmul.f32 %v3026_v41, %v197_v48  ;;  %v730_v62 = vmul.f32 %v2367_v32, %v3030_v44  ;;  %v199_v34 = vld [vmem:[%s5410_s1 + $0x70] sm:$0xff] }
  0x50   : > { %v526_v60 = vadd.f32 %v494_v43, %v459_v16  ;;  %v797_v7 = vmul.f32 %v2399_v33, %v3035_v49  ;;  %v926_v5 = vadd.f32 %v894_v52, %v658_v11  ;;  %2627 = vrcp.f32 %v392_v23  ;;  %v2369_v40 = vld [vmem:[%s5410_s1 + $0x170] sm:$0xff] }
  0x51   : > { %v659_v13 = vmul.f32 %v627_v54, %v3294_v6  ;;  %v863_v14 = vadd.f32 %v3041_v53, %v828_v58  ;;  %v762_v17 = vadd.f32 %v730_v62, %v695_v61  ;;  %v361_v4 = vadd.f32 %v3363_v12, %v3360_v24  ;;  %v2401_v42 = vld [vmem:[%s5410_s1 + $0x270] sm:$0xff]  ;;  %v3418_v61 = vld [vmem:[%s2934_s28 + $0x78] sm:$0xff] }
  0x52   : > { %v3377_v15 = vpop.eup %2625  ;;  %v593_v18 = vadd.f32 %v561_v19, %v526_v60  ;;  %v460_v55 = vmul.f32 %v2964_v9, %v198_v59  ;;  %v958_v25 = vmul.f32 %v3345_v38, %v926_v5  ;;  %v495_v56 = vmul.f32 %v2368_v1, %v3000_v22  ;;  %v3421_v62 = vld [vmem:[%s2934_s28 + $0x178] sm:$0xff] }
  0x53   : > { %v895_v47 = vmul.f32 %v3297_v10, %v863_v14  ;;  %v562_v6 = vmul.f32 %v2400_v2, %v3014_v30  ;;  %v829_v48 = vadd.f32 %v797_v7, %v762_v17  ;;  %v393_v32 = vmax.f32 %v361_v4, 0.001  ;;  %v2402_v4 = vld [vmem:[%s5410_s1 + $0x278] sm:$0xff] }
  0x54   : > { %v628_v45 = vadd.f32 %v3022_v37, %v593_v18  ;;  %v696_v33 = vmul.f32 %v3026_v41, %v198_v59  ;;  %990 = vst [vmem:[%s3103_s24 + $0x50] sm:$0xff] %v958_v25  ;;  %v527_v11 = vadd.f32 %v495_v56, %v460_v55  ;;  %v731_v36 = vmul.f32 %v2368_v1, %v3030_v44 }
  0x55   : > { %v927_v10 = vadd.f32 %v895_v47, %v659_v13  ;;  %v798_v39 = vmul.f32 %v2400_v2, %v3035_v49  ;;  %v864_v50 = vadd.f32 %v3041_v53, %v829_v48  ;;  %2629 = vrcp.f32 %v393_v32  ;;  %v2370_v13 = vld [vmem:[%s5410_s1 + $0x178] sm:$0xff] }
  0x56   : > { %v660_v46 = vmul.f32 %v628_v45, %v3326_v26  ;;  %v362_v16 = vadd.f32 %v3390_v31, %v3387_v29  ;;  %v3410_v43 = vpop.eup %2627  ;;  %v594_v52 = vadd.f32 %v562_v6, %v527_v11  ;;  %v763_v54 = vadd.f32 %v731_v36, %v696_v33  ;;  %v3449_v36 = vld [vmem:[%s2934_s28 + $0x80] sm:$0xff] }
  0x57   : > { %v959_v19 = vmul.f32 %v3377_v15, %v927_v10  ;;  %v461_v58 = vmul.f32 %v2964_v9, %v199_v34  ;;  %v896_v23 = vmul.f32 %v3329_v27, %v864_v50  ;;  %v496_v60 = vmul.f32 %v2369_v40, %v3000_v22  ;;  %v200_v27 = vld [vmem:[%s5410_s1 + $0x78] sm:$0xff] }
  0x58   : > { %v394_v59 = vmax.f32 %v362_v16, 0.001  ;;  %v563_v26 = vmul.f32 %v2401_v42, %v3014_v30  ;;  %v629_v7 = vadd.f32 %v3022_v37, %v594_v52  ;;  %v830_v1 = vadd.f32 %v798_v39, %v763_v54  ;;  %v3452_v39 = vld [vmem:[%s2934_s28 + $0x180] sm:$0xff] }
  0x59   : > { %991 = vst [vmem:[%s3103_s24 + $0x58] sm:$0xff] %v959_v19  ;;  %v697_v2 = vmul.f32 %v3026_v41, %v199_v34  ;;  %v732_v5 = vmul.f32 %v2369_v40, %v3030_v44  ;;  %v928_v14 = vadd.f32 %v896_v23, %v660_v46  ;;  %v528_v18 = vadd.f32 %v496_v60, %v461_v58  ;;  %v2371_v16 = vld [vmem:[%s5410_s1 + $0x180] sm:$0xff] }
  0x5a   : > { %2631 = vrcp.f32 %v394_v59  ;;  %v799_v17 = vmul.f32 %v2401_v42, %v3035_v49  ;;  %v661_v55 = vmul.f32 %v629_v7, %v3360_v24  ;;  %v865_v25 = vadd.f32 %v3041_v53, %v830_v1  ;;  %v2403_v58 = vld [vmem:[%s5410_s1 + $0x280] sm:$0xff] }
  0x5b   : > { %v764_v47 = vadd.f32 %v732_v5, %v697_v2  ;;  %v363_v56 = vadd.f32 %v3421_v62, %v3418_v61  ;;  %v3441_v6 = vpop.eup %2629  ;;  %v960_v45 = vmul.f32 %v3410_v43, %v928_v14  ;;  %v595_v48 = vadd.f32 %v563_v26, %v528_v18 }
  0x5c   : > { %v462_v32 = vmul.f32 %v2964_v9, %v200_v27  ;;  %v497_v33 = vmul.f32 %v2370_v13, %v3000_v22  ;;  %v897_v34 = vmul.f32 %v3363_v12, %v865_v25  ;;  %v564_v24 = vmul.f32 %v2402_v4, %v3014_v30  ;;  %v201_v12 = vld [vmem:[%s5410_s1 + $0x80] sm:$0xff] }
  0x5d   : > { %v831_v10 = vadd.f32 %v799_v17, %v764_v47  ;;  %v395_v11 = vmax.f32 %v363_v56, 0.001  ;;  %992 = vst [vmem:[%s3103_s24 + $0x60] sm:$0xff] %v960_v45  ;;  %v630_v40 = vadd.f32 %v3022_v37, %v595_v48  ;;  %v698_v46 = vmul.f32 %v3026_v41, %v200_v27  ;;  %v202_v56 = vld [vmem:[%s5410_s1 + $0x88] sm:$0xff] }
  0x5e   : > { %v529_v42 = vadd.f32 %v497_v33, %v462_v32  ;;  %v733_v50 = vmul.f32 %v2370_v13, %v3030_v44  ;;  %v929_v19 = vadd.f32 %v897_v34, %v661_v55  ;;  %v800_v54 = vmul.f32 %v2402_v4, %v3035_v49  ;;  %v3484_v4 = vld [vmem:[%s2934_s28 + $0x188] sm:$0xff] }
  0x5f   : > { %v866_v52 = vadd.f32 %v3041_v53, %v831_v10  ;;  %2633 = vrcp.f32 %v395_v11  ;;  %v662_v59 = vmul.f32 %v630_v40, %v3387_v29  ;;  %v364_v7 = vadd.f32 %v3452_v39, %v3449_v36  ;;  %v3481_v29 = vld [vmem:[%s2934_s28 + $0x88] sm:$0xff] }
  0x60   : > { %v3469_v23 = vpop.eup %2631  ;;  %v596_v60 = vadd.f32 %v564_v24, %v529_v42  ;;  %v765_v26 = vadd.f32 %v733_v50, %v698_v46  ;;  %v961_v1 = vmul.f32 %v3441_v6, %v929_v19  ;;  %v463_v5 = vmul.f32 %v2964_v9, %v201_v12  ;;  %v2372_v45 = vld [vmem:[%s5410_s1 + $0x188] sm:$0xff]  ;;  %v3514_v19 = vld [vmem:[%s2934_s28 + $0x190] sm:$0xff] }
  0x61   : > { %v898_v2 = vmul.f32 %v3390_v31, %v866_v52  ;;  %v498_v27 = vmul.f32 %v2371_v16, %v3000_v22  ;;  %v396_v18 = vmax.f32 %v364_v7, 0.001  ;;  %v565_v17 = vmul.f32 %v2403_v58, %v3014_v30  ;;  %v2404_v48 = vld [vmem:[%s5410_s1 + $0x288] sm:$0xff] }
  0x62   : > { %v631_v13 = vadd.f32 %v3022_v37, %v596_v60  ;;  %v832_v14 = vadd.f32 %v800_v54, %v765_v26  ;;  %993 = vst [vmem:[%s3103_s24 + $0x68] sm:$0xff] %v961_v1  ;;  %v699_v47 = vmul.f32 %v3026_v41, %v201_v12  ;;  %v734_v31 = vmul.f32 %v2371_v16, %v3030_v44  ;;  %v3511_v16 = vld [vmem:[%s2934_s28 + $0x90] sm:$0xff] }
  0x63   : > { %v930_v55 = vadd.f32 %v898_v2, %v662_v59  ;;  %v530_v25 = vadd.f32 %v498_v27, %v463_v5  ;;  %2635 = vrcp.f32 %v396_v18  ;;  %v801_v34 = vmul.f32 %v2403_v58, %v3035_v49  ;;  %v2373_v2 = vld [vmem:[%s5410_s1 + $0x190] sm:$0xff] }
  0x64   : > { %v663_v32 = vmul.f32 %v631_v13, %v3418_v61  ;;  %v867_v33 = vadd.f32 %v3041_v53, %v832_v14  ;;  %v766_v40 = vadd.f32 %v734_v31, %v699_v47  ;;  %v365_v42 = vadd.f32 %v3484_v4, %v3481_v29  ;;  %v2405_v5 = vld [vmem:[%s5410_s1 + $0x290] sm:$0xff] }
  0x65   : > { %v3501_v10 = vpop.eup %2633  ;;  %v962_v11 = vmul.f32 %v3469_v23, %v930_v55  ;;  %v597_v24 = vadd.f32 %v565_v17, %v530_v25  ;;  %v464_v50 = vmul.f32 %v2964_v9, %v202_v56  ;;  %v499_v61 = vmul.f32 %v2372_v45, %v3000_v22 }
  0x66   : > { %v899_v46 = vmul.f32 %v3421_v62, %v867_v33  ;;  %v566_v12 = vmul.f32 %v2404_v48, %v3014_v30  ;;  %v833_v54 = vadd.f32 %v801_v34, %v766_v40  ;;  %v397_v58 = vmax.f32 %v365_v42, 0.001  ;;  %v203_v62 = vld [vmem:[%s5410_s1 + $0x90] sm:$0xff]  ;;  %v2374_v40 = vld [vmem:[%s5410_s1 + $0x198] sm:$0xff] }
  0x67   : > { %994 = vst [vmem:[%s3103_s24 + $0x70] sm:$0xff] %v962_v11  ;;  %v632_v52 = vadd.f32 %v3022_v37, %v597_v24  ;;  %v700_v59 = vmul.f32 %v3026_v41, %v202_v56  ;;  %v531_v26 = vadd.f32 %v499_v61, %v464_v50  ;;  %v735_v7 = vmul.f32 %v2372_v45, %v3030_v44  ;;  %v2406_v61 = vld [vmem:[%s5410_s1 + $0x298] sm:$0xff] }
  0x68   : > { %v931_v60 = vadd.f32 %v899_v46, %v663_v32  ;;  %v802_v1 = vmul.f32 %v2404_v48, %v3035_v49  ;;  %v868_v13 = vadd.f32 %v3041_v53, %v833_v54  ;;  %2637 = vrcp.f32 %v397_v58  ;;  %v3542_v48 = vld [vmem:[%s2934_s28 + $0x98] sm:$0xff] }
  0x69   : > { %v664_v27 = vmul.f32 %v632_v52, %v3449_v36  ;;  %v366_v14 = vadd.f32 %v3514_v19, %v3511_v16  ;;  %v3534_v18 = vpop.eup %2635  ;;  %v598_v55 = vadd.f32 %v566_v12, %v531_v26  ;;  %v767_v25 = vadd.f32 %v735_v7, %v700_v59  ;;  %v3545_v32 = vld [vmem:[%s2934_s28 + $0x198] sm:$0xff] }
  0x6a   : > { %v963_v17 = vmul.f32 %v3501_v10, %v931_v60  ;;  %v465_v47 = vmul.f32 %v2964_v9, %v203_v62  ;;  %v900_v31 = vmul.f32 %v3452_v39, %v868_v13  ;;  %v500_v45 = vmul.f32 %v2373_v2, %v3000_v22  ;;  %v204_v39 = vld [vmem:[%s5410_s1 + $0x98] sm:$0xff]  ;;  %v3576_v13 = vld [vmem:[%s2934_s28 + $0x1a0] sm:$0xff] }
  0x6b   : > { %v398_v56 = vmax.f32 %v366_v14, 0.001  ;;  %v567_v36 = vmul.f32 %v2405_v5, %v3014_v30  ;;  %v633_v33 = vadd.f32 %v3022_v37, %v598_v55  ;;  %v834_v34 = vadd.f32 %v802_v1, %v767_v25 }
  0x6c   : > { %995 = vst [vmem:[%s3103_s24 + $0x78] sm:$0xff] %v963_v17  ;;  %v701_v11 = vmul.f32 %v3026_v41, %v203_v62  ;;  %v736_v24 = vmul.f32 %v2373_v2, %v3030_v44  ;;  %v932_v42 = vadd.f32 %v900_v31, %v664_v27  ;;  %v532_v46 = vadd.f32 %v500_v45, %v465_v47  ;;  %v3573_v27 = vld [vmem:[%s2934_s28 + $0xa0] sm:$0xff] }
  0x6d   : > { %2639 = vrcp.f32 %v398_v56  ;;  %v803_v50 = vmul.f32 %v2405_v5, %v3035_v49  ;;  %v665_v12 = vmul.f32 %v633_v33, %v3481_v29  ;;  %v869_v52 = vadd.f32 %v3041_v53, %v834_v34  ;;  %v2375_v47 = vld [vmem:[%s5410_s1 + $0x1a0] sm:$0xff] }
  0x6e   : > { %v768_v54 = vadd.f32 %v736_v24, %v701_v11  ;;  %v367_v58 = vadd.f32 %v3545_v32, %v3542_v48  ;;  %v3565_v59 = vpop.eup %2637  ;;  %v964_v62 = vmul.f32 %v3534_v18, %v932_v42  ;;  %v599_v60 = vadd.f32 %v567_v36, %v532_v46  ;;  %v2407_v36 = vld [vmem:[%s5410_s1 + $0x2a0] sm:$0xff] }
  0x6f   : > { %v466_v26 = vmul.f32 %v2964_v9, %v204_v39  ;;  %v501_v7 = vmul.f32 %v2374_v40, %v3000_v22  ;;  %v901_v1 = vmul.f32 %v3484_v4, %v869_v52  ;;  %v568_v29 = vmul.f32 %v2406_v61, %v3014_v30  ;;  %v205_v4 = vld [vmem:[%s5410_s1 + $0xa0] sm:$0xff] }
  0x70   : > { %v835_v2 = vadd.f32 %v803_v50, %v768_v54  ;;  %v399_v5 = vmax.f32 %v367_v58, 0.001  ;;  %996 = vst [vmem:[%s3103_s24 + $0x80] sm:$0xff] %v964_v62  ;;  %v634_v14 = vadd.f32 %v3022_v37, %v599_v60  ;;  %v702_v55 = vmul.f32 %v3026_v41, %v204_v39  ;;  %v3608_v58 = vld [vmem:[%s2934_s28 + $0x1a8] sm:$0xff] }
  0x71   : > { %v533_v17 = vadd.f32 %v501_v7, %v466_v26  ;;  %v737_v25 = vmul.f32 %v2374_v40, %v3030_v44  ;;  %v933_v31 = vadd.f32 %v901_v1, %v665_v12  ;;  %v804_v45 = vmul.f32 %v2406_v61, %v3035_v49  ;;  %v206_v7 = vld [vmem:[%s5410_s1 + $0xa8] sm:$0xff] }
  0x72   : > { %v870_v56 = vadd.f32 %v3041_v53, %v835_v2  ;;  %2641 = vrcp.f32 %v399_v5  ;;  %v666_v34 = vmul.f32 %v634_v14, %v3511_v16  ;;  %v368_v39 = vadd.f32 %v3576_v13, %v3573_v27  ;;  %v3605_v16 = vld [vmem:[%s2934_s28 + $0xa8] sm:$0xff] }
  0x73   : > { %v3593_v33 = vpop.eup %2639  ;;  %v600_v11 = vadd.f32 %v568_v29, %v533_v17  ;;  %v769_v24 = vadd.f32 %v737_v25, %v702_v55  ;;  %v965_v40 = vmul.f32 %v3565_v59, %v933_v31  ;;  %v467_v46 = vmul.f32 %v2964_v9, %v205_v4  ;;  %v2376_v1 = vld [vmem:[%s5410_s1 + $0x1a8] sm:$0xff] }
  0x74   : > { %v902_v42 = vmul.f32 %v3514_v19, %v870_v56  ;;  %v502_v50 = vmul.f32 %v2375_v47, %v3000_v22  ;;  %v400_v52 = vmax.f32 %v368_v39, 0.001  ;;  %v569_v54 = vmul.f32 %v2407_v36, %v3014_v30  ;;  %v2408_v2 = vld [vmem:[%s5410_s1 + $0x2a8] sm:$0xff] }
  0x75   : > { %v635_v61 = vadd.f32 %v3022_v37, %v600_v11  ;;  %v836_v12 = vadd.f32 %v804_v45, %v769_v24  ;;  %997 = vst [vmem:[%s3103_s24 + $0x88] sm:$0xff] %v965_v40  ;;  %v703_v26 = vmul.f32 %v3026_v41, %v205_v4  ;;  %v738_v19 = vmul.f32 %v2375_v47, %v3030_v44 }
  0x76   : > { %v934_v62 = vadd.f32 %v902_v42, %v666_v34  ;;  %v534_v60 = vadd.f32 %v502_v50, %v467_v46  ;;  %2643 = vrcp.f32 %v400_v52  ;;  %v805_v14 = vmul.f32 %v2407_v36, %v3035_v49  ;;  %v3635_v34 = vld [vmem:[%s2934_s28 + $0xb0] sm:$0xff] }
  0x77   : > { %v667_v5 = vmul.f32 %v635_v61, %v3542_v48  ;;  %v871_v29 = vadd.f32 %v3041_v53, %v836_v12  ;;  %v770_v4 = vadd.f32 %v738_v19, %v703_v26  ;;  %v369_v47 = vadd.f32 %v3608_v58, %v3605_v16  ;;  %v3638_v36 = vld [vmem:[%s2934_s28 + $0x1b0] sm:$0xff] }
  0x78   : > { %v3625_v17 = vpop.eup %2641  ;;  %v966_v55 = vmul.f32 %v3593_v33, %v934_v62  ;;  %v601_v25 = vadd.f32 %v569_v54, %v534_v60  ;;  %v468_v56 = vmul.f32 %v2964_v9, %v206_v7  ;;  %v503_v48 = vmul.f32 %v2376_v1, %v3000_v22  ;;  %v2377_v12 = vld [vmem:[%s5410_s1 + $0x1b0] sm:$0xff] }
  0x79   : > { %v903_v31 = vmul.f32 %v3545_v32, %v871_v29  ;;  %v570_v45 = vmul.f32 %v2408_v2, %v3014_v30  ;;  %v837_v24 = vadd.f32 %v805_v14, %v770_v4  ;;  %v401_v39 = vmax.f32 %v369_v47, 0.001  ;;  %v207_v32 = vld [vmem:[%s5410_s1 + $0xb0] sm:$0xff] }
  0x7a   : > { %998 = vst [vmem:[%s3103_s24 + $0x90] sm:$0xff] %v966_v55  ;;  %v636_v11 = vadd.f32 %v3022_v37, %v601_v25  ;;  %v704_v40 = vmul.f32 %v3026_v41, %v206_v7  ;;  %v535_v46 = vadd.f32 %v503_v48, %v468_v56  ;;  %v739_v50 = vmul.f32 %v2376_v1, %v3030_v44  ;;  %v2409_v52 = vld [vmem:[%s5410_s1 + $0x2b0] sm:$0xff]  ;;  %v3666_v55 = vld [vmem:[%s2934_s28 + $0xb8] sm:$0xff] }
  0x7b   : > { %v935_v42 = vadd.f32 %v903_v31, %v667_v5  ;;  %v806_v61 = vmul.f32 %v2408_v2, %v3035_v49  ;;  %v872_v62 = vadd.f32 %v3041_v53, %v837_v24  ;;  %2645 = vrcp.f32 %v401_v39  ;;  %v3669_v25 = vld [vmem:[%s2934_s28 + $0x1b8] sm:$0xff] }
  0x7c   : > { %v668_v54 = vmul.f32 %v636_v11, %v3573_v27  ;;  %v370_v60 = vadd.f32 %v3638_v36, %v3635_v34  ;;  %v3658_v26 = vpop.eup %2643  ;;  %v602_v7 = vadd.f32 %v570_v45, %v535_v46  ;;  %v771_v1 = vadd.f32 %v739_v50, %v704_v40  ;;  %v2378_v48 = vld [vmem:[%s5410_s1 + $0x1b8] sm:$0xff] }
  0x7d   : > { %v967_v19 = vmul.f32 %v3625_v17, %v935_v42  ;;  %v469_v2 = vmul.f32 %v2964_v9, %v207_v32  ;;  %v904_v5 = vmul.f32 %v3576_v13, %v872_v62  ;;  %v504_v14 = vmul.f32 %v2377_v12, %v3000_v22  ;;  %v208_v13 = vld [vmem:[%s5410_s1 + $0xb8] sm:$0xff] }
  0x7e   : > { %v402_v29 = vmax.f32 %v370_v60, 0.001  ;;  %v571_v27 = vmul.f32 %v2409_v52, %v3014_v30  ;;  %v637_v4 = vadd.f32 %v3022_v37, %v602_v7  ;;  %v838_v47 = vadd.f32 %v806_v61, %v771_v1  ;;  %v2410_v39 = vld [vmem:[%s5410_s1 + $0x2b8] sm:$0xff]  ;;  %v3697_v7 = vld [vmem:[%s2934_s28 + $0xc0] sm:$0xff] }
  0x7f   : > { %999 = vst [vmem:[%s3103_s24 + $0x98] sm:$0xff] %v967_v19  ;;  %v705_v31 = vmul.f32 %v3026_v41, %v207_v32  ;;  %v740_v56 = vmul.f32 %v2377_v12, %v3030_v44  ;;  %v936_v45 = vadd.f32 %v904_v5, %v668_v54  ;;  %v536_v11 = vadd.f32 %v504_v14, %v469_v2  ;;  %v3700_v1 = vld [vmem:[%s2934_s28 + $0x1c0] sm:$0xff] }
  0x80   : > { %2647 = vrcp.f32 %v402_v29  ;;  %v807_v24 = vmul.f32 %v2409_v52, %v3035_v49  ;;  %v669_v40 = vmul.f32 %v637_v4, %v3605_v16  ;;  %v873_v32 = vadd.f32 %v3041_v53, %v838_v47 }
  0x81   : > { %v772_v42 = vadd.f32 %v740_v56, %v705_v31  ;;  %v371_v46 = vadd.f32 %v3669_v25, %v3666_v55  ;;  %v3689_v50 = vpop.eup %2645  ;;  %v968_v61 = vmul.f32 %v3658_v26, %v936_v45  ;;  %v603_v12 = vadd.f32 %v571_v27, %v536_v11  ;;  %v2379_v27 = vld [vmem:[%s5410_s1 + $0x1c0] sm:$0xff] }
  0x82   : > { %v470_v52 = vmul.f32 %v2964_v9, %v208_v13  ;;  %v505_v54 = vmul.f32 %v2378_v48, %v3000_v22  ;;  %v905_v62 = vmul.f32 %v3608_v58, %v873_v32  ;;  %v572_v16 = vmul.f32 %v2410_v39, %v3014_v30  ;;  %v209_v58 = vld [vmem:[%s5410_s1 + $0xc0] sm:$0xff] }
  0x83   : > { %v839_v60 = vadd.f32 %v807_v24, %v772_v42  ;;  %v403_v19 = vmax.f32 %v371_v46, 0.001  ;;  %1000 = vst [vmem:[%s3103_s24 + $0xa0] sm:$0xff] %v968_v61  ;;  %v638_v2 = vadd.f32 %v3022_v37, %v603_v12  ;;  %v706_v29 = vmul.f32 %v3026_v41, %v208_v13  ;;  %v2411_v56 = vld [vmem:[%s5410_s1 + $0x2c0] sm:$0xff] }
  0x84   : > { %v537_v5 = vadd.f32 %v505_v54, %v470_v52  ;;  %v741_v14 = vmul.f32 %v2378_v48, %v3030_v44  ;;  %v937_v4 = vadd.f32 %v905_v62, %v669_v40  ;;  %v808_v31 = vmul.f32 %v2410_v39, %v3035_v49  ;;  %v3732_v54 = vld [vmem:[%s2934_s28 + $0x1c8] sm:$0xff] }
  0x85   : > { %v874_v47 = vadd.f32 %v3041_v53, %v839_v60  ;;  %2649 = vrcp.f32 %v403_v19  ;;  %v670_v48 = vmul.f32 %v638_v2, %v3635_v34  ;;  %v372_v24 = vadd.f32 %v3700_v1, %v3697_v7  ;;  %v3729_v34 = vld [vmem:[%s2934_s28 + $0xc8] sm:$0xff] }
  0x86   : > { %v3717_v13 = vpop.eup %2647  ;;  %v604_v45 = vadd.f32 %v572_v16, %v537_v5  ;;  %v773_v11 = vadd.f32 %v741_v14, %v706_v29  ;;  %v969_v40 = vmul.f32 %v3689_v50, %v937_v4  ;;  %v471_v39 = vmul.f32 %v2964_v9, %v209_v58  ;;  %v210_v16 = vld [vmem:[%s5410_s1 + $0xc8] sm:$0xff] }
  0x87   : > { %v906_v32 = vmul.f32 %v3638_v36, %v874_v47  ;;  %v506_v42 = vmul.f32 %v2379_v27, %v3000_v22  ;;  %v404_v12 = vmax.f32 %v372_v24, 0.001  ;;  %v573_v52 = vmul.f32 %v2411_v56, %v3014_v30  ;;  %v2380_v2 = vld [vmem:[%s5410_s1 + $0x1c8] sm:$0xff] }
  0x88   : > { %v639_v46 = vadd.f32 %v3022_v37, %v604_v45  ;;  %v840_v61 = vadd.f32 %v808_v31, %v773_v11  ;;  %1001 = vst [vmem:[%s3103_s24 + $0xa8] sm:$0xff] %v969_v40  ;;  %v707_v19 = vmul.f32 %v3026_v41, %v209_v58  ;;  %v742_v36 = vmul.f32 %v2379_v27, %v3030_v44  ;;  %v2412_v5 = vld [vmem:[%s5410_s1 + $0x2c8] sm:$0xff]  ;;  %v3759_v40 = vld [vmem:[%s2934_s28 + $0xd0] sm:$0xff] }
  0x89   : > { %v938_v62 = vadd.f32 %v906_v32, %v670_v48  ;;  %v538_v60 = vadd.f32 %v506_v42, %v471_v39  ;;  %2651 = vrcp.f32 %v404_v12  ;;  %v809_v58 = vmul.f32 %v2411_v56, %v3035_v49  ;;  %v3762_v56 = vld [vmem:[%s2934_s28 + $0x1d0] sm:$0xff] }
  0x8a   : > { %v671_v29 = vmul.f32 %v639_v46, %v3666_v55  ;;  %v875_v14 = vadd.f32 %v3041_v53, %v840_v61  ;;  %v774_v31 = vadd.f32 %v742_v36, %v707_v19  ;;  %v373_v48 = vadd.f32 %v3732_v54, %v3729_v34  ;;  %v2413_v19 = vld [vmem:[%s5410_s1 + $0x2d0] sm:$0xff] }
  0x8b   : > { %v3749_v27 = vpop.eup %2649  ;;  %v970_v4 = vmul.f32 %v3717_v13, %v938_v62  ;;  %v605_v47 = vadd.f32 %v573_v52, %v538_v60  ;;  %v472_v11 = vmul.f32 %v2964_v9, %v210_v16  ;;  %v507_v55 = vmul.f32 %v2380_v2, %v3000_v22  ;;  %v2381_v60 = vld [vmem:[%s5410_s1 + $0x1d0] sm:$0xff] }
  0x8c   : > { %v907_v45 = vmul.f32 %v3669_v25, %v875_v14  ;;  %v574_v24 = vmul.f32 %v2412_v5, %v3014_v30  ;;  %v841_v39 = vadd.f32 %v809_v58, %v774_v31  ;;  %v405_v42 = vmax.f32 %v373_v48, 0.001  ;;  %v211_v25 = vld [vmem:[%s5410_s1 + $0xd0] sm:$0xff] }
  0x8d   : > { %1002 = vst [vmem:[%s3103_s24 + $0xb0] sm:$0xff] %v970_v4  ;;  %v640_v32 = vadd.f32 %v3022_v37, %v605_v47  ;;  %v708_v46 = vmul.f32 %v3026_v41, %v210_v16  ;;  %v539_v12 = vadd.f32 %v507_v55, %v472_v11  ;;  %v743_v52 = vmul.f32 %v2380_v2, %v3030_v44  ;;  %v3793_v11 = vld [vmem:[%s2934_s28 + $0x1d8] sm:$0xff] }
  0x8e   : > { %v939_v61 = vadd.f32 %v907_v45, %v671_v29  ;;  %v810_v62 = vmul.f32 %v2412_v5, %v3035_v49  ;;  %v876_v16 = vadd.f32 %v3041_v53, %v841_v39  ;;  %2653 = vrcp.f32 %v405_v42  ;;  %v3790_v45 = vld [vmem:[%s2934_s28 + $0xd8] sm:$0xff] }
  0x8f   : > { %v672_v36 = vmul.f32 %v640_v32, %v3697_v7  ;;  %v374_v2 = vadd.f32 %v3762_v56, %v3759_v40  ;;  %v3782_v5 = vpop.eup %2651  ;;  %v606_v14 = vadd.f32 %v574_v24, %v539_v12  ;;  %v775_v58 = vadd.f32 %v743_v52, %v708_v46  ;;  %v2382_v42 = vld [vmem:[%s5410_s1 + $0x1d8] sm:$0xff] }
  0x90   : > { %v971_v29 = vmul.f32 %v3749_v27, %v939_v61  ;;  %v473_v4 = vmul.f32 %v2964_v9, %v211_v25  ;;  %v908_v47 = vmul.f32 %v3700_v1, %v876_v16  ;;  %v508_v48 = vmul.f32 %v2381_v60, %v3000_v22  ;;  %v212_v1 = vld [vmem:[%s5410_s1 + $0xd8] sm:$0xff] }
  0x91   : > { %v406_v31 = vmax.f32 %v374_v2, 0.001  ;;  %v575_v7 = vmul.f32 %v2413_v19, %v3014_v30  ;;  %v641_v55 = vadd.f32 %v3022_v37, %v606_v14  ;;  %v842_v32 = vadd.f32 %v810_v62, %v775_v58 }
  0x92   : > { %1003 = vst [vmem:[%s3103_s24 + $0xb8] sm:$0xff] %v971_v29  ;;  %v709_v24 = vmul.f32 %v3026_v41, %v211_v25  ;;  %v744_v39 = vmul.f32 %v2381_v60, %v3030_v44  ;;  %v940_v46 = vadd.f32 %v908_v47, %v672_v36  ;;  %v540_v61 = vadd.f32 %v508_v48, %v473_v4  ;;  %v2414_v25 = vld [vmem:[%s5410_s1 + $0x2d8] sm:$0xff]  ;;  %v3824_v48 = vld [vmem:[%s2934_s28 + $0x1e0] sm:$0xff] }
  0x93   : > { %2655 = vrcp.f32 %v406_v31  ;;  %v811_v12 = vmul.f32 %v2413_v19, %v3035_v49  ;;  %v673_v52 = vmul.f32 %v641_v55, %v3729_v34  ;;  %v877_v62 = vadd.f32 %v3041_v53, %v842_v32  ;;  %v3821_v31 = vld [vmem:[%s2934_s28 + $0xe0] sm:$0xff] }
  0x94   : > { %v776_v60 = vadd.f32 %v744_v39, %v709_v24  ;;  %v375_v16 = vadd.f32 %v3793_v11, %v3790_v45  ;;  %v3813_v36 = vpop.eup %2653  ;;  %v972_v2 = vmul.f32 %v3782_v5, %v940_v46  ;;  %v607_v29 = vadd.f32 %v575_v7, %v540_v61  ;;  %v2383_v39 = vld [vmem:[%s5410_s1 + $0x1e0] sm:$0xff] }
  0x95   : > { %v474_v19 = vmul.f32 %v2964_v9, %v212_v1  ;;  %v509_v14 = vmul.f32 %v2382_v42, %v3000_v22  ;;  %v909_v58 = vmul.f32 %v3732_v54, %v877_v62  ;;  %v576_v34 = vmul.f32 %v2414_v25, %v3014_v30  ;;  %v213_v54 = vld [vmem:[%s5410_s1 + $0xe0] sm:$0xff] }
  0x96   : > { %v843_v4 = vadd.f32 %v811_v12, %v776_v60  ;;  %v407_v47 = vmax.f32 %v375_v16, 0.001  ;;  %1004 = vst [vmem:[%s3103_s24 + $0xc0] sm:$0xff] %v972_v2  ;;  %v642_v55 = vadd.f32 %v3022_v37, %v607_v29  ;;  %v710_v7 = vmul.f32 %v3026_v41, %v212_v1  ;;  %v2415_v1 = vld [vmem:[%s5410_s1 + $0x2e0] sm:$0xff] }
  0x97   : > { %v541_v32 = vadd.f32 %v509_v14, %v474_v19  ;;  %v745_v24 = vmul.f32 %v2382_v42, %v3030_v44  ;;  %v941_v46 = vadd.f32 %v909_v58, %v673_v52  ;;  %v812_v12 = vmul.f32 %v2414_v25, %v3035_v49 }
  0x98   : > { %v878_v61 = vadd.f32 %v3041_v53, %v843_v4  ;;  %2657 = vrcp.f32 %v407_v47  ;;  %v674_v62 = vmul.f32 %v642_v55, %v3759_v40  ;;  %v376_v52 = vadd.f32 %v3824_v48, %v3821_v31  ;;  %v3853_v40 = vld [vmem:[%s2934_s28 + $0xe8] sm:$0xff] }
  0x99   : > { %v3841_v42 = vpop.eup %2655  ;;  %v608_v60 = vadd.f32 %v576_v34, %v541_v32  ;;  %v777_v16 = vadd.f32 %v745_v24, %v710_v7  ;;  %v973_v2 = vmul.f32 %v3813_v36, %v941_v46  ;;  %v475_v25 = vmul.f32 %v2964_v9, %v213_v54  ;;  %v3856_v34 = vld [vmem:[%s2934_s28 + $0x1e8] sm:$0xff] }
  0x9a   : > { %v910_v29 = vmul.f32 %v3762_v56, %v878_v61  ;;  %v510_v19 = vmul.f32 %v2383_v39, %v3000_v22  ;;  %v408_v4 = vmax.f32 %v376_v52, 0.001  ;;  %v577_v47 = vmul.f32 %v2415_v1, %v3014_v30  ;;  %v214_v24 = vld [vmem:[%s5410_s1 + $0xe8] sm:$0xff] }
  0x9b   : > { %v643_v14 = vadd.f32 %v3022_v37, %v608_v60  ;;  %v844_v58 = vadd.f32 %v812_v12, %v777_v16  ;;  %1005 = vst [vmem:[%s3103_s24 + $0xc8] sm:$0xff] %v973_v2  ;;  %v711_v7 = vmul.f32 %v3026_v41, %v213_v54  ;;  %v746_v56 = vmul.f32 %v2383_v39, %v3030_v44  ;;  %v2384_v46 = vld [vmem:[%s5410_s1 + $0x1e8] sm:$0xff] }
  0x9c   : > { %v942_v55 = vadd.f32 %v910_v29, %v674_v62  ;;  %v542_v32 = vadd.f32 %v510_v19, %v475_v25  ;;  %v2416_v61 = vld [vmem:[%s5410_s1 + $0x2e8] sm:$0xff]  ;;  %2659 = vrcp.f32 %v408_v4  ;;  %v813_v39 = vmul.f32 %v2415_v1, %v3035_v49  ;;  %v3886_v1 = vld [vmem:[%s2934_s28 + $0x1f0] sm:$0xff] }
  0x9d   : > { %v675_v12 = vmul.f32 %v643_v14, %v3790_v45  ;;  %v879_v54 = vadd.f32 %v3041_v53, %v844_v58  ;;  %v778_v52 = vadd.f32 %v746_v56, %v711_v7  ;;  %v377_v2 = vadd.f32 %v3856_v34, %v3853_v40  ;;  %v3883_v14 = vld [vmem:[%s2934_s28 + $0xf0] sm:$0xff] }
  0x9e   : > { %v3873_v62 = vpop.eup %2657  ;;  %v974_v60 = vmul.f32 %v3841_v42, %v942_v55  ;;  %v609_v16 = vadd.f32 %v577_v47, %v542_v32  ;;  %v476_v45 = vmul.f32 %v2964_v9, %v214_v24  ;;  %v511_v25 = vmul.f32 %v2384_v46, %v3000_v22  ;;  %v215_v55 = vld [vmem:[%s5410_s1 + $0xf0] sm:$0xff] }
  0x9f   : > { %v911_v29 = vmul.f32 %v3793_v11, %v879_v54  ;;  %v578_v19 = vmul.f32 %v2416_v61, %v3014_v30  ;;  %v845_v4 = vadd.f32 %v813_v39, %v778_v52  ;;  %v409_v47 = vmax.f32 %v377_v2, 0.001  ;;  %v2385_v39 = vld [vmem:[%s5410_s1 + $0x1f0] sm:$0xff] }
  0xa0   : > { %1006 = vst [vmem:[%s3103_s24 + $0xd0] sm:$0xff] %v974_v60  ;;  %v644_v58 = vadd.f32 %v3022_v37, %v609_v16  ;;  %v712_v11 = vmul.f32 %v3026_v41, %v214_v24  ;;  %v543_v7 = vadd.f32 %v511_v25, %v476_v45  ;;  %v747_v56 = vmul.f32 %v2384_v46, %v3030_v44  ;;  %v2417_v24 = vld [vmem:[%s5410_s1 + $0x2f0] sm:$0xff] }
  0xa1   : > { %v943_v32 = vadd.f32 %v911_v29, %v675_v12  ;;  %v814_v54 = vmul.f32 %v2416_v61, %v3035_v49  ;;  %v880_v16 = vadd.f32 %v3041_v53, %v845_v4  ;;  %2661 = vrcp.f32 %v409_v47  ;;  %v3923_v4 = vld [vmem:[%s2934_s28 + $0xf8] sm:$0xff] }
  0xa2   : > { %v676_v60 = vmul.f32 %v644_v58, %v3821_v31  ;;  %v378_v46 = vadd.f32 %v3886_v1, %v3883_v14  ;;  %v3912_v61 = vpop.eup %2659  ;;  %v610_v52 = vadd.f32 %v578_v19, %v543_v7  ;;  %v779_v2 = vadd.f32 %v747_v56, %v712_v11  ;;  %v3926_v47 = vld [vmem:[%s2934_s28 + $0x1f8] sm:$0xff] }
  0xa3   : > { %5421 = vst [vmem:[#allocation5_spill] sm:$0xff] %v3912_v61  ;;  %v975_v12 = vmul.f32 %v3873_v62, %v943_v32  ;;  %v477_v31 = vmul.f32 %v2964_v9, %v215_v55  ;;  %v912_v29 = vmul.f32 %v3824_v48, %v880_v16  ;;  %v512_v25 = vmul.f32 %v2385_v39, %v3000_v22  ;;  %v216_v7 = vld [vmem:[%s5410_s1 + $0xf8] sm:$0xff] }
  0xa4   : > { %v410_v45 = vmax.f32 %v378_v46, 0.001  ;;  %v579_v58 = vmul.f32 %v2417_v24, %v3014_v30  ;;  %v645_v19 = vadd.f32 %v3022_v37, %v610_v52  ;;  %v846_v11 = vadd.f32 %v814_v54, %v779_v2  ;;  %v2386_v56 = vld [vmem:[%s5410_s1 + $0x1f8] sm:$0xff] }
  0xa5   : > { %1007 = vst [vmem:[%s3103_s24 + $0xd8] sm:$0xff] %v975_v12  ;;  %v713_v48 = vmul.f32 %v3026_v41, %v215_v55  ;;  %v748_v32 = vmul.f32 %v2385_v39, %v3030_v44  ;;  %v944_v16 = vadd.f32 %v912_v29, %v676_v60  ;;  %v544_v46 = vadd.f32 %v512_v25, %v477_v31  ;;  %v2418_v55 = vld [vmem:[%s5410_s1 + $0x2f8] sm:$0xff] }
  0xa6   : > { %2663 = vrcp.f32 %v410_v45  ;;  %v815_v54 = vmul.f32 %v2417_v24, %v3035_v49  ;;  %v677_v39 = vmul.f32 %v645_v19, %v3853_v40  ;;  %v881_v12 = vadd.f32 %v3041_v53, %v846_v11 }
  0xa7   : > { %v780_v52 = vadd.f32 %v748_v32, %v713_v48  ;;  %v379_v60 = vadd.f32 %v3926_v47, %v3923_v4  ;;  %v3957_v2 = vpop.eup %2661  ;;  %v976_v24 = vmul.f32 %v3912_v61, %v944_v16  ;;  %v611_v31 = vadd.f32 %v579_v58, %v544_v46 }
  0xa8   : > { %5422 = vst [vmem:[#allocation6_spill] sm:$0xff] %v3957_v2  ;;  %v478_v29 = vmul.f32 %v2964_v9, %v216_v7  ;;  %v513_v45 = vmul.f32 %v2386_v56, %v3000_v22  ;;  %v913_v40 = vmul.f32 %v3856_v34, %v881_v12  ;;  %v580_v11 = vmul.f32 %v2418_v55, %v3014_v30 }
  0xa9   : > { %v847_v25 = vadd.f32 %v815_v54, %v780_v52  ;;  %v411_v19 = vmax.f32 %v379_v60, 0.001  ;;  %1008 = vst [vmem:[%s3103_s24 + $0xe0] sm:$0xff] %v976_v24  ;;  %v646_v48 = vadd.f32 %v3022_v37, %v611_v31  ;;  %v714_v9 = vmul.f32 %v3026_v41, %v216_v7  ;;  %v2667_v7 = vld [vmem:[%s5410_s1] sm:$0xff] }
  0xaa   : > { %v545_v32 = vadd.f32 %v513_v45, %v478_v29  ;;  %v749_v22 = vmul.f32 %v2386_v56, %v3030_v44  ;;  %v945_v58 = vadd.f32 %v913_v40, %v677_v39  ;;  %v816_v34 = vmul.f32 %v2418_v55, %v3035_v49  ;;  %v2668_v39 = vld [vmem:[%s5410_s1 + $0x100] sm:$0xff] }
  0xab   : > { %v882_v16 = vadd.f32 %v3041_v53, %v847_v25  ;;  %2665 = vrcp.f32 %v411_v19  ;;  %v678_v46 = vmul.f32 %v646_v48, %v3883_v14  ;;  %v3978_v52 = vstv %s3909_s13  ;;  %v2669_v31 = vld [vmem:[%s5410_s1 + $0x200] sm:$0xff]  ;;  %s1948_s13 = sadd.s32 21, %s2918_s18 }
  0xac   : > { %v3974_v30 = vpop.eup %2663  ;;  %v612_v54 = vadd.f32 %v580_v11, %v545_v32  ;;  %v781_v12 = vadd.f32 %v749_v22, %v714_v9  ;;  %v977_v41 = vmul.f32 %v3957_v2, %v945_v58  ;;  %v1015_v49 = vmul.f32 %v2667_v7, %v3978_v52  ;;  %s4666_s6 = sld [smem:[#allocation2 + %s1948_s13]] }
  0xad   : > { %5423 = vst [vmem:[#allocation7_spill] sm:$0xff] %v3974_v30  ;;  %v914_v44 = vmul.f32 %v3886_v1, %v882_v16  ;;  %v3987_v56 = vstv %s3916_s25  ;;  %v3995_v1 = vstv %s3941_s4  ;;  %v4003_v29 = vstv %s3955_s14  ;;  %s2082_s4 = sadd.s32 23, %s2918_s18 }
  0xae   : > { %v647_v14 = vadd.f32 %v3022_v37, %v612_v54  ;;  %v848_v55 = vadd.f32 %v816_v34, %v781_v12  ;;  %v1050_v60 = vmul.f32 %v2668_v39, %v3987_v56  ;;  %1009 = vst [vmem:[%s3103_s24 + $0xe8] sm:$0xff] %v977_v41  ;;  %v1117_v37 = vmul.f32 %v2669_v31, %v3995_v1  ;;  %v2670_v54 = vld [vmem:[%s5410_s1 + $0x8] sm:$0xff]  ;;  %s4691_s17 = sld [smem:[#allocation2 + %s2082_s4]] }
  0xaf   : > { %v946_v24 = vadd.f32 %v914_v44, %v678_v46  ;;  %v4006_v45 = vstv %s3929_s29  ;;  %v4015_v9 = vstv %s3948_s10  ;;  %v4018_v22 = vstv %s3962_s15  ;;  %v1216_v46 = vld [vmem:[%s2934_s28] sm:$0xff]  ;;  %s1680_s10 = sadd.s32 9, %s2918_s18  ;;  %s1913_s15 = sadd.s32 20, %s2918_s18 }
  0xb0   : > { %v679_v40 = vmul.f32 %v647_v14, %v3923_v4  ;;  %v883_v25 = vadd.f32 %v3041_v53, %v848_v55  ;;  %v1082_v19 = vadd.f32 %v1050_v60, %v1015_v49  ;;  %v1283_v11 = vmul.f32 %v2667_v7, %v4006_v45  ;;  %v2671_v41 = vld [vmem:[%s5410_s1 + $0x108] sm:$0xff]  ;;  %s4642_s22 = sld [smem:[#allocation2 + %s1680_s10]] }
  0xb1   : > { %v4011_v48 = vpop.eup %2665  ;;  %v978_v32 = vmul.f32 %v3974_v30, %v946_v24  ;;  %v4021_v58 = vstv %s3966_s16  ;;  %v1318_v4 = vmul.f32 %v2668_v39, %v4015_v9  ;;  %v1385_v53 = vmul.f32 %v2669_v31, %v4018_v22  ;;  %s4632_s16 = sld [smem:[#allocation2 + %s1645_s7]] }
  0xb2   : > { %5424 = vst [vmem:[#allocation8_spill] sm:$0xff] %v4011_v48  ;;  %v915_v16 = vmul.f32 %v3926_v47, %v883_v25  ;;  %v1149_v34 = vadd.f32 %v1117_v37, %v1082_v19  ;;  %v1016_v12 = vmul.f32 %v2670_v54, %v3978_v52  ;;  %v1051_v44 = vmul.f32 %v2671_v41, %v3987_v56  ;;  %v2672_v47 = vld [vmem:[%s5410_s1 + $0x208] sm:$0xff]  ;;  %v2673_v37 = vld [vmem:[%s5410_s1 + $0x10] sm:$0xff]  ;;  %s4652_s27 = sld [smem:[#allocation2 + %s1913_s15]] }
  0xb3   : > { %1010 = vst [vmem:[%s3103_s24 + $0xf0] sm:$0xff] %v978_v32  ;;  %v1118_v7 = vmul.f32 %v2672_v47, %v3995_v1  ;;  %v1284_v49 = vmul.f32 %v2670_v54, %v4006_v45  ;;  %v1350_v39 = vadd.f32 %v1318_v4, %v1283_v11  ;;  %v1319_v60 = vmul.f32 %v2671_v41, %v4015_v9  ;;  %v2452_v4 = vld [vmem:[%s2934_s28 + $0x100] sm:$0xff]  ;;  %v2675_v41 = vld [vmem:[%s5410_s1 + $0x210] sm:$0xff] }
  0xb4   : > { %v947_v14 = vadd.f32 %v915_v16, %v679_v40  ;;  %v1184_v55 = vadd.f32 %v4003_v29, %v1149_v34  ;;  %v1083_v24 = vadd.f32 %v1051_v44, %v1016_v12  ;;  %v1386_v31 = vmul.f32 %v2672_v47, %v4018_v22  ;;  %v2674_v40 = vld [vmem:[%s5410_s1 + $0x110] sm:$0xff] }
  0xb5   : > { %v1017_v25 = vmul.f32 %v2673_v37, %v3978_v52  ;;  %v1052_v19 = vmul.f32 %v2674_v40, %v3987_v56  ;;  %v1417_v16 = vadd.f32 %v1385_v53, %v1350_v39  ;;  %v1351_v34 = vadd.f32 %v1319_v60, %v1284_v49  ;;  %v2676_v60 = vld [vmem:[%s5410_s1 + $0x18] sm:$0xff] }
  0xb6   : > { %v979_v11 = vmul.f32 %v4011_v48, %v947_v14  ;;  %v1248_v32 = vmul.f32 %v1216_v46, %v1184_v55  ;;  %v1150_v54 = vadd.f32 %v1118_v7, %v1083_v24  ;;  %v1119_v44 = vmul.f32 %v2675_v41, %v3995_v1  ;;  %v1217_v14 = vld [vmem:[%s2934_s28 + $0x8] sm:$0xff] }
  0xb7   : > { %v1084_v12 = vadd.f32 %v1052_v19, %v1017_v25  ;;  %v1285_v47 = vmul.f32 %v2673_v37, %v4006_v45  ;;  %v1452_v30 = vadd.f32 %v4021_v58, %v1417_v16  ;;  %v1418_v46 = vadd.f32 %v1386_v31, %v1351_v34  ;;  %v2453_v55 = vld [vmem:[%s2934_s28 + $0x108] sm:$0xff]  ;;  %v2677_v37 = vld [vmem:[%s5410_s1 + $0x118] sm:$0xff]  ;;  %v1218_v19 = vld [vmem:[%s2934_s28 + $0x10] sm:$0xff] }
  0xb8   : > { %1011 = vst [vmem:[%s3103_s24 + $0xf8] sm:$0xff] %v979_v11  ;;  %v1320_v53 = vmul.f32 %v2674_v40, %v4015_v9  ;;  %v1387_v49 = vmul.f32 %v2675_v41, %v4018_v22  ;;  %v1185_v7 = vadd.f32 %v4003_v29, %v1150_v54  ;;  %v1018_v24 = vmul.f32 %v2676_v60, %v3978_v52  ;;  %v2678_v16 = vld [vmem:[%s5410_s1 + $0x218] sm:$0xff] }
  0xb9   : > { %v1151_v39 = vadd.f32 %v1119_v44, %v1084_v12  ;;  %v1053_v31 = vmul.f32 %v2677_v37, %v3987_v56  ;;  %v1516_v25 = vmul.f32 %v2452_v4, %v1452_v30  ;;  %v1453_v40 = vadd.f32 %v4021_v58, %v1418_v46 }
  0xba   : > { %v1352_v11 = vadd.f32 %v1320_v53, %v1285_v47  ;;  %v1120_v34 = vmul.f32 %v2678_v16, %v3995_v1  ;;  %v1249_v54 = vmul.f32 %v1217_v14, %v1185_v7  ;;  %v1286_v44 = vmul.f32 %v2676_v60, %v4006_v45  ;;  %v2454_v47 = vld [vmem:[%s2934_s28 + $0x110] sm:$0xff]  ;;  %v2679_v14 = vld [vmem:[%s5410_s1 + $0x20] sm:$0xff] }
  0xbb   : > { %v1186_v12 = vadd.f32 %v4003_v29, %v1151_v39  ;;  %v1085_v41 = vadd.f32 %v1053_v31, %v1018_v24  ;;  %v1548_v48 = vadd.f32 %v1516_v25, %v1248_v32  ;;  %v1517_v2 = vmul.f32 %v2453_v55, %v1453_v40  ;;  %v2681_v25 = vld [vmem:[%s5410_s1 + $0x220] sm:$0xff] }
  0xbc   : > { %v1419_v30 = vadd.f32 %v1387_v49, %v1352_v11  ;;  %v1321_v4 = vmul.f32 %v2677_v37, %v4015_v9  ;;  %v1388_v61 = vmul.f32 %v2678_v16, %v4018_v22  ;;  %v1019_v7 = vmul.f32 %v2679_v14, %v3978_v52  ;;  %v1219_v49 = vld [vmem:[%s2934_s28 + $0x18] sm:$0xff]  ;;  %v2680_v37 = vld [vmem:[%s5410_s1 + $0x120] sm:$0xff] }
  0xbd   : > { %v1250_v46 = vmul.f32 %v1218_v19, %v1186_v12  ;;  %v1152_v53 = vadd.f32 %v1120_v34, %v1085_v41  ;;  %v1580_v39 = vmul.f32 %v3038_v51, %v1548_v48  ;;  %v1549_v60 = vadd.f32 %v1517_v2, %v1249_v54  ;;  %v2455_v54 = vld [vmem:[%s2934_s28 + $0x118] sm:$0xff] }
  0xbe   : > { %v1454_v32 = vadd.f32 %v4021_v58, %v1419_v30  ;;  %v1353_v55 = vadd.f32 %v1321_v4, %v1286_v44  ;;  %v1054_v31 = vmul.f32 %v2680_v37, %v3987_v56  ;;  %v1121_v2 = vmul.f32 %v2681_v25, %v3995_v1  ;;  %v2682_v44 = vld [vmem:[%s5410_s1 + $0x28] sm:$0xff] }
  0xbf   : > { %v1187_v24 = vadd.f32 %v4003_v29, %v1152_v53  ;;  %v1287_v48 = vmul.f32 %v2679_v14, %v4006_v45  ;;  %2484 = vst [vmem:[%s3103_s24 + $0x100] sm:$0xff] %v1580_v39  ;;  %v1581_v40 = vmul.f32 %v3048_v57, %v1549_v60  ;;  %v1322_v16 = vmul.f32 %v2680_v37, %v4015_v9  ;;  %v2683_v53 = vld [vmem:[%s5410_s1 + $0x128] sm:$0xff] }
  0xc0   : > { %v1518_v19 = vmul.f32 %v2454_v47, %v1454_v32  ;;  %v1420_v11 = vadd.f32 %v1388_v61, %v1353_v55  ;;  %v1086_v12 = vadd.f32 %v1054_v31, %v1019_v7  ;;  %v1389_v41 = vmul.f32 %v2681_v25, %v4018_v22  ;;  %v2684_v39 = vld [vmem:[%s5410_s1 + $0x228] sm:$0xff] }
  0xc1   : > { %v1251_v34 = vmul.f32 %v1219_v49, %v1187_v24  ;;  %v1020_v30 = vmul.f32 %v2682_v44, %v3978_v52  ;;  %2485 = vst [vmem:[%s3103_s24 + $0x108] sm:$0xff] %v1581_v40  ;;  %v1354_v61 = vadd.f32 %v1322_v16, %v1287_v48  ;;  %v1055_v14 = vmul.f32 %v2683_v53, %v3987_v56  ;;  %v1220_v24 = vld [vmem:[%s2934_s28 + $0x20] sm:$0xff] }
  0xc2   : > { %v1550_v4 = vadd.f32 %v1518_v19, %v1250_v46  ;;  %v1455_v47 = vadd.f32 %v4021_v58, %v1420_v11  ;;  %v1153_v7 = vadd.f32 %v1121_v2, %v1086_v12  ;;  %v1122_v60 = vmul.f32 %v2684_v39, %v3995_v1  ;;  %v2456_v2 = vld [vmem:[%s2934_s28 + $0x120] sm:$0xff]  ;;  %v2685_v19 = vld [vmem:[%s5410_s1 + $0x30] sm:$0xff] }
  0xc3   : > { %v1288_v46 = vmul.f32 %v2682_v44, %v4006_v45  ;;  %v1323_v32 = vmul.f32 %v2683_v53, %v4015_v9  ;;  %v1421_v37 = vadd.f32 %v1389_v41, %v1354_v61  ;;  %v1087_v31 = vadd.f32 %v1055_v14, %v1020_v30  ;;  %v2686_v41 = vld [vmem:[%s5410_s1 + $0x130] sm:$0xff] }
  0xc4   : > { %v1582_v49 = vmul.f32 %v3057_v0, %v1550_v4  ;;  %v1519_v55 = vmul.f32 %v2455_v54, %v1455_v47  ;;  %v1188_v25 = vadd.f32 %v4003_v29, %v1153_v7  ;;  %v1390_v40 = vmul.f32 %v2684_v39, %v4018_v22  ;;  %v1221_v4 = vld [vmem:[%s2934_s28 + $0x28] sm:$0xff]  ;;  %v2687_v61 = vld [vmem:[%s5410_s1 + $0x230] sm:$0xff] }
  0xc5   : > { %v1355_v48 = vadd.f32 %v1323_v32, %v1288_v46  ;;  %v1021_v11 = vmul.f32 %v2685_v19, %v3978_v52  ;;  %v1456_v54 = vadd.f32 %v4021_v58, %v1421_v37  ;;  %v1154_v12 = vadd.f32 %v1122_v60, %v1087_v31  ;;  %v2457_v60 = vld [vmem:[%s2934_s28 + $0x128] sm:$0xff] }
  0xc6   : > { %2486 = vst [vmem:[%s3103_s24 + $0x110] sm:$0xff] %v1582_v49  ;;  %v1551_v16 = vadd.f32 %v1519_v55, %v1251_v34  ;;  %v1056_v44 = vmul.f32 %v2686_v41, %v3987_v56  ;;  %v1252_v30 = vmul.f32 %v1220_v24, %v1188_v25  ;;  %v1123_v53 = vmul.f32 %v2687_v61, %v3995_v1  ;;  %v2688_v24 = vld [vmem:[%s5410_s1 + $0x38] sm:$0xff] }
  0xc7   : > { %v1422_v47 = vadd.f32 %v1390_v40, %v1355_v48  ;;  %v1289_v34 = vmul.f32 %v2685_v19, %v4006_v45  ;;  %v1520_v7 = vmul.f32 %v2456_v2, %v1456_v54  ;;  %v1189_v39 = vadd.f32 %v4003_v29, %v1154_v12  ;;  %v2689_v48 = vld [vmem:[%s5410_s1 + $0x138] sm:$0xff] }
  0xc8   : > { %v1583_v14 = vmul.f32 %v3064_v8, %v1551_v16  ;;  %v1088_v46 = vadd.f32 %v1056_v44, %v1021_v11  ;;  %v1324_v49 = vmul.f32 %v2686_v41, %v4015_v9  ;;  %v1391_v55 = vmul.f32 %v2687_v61, %v4018_v22  ;;  %v1222_v11 = vld [vmem:[%s2934_s28 + $0x30] sm:$0xff]  ;;  %v2690_v54 = vld [vmem:[%s5410_s1 + $0x238] sm:$0xff] }
  0xc9   : > { %v1457_v32 = vadd.f32 %v4021_v58, %v1422_v47  ;;  %v1022_v37 = vmul.f32 %v2688_v24, %v3978_v52  ;;  %v1552_v31 = vadd.f32 %v1520_v7, %v1252_v30  ;;  %v1253_v25 = vmul.f32 %v1221_v4, %v1189_v39 }
  0xca   : > { %2487 = vst [vmem:[%s3103_s24 + $0x118] sm:$0xff] %v1583_v14  ;;  %v1155_v2 = vadd.f32 %v1123_v53, %v1088_v46  ;;  %v1057_v40 = vmul.f32 %v2689_v48, %v3987_v56  ;;  %v1356_v16 = vadd.f32 %v1324_v49, %v1289_v34  ;;  %v1124_v12 = vmul.f32 %v2690_v54, %v3995_v1  ;;  %v2691_v14 = vld [vmem:[%s5410_s1 + $0x40] sm:$0xff] }
  0xcb   : > { %v1521_v19 = vmul.f32 %v2457_v60, %v1457_v32  ;;  %v1290_v41 = vmul.f32 %v2688_v24, %v4006_v45  ;;  %v1584_v44 = vmul.f32 %v3149_v28, %v1552_v31  ;;  %v1325_v47 = vmul.f32 %v2689_v48, %v4015_v9  ;;  %v2458_v60 = vld [vmem:[%s2934_s28 + $0x130] sm:$0xff]  ;;  %v2692_v49 = vld [vmem:[%s5410_s1 + $0x140] sm:$0xff]  ;;  %v1223_v31 = vld [vmem:[%s2934_s28 + $0x38] sm:$0xff] }
  0xcc   : > { %v1190_v30 = vadd.f32 %v4003_v29, %v1155_v2  ;;  %v1089_v4 = vadd.f32 %v1057_v40, %v1022_v37  ;;  %v1423_v53 = vadd.f32 %v1391_v55, %v1356_v16  ;;  %v1392_v34 = vmul.f32 %v2690_v54, %v4018_v22 }
  0xcd   : > { %v1553_v61 = vadd.f32 %v1521_v19, %v1253_v25  ;;  %v1023_v7 = vmul.f32 %v2691_v14, %v3978_v52  ;;  %2488 = vst [vmem:[%s3103_s24 + $0x120] sm:$0xff] %v1584_v44  ;;  %v1357_v32 = vadd.f32 %v1325_v47, %v1290_v41  ;;  %v1058_v55 = vmul.f32 %v2692_v49, %v3987_v56  ;;  %v2693_v25 = vld [vmem:[%s5410_s1 + $0x240] sm:$0xff]  ;;  %v2694_v44 = vld [vmem:[%s5410_s1 + $0x48] sm:$0xff] }
  0xce   : > { %v1254_v39 = vmul.f32 %v1222_v11, %v1190_v30  ;;  %v1156_v46 = vadd.f32 %v1124_v12, %v1089_v4  ;;  %v1458_v37 = vadd.f32 %v4021_v58, %v1423_v53  ;;  %v1125_v2 = vmul.f32 %v2693_v25, %v3995_v1  ;;  %v2459_v12 = vld [vmem:[%s2934_s28 + $0x138] sm:$0xff]  ;;  %v2695_v4 = vld [vmem:[%s5410_s1 + $0x148] sm:$0xff] }
  0xcf   : > { %v1585_v24 = vmul.f32 %v3193_v3, %v1553_v61  ;;  %v1291_v48 = vmul.f32 %v2691_v14, %v4006_v45  ;;  %v1424_v19 = vadd.f32 %v1392_v34, %v1357_v32  ;;  %v1090_v11 = vadd.f32 %v1058_v55, %v1023_v7  ;;  %v2696_v32 = vld [vmem:[%s5410_s1 + $0x248] sm:$0xff] }
  0xd0   : > { %v1191_v40 = vadd.f32 %v4003_v29, %v1156_v46  ;;  %v1326_v16 = vmul.f32 %v2692_v49, %v4015_v9  ;;  %v1522_v54 = vmul.f32 %v2458_v60, %v1458_v37  ;;  %v1393_v41 = vmul.f32 %v2693_v25, %v4018_v22  ;;  %v1224_v60 = vld [vmem:[%s2934_s28 + $0x40] sm:$0xff] }
  0xd1   : > { %2489 = vst [vmem:[%s3103_s24 + $0x128] sm:$0xff] %v1585_v24  ;;  %v1024_v30 = vmul.f32 %v2694_v44, %v3978_v52  ;;  %v1059_v47 = vmul.f32 %v2695_v4, %v3987_v56  ;;  %v1459_v53 = vadd.f32 %v4021_v58, %v1424_v19  ;;  %v1157_v34 = vadd.f32 %v1125_v2, %v1090_v11  ;;  %v2460_v2 = vld [vmem:[%s2934_s28 + $0x140] sm:$0xff]  ;;  %v2697_v19 = vld [vmem:[%s5410_s1 + $0x50] sm:$0xff] }
  0xd2   : > { %v1255_v61 = vmul.f32 %v1223_v31, %v1191_v40  ;;  %v1358_v14 = vadd.f32 %v1326_v16, %v1291_v48  ;;  %v1554_v7 = vadd.f32 %v1522_v54, %v1254_v39  ;;  %v1126_v49 = vmul.f32 %v2696_v32, %v3995_v1 }
  0xd3   : > { %v1091_v46 = vadd.f32 %v1059_v47, %v1024_v30  ;;  %v1292_v55 = vmul.f32 %v2694_v44, %v4006_v45  ;;  %v1523_v24 = vmul.f32 %v2459_v12, %v1459_v53  ;;  %v1192_v37 = vadd.f32 %v4003_v29, %v1157_v34 }
  0xd4   : > { %v1425_v31 = vadd.f32 %v1393_v41, %v1358_v14  ;;  %v1327_v25 = vmul.f32 %v2695_v4, %v4015_v9  ;;  %v1586_v39 = vmul.f32 %v3221_v35, %v1554_v7  ;;  %v1394_v40 = vmul.f32 %v2696_v32, %v4018_v22  ;;  %v1225_v41 = vld [vmem:[%s2934_s28 + $0x48] sm:$0xff]  ;;  %v2698_v4 = vld [vmem:[%s5410_s1 + $0x150] sm:$0xff] }
  0xd5   : > { %v1158_v48 = vadd.f32 %v1126_v49, %v1091_v46  ;;  %v1025_v11 = vmul.f32 %v2697_v19, %v3978_v52  ;;  %v1555_v16 = vadd.f32 %v1523_v24, %v1255_v61  ;;  %v1256_v54 = vmul.f32 %v1224_v60, %v1192_v37  ;;  %v2699_v61 = vld [vmem:[%s5410_s1 + $0x250] sm:$0xff]  ;;  %v2461_v49 = vld [vmem:[%s2934_s28 + $0x148] sm:$0xff]  ;;  %v2700_v37 = vld [vmem:[%s5410_s1 + $0x58] sm:$0xff] }
  0xd6   : > { %v1460_v12 = vadd.f32 %v4021_v58, %v1425_v31  ;;  %v1359_v44 = vadd.f32 %v1327_v25, %v1292_v55  ;;  %2490 = vst [vmem:[%s3103_s24 + $0x130] sm:$0xff] %v1586_v39  ;;  %v1060_v47 = vmul.f32 %v2698_v4, %v3987_v56  ;;  %v1127_v53 = vmul.f32 %v2699_v61, %v3995_v1 }
  0xd7   : > { %v1193_v30 = vadd.f32 %v4003_v29, %v1158_v48  ;;  %v1293_v34 = vmul.f32 %v2697_v19, %v4006_v45  ;;  %v1587_v14 = vmul.f32 %v3250_v21, %v1555_v16  ;;  %v1328_v46 = vmul.f32 %v2698_v4, %v4015_v9  ;;  %v2701_v48 = vld [vmem:[%s5410_s1 + $0x158] sm:$0xff] }
  0xd8   : > { %v1524_v7 = vmul.f32 %v2460_v2, %v1460_v12  ;;  %v1426_v60 = vadd.f32 %v1394_v40, %v1359_v44  ;;  %v1092_v55 = vadd.f32 %v1060_v47, %v1025_v11  ;;  %v1395_v24 = vmul.f32 %v2699_v61, %v4018_v22  ;;  %v2702_v11 = vld [vmem:[%s5410_s1 + $0x258] sm:$0xff] }
  0xd9   : > { %v1257_v32 = vmul.f32 %v1225_v41, %v1193_v30  ;;  %v1026_v31 = vmul.f32 %v2700_v37, %v3978_v52  ;;  %2491 = vst [vmem:[%s3103_s24 + $0x138] sm:$0xff] %v1587_v14  ;;  %v1360_v2 = vadd.f32 %v1328_v46, %v1293_v34  ;;  %v1061_v40 = vmul.f32 %v2701_v48, %v3987_v56  ;;  %v1226_v30 = vld [vmem:[%s2934_s28 + $0x50] sm:$0xff] }
  0xda   : > { %v1556_v25 = vadd.f32 %v1524_v7, %v1256_v54  ;;  %v1461_v39 = vadd.f32 %v4021_v58, %v1426_v60  ;;  %v1159_v19 = vadd.f32 %v1127_v53, %v1092_v55  ;;  %v1128_v16 = vmul.f32 %v2702_v11, %v3995_v1  ;;  %v2462_v53 = vld [vmem:[%s2934_s28 + $0x150] sm:$0xff]  ;;  %v2703_v7 = vld [vmem:[%s5410_s1 + $0x60] sm:$0xff] }
  0xdb   : > { %v1294_v54 = vmul.f32 %v2700_v37, %v4006_v45  ;;  %v1329_v12 = vmul.f32 %v2701_v48, %v4015_v9  ;;  %v1427_v4 = vadd.f32 %v1395_v24, %v1360_v2  ;;  %v1093_v47 = vadd.f32 %v1061_v40, %v1026_v31  ;;  %v2704_v24 = vld [vmem:[%s5410_s1 + $0x160] sm:$0xff] }
  0xdc   : > { %v1588_v41 = vmul.f32 %v3286_v20, %v1556_v25  ;;  %v1525_v44 = vmul.f32 %v2461_v49, %v1461_v39  ;;  %v1194_v61 = vadd.f32 %v4003_v29, %v1159_v19  ;;  %v1396_v14 = vmul.f32 %v2702_v11, %v4018_v22  ;;  %v1227_v25 = vld [vmem:[%s2934_s28 + $0x58] sm:$0xff]  ;;  %v2705_v2 = vld [vmem:[%s5410_s1 + $0x260] sm:$0xff] }
  0xdd   : > { %v1361_v34 = vadd.f32 %v1329_v12, %v1294_v54  ;;  %v1027_v60 = vmul.f32 %v2703_v7, %v3978_v52  ;;  %v1462_v49 = vadd.f32 %v4021_v58, %v1427_v4  ;;  %v1160_v55 = vadd.f32 %v1128_v16, %v1093_v47  ;;  %v2463_v16 = vld [vmem:[%s2934_s28 + $0x158] sm:$0xff] }
  0xde   : > { %2492 = vst [vmem:[%s3103_s24 + $0x140] sm:$0xff] %v1588_v41  ;;  %v1557_v46 = vadd.f32 %v1525_v44, %v1257_v32  ;;  %v1062_v37 = vmul.f32 %v2704_v24, %v3987_v56  ;;  %v1258_v31 = vmul.f32 %v1226_v30, %v1194_v61  ;;  %v1129_v48 = vmul.f32 %v2705_v2, %v3995_v1  ;;  %v2706_v30 = vld [vmem:[%s5410_s1 + $0x68] sm:$0xff] }
  0xdf   : > { %v1428_v39 = vadd.f32 %v1396_v14, %v1361_v34  ;;  %v1295_v32 = vmul.f32 %v2703_v7, %v4006_v45  ;;  %v1526_v19 = vmul.f32 %v2462_v53, %v1462_v49  ;;  %v1195_v11 = vadd.f32 %v4003_v29, %v1160_v55  ;;  %v2707_v34 = vld [vmem:[%s5410_s1 + $0x168] sm:$0xff] }
  0xe0   : > { %v1589_v40 = vmul.f32 %v3313_v63, %v1557_v46  ;;  %v1094_v54 = vadd.f32 %v1062_v37, %v1027_v60  ;;  %v1330_v41 = vmul.f32 %v2704_v24, %v4015_v9  ;;  %v1397_v44 = vmul.f32 %v2705_v2, %v4018_v22  ;;  %v1228_v60 = vld [vmem:[%s2934_s28 + $0x60] sm:$0xff]  ;;  %v2708_v49 = vld [vmem:[%s5410_s1 + $0x268] sm:$0xff] }
  0xe1   : > { %v1463_v12 = vadd.f32 %v4021_v58, %v1428_v39  ;;  %v1028_v4 = vmul.f32 %v2706_v30, %v3978_v52  ;;  %v1558_v47 = vadd.f32 %v1526_v19, %v1258_v31  ;;  %v1259_v61 = vmul.f32 %v1227_v25, %v1195_v11 }
  0xe2   : > { %2493 = vst [vmem:[%s3103_s24 + $0x148] sm:$0xff] %v1589_v40  ;;  %v1161_v53 = vadd.f32 %v1129_v48, %v1094_v54  ;;  %v1063_v14 = vmul.f32 %v2707_v34, %v3987_v56  ;;  %v1362_v46 = vadd.f32 %v1330_v41, %v1295_v32  ;;  %v1130_v55 = vmul.f32 %v2708_v49, %v3995_v1  ;;  %v2709_v40 = vld [vmem:[%s5410_s1 + $0x70] sm:$0xff] }
  0xe3   : > { %v1527_v7 = vmul.f32 %v2463_v16, %v1463_v12  ;;  %v1296_v24 = vmul.f32 %v2706_v30, %v4006_v45  ;;  %v1590_v37 = vmul.f32 %v3345_v38, %v1558_v47  ;;  %v1331_v39 = vmul.f32 %v2707_v34, %v4015_v9  ;;  %v2464_v16 = vld [vmem:[%s2934_s28 + $0x160] sm:$0xff]  ;;  %v2710_v41 = vld [vmem:[%s5410_s1 + $0x170] sm:$0xff]  ;;  %v1229_v47 = vld [vmem:[%s2934_s28 + $0x68] sm:$0xff] }
  0xe4   : > { %v1196_v31 = vadd.f32 %v4003_v29, %v1161_v53  ;;  %v1095_v25 = vadd.f32 %v1063_v14, %v1028_v4  ;;  %v1429_v48 = vadd.f32 %v1397_v44, %v1362_v46  ;;  %v1398_v32 = vmul.f32 %v2708_v49, %v4018_v22 }
  0xe5   : > { %v1559_v2 = vadd.f32 %v1527_v7, %v1259_v61  ;;  %v1029_v19 = vmul.f32 %v2709_v40, %v3978_v52  ;;  %2494 = vst [vmem:[%s3103_s24 + $0x150] sm:$0xff] %v1590_v37  ;;  %v1363_v12 = vadd.f32 %v1331_v39, %v1296_v24  ;;  %v1064_v44 = vmul.f32 %v2710_v41, %v3987_v56  ;;  %v2711_v61 = vld [vmem:[%s5410_s1 + $0x270] sm:$0xff]  ;;  %v2712_v37 = vld [vmem:[%s5410_s1 + $0x78] sm:$0xff] }
  0xe6   : > { %v1260_v11 = vmul.f32 %v1228_v60, %v1196_v31  ;;  %v1162_v54 = vadd.f32 %v1130_v55, %v1095_v25  ;;  %v1464_v4 = vadd.f32 %v4021_v58, %v1429_v48  ;;  %v1131_v53 = vmul.f32 %v2711_v61, %v3995_v1  ;;  %v2465_v55 = vld [vmem:[%s2934_s28 + $0x168] sm:$0xff]  ;;  %v2713_v25 = vld [vmem:[%s5410_s1 + $0x178] sm:$0xff] }
  0xe7   : > { %v1591_v30 = vmul.f32 %v3377_v15, %v1559_v2  ;;  %v1297_v34 = vmul.f32 %v2709_v40, %v4006_v45  ;;  %v1430_v7 = vadd.f32 %v1398_v32, %v1363_v12  ;;  %v1096_v60 = vadd.f32 %v1064_v44, %v1029_v19  ;;  %v2714_v12 = vld [vmem:[%s5410_s1 + $0x278] sm:$0xff] }
  0xe8   : > { %v1197_v14 = vadd.f32 %v4003_v29, %v1162_v54  ;;  %v1332_v46 = vmul.f32 %v2710_v41, %v4015_v9  ;;  %v1528_v49 = vmul.f32 %v2464_v16, %v1464_v4  ;;  %v1399_v24 = vmul.f32 %v2711_v61, %v4018_v22  ;;  %v1230_v16 = vld [vmem:[%s2934_s28 + $0x70] sm:$0xff] }
  0xe9   : > { %2495 = vst [vmem:[%s3103_s24 + $0x158] sm:$0xff] %v1591_v30  ;;  %v1030_v31 = vmul.f32 %v2712_v37, %v3978_v52  ;;  %v1065_v39 = vmul.f32 %v2713_v25, %v3987_v56  ;;  %v1465_v48 = vadd.f32 %v4021_v58, %v1430_v7  ;;  %v1163_v32 = vadd.f32 %v1131_v53, %v1096_v60  ;;  %v2466_v53 = vld [vmem:[%s2934_s28 + $0x170] sm:$0xff]  ;;  %v2715_v7 = vld [vmem:[%s5410_s1 + $0x80] sm:$0xff] }
  0xea   : > { %v1261_v2 = vmul.f32 %v1229_v47, %v1197_v14  ;;  %v1364_v40 = vadd.f32 %v1332_v46, %v1297_v34  ;;  %v1560_v19 = vadd.f32 %v1528_v49, %v1260_v11  ;;  %v1132_v41 = vmul.f32 %v2714_v12, %v3995_v1 }
  0xeb   : > { %v1097_v54 = vadd.f32 %v1065_v39, %v1030_v31  ;;  %v1298_v44 = vmul.f32 %v2712_v37, %v4006_v45  ;;  %v1529_v30 = vmul.f32 %v2465_v55, %v1465_v48  ;;  %v1198_v4 = vadd.f32 %v4003_v29, %v1163_v32 }
  0xec   : > { %v1431_v47 = vadd.f32 %v1399_v24, %v1364_v40  ;;  %v1333_v61 = vmul.f32 %v2713_v25, %v4015_v9  ;;  %v1592_v11 = vmul.f32 %v3410_v43, %v1560_v19  ;;  %v1400_v14 = vmul.f32 %v2714_v12, %v4018_v22  ;;  %v1231_v24 = vld [vmem:[%s2934_s28 + $0x78] sm:$0xff]  ;;  %v2716_v25 = vld [vmem:[%s5410_s1 + $0x180] sm:$0xff] }
  0xed   : > { %v1164_v34 = vadd.f32 %v1132_v41, %v1097_v54  ;;  %v1031_v60 = vmul.f32 %v2715_v7, %v3978_v52  ;;  %v1561_v46 = vadd.f32 %v1529_v30, %v1261_v2  ;;  %v1262_v49 = vmul.f32 %v1230_v16, %v1198_v4  ;;  %v2717_v2 = vld [vmem:[%s5410_s1 + $0x280] sm:$0xff]  ;;  %v2467_v41 = vld [vmem:[%s2934_s28 + $0x178] sm:$0xff]  ;;  %v2718_v4 = vld [vmem:[%s5410_s1 + $0x88] sm:$0xff] }
  0xee   : > { %v1466_v55 = vadd.f32 %v4021_v58, %v1431_v47  ;;  %v1365_v37 = vadd.f32 %v1333_v61, %v1298_v44  ;;  %2496 = vst [vmem:[%s3103_s24 + $0x160] sm:$0xff] %v1592_v11  ;;  %v1066_v39 = vmul.f32 %v2716_v25, %v3987_v56  ;;  %v1133_v48 = vmul.f32 %v2717_v2, %v3995_v1 }
  0xef   : > { %v1199_v31 = vadd.f32 %v4003_v29, %v1164_v34  ;;  %v1299_v32 = vmul.f32 %v2715_v7, %v4006_v45  ;;  %v1593_v40 = vmul.f32 %v3441_v6, %v1561_v46  ;;  %v1334_v54 = vmul.f32 %v2716_v25, %v4015_v9  ;;  %v2719_v34 = vld [vmem:[%s5410_s1 + $0x188] sm:$0xff] }
  0xf0   : > { %v1530_v19 = vmul.f32 %v2466_v53, %v1466_v55  ;;  %v1432_v16 = vadd.f32 %v1400_v14, %v1365_v37  ;;  %v1098_v44 = vadd.f32 %v1066_v39, %v1031_v60  ;;  %v1401_v30 = vmul.f32 %v2717_v2, %v4018_v22  ;;  %v2720_v60 = vld [vmem:[%s5410_s1 + $0x288] sm:$0xff] }
  0xf1   : > { %v1263_v12 = vmul.f32 %v1231_v24, %v1199_v31  ;;  %v1032_v47 = vmul.f32 %v2718_v4, %v3978_v52  ;;  %2497 = vst [vmem:[%s3103_s24 + $0x168] sm:$0xff] %v1593_v40  ;;  %v1366_v53 = vadd.f32 %v1334_v54, %v1299_v32  ;;  %v1067_v14 = vmul.f32 %v2719_v34, %v3987_v56  ;;  %v1232_v31 = vld [vmem:[%s2934_s28 + $0x80] sm:$0xff] }
  0xf2   : > { %v1562_v61 = vadd.f32 %v1530_v19, %v1262_v49  ;;  %v1467_v11 = vadd.f32 %v4021_v58, %v1432_v16  ;;  %v1165_v7 = vadd.f32 %v1133_v48, %v1098_v44  ;;  %v1134_v46 = vmul.f32 %v2720_v60, %v3995_v1  ;;  %v2468_v48 = vld [vmem:[%s2934_s28 + $0x180] sm:$0xff]  ;;  %v2721_v19 = vld [vmem:[%s5410_s1 + $0x90] sm:$0xff] }
  0xf3   : > { %v1300_v49 = vmul.f32 %v2718_v4, %v4006_v45  ;;  %v1335_v55 = vmul.f32 %v2719_v34, %v4015_v9  ;;  %v1433_v25 = vadd.f32 %v1401_v30, %v1366_v53  ;;  %v1099_v39 = vadd.f32 %v1067_v14, %v1032_v47  ;;  %v2722_v30 = vld [vmem:[%s5410_s1 + $0x190] sm:$0xff] }
  0xf4   : > { %v1594_v24 = vmul.f32 %v3469_v23, %v1562_v61  ;;  %v1531_v37 = vmul.f32 %v2467_v41, %v1467_v11  ;;  %v1200_v2 = vadd.f32 %v4003_v29, %v1165_v7  ;;  %v1402_v40 = vmul.f32 %v2720_v60, %v4018_v22  ;;  %v1233_v61 = vld [vmem:[%s2934_s28 + $0x88] sm:$0xff]  ;;  %v2723_v53 = vld [vmem:[%s5410_s1 + $0x290] sm:$0xff] }
  0xf5   : > { %v1367_v32 = vadd.f32 %v1335_v55, %v1300_v49  ;;  %v1033_v16 = vmul.f32 %v2721_v19, %v3978_v52  ;;  %v1468_v41 = vadd.f32 %v4021_v58, %v1433_v25  ;;  %v1166_v44 = vadd.f32 %v1134_v46, %v1099_v39  ;;  %v2469_v46 = vld [vmem:[%s2934_s28 + $0x188] sm:$0xff] }
  0xf6   : > { %2498 = vst [vmem:[%s3103_s24 + $0x170] sm:$0xff] %v1594_v24  ;;  %v1563_v54 = vadd.f32 %v1531_v37, %v1263_v12  ;;  %v1068_v4 = vmul.f32 %v2722_v30, %v3987_v56  ;;  %v1264_v47 = vmul.f32 %v1232_v31, %v1200_v2  ;;  %v1135_v34 = vmul.f32 %v2723_v53, %v3995_v1  ;;  %v2724_v31 = vld [vmem:[%s5410_s1 + $0x98] sm:$0xff] }
  0xf7   : > { %v1434_v11 = vadd.f32 %v1402_v40, %v1367_v32  ;;  %v1301_v12 = vmul.f32 %v2721_v19, %v4006_v45  ;;  %v1532_v7 = vmul.f32 %v2468_v48, %v1468_v41  ;;  %v1201_v60 = vadd.f32 %v4003_v29, %v1166_v44  ;;  %v2725_v32 = vld [vmem:[%s5410_s1 + $0x198] sm:$0xff] }
  0xf8   : > { %v1595_v14 = vmul.f32 %v3501_v10, %v1563_v54  ;;  %v1100_v49 = vadd.f32 %v1068_v4, %v1033_v16  ;;  %v1336_v24 = vmul.f32 %v2722_v30, %v4015_v9  ;;  %v1403_v37 = vmul.f32 %v2723_v53, %v4018_v22  ;;  %v1234_v16 = vld [vmem:[%s2934_s28 + $0x90] sm:$0xff]  ;;  %v2726_v41 = vld [vmem:[%s5410_s1 + $0x298] sm:$0xff] }
  0xf9   : > { %v1469_v55 = vadd.f32 %v4021_v58, %v1434_v11  ;;  %v1034_v25 = vmul.f32 %v2724_v31, %v3978_v52  ;;  %v1564_v39 = vadd.f32 %v1532_v7, %v1264_v47  ;;  %v1265_v2 = vmul.f32 %v1233_v61, %v1201_v60 }
  0xfa   : > { %2499 = vst [vmem:[%s3103_s24 + $0x178] sm:$0xff] %v1595_v14  ;;  %v1167_v48 = vadd.f32 %v1135_v34, %v1100_v49  ;;  %v1069_v40 = vmul.f32 %v2725_v32, %v3987_v56  ;;  %v1368_v54 = vadd.f32 %v1336_v24, %v1301_v12  ;;  %v1136_v44 = vmul.f32 %v2726_v41, %v3995_v1  ;;  %v2727_v14 = vld [vmem:[%s5410_s1 + $0xa0] sm:$0xff] }
  0xfb   : > { %v1533_v19 = vmul.f32 %v2469_v46, %v1469_v55  ;;  %v1302_v30 = vmul.f32 %v2724_v31, %v4006_v45  ;;  %v1596_v4 = vmul.f32 %v3534_v18, %v1564_v39  ;;  %v1337_v11 = vmul.f32 %v2725_v32, %v4015_v9  ;;  %v2470_v46 = vld [vmem:[%s2934_s28 + $0x190] sm:$0xff]  ;;  %v2728_v24 = vld [vmem:[%s5410_s1 + $0x1a0] sm:$0xff]  ;;  %v1235_v39 = vld [vmem:[%s2934_s28 + $0x98] sm:$0xff] }
  0xfc   : > { %v1202_v47 = vadd.f32 %v4003_v29, %v1167_v48  ;;  %v1101_v61 = vadd.f32 %v1069_v40, %v1034_v25  ;;  %v1435_v34 = vadd.f32 %v1403_v37, %v1368_v54  ;;  %v1404_v12 = vmul.f32 %v2726_v41, %v4018_v22 }
  0xfd   : > { %v1565_v53 = vadd.f32 %v1533_v19, %v1265_v2  ;;  %v1035_v7 = vmul.f32 %v2727_v14, %v3978_v52  ;;  %2500 = vst [vmem:[%s3103_s24 + $0x180] sm:$0xff] %v1596_v4  ;;  %v1369_v55 = vadd.f32 %v1337_v11, %v1302_v30  ;;  %v1070_v37 = vmul.f32 %v2728_v24, %v3987_v56  ;;  %v2729_v2 = vld [vmem:[%s5410_s1 + $0x2a0] sm:$0xff]  ;;  %v2730_v4 = vld [vmem:[%s5410_s1 + $0xa8] sm:$0xff] }
  0xfe   : > { %v1266_v60 = vmul.f32 %v1234_v16, %v1202_v47  ;;  %v1168_v49 = vadd.f32 %v1136_v44, %v1101_v61  ;;  %v1470_v25 = vadd.f32 %v4021_v58, %v1435_v34  ;;  %v1137_v48 = vmul.f32 %v2729_v2, %v3995_v1  ;;  %v2471_v44 = vld [vmem:[%s2934_s28 + $0x198] sm:$0xff]  ;;  %v2731_v61 = vld [vmem:[%s5410_s1 + $0x1a8] sm:$0xff] }
  0xff   : > { %v1597_v31 = vmul.f32 %v3565_v59, %v1565_v53  ;;  %v1303_v32 = vmul.f32 %v2727_v14, %v4006_v45  ;;  %v1436_v19 = vadd.f32 %v1404_v12, %v1369_v55  ;;  %v1102_v16 = vadd.f32 %v1070_v37, %v1035_v7  ;;  %v2732_v55 = vld [vmem:[%s5410_s1 + $0x2a8] sm:$0xff] }
 0x100   : > { %v1203_v40 = vadd.f32 %v4003_v29, %v1168_v49  ;;  %v1338_v54 = vmul.f32 %v2728_v24, %v4015_v9  ;;  %v1534_v41 = vmul.f32 %v2470_v46, %v1470_v25  ;;  %v1405_v30 = vmul.f32 %v2729_v2, %v4018_v22  ;;  %v1236_v46 = vld [vmem:[%s2934_s28 + $0xa0] sm:$0xff] }
 0x101   : > { %2501 = vst [vmem:[%s3103_s24 + $0x188] sm:$0xff] %v1597_v31  ;;  %v1036_v47 = vmul.f32 %v2730_v4, %v3978_v52  ;;  %v1071_v11 = vmul.f32 %v2731_v61, %v3987_v56  ;;  %v1471_v34 = vadd.f32 %v4021_v58, %v1436_v19  ;;  %v1169_v12 = vadd.f32 %v1137_v48, %v1102_v16  ;;  %v2472_v48 = vld [vmem:[%s2934_s28 + $0x1a0] sm:$0xff]  ;;  %v2733_v19 = vld [vmem:[%s5410_s1 + $0xb0] sm:$0xff] }
 0x102   : > { %v1267_v53 = vmul.f32 %v1235_v39, %v1203_v40  ;;  %v1370_v14 = vadd.f32 %v1338_v54, %v1303_v32  ;;  %v1566_v7 = vadd.f32 %v1534_v41, %v1266_v60  ;;  %v1138_v24 = vmul.f32 %v2732_v55, %v3995_v1 }
 0x103   : > { %v1103_v49 = vadd.f32 %v1071_v11, %v1036_v47  ;;  %v1304_v37 = vmul.f32 %v2730_v4, %v4006_v45  ;;  %v1535_v31 = vmul.f32 %v2471_v44, %v1471_v34  ;;  %v1204_v25 = vadd.f32 %v4003_v29, %v1169_v12 }
 0x104   : > { %v1437_v39 = vadd.f32 %v1405_v30, %v1370_v14  ;;  %v1339_v2 = vmul.f32 %v2731_v61, %v4015_v9  ;;  %v1598_v60 = vmul.f32 %v3593_v33, %v1566_v7  ;;  %v1406_v40 = vmul.f32 %v2732_v55, %v4018_v22  ;;  %v1237_v30 = vld [vmem:[%s2934_s28 + $0xa8] sm:$0xff]  ;;  %v2734_v61 = vld [vmem:[%s5410_s1 + $0x1b0] sm:$0xff] }
 0x105   : > { %v1170_v32 = vadd.f32 %v1138_v24, %v1103_v49  ;;  %v1037_v16 = vmul.f32 %v2733_v19, %v3978_v52  ;;  %v1567_v54 = vadd.f32 %v1535_v31, %v1267_v53  ;;  %v1268_v41 = vmul.f32 %v1236_v46, %v1204_v25  ;;  %v2735_v53 = vld [vmem:[%s5410_s1 + $0x2b0] sm:$0xff]  ;;  %v2473_v24 = vld [vmem:[%s2934_s28 + $0x1a8] sm:$0xff]  ;;  %v2736_v25 = vld [vmem:[%s5410_s1 + $0xb8] sm:$0xff] }
 0x106   : > { %v1472_v44 = vadd.f32 %v4021_v58, %v1437_v39  ;;  %v1371_v4 = vadd.f32 %v1339_v2, %v1304_v37  ;;  %2502 = vst [vmem:[%s3103_s24 + $0x190] sm:$0xff] %v1598_v60  ;;  %v1072_v11 = vmul.f32 %v2734_v61, %v3987_v56  ;;  %v1139_v34 = vmul.f32 %v2735_v53, %v3995_v1 }
 0x107   : > { %v1205_v47 = vadd.f32 %v4003_v29, %v1170_v32  ;;  %v1305_v12 = vmul.f32 %v2733_v19, %v4006_v45  ;;  %v1599_v14 = vmul.f32 %v3625_v17, %v1567_v54  ;;  %v1340_v49 = vmul.f32 %v2734_v61, %v4015_v9  ;;  %v2737_v32 = vld [vmem:[%s5410_s1 + $0x1b8] sm:$0xff] }
 0x108   : > { %v1536_v7 = vmul.f32 %v2472_v48, %v1472_v44  ;;  %v1438_v46 = vadd.f32 %v1406_v40, %v1371_v4  ;;  %v1104_v37 = vadd.f32 %v1072_v11, %v1037_v16  ;;  %v1407_v31 = vmul.f32 %v2735_v53, %v4018_v22  ;;  %v2738_v16 = vld [vmem:[%s5410_s1 + $0x2b8] sm:$0xff] }
 0x109   : > { %v1269_v55 = vmul.f32 %v1237_v30, %v1205_v47  ;;  %v1038_v39 = vmul.f32 %v2736_v25, %v3978_v52  ;;  %2503 = vst [vmem:[%s3103_s24 + $0x198] sm:$0xff] %v1599_v14  ;;  %v1372_v48 = vadd.f32 %v1340_v49, %v1305_v12  ;;  %v1073_v40 = vmul.f32 %v2737_v32, %v3987_v56  ;;  %v1238_v47 = vld [vmem:[%s2934_s28 + $0xb0] sm:$0xff] }
 0x10a   : > { %v1568_v2 = vadd.f32 %v1536_v7, %v1268_v41  ;;  %v1473_v60 = vadd.f32 %v4021_v58, %v1438_v46  ;;  %v1171_v19 = vadd.f32 %v1139_v34, %v1104_v37  ;;  %v1140_v54 = vmul.f32 %v2738_v16, %v3995_v1  ;;  %v2474_v34 = vld [vmem:[%s2934_s28 + $0x1b0] sm:$0xff]  ;;  %v2739_v7 = vld [vmem:[%s5410_s1 + $0xc0] sm:$0xff] }
 0x10b   : > { %v1306_v41 = vmul.f32 %v2736_v25, %v4006_v45  ;;  %v1341_v44 = vmul.f32 %v2737_v32, %v4015_v9  ;;  %v1439_v61 = vadd.f32 %v1407_v31, %v1372_v48  ;;  %v1105_v11 = vadd.f32 %v1073_v40, %v1038_v39  ;;  %v2740_v31 = vld [vmem:[%s5410_s1 + $0x1c0] sm:$0xff] }
 0x10c   : > { %v1600_v30 = vmul.f32 %v3658_v26, %v1568_v2  ;;  %v1537_v4 = vmul.f32 %v2473_v24, %v1473_v60  ;;  %v1206_v53 = vadd.f32 %v4003_v29, %v1171_v19  ;;  %v1408_v14 = vmul.f32 %v2738_v16, %v4018_v22  ;;  %v1239_v2 = vld [vmem:[%s2934_s28 + $0xb8] sm:$0xff]  ;;  %v2741_v48 = vld [vmem:[%s5410_s1 + $0x2c0] sm:$0xff] }
 0x10d   : > { %v1373_v12 = vadd.f32 %v1341_v44, %v1306_v41  ;;  %v1039_v46 = vmul.f32 %v2739_v7, %v3978_v52  ;;  %v1474_v24 = vadd.f32 %v4021_v58, %v1439_v61  ;;  %v1172_v37 = vadd.f32 %v1140_v54, %v1105_v11  ;;  %v2475_v54 = vld [vmem:[%s2934_s28 + $0x1b8] sm:$0xff] }
 0x10e   : > { %2504 = vst [vmem:[%s3103_s24 + $0x1a0] sm:$0xff] %v1600_v30  ;;  %v1569_v49 = vadd.f32 %v1537_v4, %v1269_v55  ;;  %v1074_v25 = vmul.f32 %v2740_v31, %v3987_v56  ;;  %v1270_v39 = vmul.f32 %v1238_v47, %v1206_v53  ;;  %v1141_v32 = vmul.f32 %v2741_v48, %v3995_v1  ;;  %v2742_v47 = vld [vmem:[%s5410_s1 + $0xc8] sm:$0xff] }
 0x10f   : > { %v1440_v60 = vadd.f32 %v1408_v14, %v1373_v12  ;;  %v1307_v55 = vmul.f32 %v2739_v7, %v4006_v45  ;;  %v1538_v19 = vmul.f32 %v2474_v34, %v1474_v24  ;;  %v1207_v16 = vadd.f32 %v4003_v29, %v1172_v37  ;;  %v2743_v12 = vld [vmem:[%s5410_s1 + $0x1c8] sm:$0xff] }
 0x110   : > { %v1601_v40 = vmul.f32 %v3689_v50, %v1569_v49  ;;  %v1106_v41 = vadd.f32 %v1074_v25, %v1039_v46  ;;  %v1342_v30 = vmul.f32 %v2740_v31, %v4015_v9  ;;  %v1409_v4 = vmul.f32 %v2741_v48, %v4018_v22  ;;  %v1240_v46 = vld [vmem:[%s2934_s28 + $0xc0] sm:$0xff]  ;;  %v2744_v24 = vld [vmem:[%s5410_s1 + $0x2c8] sm:$0xff] }
 0x111   : > { %v1475_v44 = vadd.f32 %v4021_v58, %v1440_v60  ;;  %v1040_v61 = vmul.f32 %v2742_v47, %v3978_v52  ;;  %v1570_v11 = vadd.f32 %v1538_v19, %v1270_v39  ;;  %v1271_v53 = vmul.f32 %v1239_v2, %v1207_v16 }
 0x112   : > { %2505 = vst [vmem:[%s3103_s24 + $0x1a8] sm:$0xff] %v1601_v40  ;;  %v1173_v34 = vadd.f32 %v1141_v32, %v1106_v41  ;;  %v1075_v14 = vmul.f32 %v2743_v12, %v3987_v56  ;;  %v1374_v49 = vadd.f32 %v1342_v30, %v1307_v55  ;;  %v1142_v37 = vmul.f32 %v2744_v24, %v3995_v1  ;;  %v2745_v40 = vld [vmem:[%s5410_s1 + $0xd0] sm:$0xff] }
 0x113   : > { %v1539_v7 = vmul.f32 %v2475_v54, %v1475_v44  ;;  %v1308_v31 = vmul.f32 %v2742_v47, %v4006_v45  ;;  %v1602_v25 = vmul.f32 %v3717_v13, %v1570_v11  ;;  %v1343_v60 = vmul.f32 %v2743_v12, %v4015_v9  ;;  %v2476_v54 = vld [vmem:[%s2934_s28 + $0x1c0] sm:$0xff]  ;;  %v2746_v30 = vld [vmem:[%s5410_s1 + $0x1d0] sm:$0xff]  ;;  %v1241_v11 = vld [vmem:[%s2934_s28 + $0xc8] sm:$0xff] }
 0x114   : > { %v1208_v39 = vadd.f32 %v4003_v29, %v1173_v34  ;;  %v1107_v2 = vadd.f32 %v1075_v14, %v1040_v61  ;;  %v1441_v32 = vadd.f32 %v1409_v4, %v1374_v49  ;;  %v1410_v55 = vmul.f32 %v2744_v24, %v4018_v22 }
 0x115   : > { %v1571_v48 = vadd.f32 %v1539_v7, %v1271_v53  ;;  %v1041_v19 = vmul.f32 %v2745_v40, %v3978_v52  ;;  %2506 = vst [vmem:[%s3103_s24 + $0x1b0] sm:$0xff] %v1602_v25  ;;  %v1375_v44 = vadd.f32 %v1343_v60, %v1308_v31  ;;  %v1076_v4 = vmul.f32 %v2746_v30, %v3987_v56  ;;  %v2747_v53 = vld [vmem:[%s5410_s1 + $0x2d0] sm:$0xff]  ;;  %v2748_v25 = vld [vmem:[%s5410_s1 + $0xd8] sm:$0xff] }
 0x116   : > { %v1272_v16 = vmul.f32 %v1240_v46, %v1208_v39  ;;  %v1174_v41 = vadd.f32 %v1142_v37, %v1107_v2  ;;  %v1476_v61 = vadd.f32 %v4021_v58, %v1441_v32  ;;  %v1143_v34 = vmul.f32 %v2747_v53, %v3995_v1  ;;  %v2477_v37 = vld [vmem:[%s2934_s28 + $0x1c8] sm:$0xff]  ;;  %v2749_v2 = vld [vmem:[%s5410_s1 + $0x1d8] sm:$0xff] }
 0x117   : > { %v1603_v47 = vmul.f32 %v3749_v27, %v1571_v48  ;;  %v1309_v12 = vmul.f32 %v2745_v40, %v4006_v45  ;;  %v1442_v7 = vadd.f32 %v1410_v55, %v1375_v44  ;;  %v1108_v46 = vadd.f32 %v1076_v4, %v1041_v19  ;;  %v2750_v44 = vld [vmem:[%s5410_s1 + $0x2d8] sm:$0xff] }
 0x118   : > { %v1209_v14 = vadd.f32 %v4003_v29, %v1174_v41  ;;  %v1344_v49 = vmul.f32 %v2746_v30, %v4015_v9  ;;  %v1540_v24 = vmul.f32 %v2476_v54, %v1476_v61  ;;  %v1411_v31 = vmul.f32 %v2747_v53, %v4018_v22  ;;  %v1242_v54 = vld [vmem:[%s2934_s28 + $0xd0] sm:$0xff] }
 0x119   : > { %2507 = vst [vmem:[%s3103_s24 + $0x1b8] sm:$0xff] %v1603_v47  ;;  %v1042_v39 = vmul.f32 %v2748_v25, %v3978_v52  ;;  %v1077_v60 = vmul.f32 %v2749_v2, %v3987_v56  ;;  %v1477_v32 = vadd.f32 %v4021_v58, %v1442_v7  ;;  %v1175_v55 = vadd.f32 %v1143_v34, %v1108_v46  ;;  %v2478_v34 = vld [vmem:[%s2934_s28 + $0x1d0] sm:$0xff]  ;;  %v2751_v7 = vld [vmem:[%s5410_s1 + $0xe0] sm:$0xff] }
 0x11a   : > { %v1273_v48 = vmul.f32 %v1241_v11, %v1209_v14  ;;  %v1376_v40 = vadd.f32 %v1344_v49, %v1309_v12  ;;  %v1572_v19 = vadd.f32 %v1540_v24, %v1272_v16  ;;  %v1144_v30 = vmul.f32 %v2750_v44, %v3995_v1 }
 0x11b   : > { %v1109_v41 = vadd.f32 %v1077_v60, %v1042_v39  ;;  %v1310_v4 = vmul.f32 %v2748_v25, %v4006_v45  ;;  %v1541_v47 = vmul.f32 %v2477_v37, %v1477_v32  ;;  %v1210_v61 = vadd.f32 %v4003_v29, %v1175_v55 }
 0x11c   : > { %v1443_v11 = vadd.f32 %v1411_v31, %v1376_v40  ;;  %v1345_v53 = vmul.f32 %v2749_v2, %v4015_v9  ;;  %v1604_v16 = vmul.f32 %v3782_v5, %v1572_v19  ;;  %v1412_v14 = vmul.f32 %v2750_v44, %v4018_v22  ;;  %v1243_v31 = vld [vmem:[%s2934_s28 + $0xd8] sm:$0xff]  ;;  %v2752_v2 = vld [vmem:[%s5410_s1 + $0x1e0] sm:$0xff] }
 0x11d   : > { %v1176_v12 = vadd.f32 %v1144_v30, %v1109_v41  ;;  %v1043_v46 = vmul.f32 %v2751_v7, %v3978_v52  ;;  %v1573_v49 = vadd.f32 %v1541_v47, %v1273_v48  ;;  %v1274_v24 = vmul.f32 %v1242_v54, %v1210_v61  ;;  %v2753_v48 = vld [vmem:[%s5410_s1 + $0x2e0] sm:$0xff]  ;;  %v2479_v30 = vld [vmem:[%s2934_s28 + $0x1d8] sm:$0xff]  ;;  %v2754_v61 = vld [vmem:[%s5410_s1 + $0xe8] sm:$0xff] }
 0x11e   : > { %v1478_v37 = vadd.f32 %v4021_v58, %v1443_v11  ;;  %v1377_v25 = vadd.f32 %v1345_v53, %v1310_v4  ;;  %2508 = vst [vmem:[%s3103_s24 + $0x1c0] sm:$0xff] %v1604_v16  ;;  %v1078_v60 = vmul.f32 %v2752_v2, %v3987_v56  ;;  %v1145_v32 = vmul.f32 %v2753_v48, %v3995_v1 }
 0x11f   : > { %v1211_v39 = vadd.f32 %v4003_v29, %v1176_v12  ;;  %v1311_v55 = vmul.f32 %v2751_v7, %v4006_v45  ;;  %v1605_v40 = vmul.f32 %v3813_v36, %v1573_v49  ;;  %v1346_v41 = vmul.f32 %v2752_v2, %v4015_v9  ;;  %v2755_v12 = vld [vmem:[%s5410_s1 + $0x1e8] sm:$0xff] }
 0x120   : > { %v1542_v19 = vmul.f32 %v2478_v34, %v1478_v37  ;;  %v1444_v54 = vadd.f32 %v1412_v14, %v1377_v25  ;;  %v1110_v4 = vadd.f32 %v1078_v60, %v1043_v46  ;;  %v1413_v47 = vmul.f32 %v2753_v48, %v4018_v22  ;;  %v2756_v46 = vld [vmem:[%s5410_s1 + $0x2e8] sm:$0xff] }
 0x121   : > { %v1275_v44 = vmul.f32 %v1243_v31, %v1211_v39  ;;  %v1044_v11 = vmul.f32 %v2754_v61, %v3978_v52  ;;  %2509 = vst [vmem:[%s3103_s24 + $0x1c8] sm:$0xff] %v1605_v40  ;;  %v1378_v34 = vadd.f32 %v1346_v41, %v1311_v55  ;;  %v1079_v14 = vmul.f32 %v2755_v12, %v3987_v56  ;;  %v1244_v39 = vld [vmem:[%s2934_s28 + $0xe0] sm:$0xff] }
 0x122   : > { %v1574_v53 = vadd.f32 %v1542_v19, %v1274_v24  ;;  %v1479_v16 = vadd.f32 %v4021_v58, %v1444_v54  ;;  %v1177_v7 = vadd.f32 %v1145_v32, %v1110_v4  ;;  %v1146_v49 = vmul.f32 %v2756_v46, %v3995_v1  ;;  %v2480_v32 = vld [vmem:[%s2934_s28 + $0x1e0] sm:$0xff]  ;;  %v2757_v19 = vld [vmem:[%s5410_s1 + $0xf0] sm:$0xff] }
 0x123   : > { %v1312_v24 = vmul.f32 %v2754_v61, %v4006_v45  ;;  %v1347_v37 = vmul.f32 %v2755_v12, %v4015_v9  ;;  %v1445_v2 = vadd.f32 %v1413_v47, %v1378_v34  ;;  %v1111_v60 = vadd.f32 %v1079_v14, %v1044_v11  ;;  %v2758_v47 = vld [vmem:[%s5410_s1 + $0x1f0] sm:$0xff] }
 0x124   : > { %v1606_v31 = vmul.f32 %v3841_v42, %v1574_v53  ;;  %v1543_v25 = vmul.f32 %v2479_v30, %v1479_v16  ;;  %v1212_v48 = vadd.f32 %v4003_v29, %v1177_v7  ;;  %v1414_v40 = vmul.f32 %v2756_v46, %v4018_v22  ;;  %v1245_v53 = vld [vmem:[%s2934_s28 + $0xe8] sm:$0xff] }
 0x125   : > { %v1379_v55 = vadd.f32 %v1347_v37, %v1312_v24  ;;  %v1045_v54 = vmul.f32 %v2757_v19, %v3978_v52  ;;  %v1480_v30 = vadd.f32 %v4021_v58, %v1445_v2  ;;  %v1178_v4 = vadd.f32 %v1146_v49, %v1111_v60  ;;  %v2481_v49 = vld [vmem:[%s2934_s28 + $0x1e8] sm:$0xff] }
 0x126   : > { %2510 = vst [vmem:[%s3103_s24 + $0x1d0] sm:$0xff] %v1606_v31  ;;  %v1575_v41 = vadd.f32 %v1543_v25, %v1275_v44  ;;  %v1080_v61 = vmul.f32 %v2758_v47, %v3987_v56  ;;  %v1276_v11 = vmul.f32 %v1244_v39, %v1212_v48  ;;  %v2759_v44 = vld [vmem:[%s5410_s1 + $0x2f0] sm:$0xff]  ;;  %v1313_v12 = vmul.f32 %v2757_v19, %v4006_v45  ;;  %v2760_v39 = vld [vmem:[%s5410_s1 + $0xf8] sm:$0xff] }
 0x127   : > { %v1446_v16 = vadd.f32 %v1414_v40, %v1379_v55  ;;  %v1147_v34 = vmul.f32 %v2759_v44, %v3995_v1  ;;  %v1544_v7 = vmul.f32 %v2480_v32, %v1480_v30  ;;  %v1213_v46 = vadd.f32 %v4003_v29, %v1178_v4  ;;  %v2761_v55 = vld [vmem:[%s5410_s1 + $0x1f8] sm:$0xff] }
 0x128   : > { %v1607_v14 = vmul.f32 %v3873_v62, %v1575_v41  ;;  %v1112_v24 = vadd.f32 %v1080_v61, %v1045_v54  ;;  %v1348_v31 = vmul.f32 %v2758_v47, %v4015_v9  ;;  %v1415_v25 = vmul.f32 %v2759_v44, %v4018_v22  ;;  %v1246_v54 = vld [vmem:[%s2934_s28 + $0xf0] sm:$0xff]  ;;  %v2762_v41 = vld [vmem:[%s5410_s1 + $0x2f8] sm:$0xff]  ;;  %v5425_v47 = vld [vmem:[#allocation5_spill] sm:$0xff] }
 0x129   : > { %v1481_v37 = vadd.f32 %v4021_v58, %v1446_v16  ;;  %v1046_v2 = vmul.f32 %v2760_v39, %v3978_v52  ;;  %v1576_v60 = vadd.f32 %v1544_v7, %v1276_v11  ;;  %v1277_v48 = vmul.f32 %v1245_v53, %v1213_v46  ;;  %v2763_v46 = vld [vmem:[%s5410_s1] sm:$0xff] }
 0x12a   : > { %2511 = vst [vmem:[%s3103_s24 + $0x1d8] sm:$0xff] %v1607_v14  ;;  %v1179_v32 = vadd.f32 %v1147_v34, %v1112_v24  ;;  %v1081_v40 = vmul.f32 %v2761_v55, %v3987_v56  ;;  %v1380_v52 = vadd.f32 %v1348_v31, %v1313_v12  ;;  %v1148_v30 = vmul.f32 %v2762_v41, %v3995_v1  ;;  %v2482_v12 = vld [vmem:[%s2934_s28 + $0x1f0] sm:$0xff] }
 0x12b   : > { %v1545_v19 = vmul.f32 %v2481_v49, %v1481_v37  ;;  %v1314_v4 = vmul.f32 %v2760_v39, %v4006_v45  ;;  %v1608_v56 = vmul.f32 %v5425_v47, %v1576_v60  ;;  %v1349_v53 = vmul.f32 %v2761_v55, %v4015_v9  ;;  %v5426_v49 = vld [vmem:[#allocation6_spill] sm:$0xff]  ;;  %v1247_v37 = vld [vmem:[%s2934_s28 + $0xf8] sm:$0xff]  ;;  %v2765_v55 = vld [vmem:[%s5410_s1 + $0x200] sm:$0xff] }
 0x12c   : > { %v1214_v61 = vadd.f32 %v4003_v29, %v1179_v32  ;;  %v1113_v11 = vadd.f32 %v1081_v40, %v1046_v2  ;;  %v1447_v44 = vadd.f32 %v1415_v25, %v1380_v52  ;;  %v1416_v34 = vmul.f32 %v2762_v41, %v4018_v22  ;;  %v2483_v60 = vld [vmem:[%s2934_s28 + $0x1f8] sm:$0xff] }
 0x12d   : > { %v1577_v16 = vadd.f32 %v1545_v19, %v1277_v48  ;;  %v4698_v1 = vstv %s4632_s16  ;;  %2512 = vst [vmem:[%s3103_s24 + $0x1e0] sm:$0xff] %v1608_v56  ;;  %v1381_v7 = vadd.f32 %v1349_v53, %v1314_v4  ;;  %v4710_v31 = vstv %s4642_s22  ;;  %v2764_v48 = vld [vmem:[%s5410_s1 + $0x100] sm:$0xff] }
 0x12e   : > { %v1278_v45 = vmul.f32 %v1246_v54, %v1214_v61  ;;  %v1180_v14 = vadd.f32 %v1148_v30, %v1113_v11  ;;  %v1648_v9 = vmul.f32 %v2763_v46, %v4698_v1  ;;  %v1482_v22 = vadd.f32 %v4021_v58, %v1447_v44 }
 0x12f   : > { %v1609_v24 = vmul.f32 %v5426_v49, %v1577_v16  ;;  %v4713_v25 = vstv %s4660_s21  ;;  %v1448_v2 = vadd.f32 %v1416_v34, %v1381_v7  ;;  %v1683_v32 = vmul.f32 %v2764_v48, %v4710_v31  ;;  %v5427_v7 = vld [vmem:[#allocation7_spill] sm:$0xff] }
 0x130   : > { %v1215_v39 = vadd.f32 %v4003_v29, %v1180_v14  ;;  %v1750_v40 = vmul.f32 %v2765_v55, %v4713_v25  ;;  %v1546_v19 = vmul.f32 %v2482_v12, %v1482_v22  ;;  %v4727_v54 = vstv %s4676_s9  ;;  %v2766_v14 = vld [vmem:[%s5410_s1 + $0x8] sm:$0xff] }
 0x131   : > { %2513 = vst [vmem:[%s3103_s24 + $0x1e8] sm:$0xff] %v1609_v24  ;;  %v4730_v29 = vstv %s4652_s27  ;;  %v4733_v52 = vstv %s4666_s6  ;;  %v1483_v30 = vadd.f32 %v4021_v58, %v1448_v2  ;;  %v1715_v4 = vadd.f32 %v1683_v32, %v1648_v9  ;;  %v2767_v24 = vld [vmem:[%s5410_s1 + $0x108] sm:$0xff] }
 0x132   : > { %v1279_v41 = vmul.f32 %v1247_v37, %v1215_v39  ;;  %v1916_v56 = vmul.f32 %v2763_v46, %v4730_v29  ;;  %v1578_v61 = vadd.f32 %v1546_v19, %v1278_v45  ;;  %v1951_v11 = vmul.f32 %v2764_v48, %v4733_v52  ;;  %v1849_v45 = vld [vmem:[%s2934_s28] sm:$0xff]  ;;  %v2768_v37 = vld [vmem:[%s5410_s1 + $0x208] sm:$0xff] }
 0x133   : > { %v4739_v53 = vstv %s4683_s11  ;;  %v4742_v16 = vstv %s4691_s17  ;;  %v1547_v44 = vmul.f32 %v2483_v60, %v1483_v30  ;;  %v1782_v34 = vadd.f32 %v1750_v40, %v1715_v4  ;;  %v2769_v30 = vld [vmem:[%s5410_s1 + $0x10] sm:$0xff] }
 0x134   : > { %v2018_v12 = vmul.f32 %v2765_v55, %v4739_v53  ;;  %v1649_v58 = vmul.f32 %v2766_v14, %v4698_v1  ;;  %v1610_v46 = vmul.f32 %v5427_v7, %v1578_v61  ;;  %v1983_v9 = vadd.f32 %v1951_v11, %v1916_v56  ;;  %v2516_v11 = vld [vmem:[%s2934_s28 + $0x100] sm:$0xff] }
 0x135   : > { %v1684_v22 = vmul.f32 %v2767_v24, %v4710_v31  ;;  %v1751_v39 = vmul.f32 %v2768_v37, %v4713_v25  ;;  %v1579_v2 = vadd.f32 %v1547_v44, %v1279_v41  ;;  %v1817_v60 = vadd.f32 %v4727_v54, %v1782_v34  ;;  %v5428_v41 = vld [vmem:[#allocation8_spill] sm:$0xff]  ;;  %v2770_v34 = vld [vmem:[%s5410_s1 + $0x110] sm:$0xff] }
 0x136   : > { %v1917_v48 = vmul.f32 %v2766_v14, %v4730_v29  ;;  %v1952_v32 = vmul.f32 %v2767_v24, %v4733_v52  ;;  %2514 = vst [vmem:[%s3103_s24 + $0x1f0] sm:$0xff] %v1610_v46  ;;  %v2050_v55 = vadd.f32 %v2018_v12, %v1983_v9  ;;  %v2019_v19 = vmul.f32 %v2768_v37, %v4739_v53  ;;  %v2771_v46 = vld [vmem:[%s5410_s1 + $0x210] sm:$0xff]  ;;  %v1850_v24 = vld [vmem:[%s2934_s28 + $0x8] sm:$0xff] }
 0x137   : > { %v1716_v40 = vadd.f32 %v1684_v22, %v1649_v58  ;;  %v1650_v4 = vmul.f32 %v2769_v30, %v4698_v1  ;;  %v1611_v56 = vmul.f32 %v5428_v41, %v1579_v2  ;;  %v1881_v61 = vmul.f32 %v1849_v45, %v1817_v60 }
 0x138   : > { %v1984_v44 = vadd.f32 %v1952_v32, %v1917_v48  ;;  %v1685_v12 = vmul.f32 %v2770_v34, %v4710_v31  ;;  %v2085_v14 = vadd.f32 %v4742_v16, %v2050_v55  ;;  %v1752_v9 = vmul.f32 %v2771_v46, %v4713_v25  ;;  %v2517_v32 = vld [vmem:[%s2934_s28 + $0x108] sm:$0xff]  ;;  %v2772_v55 = vld [vmem:[%s5410_s1 + $0x18] sm:$0xff] }
 0x139   : > { %v1783_v58 = vadd.f32 %v1751_v39, %v1716_v40  ;;  %v1918_v45 = vmul.f32 %v2769_v30, %v4730_v29  ;;  %2515 = vst [vmem:[%s3103_s24 + $0x1f8] sm:$0xff] %v1611_v56  ;;  %v1953_v2 = vmul.f32 %v2770_v34, %v4733_v52  ;;  %v2020_v60 = vmul.f32 %v2771_v46, %v4739_v53 }
 0x13a   : > { %v2051_v22 = vadd.f32 %v2019_v19, %v1984_v44  ;;  %v1717_v37 = vadd.f32 %v1685_v12, %v1650_v4  ;;  %v2149_v48 = vmul.f32 %v2516_v11, %v2085_v14  ;;  %v1651_v40 = vmul.f32 %v2772_v55, %v4698_v1  ;;  %v2773_v19 = vld [vmem:[%s5410_s1 + $0x118] sm:$0xff] }
 0x13b   : > { %v1818_v39 = vadd.f32 %v4727_v54, %v1783_v58  ;;  %v1686_v30 = vmul.f32 %v2773_v19, %v4710_v31  ;;  %v1985_v11 = vadd.f32 %v1953_v2, %v1918_v45  ;;  %v2774_v44 = vld [vmem:[%s5410_s1 + $0x218] sm:$0xff]  ;;  %v1851_v58 = vld [vmem:[%s2934_s28 + $0x10] sm:$0xff]  ;;  %v1919_v41 = vmul.f32 %v2772_v55, %v4730_v29 }
 0x13c   : > { %v2086_v4 = vadd.f32 %v4742_v16, %v2051_v22  ;;  %v1784_v56 = vadd.f32 %v1752_v9, %v1717_v37  ;;  %v1753_v34 = vmul.f32 %v2774_v44, %v4713_v25  ;;  %v2181_v12 = vadd.f32 %v2149_v48, %v1881_v61  ;;  %v2518_v37 = vld [vmem:[%s2934_s28 + $0x110] sm:$0xff]  ;;  %v2775_v61 = vld [vmem:[%s5410_s1 + $0x20] sm:$0xff] }
 0x13d   : > { %v1882_v14 = vmul.f32 %v1850_v24, %v1818_v39  ;;  %v1718_v46 = vadd.f32 %v1686_v30, %v1651_v40  ;;  %v2052_v22 = vadd.f32 %v2020_v60, %v1985_v11  ;;  %v1954_v9 = vmul.f32 %v2773_v19, %v4733_v52  ;;  %v1852_v60 = vld [vmem:[%s2934_s28 + $0x18] sm:$0xff]  ;;  %v2776_v40 = vld [vmem:[%s5410_s1 + $0x120] sm:$0xff] }
 0x13e   : > { %v2150_v7 = vmul.f32 %v2517_v32, %v2086_v4  ;;  %v1819_v49 = vadd.f32 %v4727_v54, %v1784_v56  ;;  %v2213_v45 = vmul.f32 %v3038_v51, %v2181_v12  ;;  %v2021_v47 = vmul.f32 %v2774_v44, %v4739_v53 }
 0x13f   : > { %v1785_v2 = vadd.f32 %v1753_v34, %v1718_v46  ;;  %v1652_v24 = vmul.f32 %v2775_v61, %v4698_v1  ;;  %v2087_v32 = vadd.f32 %v4742_v16, %v2052_v22  ;;  %v1986_v55 = vadd.f32 %v1954_v9, %v1919_v41  ;;  %v2519_v34 = vld [vmem:[%s2934_s28 + $0x118] sm:$0xff]  ;;  %v2779_v9 = vld [vmem:[%s5410_s1 + $0x128] sm:$0xff] }
 0x140   : > { %v2182_v48 = vadd.f32 %v2150_v7, %v1882_v14  ;;  %v1883_v39 = vmul.f32 %v1851_v58, %v1819_v49  ;;  %2548 = vst [vmem:[%s3103_s24 + $0x200] sm:$0xff] %v2213_v45  ;;  %v1687_v19 = vmul.f32 %v2776_v40, %v4710_v31  ;;  %v2777_v7 = vld [vmem:[%s5410_s1 + $0x220] sm:$0xff]  ;;  %v1920_v30 = vmul.f32 %v2775_v61, %v4730_v29  ;;  %v2778_v58 = vld [vmem:[%s5410_s1 + $0x28] sm:$0xff] }
 0x141   : > { %v1820_v51 = vadd.f32 %v4727_v54, %v1785_v2  ;;  %v1754_v49 = vmul.f32 %v2777_v7, %v4713_v25  ;;  %v2151_v4 = vmul.f32 %v2518_v37, %v2087_v32  ;;  %v2053_v56 = vadd.f32 %v2021_v47, %v1986_v55  ;;  %v2780_v2 = vld [vmem:[%s5410_s1 + $0x228] sm:$0xff] }
 0x142   : > { %v2214_v41 = vmul.f32 %v3048_v57, %v2182_v48  ;;  %v1955_v11 = vmul.f32 %v2776_v40, %v4733_v52  ;;  %v1719_v12 = vadd.f32 %v1687_v19, %v1652_v24  ;;  %v2022_v14 = vmul.f32 %v2777_v7, %v4739_v53  ;;  %v2520_v19 = vld [vmem:[%s2934_s28 + $0x120] sm:$0xff] }
 0x143   : > { %v1884_v44 = vmul.f32 %v1852_v60, %v1820_v51  ;;  %v1653_v46 = vmul.f32 %v2778_v58, %v4698_v1  ;;  %v2183_v22 = vadd.f32 %v2151_v4, %v1883_v39  ;;  %v2088_v57 = vadd.f32 %v4742_v16, %v2053_v56  ;;  %v1853_v60 = vld [vmem:[%s2934_s28 + $0x20] sm:$0xff] }
 0x144   : > { %2549 = vst [vmem:[%s3103_s24 + $0x208] sm:$0xff] %v2214_v41  ;;  %v1987_v47 = vadd.f32 %v1955_v11, %v1920_v30  ;;  %v1688_v45 = vmul.f32 %v2779_v9, %v4710_v31  ;;  %v1786_v37 = vadd.f32 %v1754_v49, %v1719_v12  ;;  %v1755_v61 = vmul.f32 %v2780_v2, %v4713_v25  ;;  %v2781_v30 = vld [vmem:[%s5410_s1 + $0x30] sm:$0xff] }
 0x145   : > { %v1921_v24 = vmul.f32 %v2778_v58, %v4730_v29  ;;  %v1956_v48 = vmul.f32 %v2779_v9, %v4733_v52  ;;  %v2215_v39 = vmul.f32 %v3057_v0, %v2183_v22  ;;  %v2152_v32 = vmul.f32 %v2519_v34, %v2088_v57  ;;  %v2782_v11 = vld [vmem:[%s5410_s1 + $0x130] sm:$0xff] }
 0x146   : > { %v2054_v55 = vadd.f32 %v2022_v14, %v1987_v47  ;;  %v1720_v51 = vadd.f32 %v1688_v45, %v1653_v46  ;;  %v1821_v40 = vadd.f32 %v4727_v54, %v1786_v37  ;;  %v2023_v49 = vmul.f32 %v2780_v2, %v4739_v53  ;;  %v1854_v14 = vld [vmem:[%s2934_s28 + $0x28] sm:$0xff]  ;;  %v2783_v46 = vld [vmem:[%s5410_s1 + $0x230] sm:$0xff] }
 0x147   : > { %v1988_v7 = vadd.f32 %v1956_v48, %v1921_v24  ;;  %v1654_v41 = vmul.f32 %v2781_v30, %v4698_v1  ;;  %2550 = vst [vmem:[%s3103_s24 + $0x210] sm:$0xff] %v2215_v39  ;;  %v2184_v0 = vadd.f32 %v2152_v32, %v1884_v44  ;;  %v1689_v34 = vmul.f32 %v2782_v11, %v4710_v31  ;;  %v2521_v45 = vld [vmem:[%s2934_s28 + $0x128] sm:$0xff]  ;;  %v2784_v48 = vld [vmem:[%s5410_s1 + $0x38] sm:$0xff] }
 0x148   : > { %v2089_v4 = vadd.f32 %v4742_v16, %v2054_v55  ;;  %v1787_v56 = vadd.f32 %v1755_v61, %v1720_v51  ;;  %v1885_v12 = vmul.f32 %v1853_v60, %v1821_v40  ;;  %v1756_v22 = vmul.f32 %v2783_v46, %v4713_v25  ;;  %v2785_v55 = vld [vmem:[%s5410_s1 + $0x138] sm:$0xff] }
 0x149   : > { %v2055_v58 = vadd.f32 %v2023_v49, %v1988_v7  ;;  %v1922_v44 = vmul.f32 %v2781_v30, %v4730_v29  ;;  %v2216_v57 = vmul.f32 %v3064_v8, %v2184_v0  ;;  %v1721_v37 = vadd.f32 %v1689_v34, %v1654_v41  ;;  %v2786_v49 = vld [vmem:[%s5410_s1 + $0x238] sm:$0xff] }
 0x14a   : > { %v2153_v47 = vmul.f32 %v2520_v19, %v2089_v4  ;;  %v1822_v9 = vadd.f32 %v4727_v54, %v1787_v56  ;;  %v1957_v61 = vmul.f32 %v2782_v11, %v4733_v52  ;;  %v2024_v24 = vmul.f32 %v2783_v46, %v4739_v53  ;;  %v1855_v19 = vld [vmem:[%s2934_s28 + $0x30] sm:$0xff] }
 0x14b   : > { %v2090_v2 = vadd.f32 %v4742_v16, %v2055_v58  ;;  %v1655_v39 = vmul.f32 %v2784_v48, %v4698_v1  ;;  %2551 = vst [vmem:[%s3103_s24 + $0x218] sm:$0xff] %v2216_v57  ;;  %v1788_v60 = vadd.f32 %v1756_v22, %v1721_v37  ;;  %v1690_v51 = vmul.f32 %v2785_v55, %v4710_v31  ;;  %v2787_v58 = vld [vmem:[%s5410_s1 + $0x40] sm:$0xff] }
 0x14c   : > { %v2185_v8 = vadd.f32 %v2153_v47, %v1885_v12  ;;  %v1886_v32 = vmul.f32 %v1854_v14, %v1822_v9  ;;  %v1989_v7 = vadd.f32 %v1957_v61, %v1922_v44  ;;  %v1757_v30 = vmul.f32 %v2786_v49, %v4713_v25  ;;  %v2788_v47 = vld [vmem:[%s5410_s1 + $0x140] sm:$0xff] }
 0x14d   : > { %v2154_v40 = vmul.f32 %v2521_v45, %v2090_v2  ;;  %v1923_v41 = vmul.f32 %v2784_v48, %v4730_v29  ;;  %v1823_v4 = vadd.f32 %v4727_v54, %v1788_v60  ;;  %v1722_v56 = vadd.f32 %v1690_v51, %v1655_v39  ;;  %v1856_v2 = vld [vmem:[%s2934_s28 + $0x38] sm:$0xff]  ;;  %v2789_v61 = vld [vmem:[%s5410_s1 + $0x240] sm:$0xff] }
 0x14e   : > { %v2217_v0 = vmul.f32 %v3149_v28, %v2185_v8  ;;  %v1958_v11 = vmul.f32 %v2785_v55, %v4733_v52  ;;  %v2056_v12 = vadd.f32 %v2024_v24, %v1989_v7  ;;  %v2025_v14 = vmul.f32 %v2786_v49, %v4739_v53  ;;  %v2522_v28 = vld [vmem:[%s2934_s28 + $0x130] sm:$0xff]  ;;  %v2523_v55 = vld [vmem:[%s2934_s28 + $0x138] sm:$0xff]  ;;  %v2791_v7 = vld [vmem:[%s5410_s1 + $0x148] sm:$0xff] }
 0x14f   : > { %v2186_v34 = vadd.f32 %v2154_v40, %v1886_v32  ;;  %v1656_v46 = vmul.f32 %v2787_v58, %v4698_v1  ;;  %v1887_v22 = vmul.f32 %v1855_v19, %v1823_v4  ;;  %v1789_v44 = vadd.f32 %v1757_v30, %v1722_v56  ;;  %v2790_v40 = vld [vmem:[%s5410_s1 + $0x48] sm:$0xff] }
 0x150   : > { %2552 = vst [vmem:[%s3103_s24 + $0x220] sm:$0xff] %v2217_v0  ;;  %v1990_v57 = vadd.f32 %v1958_v11, %v1923_v41  ;;  %v1691_v9 = vmul.f32 %v2788_v47, %v4710_v31  ;;  %v2091_v37 = vadd.f32 %v4742_v16, %v2056_v12  ;;  %v1758_v24 = vmul.f32 %v2789_v61, %v4713_v25  ;;  %v1857_v11 = vld [vmem:[%s2934_s28 + $0x40] sm:$0xff]  ;;  %v2792_v12 = vld [vmem:[%s5410_s1 + $0x248] sm:$0xff] }
 0x151   : > { %v2218_v45 = vmul.f32 %v3193_v3, %v2186_v34  ;;  %v1924_v48 = vmul.f32 %v2787_v58, %v4730_v29  ;;  %v1824_v39 = vadd.f32 %v4727_v54, %v1789_v44  ;;  %v1959_v60 = vmul.f32 %v2788_v47, %v4733_v52  ;;  %v2524_v47 = vld [vmem:[%s2934_s28 + $0x140] sm:$0xff] }
 0x152   : > { %v2057_v8 = vadd.f32 %v2025_v14, %v1990_v57  ;;  %v1723_v32 = vadd.f32 %v1691_v9, %v1656_v46  ;;  %v2155_v3 = vmul.f32 %v2522_v28, %v2091_v37  ;;  %v2026_v51 = vmul.f32 %v2789_v61, %v4739_v53  ;;  %v2793_v37 = vld [vmem:[%s5410_s1 + $0x50] sm:$0xff] }
 0x153   : > { %2553 = vst [vmem:[%s3103_s24 + $0x228] sm:$0xff] %v2218_v45  ;;  %v1657_v19 = vmul.f32 %v2790_v40, %v4698_v1  ;;  %v1692_v49 = vmul.f32 %v2791_v7, %v4710_v31  ;;  %v1888_v30 = vmul.f32 %v1856_v2, %v1824_v39  ;;  %v1991_v4 = vadd.f32 %v1959_v60, %v1924_v48  ;;  %v1858_v39 = vld [vmem:[%s2934_s28 + $0x48] sm:$0xff] }
 0x154   : > { %v2092_v41 = vadd.f32 %v4742_v16, %v2057_v8  ;;  %v1790_v0 = vadd.f32 %v1758_v24, %v1723_v32  ;;  %v2187_v56 = vadd.f32 %v2155_v3, %v1887_v22  ;;  %v1759_v14 = vmul.f32 %v2792_v12, %v4713_v25  ;;  %v2794_v32 = vld [vmem:[%s5410_s1 + $0x150] sm:$0xff] }
 0x155   : > { %v1724_v34 = vadd.f32 %v1692_v49, %v1657_v19  ;;  %v1925_v58 = vmul.f32 %v2790_v40, %v4730_v29  ;;  %v2058_v44 = vadd.f32 %v2026_v51, %v1991_v4  ;;  %v1960_v57 = vmul.f32 %v2791_v7, %v4733_v52  ;;  %v2795_v3 = vld [vmem:[%s5410_s1 + $0x250] sm:$0xff] }
 0x156   : > { %v2156_v46 = vmul.f32 %v2523_v55, %v2092_v41  ;;  %v1825_v28 = vadd.f32 %v4727_v54, %v1790_v0  ;;  %v2219_v22 = vmul.f32 %v3221_v35, %v2187_v56  ;;  %v2027_v45 = vmul.f32 %v2792_v12, %v4739_v53  ;;  %v2525_v41 = vld [vmem:[%s2934_s28 + $0x148] sm:$0xff]  ;;  %v2796_v56 = vld [vmem:[%s5410_s1 + $0x58] sm:$0xff] }
 0x157   : > { %v1791_v9 = vadd.f32 %v1759_v14, %v1724_v34  ;;  %v1658_v2 = vmul.f32 %v2793_v37, %v4698_v1  ;;  %v2093_v48 = vadd.f32 %v4742_v16, %v2058_v44  ;;  %v1992_v8 = vadd.f32 %v1960_v57, %v1925_v58  ;;  %v2797_v14 = vld [vmem:[%s5410_s1 + $0x158] sm:$0xff] }
 0x158   : > { %v2188_v61 = vadd.f32 %v2156_v46, %v1888_v30  ;;  %v1889_v24 = vmul.f32 %v1857_v11, %v1825_v28  ;;  %2554 = vst [vmem:[%s3103_s24 + $0x230] sm:$0xff] %v2219_v22  ;;  %v1693_v60 = vmul.f32 %v2794_v32, %v4710_v31  ;;  %v1760_v55 = vmul.f32 %v2795_v3, %v4713_v25  ;;  %v2798_v28 = vld [vmem:[%s5410_s1 + $0x258] sm:$0xff] }
 0x159   : > { %v1826_v35 = vadd.f32 %v4727_v54, %v1791_v9  ;;  %v1926_v51 = vmul.f32 %v2793_v37, %v4730_v29  ;;  %v2157_v19 = vmul.f32 %v2524_v47, %v2093_v48  ;;  %v2059_v7 = vadd.f32 %v2027_v45, %v1992_v8  ;;  %v1859_v45 = vld [vmem:[%s2934_s28 + $0x50] sm:$0xff]  ;;  %v2799_v8 = vld [vmem:[%s5410_s1 + $0x60] sm:$0xff] }
 0x15a   : > { %v2220_v40 = vmul.f32 %v3250_v21, %v2188_v61  ;;  %v1961_v49 = vmul.f32 %v2794_v32, %v4733_v52  ;;  %v1725_v0 = vadd.f32 %v1693_v60, %v1658_v2  ;;  %v2028_v4 = vmul.f32 %v2795_v3, %v4739_v53  ;;  %v2800_v3 = vld [vmem:[%s5410_s1 + $0x160] sm:$0xff] }
 0x15b   : > { %v1890_v30 = vmul.f32 %v1858_v39, %v1826_v35  ;;  %v1659_v11 = vmul.f32 %v2796_v56, %v4698_v1  ;;  %v2189_v34 = vadd.f32 %v2157_v19, %v1889_v24  ;;  %v2094_v21 = vadd.f32 %v4742_v16, %v2059_v7  ;;  %v2526_v24 = vld [vmem:[%s2934_s28 + $0x150] sm:$0xff]  ;;  %v2801_v7 = vld [vmem:[%s5410_s1 + $0x260] sm:$0xff] }
 0x15c   : > { %2555 = vst [vmem:[%s3103_s24 + $0x238] sm:$0xff] %v2220_v40  ;;  %v1993_v12 = vadd.f32 %v1961_v49, %v1926_v51  ;;  %v1694_v58 = vmul.f32 %v2797_v14, %v4710_v31  ;;  %v1792_v46 = vadd.f32 %v1760_v55, %v1725_v0  ;;  %v1761_v44 = vmul.f32 %v2798_v28, %v4713_v25  ;;  %v1860_v40 = vld [vmem:[%s2934_s28 + $0x58] sm:$0xff] }
 0x15d   : > { %v1927_v57 = vmul.f32 %v2796_v56, %v4730_v29  ;;  %v1962_v22 = vmul.f32 %v2797_v14, %v4733_v52  ;;  %v2221_v47 = vmul.f32 %v3286_v20, %v2189_v34  ;;  %v2158_v9 = vmul.f32 %v2525_v41, %v2094_v21  ;;  %v2527_v56 = vld [vmem:[%s2934_s28 + $0x158] sm:$0xff]  ;;  %v2802_v14 = vld [vmem:[%s5410_s1 + $0x68] sm:$0xff] }
 0x15e   : > { %v2060_v37 = vadd.f32 %v2028_v4, %v1993_v12  ;;  %v1726_v2 = vadd.f32 %v1694_v58, %v1659_v11  ;;  %v1827_v61 = vadd.f32 %v4727_v54, %v1792_v46  ;;  %v2029_v39 = vmul.f32 %v2798_v28, %v4739_v53 }
 0x15f   : > { %v1994_v48 = vadd.f32 %v1962_v22, %v1927_v57  ;;  %v1660_v35 = vmul.f32 %v2799_v8, %v4698_v1  ;;  %2556 = vst [vmem:[%s3103_s24 + $0x240] sm:$0xff] %v2221_v47  ;;  %v2190_v20 = vadd.f32 %v2158_v9, %v1890_v30  ;;  %v1695_v55 = vmul.f32 %v2800_v3, %v4710_v31  ;;  %v1861_v47 = vld [vmem:[%s2934_s28 + $0x60] sm:$0xff] }
 0x160   : > { %v2095_v32 = vadd.f32 %v4742_v16, %v2060_v37  ;;  %v1793_v60 = vadd.f32 %v1761_v44, %v1726_v2  ;;  %v1891_v51 = vmul.f32 %v1859_v45, %v1827_v61  ;;  %v1762_v49 = vmul.f32 %v2801_v7, %v4713_v25  ;;  %v2803_v44 = vld [vmem:[%s5410_s1 + $0x168] sm:$0xff] }
 0x161   : > { %v2061_v19 = vadd.f32 %v2029_v39, %v1994_v48  ;;  %v1928_v30 = vmul.f32 %v2799_v8, %v4730_v29  ;;  %v2222_v41 = vmul.f32 %v3313_v63, %v2190_v20  ;;  %v1727_v11 = vadd.f32 %v1695_v55, %v1660_v35  ;;  %v2804_v45 = vld [vmem:[%s5410_s1 + $0x268] sm:$0xff] }
 0x162   : > { %v2159_v0 = vmul.f32 %v2526_v24, %v2095_v32  ;;  %v1828_v4 = vadd.f32 %v4727_v54, %v1793_v60  ;;  %v1963_v21 = vmul.f32 %v2800_v3, %v4733_v52  ;;  %v2030_v12 = vmul.f32 %v2801_v7, %v4739_v53  ;;  %v2805_v32 = vld [vmem:[%s5410_s1 + $0x70] sm:$0xff] }
 0x163   : > { %v2096_v34 = vadd.f32 %v4742_v16, %v2061_v19  ;;  %v1661_v58 = vmul.f32 %v2802_v14, %v4698_v1  ;;  %2557 = vst [vmem:[%s3103_s24 + $0x248] sm:$0xff] %v2222_v41  ;;  %v1794_v28 = vadd.f32 %v1762_v49, %v1727_v11  ;;  %v1696_v57 = vmul.f32 %v2803_v44, %v4710_v31  ;;  %v2807_v41 = vld [vmem:[%s5410_s1 + $0x270] sm:$0xff] }
 0x164   : > { %v2191_v63 = vadd.f32 %v2159_v0, %v1891_v51  ;;  %v1892_v46 = vmul.f32 %v1860_v40, %v1828_v4  ;;  %v1995_v9 = vadd.f32 %v1963_v21, %v1928_v30  ;;  %v1763_v37 = vmul.f32 %v2804_v45, %v4713_v25  ;;  %v2806_v40 = vld [vmem:[%s5410_s1 + $0x170] sm:$0xff]  ;;  %v1862_v30 = vld [vmem:[%s2934_s28 + $0x68] sm:$0xff] }
 0x165   : > { %v2160_v22 = vmul.f32 %v2527_v56, %v2096_v34  ;;  %v1929_v2 = vmul.f32 %v2802_v14, %v4730_v29  ;;  %v1829_v24 = vadd.f32 %v4727_v54, %v1794_v28  ;;  %v1728_v48 = vadd.f32 %v1696_v57, %v1661_v58  ;;  %v2808_v58 = vld [vmem:[%s5410_s1 + $0x78] sm:$0xff] }
 0x166   : > { %v2223_v61 = vmul.f32 %v3345_v38, %v2191_v63  ;;  %v1964_v39 = vmul.f32 %v2803_v44, %v4733_v52  ;;  %v2062_v35 = vadd.f32 %v2030_v12, %v1995_v9  ;;  %v2031_v20 = vmul.f32 %v2804_v45, %v4739_v53  ;;  %v2528_v38 = vld [vmem:[%s2934_s28 + $0x160] sm:$0xff]  ;;  %v2529_v12 = vld [vmem:[%s2934_s28 + $0x168] sm:$0xff]  ;;  %v1863_v45 = vld [vmem:[%s2934_s28 + $0x70] sm:$0xff] }
 0x167   : > { %v2192_v8 = vadd.f32 %v2160_v22, %v1892_v46  ;;  %v1662_v60 = vmul.f32 %v2805_v32, %v4698_v1  ;;  %v1893_v3 = vmul.f32 %v1861_v47, %v1829_v24  ;;  %v1795_v55 = vadd.f32 %v1763_v37, %v1728_v48  ;;  %v2809_v46 = vld [vmem:[%s5410_s1 + $0x178] sm:$0xff] }
 0x168   : > { %2558 = vst [vmem:[%s3103_s24 + $0x250] sm:$0xff] %v2223_v61  ;;  %v1996_v51 = vadd.f32 %v1964_v39, %v1929_v2  ;;  %v1697_v19 = vmul.f32 %v2806_v40, %v4710_v31  ;;  %v2097_v49 = vadd.f32 %v4742_v16, %v2062_v35  ;;  %v1764_v0 = vmul.f32 %v2807_v41, %v4713_v25  ;;  %v2810_v2 = vld [vmem:[%s5410_s1 + $0x278] sm:$0xff] }
 0x169   : > { %v2224_v7 = vmul.f32 %v3377_v15, %v2192_v8  ;;  %v1930_v4 = vmul.f32 %v2805_v32, %v4730_v29  ;;  %v1830_v56 = vadd.f32 %v4727_v54, %v1795_v55  ;;  %v1965_v21 = vmul.f32 %v2806_v40, %v4733_v52  ;;  %v2530_v32 = vld [vmem:[%s2934_s28 + $0x170] sm:$0xff] }
 0x16a   : > { %v2063_v11 = vadd.f32 %v2031_v20, %v1996_v51  ;;  %v1729_v34 = vadd.f32 %v1697_v19, %v1662_v60  ;;  %v2161_v15 = vmul.f32 %v2528_v38, %v2097_v49  ;;  %v2032_v14 = vmul.f32 %v2807_v41, %v4739_v53  ;;  %v2811_v38 = vld [vmem:[%s5410_s1 + $0x80] sm:$0xff] }
 0x16b   : > { %2559 = vst [vmem:[%s3103_s24 + $0x258] sm:$0xff] %v2224_v7  ;;  %v1663_v63 = vmul.f32 %v2808_v58, %v4698_v1  ;;  %v1698_v28 = vmul.f32 %v2809_v46, %v4710_v31  ;;  %v1894_v44 = vmul.f32 %v1862_v30, %v1830_v56  ;;  %v1997_v47 = vadd.f32 %v1965_v21, %v1930_v4  ;;  %v1864_v7 = vld [vmem:[%s2934_s28 + $0x78] sm:$0xff]  ;;  %v2812_v30 = vld [vmem:[%s5410_s1 + $0x180] sm:$0xff] }
 0x16c   : > { %v2098_v57 = vadd.f32 %v4742_v16, %v2063_v11  ;;  %v1796_v22 = vadd.f32 %v1764_v0, %v1729_v34  ;;  %v2193_v9 = vadd.f32 %v2161_v15, %v1893_v3  ;;  %v1765_v61 = vmul.f32 %v2810_v2, %v4713_v25  ;;  %v2813_v0 = vld [vmem:[%s5410_s1 + $0x280] sm:$0xff] }
 0x16d   : > { %v1730_v37 = vadd.f32 %v1698_v28, %v1663_v63  ;;  %v1931_v24 = vmul.f32 %v2808_v58, %v4730_v29  ;;  %v2064_v8 = vadd.f32 %v2032_v14, %v1997_v47  ;;  %v1966_v35 = vmul.f32 %v2809_v46, %v4733_v52  ;;  %v2531_v14 = vld [vmem:[%s2934_s28 + $0x178] sm:$0xff]  ;;  %v2814_v46 = vld [vmem:[%s5410_s1 + $0x88] sm:$0xff] }
 0x16e   : > { %v2162_v48 = vmul.f32 %v2529_v12, %v2098_v57  ;;  %v1831_v39 = vadd.f32 %v4727_v54, %v1796_v22  ;;  %v2225_v20 = vmul.f32 %v3410_v43, %v2193_v9  ;;  %v2033_v3 = vmul.f32 %v2810_v2, %v4739_v53  ;;  %v2815_v22 = vld [vmem:[%s5410_s1 + $0x188] sm:$0xff] }
 0x16f   : > { %v1797_v60 = vadd.f32 %v1765_v61, %v1730_v37  ;;  %v1664_v55 = vmul.f32 %v2811_v38, %v4698_v1  ;;  %v2099_v19 = vadd.f32 %v4742_v16, %v2064_v8  ;;  %v1998_v49 = vadd.f32 %v1966_v35, %v1931_v24 }
 0x170   : > { %v2194_v51 = vadd.f32 %v2162_v48, %v1894_v44  ;;  %v1895_v40 = vmul.f32 %v1863_v45, %v1831_v39  ;;  %2560 = vst [vmem:[%s3103_s24 + $0x260] sm:$0xff] %v2225_v20  ;;  %v1699_v41 = vmul.f32 %v2812_v30, %v4710_v31  ;;  %v1766_v4 = vmul.f32 %v2813_v0, %v4713_v25  ;;  %v2816_v45 = vld [vmem:[%s5410_s1 + $0x288] sm:$0xff]  ;;  %v1865_v39 = vld [vmem:[%s2934_s28 + $0x80] sm:$0xff] }
 0x171   : > { %v1832_v43 = vadd.f32 %v4727_v54, %v1797_v60  ;;  %v1932_v56 = vmul.f32 %v2811_v38, %v4730_v29  ;;  %v2163_v34 = vmul.f32 %v2530_v32, %v2099_v19  ;;  %v2065_v21 = vadd.f32 %v2033_v3, %v1998_v49  ;;  %v2532_v32 = vld [vmem:[%s2934_s28 + $0x180] sm:$0xff]  ;;  %v2817_v38 = vld [vmem:[%s5410_s1 + $0x90] sm:$0xff] }
 0x172   : > { %v2226_v11 = vmul.f32 %v3441_v6, %v2194_v51  ;;  %v1967_v15 = vmul.f32 %v2812_v30, %v4733_v52  ;;  %v1731_v58 = vadd.f32 %v1699_v41, %v1664_v55  ;;  %v2034_v63 = vmul.f32 %v2813_v0, %v4739_v53  ;;  %v2818_v19 = vld [vmem:[%s5410_s1 + $0x190] sm:$0xff] }
 0x173   : > { %v1896_v12 = vmul.f32 %v1864_v7, %v1832_v43  ;;  %v1665_v28 = vmul.f32 %v2814_v46, %v4698_v1  ;;  %v2195_v44 = vadd.f32 %v2163_v34, %v1895_v40  ;;  %v2100_v6 = vadd.f32 %v4742_v16, %v2065_v21  ;;  %v1866_v43 = vld [vmem:[%s2934_s28 + $0x88] sm:$0xff]  ;;  %v2819_v41 = vld [vmem:[%s5410_s1 + $0x290] sm:$0xff] }
 0x174   : > { %2561 = vst [vmem:[%s3103_s24 + $0x268] sm:$0xff] %v2226_v11  ;;  %v1999_v57 = vadd.f32 %v1967_v15, %v1932_v56  ;;  %v1700_v47 = vmul.f32 %v2815_v22, %v4710_v31  ;;  %v1798_v9 = vadd.f32 %v1766_v4, %v1731_v58  ;;  %v1767_v37 = vmul.f32 %v2816_v45, %v4713_v25  ;;  %v2533_v21 = vld [vmem:[%s2934_s28 + $0x188] sm:$0xff] }
 0x175   : > { %v1933_v2 = vmul.f32 %v2814_v46, %v4730_v29  ;;  %v1968_v61 = vmul.f32 %v2815_v22, %v4733_v52  ;;  %v2227_v24 = vmul.f32 %v3469_v23, %v2195_v44  ;;  %v2164_v48 = vmul.f32 %v2531_v14, %v2100_v6  ;;  %v2821_v6 = vld [vmem:[%s5410_s1 + $0x198] sm:$0xff] }
 0x176   : > { %v2066_v8 = vadd.f32 %v2034_v63, %v1999_v57  ;;  %v1732_v35 = vadd.f32 %v1700_v47, %v1665_v28  ;;  %v1833_v20 = vadd.f32 %v4727_v54, %v1798_v9  ;;  %v2035_v3 = vmul.f32 %v2816_v45, %v4739_v53  ;;  %v2820_v63 = vld [vmem:[%s5410_s1 + $0x98] sm:$0xff]  ;;  %v1867_v47 = vld [vmem:[%s2934_s28 + $0x90] sm:$0xff] }
 0x177   : > { %v2000_v60 = vadd.f32 %v1968_v61, %v1933_v2  ;;  %v1666_v55 = vmul.f32 %v2817_v38, %v4698_v1  ;;  %2562 = vst [vmem:[%s3103_s24 + $0x270] sm:$0xff] %v2227_v24  ;;  %v2196_v23 = vadd.f32 %v2164_v48, %v1896_v12  ;;  %v1701_v7 = vmul.f32 %v2818_v19, %v4710_v31  ;;  %v2822_v45 = vld [vmem:[%s5410_s1 + $0x298] sm:$0xff] }
 0x178   : > { %v2101_v51 = vadd.f32 %v4742_v16, %v2066_v8  ;;  %v1799_v40 = vadd.f32 %v1767_v37, %v1732_v35  ;;  %v1897_v49 = vmul.f32 %v1865_v39, %v1833_v20  ;;  %v1768_v0 = vmul.f32 %v2819_v41, %v4713_v25 }
 0x179   : > { %v2067_v30 = vadd.f32 %v2035_v3, %v2000_v60  ;;  %v1934_v4 = vmul.f32 %v2817_v38, %v4730_v29  ;;  %v2228_v56 = vmul.f32 %v3501_v10, %v2196_v23  ;;  %v1733_v15 = vadd.f32 %v1701_v7, %v1666_v55  ;;  %v2824_v23 = vld [vmem:[%s5410_s1 + $0x1a0] sm:$0xff]  ;;  %v1868_v7 = vld [vmem:[%s2934_s28 + $0x98] sm:$0xff] }
 0x17a   : > { %v2165_v11 = vmul.f32 %v2532_v32, %v2101_v51  ;;  %v1834_v34 = vadd.f32 %v4727_v54, %v1799_v40  ;;  %v1969_v14 = vmul.f32 %v2818_v19, %v4733_v52  ;;  %v2036_v58 = vmul.f32 %v2819_v41, %v4739_v53  ;;  %v2823_v32 = vld [vmem:[%s5410_s1 + $0xa0] sm:$0xff] }
 0x17b   : > { %v2102_v12 = vadd.f32 %v4742_v16, %v2067_v30  ;;  %v1667_v46 = vmul.f32 %v2820_v63, %v4698_v1  ;;  %2563 = vst [vmem:[%s3103_s24 + $0x278] sm:$0xff] %v2228_v56  ;;  %v1800_v44 = vadd.f32 %v1768_v0, %v1733_v15  ;;  %v1702_v57 = vmul.f32 %v2821_v6, %v4710_v31 }
 0x17c   : > { %v2197_v10 = vadd.f32 %v2165_v11, %v1897_v49  ;;  %v1898_v28 = vmul.f32 %v1866_v43, %v1834_v34  ;;  %v2001_v9 = vadd.f32 %v1969_v14, %v1934_v4  ;;  %v1769_v37 = vmul.f32 %v2822_v45, %v4713_v25  ;;  %v2825_v49 = vld [vmem:[%s5410_s1 + $0x2a0] sm:$0xff]  ;;  %v2535_v11 = vld [vmem:[%s2934_s28 + $0x198] sm:$0xff] }
 0x17d   : > { %v2166_v22 = vmul.f32 %v2533_v21, %v2102_v12  ;;  %v1935_v2 = vmul.f32 %v2820_v63, %v4730_v29  ;;  %v1835_v24 = vadd.f32 %v4727_v54, %v1800_v44  ;;  %v1734_v48 = vadd.f32 %v1702_v57, %v1667_v46  ;;  %v2826_v21 = vld [vmem:[%s5410_s1 + $0xa8] sm:$0xff]  ;;  %v1869_v44 = vld [vmem:[%s2934_s28 + $0xa0] sm:$0xff] }
 0x17e   : > { %v2229_v61 = vmul.f32 %v3534_v18, %v2197_v10  ;;  %v1970_v39 = vmul.f32 %v2821_v6, %v4733_v52  ;;  %v2068_v35 = vadd.f32 %v2036_v58, %v2001_v9  ;;  %v2037_v20 = vmul.f32 %v2822_v45, %v4739_v53  ;;  %v2534_v18 = vld [vmem:[%s2934_s28 + $0x190] sm:$0xff]  ;;  %v2827_v12 = vld [vmem:[%s5410_s1 + $0x1a8] sm:$0xff] }
 0x17f   : > { %v2198_v8 = vadd.f32 %v2166_v22, %v1898_v28  ;;  %v1668_v60 = vmul.f32 %v2823_v32, %v4698_v1  ;;  %v1899_v3 = vmul.f32 %v1867_v47, %v1835_v24  ;;  %v1801_v38 = vadd.f32 %v1769_v37, %v1734_v48  ;;  %v2828_v57 = vld [vmem:[%s5410_s1 + $0x2a8] sm:$0xff]  ;;  %v2536_v24 = vld [vmem:[%s2934_s28 + $0x1a0] sm:$0xff] }
 0x180   : > { %2564 = vst [vmem:[%s3103_s24 + $0x280] sm:$0xff] %v2229_v61  ;;  %v2002_v55 = vadd.f32 %v1970_v39, %v1935_v2  ;;  %v1703_v51 = vmul.f32 %v2824_v23, %v4710_v31  ;;  %v2103_v19 = vadd.f32 %v4742_v16, %v2068_v35  ;;  %v1770_v43 = vmul.f32 %v2825_v49, %v4713_v25 }
 0x181   : > { %v2230_v40 = vmul.f32 %v3565_v59, %v2198_v8  ;;  %v1936_v30 = vmul.f32 %v2823_v32, %v4730_v29  ;;  %v1836_v41 = vadd.f32 %v4727_v54, %v1801_v38  ;;  %v1971_v56 = vmul.f32 %v2824_v23, %v4733_v52  ;;  %v2829_v8 = vld [vmem:[%s5410_s1 + $0xb0] sm:$0xff] }
 0x182   : > { %v2069_v0 = vadd.f32 %v2037_v20, %v2002_v55  ;;  %v1735_v4 = vadd.f32 %v1703_v51, %v1668_v60  ;;  %v2167_v59 = vmul.f32 %v2534_v18, %v2103_v19  ;;  %v2038_v34 = vmul.f32 %v2825_v49, %v4739_v53  ;;  %v2830_v38 = vld [vmem:[%s5410_s1 + $0x1b0] sm:$0xff] }
 0x183   : > { %2565 = vst [vmem:[%s3103_s24 + $0x288] sm:$0xff] %v2230_v40  ;;  %v1669_v15 = vmul.f32 %v2826_v21, %v4698_v1  ;;  %v1704_v14 = vmul.f32 %v2827_v12, %v4710_v31  ;;  %v1900_v58 = vmul.f32 %v1868_v7, %v1836_v41  ;;  %v2003_v10 = vadd.f32 %v1971_v56, %v1936_v30  ;;  %v2831_v23 = vld [vmem:[%s5410_s1 + $0x2b0] sm:$0xff]  ;;  %v2537_v41 = vld [vmem:[%s2934_s28 + $0x1a8] sm:$0xff]  ;;  %v2832_v56 = vld [vmem:[%s5410_s1 + $0xb8] sm:$0xff] }
 0x184   : > { %v2104_v63 = vadd.f32 %v4742_v16, %v2069_v0  ;;  %v1802_v46 = vadd.f32 %v1770_v43, %v1735_v4  ;;  %v2199_v28 = vadd.f32 %v2167_v59, %v1899_v3  ;;  %v1771_v22 = vmul.f32 %v2828_v57, %v4713_v25  ;;  %v1870_v3 = vld [vmem:[%s2934_s28 + $0xa8] sm:$0xff] }
 0x185   : > { %v1736_v6 = vadd.f32 %v1704_v14, %v1669_v15  ;;  %v1937_v47 = vmul.f32 %v2826_v21, %v4730_v29  ;;  %v2070_v37 = vadd.f32 %v2038_v34, %v2003_v10  ;;  %v1972_v2 = vmul.f32 %v2827_v12, %v4733_v52  ;;  %v2833_v21 = vld [vmem:[%s5410_s1 + $0x1b8] sm:$0xff] }
 0x186   : > { %v2168_v9 = vmul.f32 %v2535_v11, %v2104_v63  ;;  %v1837_v45 = vadd.f32 %v4727_v54, %v1802_v46  ;;  %v2231_v61 = vmul.f32 %v3593_v33, %v2199_v28  ;;  %v2039_v39 = vmul.f32 %v2828_v57, %v4739_v53  ;;  %v2834_v14 = vld [vmem:[%s5410_s1 + $0x2b8] sm:$0xff] }
 0x187   : > { %v1803_v48 = vadd.f32 %v1771_v22, %v1736_v6  ;;  %v1670_v35 = vmul.f32 %v2829_v8, %v4698_v1  ;;  %v2105_v60 = vadd.f32 %v4742_v16, %v2070_v37  ;;  %v2004_v18 = vadd.f32 %v1972_v2, %v1937_v47  ;;  %v2538_v47 = vld [vmem:[%s2934_s28 + $0x1b0] sm:$0xff]  ;;  %v2835_v37 = vld [vmem:[%s5410_s1 + $0xc0] sm:$0xff] }
 0x188   : > { %v2200_v20 = vadd.f32 %v2168_v9, %v1900_v58  ;;  %v1901_v32 = vmul.f32 %v1869_v44, %v1837_v45  ;;  %2566 = vst [vmem:[%s3103_s24 + $0x290] sm:$0xff] %v2231_v61  ;;  %v1705_v55 = vmul.f32 %v2830_v38, %v4710_v31  ;;  %v1772_v51 = vmul.f32 %v2831_v23, %v4713_v25  ;;  %v1871_v44 = vld [vmem:[%s2934_s28 + $0xb0] sm:$0xff] }
 0x189   : > { %v1838_v33 = vadd.f32 %v4727_v54, %v1803_v48  ;;  %v1938_v40 = vmul.f32 %v2829_v8, %v4730_v29  ;;  %v2169_v7 = vmul.f32 %v2536_v24, %v2105_v60  ;;  %v2071_v49 = vadd.f32 %v2039_v39, %v2004_v18  ;;  %v2836_v48 = vld [vmem:[%s5410_s1 + $0x1c0] sm:$0xff] }
 0x18a   : > { %v2232_v19 = vmul.f32 %v3625_v17, %v2200_v20  ;;  %v1973_v43 = vmul.f32 %v2830_v38, %v4733_v52  ;;  %v1737_v0 = vadd.f32 %v1705_v55, %v1670_v35  ;;  %v2040_v4 = vmul.f32 %v2831_v23, %v4739_v53  ;;  %v1872_v35 = vld [vmem:[%s2934_s28 + $0xb8] sm:$0xff] }
 0x18b   : > { %v1902_v30 = vmul.f32 %v1870_v3, %v1838_v33  ;;  %v1671_v59 = vmul.f32 %v2832_v56, %v4698_v1  ;;  %v2201_v11 = vadd.f32 %v2169_v7, %v1901_v32  ;;  %v2106_v17 = vadd.f32 %v4742_v16, %v2071_v49  ;;  %v2837_v32 = vld [vmem:[%s5410_s1 + $0x2c0] sm:$0xff]  ;;  %v2539_v55 = vld [vmem:[%s2934_s28 + $0x1b8] sm:$0xff]  ;;  %v2838_v7 = vld [vmem:[%s5410_s1 + $0xc8] sm:$0xff] }
 0x18c   : > { %2567 = vst [vmem:[%s3103_s24 + $0x298] sm:$0xff] %v2232_v19  ;;  %v2005_v34 = vadd.f32 %v1973_v43, %v1938_v40  ;;  %v1706_v15 = vmul.f32 %v2833_v21, %v4710_v31  ;;  %v1804_v12 = vadd.f32 %v1772_v51, %v1737_v0  ;;  %v1773_v58 = vmul.f32 %v2834_v14, %v4713_v25 }
 0x18d   : > { %v1939_v63 = vmul.f32 %v2832_v56, %v4730_v29  ;;  %v1974_v46 = vmul.f32 %v2833_v21, %v4733_v52  ;;  %v2233_v10 = vmul.f32 %v3658_v26, %v2201_v11  ;;  %v2170_v28 = vmul.f32 %v2537_v41, %v2106_v17  ;;  %v2839_v41 = vld [vmem:[%s5410_s1 + $0x1c8] sm:$0xff]  ;;  %v1873_v56 = vld [vmem:[%s2934_s28 + $0xc0] sm:$0xff] }
 0x18e   : > { %v2072_v6 = vadd.f32 %v2040_v4, %v2005_v34  ;;  %v1738_v57 = vadd.f32 %v1706_v15, %v1671_v59  ;;  %v1839_v22 = vadd.f32 %v4727_v54, %v1804_v12  ;;  %v2041_v45 = vmul.f32 %v2834_v14, %v4739_v53  ;;  %v2840_v11 = vld [vmem:[%s5410_s1 + $0x2c8] sm:$0xff] }
 0x18f   : > { %v2006_v9 = vadd.f32 %v1974_v46, %v1939_v63  ;;  %v1672_v2 = vmul.f32 %v2835_v37, %v4698_v1  ;;  %2568 = vst [vmem:[%s3103_s24 + $0x2a0] sm:$0xff] %v2233_v10  ;;  %v2202_v26 = vadd.f32 %v2170_v28, %v1902_v30  ;;  %v1707_v39 = vmul.f32 %v2836_v48, %v4710_v31  ;;  %v2841_v10 = vld [vmem:[%s5410_s1 + $0xd0] sm:$0xff] }
 0x190   : > { %v2107_v61 = vadd.f32 %v4742_v16, %v2072_v6  ;;  %v1805_v24 = vadd.f32 %v1773_v58, %v1738_v57  ;;  %v1903_v8 = vmul.f32 %v1871_v44, %v1839_v22  ;;  %v1774_v60 = vmul.f32 %v2837_v32, %v4713_v25  ;;  %v2842_v22 = vld [vmem:[%s5410_s1 + $0x1d0] sm:$0xff] }
 0x191   : > { %v2073_v20 = vadd.f32 %v2041_v45, %v2006_v9  ;;  %v1940_v3 = vmul.f32 %v2835_v37, %v4730_v29  ;;  %v2234_v18 = vmul.f32 %v3689_v50, %v2202_v26  ;;  %v1739_v23 = vadd.f32 %v1707_v39, %v1672_v2  ;;  %v1874_v37 = vld [vmem:[%s2934_s28 + $0xc8] sm:$0xff]  ;;  %v2843_v2 = vld [vmem:[%s5410_s1 + $0x2d0] sm:$0xff] }
 0x192   : > { %v2171_v33 = vmul.f32 %v2538_v47, %v2107_v61  ;;  %v1840_v38 = vadd.f32 %v4727_v54, %v1805_v24  ;;  %v1975_v40 = vmul.f32 %v2836_v48, %v4733_v52  ;;  %v2042_v19 = vmul.f32 %v2837_v32, %v4739_v53  ;;  %v2844_v32 = vld [vmem:[%s5410_s1 + $0xd8] sm:$0xff] }
 0x193   : > { %v2108_v51 = vadd.f32 %v4742_v16, %v2073_v20  ;;  %v1673_v49 = vmul.f32 %v2838_v7, %v4698_v1  ;;  %2569 = vst [vmem:[%s3103_s24 + $0x2a8] sm:$0xff] %v2234_v18  ;;  %v1806_v30 = vadd.f32 %v1774_v60, %v1739_v23  ;;  %v1708_v0 = vmul.f32 %v2839_v41, %v4710_v31 }
 0x194   : > { %v2203_v50 = vadd.f32 %v2171_v33, %v1903_v8  ;;  %v1904_v43 = vmul.f32 %v1872_v35, %v1840_v38  ;;  %v2007_v59 = vadd.f32 %v1975_v40, %v1940_v3  ;;  %v1775_v17 = vmul.f32 %v2840_v11, %v4713_v25  ;;  %v2541_v35 = vld [vmem:[%s2934_s28 + $0x1c8] sm:$0xff]  ;;  %v2845_v3 = vld [vmem:[%s5410_s1 + $0x1d8] sm:$0xff]  ;;  %v1875_v40 = vld [vmem:[%s2934_s28 + $0xd0] sm:$0xff] }
 0x195   : > { %v2172_v4 = vmul.f32 %v2539_v55, %v2108_v51  ;;  %v1941_v34 = vmul.f32 %v2838_v7, %v4730_v29  ;;  %v1841_v15 = vadd.f32 %v4727_v54, %v1806_v30  ;;  %v1740_v12 = vadd.f32 %v1708_v0, %v1673_v49  ;;  %v2846_v7 = vld [vmem:[%s5410_s1 + $0x2d8] sm:$0xff] }
 0x196   : > { %v2235_v21 = vmul.f32 %v3717_v13, %v2203_v50  ;;  %v1976_v14 = vmul.f32 %v2839_v41, %v4733_v52  ;;  %v2074_v63 = vadd.f32 %v2042_v19, %v2007_v59  ;;  %v2043_v46 = vmul.f32 %v2840_v11, %v4739_v53  ;;  %v2540_v13 = vld [vmem:[%s2934_s28 + $0x1c0] sm:$0xff] }
 0x197   : > { %v2204_v58 = vadd.f32 %v2172_v4, %v1904_v43  ;;  %v1674_v28 = vmul.f32 %v2841_v10, %v4698_v1  ;;  %v1905_v44 = vmul.f32 %v1873_v56, %v1841_v15  ;;  %v1807_v6 = vadd.f32 %v1775_v17, %v1740_v12  ;;  %v2542_v56 = vld [vmem:[%s2934_s28 + $0x1d0] sm:$0xff]  ;;  %v2847_v17 = vld [vmem:[%s5410_s1 + $0xe0] sm:$0xff] }
 0x198   : > { %2570 = vst [vmem:[%s3103_s24 + $0x2b0] sm:$0xff] %v2235_v21  ;;  %v2008_v57 = vadd.f32 %v1976_v14, %v1941_v34  ;;  %v1709_v47 = vmul.f32 %v2842_v22, %v4710_v31  ;;  %v2109_v45 = vadd.f32 %v4742_v16, %v2074_v63  ;;  %v1776_v26 = vmul.f32 %v2843_v2, %v4713_v25  ;;  %v1876_v14 = vld [vmem:[%s2934_s28 + $0xd8] sm:$0xff]  ;;  %v2848_v63 = vld [vmem:[%s5410_s1 + $0x1e0] sm:$0xff] }
 0x199   : > { %v2236_v9 = vmul.f32 %v3749_v27, %v2204_v58  ;;  %v1942_v61 = vmul.f32 %v2841_v10, %v4730_v29  ;;  %v1842_v24 = vadd.f32 %v4727_v54, %v1807_v6  ;;  %v1977_v8 = vmul.f32 %v2842_v22, %v4733_v52  ;;  %v2849_v10 = vld [vmem:[%s5410_s1 + $0x2e0] sm:$0xff] }
 0x19a   : > { %v2075_v48 = vadd.f32 %v2043_v46, %v2008_v57  ;;  %v1741_v39 = vadd.f32 %v1709_v47, %v1674_v28  ;;  %v2173_v27 = vmul.f32 %v2540_v13, %v2109_v45  ;;  %v2044_v20 = vmul.f32 %v2843_v2, %v4739_v53  ;;  %v2850_v2 = vld [vmem:[%s5410_s1 + $0xe8] sm:$0xff] }
 0x19b   : > { %2571 = vst [vmem:[%s3103_s24 + $0x2b8] sm:$0xff] %v2236_v9  ;;  %v1675_v60 = vmul.f32 %v2844_v32, %v4698_v1  ;;  %v1710_v18 = vmul.f32 %v2845_v3, %v4710_v31  ;;  %v1906_v33 = vmul.f32 %v1874_v37, %v1842_v24  ;;  %v2009_v23 = vadd.f32 %v1977_v8, %v1942_v61  ;;  %v2543_v9 = vld [vmem:[%s2934_s28 + $0x1d8] sm:$0xff] }
 0x19c   : > { %v2110_v38 = vadd.f32 %v4742_v16, %v2075_v48  ;;  %v1808_v55 = vadd.f32 %v1776_v26, %v1741_v39  ;;  %v2205_v51 = vadd.f32 %v2173_v27, %v1905_v44  ;;  %v1777_v49 = vmul.f32 %v2846_v7, %v4713_v25  ;;  %v2851_v48 = vld [vmem:[%s5410_s1 + $0x1e8] sm:$0xff] }
 0x19d   : > { %v1742_v19 = vadd.f32 %v1710_v18, %v1675_v60  ;;  %v1943_v50 = vmul.f32 %v2844_v32, %v4730_v29  ;;  %v2076_v41 = vadd.f32 %v2044_v20, %v2009_v23  ;;  %v1978_v0 = vmul.f32 %v2845_v3, %v4733_v52  ;;  %v2852_v27 = vld [vmem:[%s5410_s1 + $0x2e8] sm:$0xff]  ;;  %v1877_v18 = vld [vmem:[%s2934_s28 + $0xe0] sm:$0xff] }
 0x19e   : > { %v2174_v43 = vmul.f32 %v2541_v35, %v2110_v38  ;;  %v1843_v30 = vadd.f32 %v4727_v54, %v1808_v55  ;;  %v2237_v4 = vmul.f32 %v3782_v5, %v2205_v51  ;;  %v2045_v11 = vmul.f32 %v2846_v7, %v4739_v53  ;;  %v2544_v23 = vld [vmem:[%s2934_s28 + $0x1e0] sm:$0xff] }
 0x19f   : > { %v1809_v59 = vadd.f32 %v1777_v49, %v1742_v19  ;;  %v1676_v34 = vmul.f32 %v2847_v17, %v4698_v1  ;;  %v2111_v12 = vadd.f32 %v4742_v16, %v2076_v41  ;;  %v2010_v58 = vadd.f32 %v1978_v0, %v1943_v50  ;;  %v2853_v19 = vld [vmem:[%s5410_s1 + $0xf0] sm:$0xff]  ;;  %v1878_v0 = vld [vmem:[%s2934_s28 + $0xe8] sm:$0xff] }
 0x1a0   : > { %v2206_v21 = vadd.f32 %v2174_v43, %v1906_v33  ;;  %v1907_v15 = vmul.f32 %v1875_v40, %v1843_v30  ;;  %2572 = vst [vmem:[%s3103_s24 + $0x2c0] sm:$0xff] %v2237_v4  ;;  %v1711_v46 = vmul.f32 %v2848_v63, %v4710_v31  ;;  %v1778_v28 = vmul.f32 %v2849_v10, %v4713_v25  ;;  %v2854_v43 = vld [vmem:[%s5410_s1 + $0x1f0] sm:$0xff] }
 0x1a1   : > { %v1844_v5 = vadd.f32 %v4727_v54, %v1809_v59  ;;  %v1944_v44 = vmul.f32 %v2847_v17, %v4730_v29  ;;  %v2175_v6 = vmul.f32 %v2542_v56, %v2111_v12  ;;  %v2077_v57 = vadd.f32 %v2045_v11, %v2010_v58  ;;  %v2855_v56 = vld [vmem:[%s5410_s1 + $0x2f0] sm:$0xff] }
 0x1a2   : > { %v2238_v13 = vmul.f32 %v3813_v36, %v2206_v21  ;;  %v1979_v22 = vmul.f32 %v2848_v63, %v4733_v52  ;;  %v1743_v45 = vadd.f32 %v1711_v46, %v1676_v34  ;;  %v2046_v37 = vmul.f32 %v2849_v10, %v4739_v53  ;;  %v2856_v63 = vld [vmem:[%s5410_s1 + $0xf8] sm:$0xff] }
 0x1a3   : > { %v1908_v47 = vmul.f32 %v1876_v14, %v1844_v5  ;;  %v1677_v26 = vmul.f32 %v2850_v2, %v4698_v1  ;;  %v2207_v61 = vadd.f32 %v2175_v6, %v1907_v15  ;;  %v2112_v36 = vadd.f32 %v4742_v16, %v2077_v57  ;;  %v2545_v15 = vld [vmem:[%s2934_s28 + $0x1e8] sm:$0xff] }
 0x1a4   : > { %2573 = vst [vmem:[%s3103_s24 + $0x2c8] sm:$0xff] %v2238_v13  ;;  %v2011_v24 = vadd.f32 %v1979_v22, %v1944_v44  ;;  %v1712_v39 = vmul.f32 %v2851_v48, %v4710_v31  ;;  %v1810_v8 = vadd.f32 %v1778_v28, %v1743_v45  ;;  %v1779_v35 = vmul.f32 %v2852_v27, %v4713_v25  ;;  %v2857_v44 = vld [vmem:[%s5410_s1 + $0x1f8] sm:$0xff] }
 0x1a5   : > { %v1945_v20 = vmul.f32 %v2850_v2, %v4730_v29  ;;  %v1980_v32 = vmul.f32 %v2851_v48, %v4733_v52  ;;  %v2239_v60 = vmul.f32 %v3841_v42, %v2207_v61  ;;  %v2176_v3 = vmul.f32 %v2543_v9, %v2112_v36  ;;  %v2858_v22 = vld [vmem:[%s5410_s1 + $0x2f8] sm:$0xff]  ;;  %v5429_v9 = vld [vmem:[#allocation5_spill] sm:$0xff]  ;;  %v1879_v2 = vld [vmem:[%s2934_s28 + $0xf0] sm:$0xff] }
 0x1a6   : > { %v2078_v33 = vadd.f32 %v2046_v37, %v2011_v24  ;;  %v1744_v38 = vadd.f32 %v1712_v39, %v1677_v26  ;;  %v1845_v55 = vadd.f32 %v4727_v54, %v1810_v8  ;;  %v2047_v40 = vmul.f32 %v2852_v27, %v4739_v53  ;;  %v2546_v48 = vld [vmem:[%s2934_s28 + $0x1f0] sm:$0xff] }
 0x1a7   : > { %v2012_v51 = vadd.f32 %v1980_v32, %v1945_v20  ;;  %v1678_v7 = vmul.f32 %v2853_v19, %v4698_v1  ;;  %2574 = vst [vmem:[%s3103_s24 + $0x2d0] sm:$0xff] %v2239_v60  ;;  %v2208_v42 = vadd.f32 %v2176_v3, %v1908_v47  ;;  %v1713_v30 = vmul.f32 %v2854_v43, %v4710_v31  ;;  %v1880_v20 = vld [vmem:[%s2934_s28 + $0xf8] sm:$0xff] }
 0x1a8   : > { %v2113_v49 = vadd.f32 %v4742_v16, %v2078_v33  ;;  %v1811_v50 = vadd.f32 %v1779_v35, %v1744_v38  ;;  %v1909_v41 = vmul.f32 %v1877_v18, %v1845_v55  ;;  %v1780_v59 = vmul.f32 %v2855_v56, %v4713_v25  ;;  %v2547_v3 = vld [vmem:[%s2934_s28 + $0x1f8] sm:$0xff]  ;;  %v5431_v55 = vld [vmem:[#allocation7_spill] sm:$0xff] }
 0x1a9   : > { %v2079_v4 = vadd.f32 %v2047_v40, %v2012_v51  ;;  %v1946_v11 = vmul.f32 %v2853_v19, %v4730_v29  ;;  %v2240_v17 = vmul.f32 %v3873_v62, %v2208_v42  ;;  %v1745_v12 = vadd.f32 %v1713_v30, %v1678_v7  ;;  %v5432_v40 = vld [vmem:[#allocation8_spill] sm:$0xff] }
 0x1aa   : > { %v2177_v34 = vmul.f32 %v2544_v23, %v2113_v49  ;;  %v1846_v21 = vadd.f32 %v4727_v54, %v1811_v50  ;;  %v1981_v58 = vmul.f32 %v2854_v43, %v4733_v52  ;;  %v2048_v5 = vmul.f32 %v2855_v56, %v4739_v53 }
 0x1ab   : > { %v2114_v14 = vadd.f32 %v4742_v16, %v2079_v4  ;;  %v1679_v46 = vmul.f32 %v2856_v63, %v4698_v1  ;;  %2575 = vst [vmem:[%s3103_s24 + $0x2d8] sm:$0xff] %v2240_v17  ;;  %v1812_v28 = vadd.f32 %v1780_v59, %v1745_v12  ;;  %v1714_v13 = vmul.f32 %v2857_v44, %v4710_v31 }
 0x1ac   : > { %v2209_v62 = vadd.f32 %v2177_v34, %v1909_v41  ;;  %v1910_v10 = vmul.f32 %v1878_v0, %v1846_v21  ;;  %v2013_v57 = vadd.f32 %v1981_v58, %v1946_v11  ;;  %v1781_v1 = vmul.f32 %v2858_v22, %v4713_v25 }
 0x1ad   : > { %v2178_v6 = vmul.f32 %v2545_v15, %v2114_v14  ;;  %v1947_v47 = vmul.f32 %v2856_v63, %v4730_v29  ;;  %v1847_v37 = vadd.f32 %v4727_v54, %v1812_v28  ;;  %v1746_v26 = vadd.f32 %v1714_v13, %v1679_v46  ;;  %v5430_v29 = vld [vmem:[#allocation6_spill] sm:$0xff] }
 0x1ae   : > { %v2241_v45 = vmul.f32 %v5429_v9, %v2209_v62  ;;  %v1982_v31 = vmul.f32 %v2857_v44, %v4733_v52  ;;  %v2080_v36 = vadd.f32 %v2048_v5, %v2013_v57  ;;  %v2049_v24 = vmul.f32 %v2858_v22, %v4739_v53 }
 0x1af   : > { %v2210_v61 = vadd.f32 %v2178_v6, %v1910_v10  ;;  %v1813_v25 = vadd.f32 %v1781_v1, %v1746_v26  ;;  %v1911_v27 = vmul.f32 %v1879_v2, %v1847_v37 }
 0x1b0   : > { %2576 = vst [vmem:[%s3103_s24 + $0x2e0] sm:$0xff] %v2241_v45  ;;  %v2014_v39 = vadd.f32 %v1982_v31, %v1947_v47  ;;  %v2115_v35 = vadd.f32 %v4742_v16, %v2080_v36 }
 0x1b1   : > { %v2242_v8 = vmul.f32 %v5430_v29, %v2210_v61  ;;  %v1848_v32 = vadd.f32 %v4727_v54, %v1813_v25 }
 0x1b2   : > { %v2081_v52 = vadd.f32 %v2049_v24, %v2014_v39  ;;  %v2179_v60 = vmul.f32 %v2546_v48, %v2115_v35 }
 0x1b3   : > { %2577 = vst [vmem:[%s3103_s24 + $0x2e8] sm:$0xff] %v2242_v8  ;;  %v1912_v18 = vmul.f32 %v1880_v20, %v1848_v32 }
 0x1b4   : > { %v2116_v53 = vadd.f32 %v4742_v16, %v2081_v52  ;;  %v2211_v33 = vadd.f32 %v2179_v60, %v1911_v27 }
 0x1b6   : > { %v2180_v38 = vmul.f32 %v2547_v3, %v2116_v53  ;;  %v2243_v23 = vmul.f32 %v5431_v55, %v2211_v33 }
 0x1b8   : > { %v2212_v51 = vadd.f32 %v2180_v38, %v1912_v18  ;;  %2578 = vst [vmem:[%s3103_s24 + $0x2f0] sm:$0xff] %v2243_v23 }
 0x1ba   : > { %v2244_v19 = vmul.f32 %v5432_v40, %v2212_v51 }
 0x1bc   : > { %2579 = vst [vmem:[%s3103_s24 + $0x2f8] sm:$0xff] %v2244_v19 }
 0x1bd PF: > { %s14_s12 = sadd.s32 1, %s2884_s12  }
 0x1be   : > { %p11_p7 = scmp.ge.s32.totalorder %s14_s12, 4  }
 0x1c0   :  { %13 = sbr.rel (!%p11_p7) target bundleno = 1 (0x1), region = 72 }
 0x1c5   :  { %2299 = vsyncpa [#allocation3], 1 }
 0x1c6   :  { %2301 = vsyncpa [#allocation3 + $0x1], 1 }

</bundles_post_ra>
